<compile_context>
chip_gen: v7x
topology: tpu7x:2x2x1
jax: 0.10.0
libtpu: 0.0.40
codegen_flags: <defaults>
</compile_context>

<pallas_src>
import numpy as np
import jax
import jax.numpy as jnp
from jax import lax
from jax.experimental import pallas as pl
from jax.experimental.pallas import tpu as pltpu


B_TILE = 8  # images per grid step (sweepable 8..32; code-size bound, not VMEM)


# ----------------------------- fused LeNet kernel -----------------------------

def _lenet_kernel(x_ref, w1c_ref, b1r_ref, r1_ref, s1_ref,
                  w2b_ref, b2r_ref, r2_ref, s2_ref,
                  w1f_ref, b1f_ref, w2f_ref, b2f_ref, w3f_ref, b3f_ref,
                  o_ref, p2_ref):
    f32 = jnp.float32
    bf16 = jnp.bfloat16
    b_tile = x_ref.shape[0]

    # ---- per-image conv/pool pipeline; pool2 result staged into p2_ref ----
    def per_image(img, carry):
        xe = x_ref[img]                                       # (28, 160) bf16

        # conv1 (1->6, 5x5, pad=2): single K=160 MXU dot (row taps folded in K).
        o1 = jnp.dot(xe, w1c_ref[...], preferred_element_type=f32)   # (28, 168)
        o1 = jnp.maximum(o1 + b1r_ref[...], 0.0).astype(bf16)

        # maxpool 2x2 via exact 0/1 selection matmuls (rows then columns).
        t1 = jnp.maximum(jnp.dot(r1_ref[0], o1, preferred_element_type=f32),
                         jnp.dot(r1_ref[1], o1, preferred_element_type=f32)).astype(bf16)
        p1 = jnp.maximum(jnp.dot(t1, s1_ref[0], preferred_element_type=f32),
                         jnp.dot(t1, s1_ref[1], preferred_element_type=f32)).astype(bf16)
        # p1[k, c*14 + m] = pool1 channel c at (k, m).          (14, 84)

        # conv2 (6->16, 5x5): 5 independent banded dots, tree-summed partials.
        d0 = jnp.dot(p1[0:10, :], w2b_ref[0], preferred_element_type=f32)
        d1 = jnp.dot(p1[1:11, :], w2b_ref[1], preferred_element_type=f32)
        d2 = jnp.dot(p1[2:12, :], w2b_ref[2], preferred_element_type=f32)
        d3 = jnp.dot(p1[3:13, :], w2b_ref[3], preferred_element_type=f32)
        d4 = jnp.dot(p1[4:14, :], w2b_ref[4], preferred_element_type=f32)
        o2 = (d0 + d1) + (d2 + d3) + d4
        o2 = jnp.maximum(o2 + b2r_ref[...], 0.0).astype(bf16)
        # o2[y, o*10 + x] = conv2 channel o at (y, x).           (10, 160)

        t2 = jnp.maximum(jnp.dot(r2_ref[0], o2, preferred_element_type=f32),
                         jnp.dot(r2_ref[1], o2, preferred_element_type=f32)).astype(bf16)
        p2 = jnp.maximum(jnp.dot(t2, s2_ref[0], preferred_element_type=f32),
                         jnp.dot(t2, s2_ref[1], preferred_element_type=f32)).astype(bf16)
        # p2[h, c*5 + w] = pool2 channel c at (h, w).            (5, 80)

        p2_ref[img] = p2          # dynamic index only on leading scratch axis
        return carry

    lax.fori_loop(0, b_tile, per_image, None, unroll=True)

    # ---- batched FC stage: M = B_TILE ----
    p2a = p2_ref[...]                                          # (B_TILE, 5, 80) bf16

    # fc1 (400 -> 120, ReLU): 5 dots over the h axis, tree-summed; N padded to 128.
    g0 = jnp.dot(p2a[:, 0, :], w1f_ref[0], preferred_element_type=f32)
    g1 = jnp.dot(p2a[:, 1, :], w1f_ref[1], preferred_element_type=f32)
    g2 = jnp.dot(p2a[:, 2, :], w1f_ref[2], preferred_element_type=f32)
    g3 = jnp.dot(p2a[:, 3, :], w1f_ref[3], preferred_element_type=f32)
    g4 = jnp.dot(p2a[:, 4, :], w1f_ref[4], preferred_element_type=f32)
    f1 = (g0 + g1) + (g2 + g3) + g4 + b1f_ref[...]
    f1 = jnp.maximum(f1, 0.0).astype(bf16)                     # (B_TILE, 128)

    # fc2 (120 -> 84, ReLU) and fc3 (84 -> 10); K/N zero-padded to 128.
    f2 = jnp.dot(f1, w2f_ref[...], preferred_element_type=f32) + b2f_ref[...]
    f2 = jnp.maximum(f2, 0.0).astype(bf16)
    f3 = jnp.dot(f2, w3f_ref[...], preferred_element_type=f32) + b3f_ref[...]

    o_ref[...] = f3.astype(o_ref.dtype)        # dense unmasked (B_TILE, 128) store


# ----------------------- one-time host-side weight packing --------------------

def pack_params(params):
    """Pre-pack torch-layout parameters into MXU-friendly resident matrices."""
    w1 = np.asarray(params["conv1_w"], np.float32)    # (6, 1, 5, 5)
    b1 = np.asarray(params["conv1_b"], np.float32)    # (6,)
    w2 = np.asarray(params["conv2_w"], np.float32)    # (16, 6, 5, 5)
    b2 = np.asarray(params["conv2_b"], np.float32)    # (16,)
    f1w = np.asarray(params["fc1_w"], np.float32)     # (120, 400)
    f1b = np.asarray(params["fc1_b"], np.float32)
    f2w = np.asarray(params["fc2_w"], np.float32)     # (84, 120)
    f2b = np.asarray(params["fc2_b"], np.float32)
    f3w = np.asarray(params["fc3_w"], np.float32)     # (10, 84)
    f3b = np.asarray(params["fc3_b"], np.float32)

    xs28 = np.arange(28)
    xs10 = np.arange(10)

    # conv1 K-stacked banded weight: w1c[i*32 + x + j, o*28 + x] = w1[o, 0, i, j]
    # (matches wrapper input xe[y, i*32 + u] = xpad[y + i, u]).
    w1c = np.zeros((5 * 32, 6 * 28), np.float32)
    for i in range(5):
        for j in range(5):
            for o in range(6):
                w1c[i * 32 + xs28 + j, o * 28 + xs28] = w1[o, 0, i, j]
    b1row = np.repeat(b1, 28)[None, :]                              # (1, 168)

    # pool1 selection matrices (exact 0/1).
    k14 = np.arange(14)
    r1 = np.zeros((2, 14, 28), np.float32)
    r1[0, k14, 2 * k14] = 1.0
    r1[1, k14, 2 * k14 + 1] = 1.0
    s1 = np.zeros((2, 6 * 28, 6 * 14), np.float32)
    for o in range(6):
        s1[0, o * 28 + 2 * k14, o * 14 + k14] = 1.0
        s1[1, o * 28 + 2 * k14 + 1, o * 14 + k14] = 1.0

    # conv2 banded weights (Cin folded into K):
    # w2b[i, c*14 + x + j, o*10 + x] = w2[o, c, i, j]
    w2b = np.zeros((5, 6 * 14, 16 * 10), np.float32)
    for i in range(5):
        for j in range(5):
            for c in range(6):
                for o in range(16):
                    w2b[i, c * 14 + xs10 + j, o * 10 + xs10] = w2[o, c, i, j]
    b2row = np.repeat(b2, 10)[None, :]                              # (1, 160)

    # pool2 selection matrices.
    k5 = np.arange(5)
    r2 = np.zeros((2, 5, 10), np.float32)
    r2[0, k5, 2 * k5] = 1.0
    r2[1, k5, 2 * k5 + 1] = 1.0
    s2 = np.zeros((2, 16 * 10, 16 * 5), np.float32)
    for o in range(16):
        s2[0, o * 10 + 2 * k5, o * 5 + k5] = 1.0
        s2[1, o * 10 + 2 * k5 + 1, o * 5 + k5] = 1.0

    # fc1: rows re-ordered to the kernel's per-h (c*5 + w) flatten, N padded to 128.
    a = f1w.reshape(120, 16, 5, 5)                    # [n, c, h, w]
    w1f = np.zeros((5, 80, 128), np.float32)
    w1f[:, :, :120] = a.transpose(2, 1, 3, 0).reshape(5, 80, 120)
    b1f = np.zeros((1, 128), np.float32)
    b1f[0, :120] = f1b

    # fc2 / fc3: transposed once, zero-padded to 128x128.
    w2f = np.zeros((128, 128), np.float32)
    w2f[:120, :84] = f2w.T
    b2f = np.zeros((1, 128), np.float32)
    b2f[0, :84] = f2b
    w3f = np.zeros((128, 128), np.float32)
    w3f[:84, :10] = f3w.T
    b3f = np.zeros((1, 128), np.float32)
    b3f[0, :10] = f3b

    bf = lambda v: jnp.asarray(v, jnp.bfloat16)
    fp = lambda v: jnp.asarray(v, jnp.float32)
    return {
        "w1c": bf(w1c), "b1r": fp(b1row), "r1": bf(r1), "s1": bf(s1),
        "w2b": bf(w2b), "b2r": fp(b2row), "r2": bf(r2), "s2": bf(s2),
        "w1f": bf(w1f), "b1f": fp(b1f),
        "w2f": bf(w2f), "b2f": fp(b2f),
        "w3f": bf(w3f), "b3f": fp(b3f),
    }


# ------------------------------- forward wrapper -------------------------------

_WEIGHT_ORDER = ["w1c", "b1r", "r1", "s1", "w2b", "b2r", "r2", "s2",
                 "w1f", "b1f", "w2f", "b2f", "w3f", "b3f"]


def lenet_forward(packed, x):
    """x: (B, 1, 28, 28) float32 NCHW -> logits (B, 10) float32."""
    B = x.shape[0]
    Bp = ((B + B_TILE - 1) // B_TILE) * B_TILE

    # Glue: pad batch to a tile multiple, fold conv1 padding + the 5 row taps
    # into the K dimension, cast to bf16.
    xs = x.reshape(B, 28, 28)
    if Bp != B:
        xs = jnp.pad(xs, ((0, Bp - B), (0, 0), (0, 0)))
    xp = jnp.pad(xs, ((0, 0), (2, 2), (2, 2)))                    # (Bp, 32, 32)
    xe = jnp.concatenate([xp[:, i:i + 28, :] for i in range(5)],
                         axis=-1).astype(jnp.bfloat16)            # (Bp, 28, 160)

    weights = [packed[k] for k in _WEIGHT_ORDER]

    def full_spec(a):
        return pl.BlockSpec(a.shape, lambda b, nd=a.ndim: (0,) * nd)

    in_specs = [pl.BlockSpec((B_TILE, 28, 160), lambda b: (b, 0, 0))]
    in_specs += [full_spec(w) for w in weights]

    out = pl.pallas_call(
        _lenet_kernel,
        out_shape=jax.ShapeDtypeStruct((Bp, 128), jnp.float32),
        grid_spec=pltpu.PrefetchScalarGridSpec(
            num_scalar_prefetch=0,
            grid=(Bp // B_TILE,),
            in_specs=in_specs,
            out_specs=pl.BlockSpec((B_TILE, 128), lambda b: (b, 0)),
            scratch_shapes=[pltpu.VMEM((B_TILE, 5, 80), jnp.bfloat16)]),
        compiler_params=pltpu.CompilerParams(
            # On v7x verify the batch-tile axis actually shards across both TCs.
            dimension_semantics=("parallel",)),
    )(xe, *weights)

    return out[:B, :10]


# ----------------------------- params & f32 reference --------------------------

def init_params(key):
    ks = jax.random.split(key, 10)
    s = 0.1
    return {
        "conv1_w": jax.random.normal(ks[0], (6, 1, 5, 5), jnp.float32) * s,
        "conv1_b": jax.random.normal(ks[1], (6,), jnp.float32) * s,
        "conv2_w": jax.random.normal(ks[2], (16, 6, 5, 5), jnp.float32) * s,
        "conv2_b": jax.random.normal(ks[3], (16,), jnp.float32) * s,
        "fc1_w": jax.random.normal(ks[4], (120, 400), jnp.float32) * s,   # torch (out, in)
        "fc1_b": jax.random.normal(ks[5], (120,), jnp.float32) * s,
        "fc2_w": jax.random.normal(ks[6], (84, 120), jnp.float32) * s,
        "fc2_b": jax.random.normal(ks[7], (84,), jnp.float32) * s,
        "fc3_w": jax.random.normal(ks[8], (10, 84), jnp.float32) * s,
        "fc3_b": jax.random.normal(ks[9], (10,), jnp.float32) * s,
    }


def lenet_reference(params, x):
    """Plain-JAX float32 reference mirroring the PyTorch module."""
    hp = lax.Precision.HIGHEST
    dn = ("NCHW", "OIHW", "NCHW")
    y = lax.conv_general_dilated(x, params["conv1_w"], (1, 1), ((2, 2), (2, 2)),
                                 dimension_numbers=dn, precision=hp)
    y = jax.nn.relu(y + params["conv1_b"].reshape(1, -1, 1, 1))
    y = lax.reduce_window(y, -jnp.inf, lax.max, (1, 1, 2, 2), (1, 1, 2, 2), "VALID")
    y = lax.conv_general_dilated(y, params["conv2_w"], (1, 1), ((0, 0), (0, 0)),
                                 dimension_numbers=dn, precision=hp)
    y = jax.nn.relu(y + params["conv2_b"].reshape(1, -1, 1, 1))
    y = lax.reduce_window(y, -jnp.inf, lax.max, (1, 1, 2, 2), (1, 1, 2, 2), "VALID")
    y = y.reshape(y.shape[0], -1)
    y = jax.nn.relu(jnp.dot(y, params["fc1_w"].T, precision=hp) + params["fc1_b"])
    y = jax.nn.relu(jnp.dot(y, params["fc2_w"].T, precision=hp) + params["fc2_b"])
    return jnp.dot(y, params["fc3_w"].T, precision=hp) + params["fc3_b"]


# ------------------------------------ main --------------------------------------

if __name__ == "__main__":
    key = jax.random.PRNGKey(0)
    k_param, k_x = jax.random.split(key)
    params = init_params(k_param)
    packed = pack_params(params)          # one-time host-side weight packing

    # MNIST-shaped input (batch=2, 1 channel, 28x28; required by the 16*5*5 flatten).
    x = jax.random.normal(k_x, (2, 1, 28, 28), jnp.float32)

    fwd = jax.jit(lenet_forward)
    out = jax.block_until_ready(fwd(packed, x))
    assert out.shape == (2, 10) and out.dtype == jnp.float32

    # Sanity check against the f32 reference (kernel uses bf16 MXU operands).
    ref = lenet_reference(params, x)
    tol = 0.1 * (1.0 + float(jnp.max(jnp.abs(ref))))
    assert float(jnp.max(jnp.abs(out - ref))) < tol

    print("KERNEL_OK")
</pallas_src>

<mosaic_0001>
module attributes {stable_mosaic.version = 11 : i64} {
  func.func @_lenet_kernel(%arg0: i32, %arg1: memref<8x28x160xbf16, #tpu.memory_space<vmem>>, %arg2: memref<160x168xbf16, #tpu.memory_space<vmem>>, %arg3: memref<1x168xf32, #tpu.memory_space<vmem>>, %arg4: memref<2x14x28xbf16, #tpu.memory_space<vmem>>, %arg5: memref<2x168x84xbf16, #tpu.memory_space<vmem>>, %arg6: memref<5x84x160xbf16, #tpu.memory_space<vmem>>, %arg7: memref<1x160xf32, #tpu.memory_space<vmem>>, %arg8: memref<2x5x10xbf16, #tpu.memory_space<vmem>>, %arg9: memref<2x160x80xbf16, #tpu.memory_space<vmem>>, %arg10: memref<5x80x128xbf16, #tpu.memory_space<vmem>>, %arg11: memref<1x128xf32, #tpu.memory_space<vmem>>, %arg12: memref<128x128xbf16, #tpu.memory_space<vmem>>, %arg13: memref<1x128xf32, #tpu.memory_space<vmem>>, %arg14: memref<128x128xbf16, #tpu.memory_space<vmem>>, %arg15: memref<1x128xf32, #tpu.memory_space<vmem>>, %arg16: memref<8x128xf32, #tpu.memory_space<vmem>>, %arg17: memref<8x5x80xbf16, #tpu.memory_space<vmem>>) attributes {dimension_semantics = [#tpu.dimension_semantics<parallel>], iteration_bounds = array<i64: 1>, scalar_prefetch = 0 : i64, scratch_operands = 1 : i64, tpu.core_type = #tpu.core_type<tc>, window_params = [{transform_indices = @transform_0, window_bounds = array<i64: 8, 28, 160>}, {pipeline_mode = #tpu.pipeline_mode<synchronous>, transform_indices = @transform_1, window_bounds = array<i64: 160, 168>}, {pipeline_mode = #tpu.pipeline_mode<synchronous>, transform_indices = @transform_2, window_bounds = array<i64: 1, 168>}, {pipeline_mode = #tpu.pipeline_mode<synchronous>, transform_indices = @transform_3, window_bounds = array<i64: 2, 14, 28>}, {pipeline_mode = #tpu.pipeline_mode<synchronous>, transform_indices = @transform_4, window_bounds = array<i64: 2, 168, 84>}, {pipeline_mode = #tpu.pipeline_mode<synchronous>, transform_indices = @transform_5, window_bounds = array<i64: 5, 84, 160>}, {pipeline_mode = #tpu.pipeline_mode<synchronous>, transform_indices = @transform_6, window_bounds = array<i64: 1, 160>}, {pipeline_mode = #tpu.pipeline_mode<synchronous>, transform_indices = @transform_7, window_bounds = array<i64: 2, 5, 10>}, {pipeline_mode = #tpu.pipeline_mode<synchronous>, transform_indices = @transform_8, window_bounds = array<i64: 2, 160, 80>}, {pipeline_mode = #tpu.pipeline_mode<synchronous>, transform_indices = @transform_9, window_bounds = array<i64: 5, 80, 128>}, {pipeline_mode = #tpu.pipeline_mode<synchronous>, transform_indices = @transform_10, window_bounds = array<i64: 1, 128>}, {pipeline_mode = #tpu.pipeline_mode<synchronous>, transform_indices = @transform_11, window_bounds = array<i64: 128, 128>}, {pipeline_mode = #tpu.pipeline_mode<synchronous>, transform_indices = @transform_12, window_bounds = array<i64: 1, 128>}, {pipeline_mode = #tpu.pipeline_mode<synchronous>, transform_indices = @transform_13, window_bounds = array<i64: 128, 128>}, {pipeline_mode = #tpu.pipeline_mode<synchronous>, transform_indices = @transform_14, window_bounds = array<i64: 1, 128>}, {transform_indices = @transform_15, window_bounds = array<i64: 8, 128>}]} {
    %c0_i32 = arith.constant 0 : i32
    %0 = arith.index_cast %c0_i32 : i32 to index
    %c0 = arith.constant 0 : index
    %c0_0 = arith.constant 0 : index
    %1 = vector.load %arg1[%0, %c0, %c0_0] : memref<8x28x160xbf16, #tpu.memory_space<vmem>>, vector<1x28x160xbf16>
    %2 = vector.shape_cast %1 : vector<1x28x160xbf16> to vector<28x160xbf16>
    %c0_1 = arith.constant 0 : index
    %c0_2 = arith.constant 0 : index
    %3 = vector.load %arg2[%c0_1, %c0_2] : memref<160x168xbf16, #tpu.memory_space<vmem>>, vector<160x168xbf16>
    %cst = arith.constant dense<0.000000e+00> : vector<28x168xf32>
    %4 = tpu.matmul %2, %3, %cst {dimension_numbers = #tpu.dot_dimension_numbers<[1], [0], [0], [1], [0, 0, 1, 1], [], []>} : vector<28x160xbf16>, vector<160x168xbf16>, vector<28x168xf32> -> vector<28x168xf32>
    %c0_3 = arith.constant 0 : index
    %c0_4 = arith.constant 0 : index
    %5 = vector.load %arg3[%c0_3, %c0_4] : memref<1x168xf32, #tpu.memory_space<vmem>>, vector<1x168xf32>
    %6 = vector.broadcast %5 : vector<1x168xf32> to vector<28x168xf32>
    %7 = arith.addf %4, %6 : vector<28x168xf32>
    %cst_5 = arith.constant 0.000000e+00 : f32
    %8 = vector.broadcast %cst_5 : f32 to vector<28x168xf32>
    %9 = arith.maximumf %7, %8 : vector<28x168xf32>
    %10 = arith.truncf %9 : vector<28x168xf32> to vector<28x168xbf16>
    %c0_6 = arith.constant 0 : index
    %c0_7 = arith.constant 0 : index
    %c0_8 = arith.constant 0 : index
    %11 = vector.load %arg4[%c0_6, %c0_7, %c0_8] : memref<2x14x28xbf16, #tpu.memory_space<vmem>>, vector<1x14x28xbf16>
    %12 = vector.shape_cast %11 : vector<1x14x28xbf16> to vector<14x28xbf16>
    %cst_9 = arith.constant dense<0.000000e+00> : vector<14x168xf32>
    %13 = tpu.matmul %12, %10, %cst_9 {dimension_numbers = #tpu.dot_dimension_numbers<[1], [0], [0], [1], [0, 0, 1, 1], [], []>} : vector<14x28xbf16>, vector<28x168xbf16>, vector<14x168xf32> -> vector<14x168xf32>
    %c1 = arith.constant 1 : index
    %c0_10 = arith.constant 0 : index
    %c0_11 = arith.constant 0 : index
    %14 = vector.load %arg4[%c1, %c0_10, %c0_11] : memref<2x14x28xbf16, #tpu.memory_space<vmem>>, vector<1x14x28xbf16>
    %15 = vector.shape_cast %14 : vector<1x14x28xbf16> to vector<14x28xbf16>
    %cst_12 = arith.constant dense<0.000000e+00> : vector<14x168xf32>
    %16 = tpu.matmul %15, %10, %cst_12 {dimension_numbers = #tpu.dot_dimension_numbers<[1], [0], [0], [1], [0, 0, 1, 1], [], []>} : vector<14x28xbf16>, vector<28x168xbf16>, vector<14x168xf32> -> vector<14x168xf32>
    %17 = arith.maximumf %13, %16 : vector<14x168xf32>
    %18 = arith.truncf %17 : vector<14x168xf32> to vector<14x168xbf16>
    %c0_13 = arith.constant 0 : index
    %c0_14 = arith.constant 0 : index
    %c0_15 = arith.constant 0 : index
    %19 = vector.load %arg5[%c0_13, %c0_14, %c0_15] : memref<2x168x84xbf16, #tpu.memory_space<vmem>>, vector<1x168x84xbf16>
    %20 = vector.shape_cast %19 : vector<1x168x84xbf16> to vector<168x84xbf16>
    %cst_16 = arith.constant dense<0.000000e+00> : vector<14x84xf32>
    %21 = tpu.matmul %18, %20, %cst_16 {dimension_numbers = #tpu.dot_dimension_numbers<[1], [0], [0], [1], [0, 0, 1, 1], [], []>} : vector<14x168xbf16>, vector<168x84xbf16>, vector<14x84xf32> -> vector<14x84xf32>
    %c1_17 = arith.constant 1 : index
    %c0_18 = arith.constant 0 : index
    %c0_19 = arith.constant 0 : index
    %22 = vector.load %arg5[%c1_17, %c0_18, %c0_19] : memref<2x168x84xbf16, #tpu.memory_space<vmem>>, vector<1x168x84xbf16>
    %23 = vector.shape_cast %22 : vector<1x168x84xbf16> to vector<168x84xbf16>
    %cst_20 = arith.constant dense<0.000000e+00> : vector<14x84xf32>
    %24 = tpu.matmul %18, %23, %cst_20 {dimension_numbers = #tpu.dot_dimension_numbers<[1], [0], [0], [1], [0, 0, 1, 1], [], []>} : vector<14x168xbf16>, vector<168x84xbf16>, vector<14x84xf32> -> vector<14x84xf32>
    %25 = arith.maximumf %21, %24 : vector<14x84xf32>
    %26 = arith.truncf %25 : vector<14x84xf32> to vector<14x84xbf16>
    %27 = vector.extract_strided_slice %26 {offsets = [0, 0], sizes = [10, 84], strides = [1, 1]} : vector<14x84xbf16> to vector<10x84xbf16>
    %c0_21 = arith.constant 0 : index
    %c0_22 = arith.constant 0 : index
    %c0_23 = arith.constant 0 : index
    %28 = vector.load %arg6[%c0_21, %c0_22, %c0_23] : memref<5x84x160xbf16, #tpu.memory_space<vmem>>, vector<1x84x160xbf16>
    %29 = vector.shape_cast %28 : vector<1x84x160xbf16> to vector<84x160xbf16>
    %cst_24 = arith.constant dense<0.000000e+00> : vector<10x160xf32>
    %30 = tpu.matmul %27, %29, %cst_24 {dimension_numbers = #tpu.dot_dimension_numbers<[1], [0], [0], [1], [0, 0, 1, 1], [], []>} : vector<10x84xbf16>, vector<84x160xbf16>, vector<10x160xf32> -> vector<10x160xf32>
    %31 = vector.extract_strided_slice %26 {offsets = [1, 0], sizes = [10, 84], strides = [1, 1]} : vector<14x84xbf16> to vector<10x84xbf16>
    %c1_25 = arith.constant 1 : index
    %c0_26 = arith.constant 0 : index
    %c0_27 = arith.constant 0 : index
    %32 = vector.load %arg6[%c1_25, %c0_26, %c0_27] : memref<5x84x160xbf16, #tpu.memory_space<vmem>>, vector<1x84x160xbf16>
    %33 = vector.shape_cast %32 : vector<1x84x160xbf16> to vector<84x160xbf16>
    %cst_28 = arith.constant dense<0.000000e+00> : vector<10x160xf32>
    %34 = tpu.matmul %31, %33, %cst_28 {dimension_numbers = #tpu.dot_dimension_numbers<[1], [0], [0], [1], [0, 0, 1, 1], [], []>} : vector<10x84xbf16>, vector<84x160xbf16>, vector<10x160xf32> -> vector<10x160xf32>
    %35 = vector.extract_strided_slice %26 {offsets = [2, 0], sizes = [10, 84], strides = [1, 1]} : vector<14x84xbf16> to vector<10x84xbf16>
    %c2 = arith.constant 2 : index
    %c0_29 = arith.constant 0 : index
    %c0_30 = arith.constant 0 : index
    %36 = vector.load %arg6[%c2, %c0_29, %c0_30] : memref<5x84x160xbf16, #tpu.memory_space<vmem>>, vector<1x84x160xbf16>
    %37 = vector.shape_cast %36 : vector<1x84x160xbf16> to vector<84x160xbf16>
    %cst_31 = arith.constant dense<0.000000e+00> : vector<10x160xf32>
    %38 = tpu.matmul %35, %37, %cst_31 {dimension_numbers = #tpu.dot_dimension_numbers<[1], [0], [0], [1], [0, 0, 1, 1], [], []>} : vector<10x84xbf16>, vector<84x160xbf16>, vector<10x160xf32> -> vector<10x160xf32>
    %39 = vector.extract_strided_slice %26 {offsets = [3, 0], sizes = [10, 84], strides = [1, 1]} : vector<14x84xbf16> to vector<10x84xbf16>
    %c3 = arith.constant 3 : index
    %c0_32 = arith.constant 0 : index
    %c0_33 = arith.constant 0 : index
    %40 = vector.load %arg6[%c3, %c0_32, %c0_33] : memref<5x84x160xbf16, #tpu.memory_space<vmem>>, vector<1x84x160xbf16>
    %41 = vector.shape_cast %40 : vector<1x84x160xbf16> to vector<84x160xbf16>
    %cst_34 = arith.constant dense<0.000000e+00> : vector<10x160xf32>
    %42 = tpu.matmul %39, %41, %cst_34 {dimension_numbers = #tpu.dot_dimension_numbers<[1], [0], [0], [1], [0, 0, 1, 1], [], []>} : vector<10x84xbf16>, vector<84x160xbf16>, vector<10x160xf32> -> vector<10x160xf32>
    %43 = vector.extract_strided_slice %26 {offsets = [4, 0], sizes = [10, 84], strides = [1, 1]} : vector<14x84xbf16> to vector<10x84xbf16>
    %c4 = arith.constant 4 : index
    %c0_35 = arith.constant 0 : index
    %c0_36 = arith.constant 0 : index
    %44 = vector.load %arg6[%c4, %c0_35, %c0_36] : memref<5x84x160xbf16, #tpu.memory_space<vmem>>, vector<1x84x160xbf16>
    %45 = vector.shape_cast %44 : vector<1x84x160xbf16> to vector<84x160xbf16>
    %cst_37 = arith.constant dense<0.000000e+00> : vector<10x160xf32>
    %46 = tpu.matmul %43, %45, %cst_37 {dimension_numbers = #tpu.dot_dimension_numbers<[1], [0], [0], [1], [0, 0, 1, 1], [], []>} : vector<10x84xbf16>, vector<84x160xbf16>, vector<10x160xf32> -> vector<10x160xf32>
    %47 = arith.addf %30, %34 : vector<10x160xf32>
    %48 = arith.addf %38, %42 : vector<10x160xf32>
    %49 = arith.addf %47, %48 : vector<10x160xf32>
    %50 = arith.addf %49, %46 : vector<10x160xf32>
    %c0_38 = arith.constant 0 : index
    %c0_39 = arith.constant 0 : index
    %51 = vector.load %arg7[%c0_38, %c0_39] : memref<1x160xf32, #tpu.memory_space<vmem>>, vector<1x160xf32>
    %52 = vector.broadcast %51 : vector<1x160xf32> to vector<10x160xf32>
    %53 = arith.addf %50, %52 : vector<10x160xf32>
    %cst_40 = arith.constant 0.000000e+00 : f32
    %54 = vector.broadcast %cst_40 : f32 to vector<10x160xf32>
    %55 = arith.maximumf %53, %54 : vector<10x160xf32>
    %56 = arith.truncf %55 : vector<10x160xf32> to vector<10x160xbf16>
    %c0_41 = arith.constant 0 : index
    %c0_42 = arith.constant 0 : index
    %c0_43 = arith.constant 0 : index
    %57 = vector.load %arg8[%c0_41, %c0_42, %c0_43] : memref<2x5x10xbf16, #tpu.memory_space<vmem>>, vector<1x5x10xbf16>
    %58 = vector.shape_cast %57 : vector<1x5x10xbf16> to vector<5x10xbf16>
    %cst_44 = arith.constant dense<0.000000e+00> : vector<5x160xf32>
    %59 = tpu.matmul %58, %56, %cst_44 {dimension_numbers = #tpu.dot_dimension_numbers<[1], [0], [0], [1], [0, 0, 1, 1], [], []>} : vector<5x10xbf16>, vector<10x160xbf16>, vector<5x160xf32> -> vector<5x160xf32>
    %c1_45 = arith.constant 1 : index
    %c0_46 = arith.constant 0 : index
    %c0_47 = arith.constant 0 : index
    %60 = vector.load %arg8[%c1_45, %c0_46, %c0_47] : memref<2x5x10xbf16, #tpu.memory_space<vmem>>, vector<1x5x10xbf16>
    %61 = vector.shape_cast %60 : vector<1x5x10xbf16> to vector<5x10xbf16>
    %cst_48 = arith.constant dense<0.000000e+00> : vector<5x160xf32>
    %62 = tpu.matmul %61, %56, %cst_48 {dimension_numbers = #tpu.dot_dimension_numbers<[1], [0], [0], [1], [0, 0, 1, 1], [], []>} : vector<5x10xbf16>, vector<10x160xbf16>, vector<5x160xf32> -> vector<5x160xf32>
    %63 = arith.maximumf %59, %62 : vector<5x160xf32>
    %64 = arith.truncf %63 : vector<5x160xf32> to vector<5x160xbf16>
    %c0_49 = arith.constant 0 : index
    %c0_50 = arith.constant 0 : index
    %c0_51 = arith.constant 0 : index
    %65 = vector.load %arg9[%c0_49, %c0_50, %c0_51] : memref<2x160x80xbf16, #tpu.memory_space<vmem>>, vector<1x160x80xbf16>
    %66 = vector.shape_cast %65 : vector<1x160x80xbf16> to vector<160x80xbf16>
    %cst_52 = arith.constant dense<0.000000e+00> : vector<5x80xf32>
    %67 = tpu.matmul %64, %66, %cst_52 {dimension_numbers = #tpu.dot_dimension_numbers<[1], [0], [0], [1], [0, 0, 1, 1], [], []>} : vector<5x160xbf16>, vector<160x80xbf16>, vector<5x80xf32> -> vector<5x80xf32>
    %c1_53 = arith.constant 1 : index
    %c0_54 = arith.constant 0 : index
    %c0_55 = arith.constant 0 : index
    %68 = vector.load %arg9[%c1_53, %c0_54, %c0_55] : memref<2x160x80xbf16, #tpu.memory_space<vmem>>, vector<1x160x80xbf16>
    %69 = vector.shape_cast %68 : vector<1x160x80xbf16> to vector<160x80xbf16>
    %cst_56 = arith.constant dense<0.000000e+00> : vector<5x80xf32>
    %70 = tpu.matmul %64, %69, %cst_56 {dimension_numbers = #tpu.dot_dimension_numbers<[1], [0], [0], [1], [0, 0, 1, 1], [], []>} : vector<5x160xbf16>, vector<160x80xbf16>, vector<5x80xf32> -> vector<5x80xf32>
    %71 = arith.maximumf %67, %70 : vector<5x80xf32>
    %72 = arith.truncf %71 : vector<5x80xf32> to vector<5x80xbf16>
    %73 = arith.index_cast %c0_i32 : i32 to index
    %c0_57 = arith.constant 0 : index
    %c0_58 = arith.constant 0 : index
    %74 = vector.load %arg17[%73, %c0_57, %c0_58] : memref<8x5x80xbf16, #tpu.memory_space<vmem>>, vector<1x5x80xbf16>
    %75 = vector.shape_cast %74 : vector<1x5x80xbf16> to vector<5x80xbf16>
    %76 = vector.shape_cast %72 : vector<5x80xbf16> to vector<1x5x80xbf16>
    tpu.vector_store %arg17[%73, %c0_57, %c0_58], %76 {strides = array<i32>} : memref<8x5x80xbf16, #tpu.memory_space<vmem>>, vector<1x5x80xbf16>,
    %c1_i32 = arith.constant 1 : i32
    %77 = arith.index_cast %c1_i32 : i32 to index
    %c0_59 = arith.constant 0 : index
    %c0_60 = arith.constant 0 : index
    %78 = vector.load %arg1[%77, %c0_59, %c0_60] : memref<8x28x160xbf16, #tpu.memory_space<vmem>>, vector<1x28x160xbf16>
    %79 = vector.shape_cast %78 : vector<1x28x160xbf16> to vector<28x160xbf16>
    %c0_61 = arith.constant 0 : index
    %c0_62 = arith.constant 0 : index
    %80 = vector.load %arg2[%c0_61, %c0_62] : memref<160x168xbf16, #tpu.memory_space<vmem>>, vector<160x168xbf16>
    %cst_63 = arith.constant dense<0.000000e+00> : vector<28x168xf32>
    %81 = tpu.matmul %79, %80, %cst_63 {dimension_numbers = #tpu.dot_dimension_numbers<[1], [0], [0], [1], [0, 0, 1, 1], [], []>} : vector<28x160xbf16>, vector<160x168xbf16>, vector<28x168xf32> -> vector<28x168xf32>
    %c0_64 = arith.constant 0 : index
    %c0_65 = arith.constant 0 : index
    %82 = vector.load %arg3[%c0_64, %c0_65] : memref<1x168xf32, #tpu.memory_space<vmem>>, vector<1x168xf32>
    %83 = vector.broadcast %82 : vector<1x168xf32> to vector<28x168xf32>
    %84 = arith.addf %81, %83 : vector<28x168xf32>
    %cst_66 = arith.constant 0.000000e+00 : f32
    %85 = vector.broadcast %cst_66 : f32 to vector<28x168xf32>
    %86 = arith.maximumf %84, %85 : vector<28x168xf32>
    %87 = arith.truncf %86 : vector<28x168xf32> to vector<28x168xbf16>
    %c0_67 = arith.constant 0 : index
    %c0_68 = arith.constant 0 : index
    %c0_69 = arith.constant 0 : index
    %88 = vector.load %arg4[%c0_67, %c0_68, %c0_69] : memref<2x14x28xbf16, #tpu.memory_space<vmem>>, vector<1x14x28xbf16>
    %89 = vector.shape_cast %88 : vector<1x14x28xbf16> to vector<14x28xbf16>
    %cst_70 = arith.constant dense<0.000000e+00> : vector<14x168xf32>
    %90 = tpu.matmul %89, %87, %cst_70 {dimension_numbers = #tpu.dot_dimension_numbers<[1], [0], [0], [1], [0, 0, 1, 1], [], []>} : vector<14x28xbf16>, vector<28x168xbf16>, vector<14x168xf32> -> vector<14x168xf32>
    %c1_71 = arith.constant 1 : index
    %c0_72 = arith.constant 0 : index
    %c0_73 = arith.constant 0 : index
    %91 = vector.load %arg4[%c1_71, %c0_72, %c0_73] : memref<2x14x28xbf16, #tpu.memory_space<vmem>>, vector<1x14x28xbf16>
    %92 = vector.shape_cast %91 : vector<1x14x28xbf16> to vector<14x28xbf16>
    %cst_74 = arith.constant dense<0.000000e+00> : vector<14x168xf32>
    %93 = tpu.matmul %92, %87, %cst_74 {dimension_numbers = #tpu.dot_dimension_numbers<[1], [0], [0], [1], [0, 0, 1, 1], [], []>} : vector<14x28xbf16>, vector<28x168xbf16>, vector<14x168xf32> -> vector<14x168xf32>
    %94 = arith.maximumf %90, %93 : vector<14x168xf32>
    %95 = arith.truncf %94 : vector<14x168xf32> to vector<14x168xbf16>
    %c0_75 = arith.constant 0 : index
    %c0_76 = arith.constant 0 : index
    %c0_77 = arith.constant 0 : index
    %96 = vector.load %arg5[%c0_75, %c0_76, %c0_77] : memref<2x168x84xbf16, #tpu.memory_space<vmem>>, vector<1x168x84xbf16>
    %97 = vector.shape_cast %96 : vector<1x168x84xbf16> to vector<168x84xbf16>
    %cst_78 = arith.constant dense<0.000000e+00> : vector<14x84xf32>
    %98 = tpu.matmul %95, %97, %cst_78 {dimension_numbers = #tpu.dot_dimension_numbers<[1], [0], [0], [1], [0, 0, 1, 1], [], []>} : vector<14x168xbf16>, vector<168x84xbf16>, vector<14x84xf32> -> vector<14x84xf32>
    %c1_79 = arith.constant 1 : index
    %c0_80 = arith.constant 0 : index
    %c0_81 = arith.constant 0 : index
    %99 = vector.load %arg5[%c1_79, %c0_80, %c0_81] : memref<2x168x84xbf16, #tpu.memory_space<vmem>>, vector<1x168x84xbf16>
    %100 = vector.shape_cast %99 : vector<1x168x84xbf16> to vector<168x84xbf16>
    %cst_82 = arith.constant dense<0.000000e+00> : vector<14x84xf32>
    %101 = tpu.matmul %95, %100, %cst_82 {dimension_numbers = #tpu.dot_dimension_numbers<[1], [0], [0], [1], [0, 0, 1, 1], [], []>} : vector<14x168xbf16>, vector<168x84xbf16>, vector<14x84xf32> -> vector<14x84xf32>
    %102 = arith.maximumf %98, %101 : vector<14x84xf32>
    %103 = arith.truncf %102 : vector<14x84xf32> to vector<14x84xbf16>
    %104 = vector.extract_strided_slice %103 {offsets = [0, 0], sizes = [10, 84], strides = [1, 1]} : vector<14x84xbf16> to vector<10x84xbf16>
    %c0_83 = arith.constant 0 : index
    %c0_84 = arith.constant 0 : index
    %c0_85 = arith.constant 0 : index
    %105 = vector.load %arg6[%c0_83, %c0_84, %c0_85] : memref<5x84x160xbf16, #tpu.memory_space<vmem>>, vector<1x84x160xbf16>
    %106 = vector.shape_cast %105 : vector<1x84x160xbf16> to vector<84x160xbf16>
    %cst_86 = arith.constant dense<0.000000e+00> : vector<10x160xf32>
    %107 = tpu.matmul %104, %106, %cst_86 {dimension_numbers = #tpu.dot_dimension_numbers<[1], [0], [0], [1], [0, 0, 1, 1], [], []>} : vector<10x84xbf16>, vector<84x160xbf16>, vector<10x160xf32> -> vector<10x160xf32>
    %108 = vector.extract_strided_slice %103 {offsets = [1, 0], sizes = [10, 84], strides = [1, 1]} : vector<14x84xbf16> to vector<10x84xbf16>
    %c1_87 = arith.constant 1 : index
    %c0_88 = arith.constant 0 : index
    %c0_89 = arith.constant 0 : index
    %109 = vector.load %arg6[%c1_87, %c0_88, %c0_89] : memref<5x84x160xbf16, #tpu.memory_space<vmem>>, vector<1x84x160xbf16>
    %110 = vector.shape_cast %109 : vector<1x84x160xbf16> to vector<84x160xbf16>
    %cst_90 = arith.constant dense<0.000000e+00> : vector<10x160xf32>
    %111 = tpu.matmul %108, %110, %cst_90 {dimension_numbers = #tpu.dot_dimension_numbers<[1], [0], [0], [1], [0, 0, 1, 1], [], []>} : vector<10x84xbf16>, vector<84x160xbf16>, vector<10x160xf32> -> vector<10x160xf32>
    %112 = vector.extract_strided_slice %103 {offsets = [2, 0], sizes = [10, 84], strides = [1, 1]} : vector<14x84xbf16> to vector<10x84xbf16>
    %c2_91 = arith.constant 2 : index
    %c0_92 = arith.constant 0 : index
    %c0_93 = arith.constant 0 : index
    %113 = vector.load %arg6[%c2_91, %c0_92, %c0_93] : memref<5x84x160xbf16, #tpu.memory_space<vmem>>, vector<1x84x160xbf16>
    %114 = vector.shape_cast %113 : vector<1x84x160xbf16> to vector<84x160xbf16>
    %cst_94 = arith.constant dense<0.000000e+00> : vector<10x160xf32>
    %115 = tpu.matmul %112, %114, %cst_94 {dimension_numbers = #tpu.dot_dimension_numbers<[1], [0], [0], [1], [0, 0, 1, 1], [], []>} : vector<10x84xbf16>, vector<84x160xbf16>, vector<10x160xf32> -> vector<10x160xf32>
    %116 = vector.extract_strided_slice %103 {offsets = [3, 0], sizes = [10, 84], strides = [1, 1]} : vector<14x84xbf16> to vector<10x84xbf16>
    %c3_95 = arith.constant 3 : index
    %c0_96 = arith.constant 0 : index
    %c0_97 = arith.constant 0 : index
    %117 = vector.load %arg6[%c3_95, %c0_96, %c0_97] : memref<5x84x160xbf16, #tpu.memory_space<vmem>>, vector<1x84x160xbf16>
    %118 = vector.shape_cast %117 : vector<1x84x160xbf16> to vector<84x160xbf16>
    %cst_98 = arith.constant dense<0.000000e+00> : vector<10x160xf32>
    %119 = tpu.matmul %116, %118, %cst_98 {dimension_numbers = #tpu.dot_dimension_numbers<[1], [0], [0], [1], [0, 0, 1, 1], [], []>} : vector<10x84xbf16>, vector<84x160xbf16>, vector<10x160xf32> -> vector<10x160xf32>
    %120 = vector.extract_strided_slice %103 {offsets = [4, 0], sizes = [10, 84], strides = [1, 1]} : vector<14x84xbf16> to vector<10x84xbf16>
    %c4_99 = arith.constant 4 : index
    %c0_100 = arith.constant 0 : index
    %c0_101 = arith.constant 0 : index
    %121 = vector.load %arg6[%c4_99, %c0_100, %c0_101] : memref<5x84x160xbf16, #tpu.memory_space<vmem>>, vector<1x84x160xbf16>
    %122 = vector.shape_cast %121 : vector<1x84x160xbf16> to vector<84x160xbf16>
    %cst_102 = arith.constant dense<0.000000e+00> : vector<10x160xf32>
    %123 = tpu.matmul %120, %122, %cst_102 {dimension_numbers = #tpu.dot_dimension_numbers<[1], [0], [0], [1], [0, 0, 1, 1], [], []>} : vector<10x84xbf16>, vector<84x160xbf16>, vector<10x160xf32> -> vector<10x160xf32>
    %124 = arith.addf %107, %111 : vector<10x160xf32>
    %125 = arith.addf %115, %119 : vector<10x160xf32>
    %126 = arith.addf %124, %125 : vector<10x160xf32>
    %127 = arith.addf %126, %123 : vector<10x160xf32>
    %c0_103 = arith.constant 0 : index
    %c0_104 = arith.constant 0 : index
    %128 = vector.load %arg7[%c0_103, %c0_104] : memref<1x160xf32, #tpu.memory_space<vmem>>, vector<1x160xf32>
    %129 = vector.broadcast %128 : vector<1x160xf32> to vector<10x160xf32>
    %130 = arith.addf %127, %129 : vector<10x160xf32>
    %cst_105 = arith.constant 0.000000e+00 : f32
    %131 = vector.broadcast %cst_105 : f32 to vector<10x160xf32>
    %132 = arith.maximumf %130, %131 : vector<10x160xf32>
    %133 = arith.truncf %132 : vector<10x160xf32> to vector<10x160xbf16>
    %c0_106 = arith.constant 0 : index
    %c0_107 = arith.constant 0 : index
    %c0_108 = arith.constant 0 : index
    %134 = vector.load %arg8[%c0_106, %c0_107, %c0_108] : memref<2x5x10xbf16, #tpu.memory_space<vmem>>, vector<1x5x10xbf16>
    %135 = vector.shape_cast %134 : vector<1x5x10xbf16> to vector<5x10xbf16>
    %cst_109 = arith.constant dense<0.000000e+00> : vector<5x160xf32>
    %136 = tpu.matmul %135, %133, %cst_109 {dimension_numbers = #tpu.dot_dimension_numbers<[1], [0], [0], [1], [0, 0, 1, 1], [], []>} : vector<5x10xbf16>, vector<10x160xbf16>, vector<5x160xf32> -> vector<5x160xf32>
    %c1_110 = arith.constant 1 : index
    %c0_111 = arith.constant 0 : index
    %c0_112 = arith.constant 0 : index
    %137 = vector.load %arg8[%c1_110, %c0_111, %c0_112] : memref<2x5x10xbf16, #tpu.memory_space<vmem>>, vector<1x5x10xbf16>
    %138 = vector.shape_cast %137 : vector<1x5x10xbf16> to vector<5x10xbf16>
    %cst_113 = arith.constant dense<0.000000e+00> : vector<5x160xf32>
    %139 = tpu.matmul %138, %133, %cst_113 {dimension_numbers = #tpu.dot_dimension_numbers<[1], [0], [0], [1], [0, 0, 1, 1], [], []>} : vector<5x10xbf16>, vector<10x160xbf16>, vector<5x160xf32> -> vector<5x160xf32>
    %140 = arith.maximumf %136, %139 : vector<5x160xf32>
    %141 = arith.truncf %140 : vector<5x160xf32> to vector<5x160xbf16>
    %c0_114 = arith.constant 0 : index
    %c0_115 = arith.constant 0 : index
    %c0_116 = arith.constant 0 : index
    %142 = vector.load %arg9[%c0_114, %c0_115, %c0_116] : memref<2x160x80xbf16, #tpu.memory_space<vmem>>, vector<1x160x80xbf16>
    %143 = vector.shape_cast %142 : vector<1x160x80xbf16> to vector<160x80xbf16>
    %cst_117 = arith.constant dense<0.000000e+00> : vector<5x80xf32>
    %144 = tpu.matmul %141, %143, %cst_117 {dimension_numbers = #tpu.dot_dimension_numbers<[1], [0], [0], [1], [0, 0, 1, 1], [], []>} : vector<5x160xbf16>, vector<160x80xbf16>, vector<5x80xf32> -> vector<5x80xf32>
    %c1_118 = arith.constant 1 : index
    %c0_119 = arith.constant 0 : index
    %c0_120 = arith.constant 0 : index
    %145 = vector.load %arg9[%c1_118, %c0_119, %c0_120] : memref<2x160x80xbf16, #tpu.memory_space<vmem>>, vector<1x160x80xbf16>
    %146 = vector.shape_cast %145 : vector<1x160x80xbf16> to vector<160x80xbf16>
    %cst_121 = arith.constant dense<0.000000e+00> : vector<5x80xf32>
    %147 = tpu.matmul %141, %146, %cst_121 {dimension_numbers = #tpu.dot_dimension_numbers<[1], [0], [0], [1], [0, 0, 1, 1], [], []>} : vector<5x160xbf16>, vector<160x80xbf16>, vector<5x80xf32> -> vector<5x80xf32>
    %148 = arith.maximumf %144, %147 : vector<5x80xf32>
    %149 = arith.truncf %148 : vector<5x80xf32> to vector<5x80xbf16>
    %150 = arith.index_cast %c1_i32 : i32 to index
    %c0_122 = arith.constant 0 : index
    %c0_123 = arith.constant 0 : index
    %151 = vector.load %arg17[%150, %c0_122, %c0_123] : memref<8x5x80xbf16, #tpu.memory_space<vmem>>, vector<1x5x80xbf16>
    %152 = vector.shape_cast %151 : vector<1x5x80xbf16> to vector<5x80xbf16>
    %153 = vector.shape_cast %149 : vector<5x80xbf16> to vector<1x5x80xbf16>
    tpu.vector_store %arg17[%150, %c0_122, %c0_123], %153 {strides = array<i32>} : memref<8x5x80xbf16, #tpu.memory_space<vmem>>, vector<1x5x80xbf16>,
    %c2_i32 = arith.constant 2 : i32
    %154 = arith.index_cast %c2_i32 : i32 to index
    %c0_124 = arith.constant 0 : index
    %c0_125 = arith.constant 0 : index
    %155 = vector.load %arg1[%154, %c0_124, %c0_125] : memref<8x28x160xbf16, #tpu.memory_space<vmem>>, vector<1x28x160xbf16>
    %156 = vector.shape_cast %155 : vector<1x28x160xbf16> to vector<28x160xbf16>
    %c0_126 = arith.constant 0 : index
    %c0_127 = arith.constant 0 : index
    %157 = vector.load %arg2[%c0_126, %c0_127] : memref<160x168xbf16, #tpu.memory_space<vmem>>, vector<160x168xbf16>
    %cst_128 = arith.constant dense<0.000000e+00> : vector<28x168xf32>
    %158 = tpu.matmul %156, %157, %cst_128 {dimension_numbers = #tpu.dot_dimension_numbers<[1], [0], [0], [1], [0, 0, 1, 1], [], []>} : vector<28x160xbf16>, vector<160x168xbf16>, vector<28x168xf32> -> vector<28x168xf32>
    %c0_129 = arith.constant 0 : index
    %c0_130 = arith.constant 0 : index
    %159 = vector.load %arg3[%c0_129, %c0_130] : memref<1x168xf32, #tpu.memory_space<vmem>>, vector<1x168xf32>
    %160 = vector.broadcast %159 : vector<1x168xf32> to vector<28x168xf32>
    %161 = arith.addf %158, %160 : vector<28x168xf32>
    %cst_131 = arith.constant 0.000000e+00 : f32
    %162 = vector.broadcast %cst_131 : f32 to vector<28x168xf32>
    %163 = arith.maximumf %161, %162 : vector<28x168xf32>
    %164 = arith.truncf %163 : vector<28x168xf32> to vector<28x168xbf16>
    %c0_132 = arith.constant 0 : index
    %c0_133 = arith.constant 0 : index
    %c0_134 = arith.constant 0 : index
    %165 = vector.load %arg4[%c0_132, %c0_133, %c0_134] : memref<2x14x28xbf16, #tpu.memory_space<vmem>>, vector<1x14x28xbf16>
    %166 = vector.shape_cast %165 : vector<1x14x28xbf16> to vector<14x28xbf16>
    %cst_135 = arith.constant dense<0.000000e+00> : vector<14x168xf32>
    %167 = tpu.matmul %166, %164, %cst_135 {dimension_numbers = #tpu.dot_dimension_numbers<[1], [0], [0], [1], [0, 0, 1, 1], [], []>} : vector<14x28xbf16>, vector<28x168xbf16>, vector<14x168xf32> -> vector<14x168xf32>
    %c1_136 = arith.constant 1 : index
    %c0_137 = arith.constant 0 : index
    %c0_138 = arith.constant 0 : index
    %168 = vector.load %arg4[%c1_136, %c0_137, %c0_138] : memref<2x14x28xbf16, #tpu.memory_space<vmem>>, vector<1x14x28xbf16>
    %169 = vector.shape_cast %168 : vector<1x14x28xbf16> to vector<14x28xbf16>
    %cst_139 = arith.constant dense<0.000000e+00> : vector<14x168xf32>
    %170 = tpu.matmul %169, %164, %cst_139 {dimension_numbers = #tpu.dot_dimension_numbers<[1], [0], [0], [1], [0, 0, 1, 1], [], []>} : vector<14x28xbf16>, vector<28x168xbf16>, vector<14x168xf32> -> vector<14x168xf32>
    %171 = arith.maximumf %167, %170 : vector<14x168xf32>
    %172 = arith.truncf %171 : vector<14x168xf32> to vector<14x168xbf16>
    %c0_140 = arith.constant 0 : index
    %c0_141 = arith.constant 0 : index
    %c0_142 = arith.constant 0 : index
    %173 = vector.load %arg5[%c0_140, %c0_141, %c0_142] : memref<2x168x84xbf16, #tpu.memory_space<vmem>>, vector<1x168x84xbf16>
    %174 = vector.shape_cast %173 : vector<1x168x84xbf16> to vector<168x84xbf16>
    %cst_143 = arith.constant dense<0.000000e+00> : vector<14x84xf32>
    %175 = tpu.matmul %172, %174, %cst_143 {dimension_numbers = #tpu.dot_dimension_numbers<[1], [0], [0], [1], [0, 0, 1, 1], [], []>} : vector<14x168xbf16>, vector<168x84xbf16>, vector<14x84xf32> -> vector<14x84xf32>
    %c1_144 = arith.constant 1 : index
    %c0_145 = arith.constant 0 : index
    %c0_146 = arith.constant 0 : index
    %176 = vector.load %arg5[%c1_144, %c0_145, %c0_146] : memref<2x168x84xbf16, #tpu.memory_space<vmem>>, vector<1x168x84xbf16>
    %177 = vector.shape_cast %176 : vector<1x168x84xbf16> to vector<168x84xbf16>
    %cst_147 = arith.constant dense<0.000000e+00> : vector<14x84xf32>
    %178 = tpu.matmul %172, %177, %cst_147 {dimension_numbers = #tpu.dot_dimension_numbers<[1], [0], [0], [1], [0, 0, 1, 1], [], []>} : vector<14x168xbf16>, vector<168x84xbf16>, vector<14x84xf32> -> vector<14x84xf32>
    %179 = arith.maximumf %175, %178 : vector<14x84xf32>
    %180 = arith.truncf %179 : vector<14x84xf32> to vector<14x84xbf16>
    %181 = vector.extract_strided_slice %180 {offsets = [0, 0], sizes = [10, 84], strides = [1, 1]} : vector<14x84xbf16> to vector<10x84xbf16>
    %c0_148 = arith.constant 0 : index
    %c0_149 = arith.constant 0 : index
    %c0_150 = arith.constant 0 : index
    %182 = vector.load %arg6[%c0_148, %c0_149, %c0_150] : memref<5x84x160xbf16, #tpu.memory_space<vmem>>, vector<1x84x160xbf16>
    %183 = vector.shape_cast %182 : vector<1x84x160xbf16> to vector<84x160xbf16>
    %cst_151 = arith.constant dense<0.000000e+00> : vector<10x160xf32>
    %184 = tpu.matmul %181, %183, %cst_151 {dimension_numbers = #tpu.dot_dimension_numbers<[1], [0], [0], [1], [0, 0, 1, 1], [], []>} : vector<10x84xbf16>, vector<84x160xbf16>, vector<10x160xf32> -> vector<10x160xf32>
    %185 = vector.extract_strided_slice %180 {offsets = [1, 0], sizes = [10, 84], strides = [1, 1]} : vector<14x84xbf16> to vector<10x84xbf16>
    %c1_152 = arith.constant 1 : index
    %c0_153 = arith.constant 0 : index
    %c0_154 = arith.constant 0 : index
    %186 = vector.load %arg6[%c1_152, %c0_153, %c0_154] : memref<5x84x160xbf16, #tpu.memory_space<vmem>>, vector<1x84x160xbf16>
    %187 = vector.shape_cast %186 : vector<1x84x160xbf16> to vector<84x160xbf16>
    %cst_155 = arith.constant dense<0.000000e+00> : vector<10x160xf32>
    %188 = tpu.matmul %185, %187, %cst_155 {dimension_numbers = #tpu.dot_dimension_numbers<[1], [0], [0], [1], [0, 0, 1, 1], [], []>} : vector<10x84xbf16>, vector<84x160xbf16>, vector<10x160xf32> -> vector<10x160xf32>
    %189 = vector.extract_strided_slice %180 {offsets = [2, 0], sizes = [10, 84], strides = [1, 1]} : vector<14x84xbf16> to vector<10x84xbf16>
    %c2_156 = arith.constant 2 : index
    %c0_157 = arith.constant 0 : index
    %c0_158 = arith.constant 0 : index
    %190 = vector.load %arg6[%c2_156, %c0_157, %c0_158] : memref<5x84x160xbf16, #tpu.memory_space<vmem>>, vector<1x84x160xbf16>
    %191 = vector.shape_cast %190 : vector<1x84x160xbf16> to vector<84x160xbf16>
    %cst_159 = arith.constant dense<0.000000e+00> : vector<10x160xf32>
    %192 = tpu.matmul %189, %191, %cst_159 {dimension_numbers = #tpu.dot_dimension_numbers<[1], [0], [0], [1], [0, 0, 1, 1], [], []>} : vector<10x84xbf16>, vector<84x160xbf16>, vector<10x160xf32> -> vector<10x160xf32>
    %193 = vector.extract_strided_slice %180 {offsets = [3, 0], sizes = [10, 84], strides = [1, 1]} : vector<14x84xbf16> to vector<10x84xbf16>
    %c3_160 = arith.constant 3 : index
    %c0_161 = arith.constant 0 : index
    %c0_162 = arith.constant 0 : index
    %194 = vector.load %arg6[%c3_160, %c0_161, %c0_162] : memref<5x84x160xbf16, #tpu.memory_space<vmem>>, vector<1x84x160xbf16>
    %195 = vector.shape_cast %194 : vector<1x84x160xbf16> to vector<84x160xbf16>
    %cst_163 = arith.constant dense<0.000000e+00> : vector<10x160xf32>
    %196 = tpu.matmul %193, %195, %cst_163 {dimension_numbers = #tpu.dot_dimension_numbers<[1], [0], [0], [1], [0, 0, 1, 1], [], []>} : vector<10x84xbf16>, vector<84x160xbf16>, vector<10x160xf32> -> vector<10x160xf32>
    %197 = vector.extract_strided_slice %180 {offsets = [4, 0], sizes = [10, 84], strides = [1, 1]} : vector<14x84xbf16> to vector<10x84xbf16>
    %c4_164 = arith.constant 4 : index
    %c0_165 = arith.constant 0 : index
    %c0_166 = arith.constant 0 : index
    %198 = vector.load %arg6[%c4_164, %c0_165, %c0_166] : memref<5x84x160xbf16, #tpu.memory_space<vmem>>, vector<1x84x160xbf16>
    %199 = vector.shape_cast %198 : vector<1x84x160xbf16> to vector<84x160xbf16>
    %cst_167 = arith.constant dense<0.000000e+00> : vector<10x160xf32>
    %200 = tpu.matmul %197, %199, %cst_167 {dimension_numbers = #tpu.dot_dimension_numbers<[1], [0], [0], [1], [0, 0, 1, 1], [], []>} : vector<10x84xbf16>, vector<84x160xbf16>, vector<10x160xf32> -> vector<10x160xf32>
    %201 = arith.addf %184, %188 : vector<10x160xf32>
    %202 = arith.addf %192, %196 : vector<10x160xf32>
    %203 = arith.addf %201, %202 : vector<10x160xf32>
    %204 = arith.addf %203, %200 : vector<10x160xf32>
    %c0_168 = arith.constant 0 : index
    %c0_169 = arith.constant 0 : index
    %205 = vector.load %arg7[%c0_168, %c0_169] : memref<1x160xf32, #tpu.memory_space<vmem>>, vector<1x160xf32>
    %206 = vector.broadcast %205 : vector<1x160xf32> to vector<10x160xf32>
    %207 = arith.addf %204, %206 : vector<10x160xf32>
    %cst_170 = arith.constant 0.000000e+00 : f32
    %208 = vector.broadcast %cst_170 : f32 to vector<10x160xf32>
    %209 = arith.maximumf %207, %208 : vector<10x160xf32>
    %210 = arith.truncf %209 : vector<10x160xf32> to vector<10x160xbf16>
    %c0_171 = arith.constant 0 : index
    %c0_172 = arith.constant 0 : index
    %c0_173 = arith.constant 0 : index
    %211 = vector.load %arg8[%c0_171, %c0_172, %c0_173] : memref<2x5x10xbf16, #tpu.memory_space<vmem>>, vector<1x5x10xbf16>
    %212 = vector.shape_cast %211 : vector<1x5x10xbf16> to vector<5x10xbf16>
    %cst_174 = arith.constant dense<0.000000e+00> : vector<5x160xf32>
    %213 = tpu.matmul %212, %210, %cst_174 {dimension_numbers = #tpu.dot_dimension_numbers<[1], [0], [0], [1], [0, 0, 1, 1], [], []>} : vector<5x10xbf16>, vector<10x160xbf16>, vector<5x160xf32> -> vector<5x160xf32>
    %c1_175 = arith.constant 1 : index
    %c0_176 = arith.constant 0 : index
    %c0_177 = arith.constant 0 : index
    %214 = vector.load %arg8[%c1_175, %c0_176, %c0_177] : memref<2x5x10xbf16, #tpu.memory_space<vmem>>, vector<1x5x10xbf16>
    %215 = vector.shape_cast %214 : vector<1x5x10xbf16> to vector<5x10xbf16>
    %cst_178 = arith.constant dense<0.000000e+00> : vector<5x160xf32>
    %216 = tpu.matmul %215, %210, %cst_178 {dimension_numbers = #tpu.dot_dimension_numbers<[1], [0], [0], [1], [0, 0, 1, 1], [], []>} : vector<5x10xbf16>, vector<10x160xbf16>, vector<5x160xf32> -> vector<5x160xf32>
    %217 = arith.maximumf %213, %216 : vector<5x160xf32>
    %218 = arith.truncf %217 : vector<5x160xf32> to vector<5x160xbf16>
    %c0_179 = arith.constant 0 : index
    %c0_180 = arith.constant 0 : index
    %c0_181 = arith.constant 0 : index
    %219 = vector.load %arg9[%c0_179, %c0_180, %c0_181] : memref<2x160x80xbf16, #tpu.memory_space<vmem>>, vector<1x160x80xbf16>
    %220 = vector.shape_cast %219 : vector<1x160x80xbf16> to vector<160x80xbf16>
    %cst_182 = arith.constant dense<0.000000e+00> : vector<5x80xf32>
    %221 = tpu.matmul %218, %220, %cst_182 {dimension_numbers = #tpu.dot_dimension_numbers<[1], [0], [0], [1], [0, 0, 1, 1], [], []>} : vector<5x160xbf16>, vector<160x80xbf16>, vector<5x80xf32> -> vector<5x80xf32>
    %c1_183 = arith.constant 1 : index
    %c0_184 = arith.constant 0 : index
    %c0_185 = arith.constant 0 : index
    %222 = vector.load %arg9[%c1_183, %c0_184, %c0_185] : memref<2x160x80xbf16, #tpu.memory_space<vmem>>, vector<1x160x80xbf16>
    %223 = vector.shape_cast %222 : vector<1x160x80xbf16> to vector<160x80xbf16>
    %cst_186 = arith.constant dense<0.000000e+00> : vector<5x80xf32>
    %224 = tpu.matmul %218, %223, %cst_186 {dimension_numbers = #tpu.dot_dimension_numbers<[1], [0], [0], [1], [0, 0, 1, 1], [], []>} : vector<5x160xbf16>, vector<160x80xbf16>, vector<5x80xf32> -> vector<5x80xf32>
    %225 = arith.maximumf %221, %224 : vector<5x80xf32>
    %226 = arith.truncf %225 : vector<5x80xf32> to vector<5x80xbf16>
    %227 = arith.index_cast %c2_i32 : i32 to index
    %c0_187 = arith.constant 0 : index
    %c0_188 = arith.constant 0 : index
    %228 = vector.load %arg17[%227, %c0_187, %c0_188] : memref<8x5x80xbf16, #tpu.memory_space<vmem>>, vector<1x5x80xbf16>
    %229 = vector.shape_cast %228 : vector<1x5x80xbf16> to vector<5x80xbf16>
    %230 = vector.shape_cast %226 : vector<5x80xbf16> to vector<1x5x80xbf16>
    tpu.vector_store %arg17[%227, %c0_187, %c0_188], %230 {strides = array<i32>} : memref<8x5x80xbf16, #tpu.memory_space<vmem>>, vector<1x5x80xbf16>,
    %c3_i32 = arith.constant 3 : i32
    %231 = arith.index_cast %c3_i32 : i32 to index
    %c0_189 = arith.constant 0 : index
    %c0_190 = arith.constant 0 : index
    %232 = vector.load %arg1[%231, %c0_189, %c0_190] : memref<8x28x160xbf16, #tpu.memory_space<vmem>>, vector<1x28x160xbf16>
    %233 = vector.shape_cast %232 : vector<1x28x160xbf16> to vector<28x160xbf16>
    %c0_191 = arith.constant 0 : index
    %c0_192 = arith.constant 0 : index
    %234 = vector.load %arg2[%c0_191, %c0_192] : memref<160x168xbf16, #tpu.memory_space<vmem>>, vector<160x168xbf16>
    %cst_193 = arith.constant dense<0.000000e+00> : vector<28x168xf32>
    %235 = tpu.matmul %233, %234, %cst_193 {dimension_numbers = #tpu.dot_dimension_numbers<[1], [0], [0], [1], [0, 0, 1, 1], [], []>} : vector<28x160xbf16>, vector<160x168xbf16>, vector<28x168xf32> -> vector<28x168xf32>
    %c0_194 = arith.constant 0 : index
    %c0_195 = arith.constant 0 : index
    %236 = vector.load %arg3[%c0_194, %c0_195] : memref<1x168xf32, #tpu.memory_space<vmem>>, vector<1x168xf32>
    %237 = vector.broadcast %236 : vector<1x168xf32> to vector<28x168xf32>
    %238 = arith.addf %235, %237 : vector<28x168xf32>
    %cst_196 = arith.constant 0.000000e+00 : f32
    %239 = vector.broadcast %cst_196 : f32 to vector<28x168xf32>
    %240 = arith.maximumf %238, %239 : vector<28x168xf32>
    %241 = arith.truncf %240 : vector<28x168xf32> to vector<28x168xbf16>
    %c0_197 = arith.constant 0 : index
    %c0_198 = arith.constant 0 : index
    %c0_199 = arith.constant 0 : index
    %242 = vector.load %arg4[%c0_197, %c0_198, %c0_199] : memref<2x14x28xbf16, #tpu.memory_space<vmem>>, vector<1x14x28xbf16>
    %243 = vector.shape_cast %242 : vector<1x14x28xbf16> to vector<14x28xbf16>
    %cst_200 = arith.constant dense<0.000000e+00> : vector<14x168xf32>
    %244 = tpu.matmul %243, %241, %cst_200 {dimension_numbers = #tpu.dot_dimension_numbers<[1], [0], [0], [1], [0, 0, 1, 1], [], []>} : vector<14x28xbf16>, vector<28x168xbf16>, vector<14x168xf32> -> vector<14x168xf32>
    %c1_201 = arith.constant 1 : index
    %c0_202 = arith.constant 0 : index
    %c0_203 = arith.constant 0 : index
    %245 = vector.load %arg4[%c1_201, %c0_202, %c0_203] : memref<2x14x28xbf16, #tpu.memory_space<vmem>>, vector<1x14x28xbf16>
    %246 = vector.shape_cast %245 : vector<1x14x28xbf16> to vector<14x28xbf16>
    %cst_204 = arith.constant dense<0.000000e+00> : vector<14x168xf32>
    %247 = tpu.matmul %246, %241, %cst_204 {dimension_numbers = #tpu.dot_dimension_numbers<[1], [0], [0], [1], [0, 0, 1, 1], [], []>} : vector<14x28xbf16>, vector<28x168xbf16>, vector<14x168xf32> -> vector<14x168xf32>
    %248 = arith.maximumf %244, %247 : vector<14x168xf32>
    %249 = arith.truncf %248 : vector<14x168xf32> to vector<14x168xbf16>
    %c0_205 = arith.constant 0 : index
    %c0_206 = arith.constant 0 : index
    %c0_207 = arith.constant 0 : index
    %250 = vector.load %arg5[%c0_205, %c0_206, %c0_207] : memref<2x168x84xbf16, #tpu.memory_space<vmem>>, vector<1x168x84xbf16>
    %251 = vector.shape_cast %250 : vector<1x168x84xbf16> to vector<168x84xbf16>
    %cst_208 = arith.constant dense<0.000000e+00> : vector<14x84xf32>
    %252 = tpu.matmul %249, %251, %cst_208 {dimension_numbers = #tpu.dot_dimension_numbers<[1], [0], [0], [1], [0, 0, 1, 1], [], []>} : vector<14x168xbf16>, vector<168x84xbf16>, vector<14x84xf32> -> vector<14x84xf32>
    %c1_209 = arith.constant 1 : index
    %c0_210 = arith.constant 0 : index
    %c0_211 = arith.constant 0 : index
    %253 = vector.load %arg5[%c1_209, %c0_210, %c0_211] : memref<2x168x84xbf16, #tpu.memory_space<vmem>>, vector<1x168x84xbf16>
    %254 = vector.shape_cast %253 : vector<1x168x84xbf16> to vector<168x84xbf16>
    %cst_212 = arith.constant dense<0.000000e+00> : vector<14x84xf32>
    %255 = tpu.matmul %249, %254, %cst_212 {dimension_numbers = #tpu.dot_dimension_numbers<[1], [0], [0], [1], [0, 0, 1, 1], [], []>} : vector<14x168xbf16>, vector<168x84xbf16>, vector<14x84xf32> -> vector<14x84xf32>
    %256 = arith.maximumf %252, %255 : vector<14x84xf32>
    %257 = arith.truncf %256 : vector<14x84xf32> to vector<14x84xbf16>
    %258 = vector.extract_strided_slice %257 {offsets = [0, 0], sizes = [10, 84], strides = [1, 1]} : vector<14x84xbf16> to vector<10x84xbf16>
    %c0_213 = arith.constant 0 : index
    %c0_214 = arith.constant 0 : index
    %c0_215 = arith.constant 0 : index
    %259 = vector.load %arg6[%c0_213, %c0_214, %c0_215] : memref<5x84x160xbf16, #tpu.memory_space<vmem>>, vector<1x84x160xbf16>
    %260 = vector.shape_cast %259 : vector<1x84x160xbf16> to vector<84x160xbf16>
    %cst_216 = arith.constant dense<0.000000e+00> : vector<10x160xf32>
    %261 = tpu.matmul %258, %260, %cst_216 {dimension_numbers = #tpu.dot_dimension_numbers<[1], [0], [0], [1], [0, 0, 1, 1], [], []>} : vector<10x84xbf16>, vector<84x160xbf16>, vector<10x160xf32> -> vector<10x160xf32>
    %262 = vector.extract_strided_slice %257 {offsets = [1, 0], sizes = [10, 84], strides = [1, 1]} : vector<14x84xbf16> to vector<10x84xbf16>
    %c1_217 = arith.constant 1 : index
    %c0_218 = arith.constant 0 : index
    %c0_219 = arith.constant 0 : index
    %263 = vector.load %arg6[%c1_217, %c0_218, %c0_219] : memref<5x84x160xbf16, #tpu.memory_space<vmem>>, vector<1x84x160xbf16>
    %264 = vector.shape_cast %263 : vector<1x84x160xbf16> to vector<84x160xbf16>
    %cst_220 = arith.constant dense<0.000000e+00> : vector<10x160xf32>
    %265 = tpu.matmul %262, %264, %cst_220 {dimension_numbers = #tpu.dot_dimension_numbers<[1], [0], [0], [1], [0, 0, 1, 1], [], []>} : vector<10x84xbf16>, vector<84x160xbf16>, vector<10x160xf32> -> vector<10x160xf32>
    %266 = vector.extract_strided_slice %257 {offsets = [2, 0], sizes = [10, 84], strides = [1, 1]} : vector<14x84xbf16> to vector<10x84xbf16>
    %c2_221 = arith.constant 2 : index
    %c0_222 = arith.constant 0 : index
    %c0_223 = arith.constant 0 : index
    %267 = vector.load %arg6[%c2_221, %c0_222, %c0_223] : memref<5x84x160xbf16, #tpu.memory_space<vmem>>, vector<1x84x160xbf16>
    %268 = vector.shape_cast %267 : vector<1x84x160xbf16> to vector<84x160xbf16>
    %cst_224 = arith.constant dense<0.000000e+00> : vector<10x160xf32>
    %269 = tpu.matmul %266, %268, %cst_224 {dimension_numbers = #tpu.dot_dimension_numbers<[1], [0], [0], [1], [0, 0, 1, 1], [], []>} : vector<10x84xbf16>, vector<84x160xbf16>, vector<10x160xf32> -> vector<10x160xf32>
    %270 = vector.extract_strided_slice %257 {offsets = [3, 0], sizes = [10, 84], strides = [1, 1]} : vector<14x84xbf16> to vector<10x84xbf16>
    %c3_225 = arith.constant 3 : index
    %c0_226 = arith.constant 0 : index
    %c0_227 = arith.constant 0 : index
    %271 = vector.load %arg6[%c3_225, %c0_226, %c0_227] : memref<5x84x160xbf16, #tpu.memory_space<vmem>>, vector<1x84x160xbf16>
    %272 = vector.shape_cast %271 : vector<1x84x160xbf16> to vector<84x160xbf16>
    %cst_228 = arith.constant dense<0.000000e+00> : vector<10x160xf32>
    %273 = tpu.matmul %270, %272, %cst_228 {dimension_numbers = #tpu.dot_dimension_numbers<[1], [0], [0], [1], [0, 0, 1, 1], [], []>} : vector<10x84xbf16>, vector<84x160xbf16>, vector<10x160xf32> -> vector<10x160xf32>
    %274 = vector.extract_strided_slice %257 {offsets = [4, 0], sizes = [10, 84], strides = [1, 1]} : vector<14x84xbf16> to vector<10x84xbf16>
    %c4_229 = arith.constant 4 : index
    %c0_230 = arith.constant 0 : index
    %c0_231 = arith.constant 0 : index
    %275 = vector.load %arg6[%c4_229, %c0_230, %c0_231] : memref<5x84x160xbf16, #tpu.memory_space<vmem>>, vector<1x84x160xbf16>
    %276 = vector.shape_cast %275 : vector<1x84x160xbf16> to vector<84x160xbf16>
    %cst_232 = arith.constant dense<0.000000e+00> : vector<10x160xf32>
    %277 = tpu.matmul %274, %276, %cst_232 {dimension_numbers = #tpu.dot_dimension_numbers<[1], [0], [0], [1], [0, 0, 1, 1], [], []>} : vector<10x84xbf16>, vector<84x160xbf16>, vector<10x160xf32> -> vector<10x160xf32>
    %278 = arith.addf %261, %265 : vector<10x160xf32>
    %279 = arith.addf %269, %273 : vector<10x160xf32>
    %280 = arith.addf %278, %279 : vector<10x160xf32>
    %281 = arith.addf %280, %277 : vector<10x160xf32>
    %c0_233 = arith.constant 0 : index
    %c0_234 = arith.constant 0 : index
    %282 = vector.load %arg7[%c0_233, %c0_234] : memref<1x160xf32, #tpu.memory_space<vmem>>, vector<1x160xf32>
    %283 = vector.broadcast %282 : vector<1x160xf32> to vector<10x160xf32>
    %284 = arith.addf %281, %283 : vector<10x160xf32>
    %cst_235 = arith.constant 0.000000e+00 : f32
    %285 = vector.broadcast %cst_235 : f32 to vector<10x160xf32>
    %286 = arith.maximumf %284, %285 : vector<10x160xf32>
    %287 = arith.truncf %286 : vector<10x160xf32> to vector<10x160xbf16>
    %c0_236 = arith.constant 0 : index
    %c0_237 = arith.constant 0 : index
    %c0_238 = arith.constant 0 : index
    %288 = vector.load %arg8[%c0_236, %c0_237, %c0_238] : memref<2x5x10xbf16, #tpu.memory_space<vmem>>, vector<1x5x10xbf16>
    %289 = vector.shape_cast %288 : vector<1x5x10xbf16> to vector<5x10xbf16>
    %cst_239 = arith.constant dense<0.000000e+00> : vector<5x160xf32>
    %290 = tpu.matmul %289, %287, %cst_239 {dimension_numbers = #tpu.dot_dimension_numbers<[1], [0], [0], [1], [0, 0, 1, 1], [], []>} : vector<5x10xbf16>, vector<10x160xbf16>, vector<5x160xf32> -> vector<5x160xf32>
    %c1_240 = arith.constant 1 : index
    %c0_241 = arith.constant 0 : index
    %c0_242 = arith.constant 0 : index
    %291 = vector.load %arg8[%c1_240, %c0_241, %c0_242] : memref<2x5x10xbf16, #tpu.memory_space<vmem>>, vector<1x5x10xbf16>
    %292 = vector.shape_cast %291 : vector<1x5x10xbf16> to vector<5x10xbf16>
    %cst_243 = arith.constant dense<0.000000e+00> : vector<5x160xf32>
    %293 = tpu.matmul %292, %287, %cst_243 {dimension_numbers = #tpu.dot_dimension_numbers<[1], [0], [0], [1], [0, 0, 1, 1], [], []>} : vector<5x10xbf16>, vector<10x160xbf16>, vector<5x160xf32> -> vector<5x160xf32>
    %294 = arith.maximumf %290, %293 : vector<5x160xf32>
    %295 = arith.truncf %294 : vector<5x160xf32> to vector<5x160xbf16>
    %c0_244 = arith.constant 0 : index
    %c0_245 = arith.constant 0 : index
    %c0_246 = arith.constant 0 : index
    %296 = vector.load %arg9[%c0_244, %c0_245, %c0_246] : memref<2x160x80xbf16, #tpu.memory_space<vmem>>, vector<1x160x80xbf16>
    %297 = vector.shape_cast %296 : vector<1x160x80xbf16> to vector<160x80xbf16>
    %cst_247 = arith.constant dense<0.000000e+00> : vector<5x80xf32>
    %298 = tpu.matmul %295, %297, %cst_247 {dimension_numbers = #tpu.dot_dimension_numbers<[1], [0], [0], [1], [0, 0, 1, 1], [], []>} : vector<5x160xbf16>, vector<160x80xbf16>, vector<5x80xf32> -> vector<5x80xf32>
    %c1_248 = arith.constant 1 : index
    %c0_249 = arith.constant 0 : index
    %c0_250 = arith.constant 0 : index
    %299 = vector.load %arg9[%c1_248, %c0_249, %c0_250] : memref<2x160x80xbf16, #tpu.memory_space<vmem>>, vector<1x160x80xbf16>
    %300 = vector.shape_cast %299 : vector<1x160x80xbf16> to vector<160x80xbf16>
    %cst_251 = arith.constant dense<0.000000e+00> : vector<5x80xf32>
    %301 = tpu.matmul %295, %300, %cst_251 {dimension_numbers = #tpu.dot_dimension_numbers<[1], [0], [0], [1], [0, 0, 1, 1], [], []>} : vector<5x160xbf16>, vector<160x80xbf16>, vector<5x80xf32> -> vector<5x80xf32>
    %302 = arith.maximumf %298, %301 : vector<5x80xf32>
    %303 = arith.truncf %302 : vector<5x80xf32> to vector<5x80xbf16>
    %304 = arith.index_cast %c3_i32 : i32 to index
    %c0_252 = arith.constant 0 : index
    %c0_253 = arith.constant 0 : index
    %305 = vector.load %arg17[%304, %c0_252, %c0_253] : memref<8x5x80xbf16, #tpu.memory_space<vmem>>, vector<1x5x80xbf16>
    %306 = vector.shape_cast %305 : vector<1x5x80xbf16> to vector<5x80xbf16>
    %307 = vector.shape_cast %303 : vector<5x80xbf16> to vector<1x5x80xbf16>
    tpu.vector_store %arg17[%304, %c0_252, %c0_253], %307 {strides = array<i32>} : memref<8x5x80xbf16, #tpu.memory_space<vmem>>, vector<1x5x80xbf16>,
    %c4_i32 = arith.constant 4 : i32
    %308 = arith.index_cast %c4_i32 : i32 to index
    %c0_254 = arith.constant 0 : index
    %c0_255 = arith.constant 0 : index
    %309 = vector.load %arg1[%308, %c0_254, %c0_255] : memref<8x28x160xbf16, #tpu.memory_space<vmem>>, vector<1x28x160xbf16>
    %310 = vector.shape_cast %309 : vector<1x28x160xbf16> to vector<28x160xbf16>
    %c0_256 = arith.constant 0 : index
    %c0_257 = arith.constant 0 : index
    %311 = vector.load %arg2[%c0_256, %c0_257] : memref<160x168xbf16, #tpu.memory_space<vmem>>, vector<160x168xbf16>
    %cst_258 = arith.constant dense<0.000000e+00> : vector<28x168xf32>
    %312 = tpu.matmul %310, %311, %cst_258 {dimension_numbers = #tpu.dot_dimension_numbers<[1], [0], [0], [1], [0, 0, 1, 1], [], []>} : vector<28x160xbf16>, vector<160x168xbf16>, vector<28x168xf32> -> vector<28x168xf32>
    %c0_259 = arith.constant 0 : index
    %c0_260 = arith.constant 0 : index
    %313 = vector.load %arg3[%c0_259, %c0_260] : memref<1x168xf32, #tpu.memory_space<vmem>>, vector<1x168xf32>
    %314 = vector.broadcast %313 : vector<1x168xf32> to vector<28x168xf32>
    %315 = arith.addf %312, %314 : vector<28x168xf32>
    %cst_261 = arith.constant 0.000000e+00 : f32
    %316 = vector.broadcast %cst_261 : f32 to vector<28x168xf32>
    %317 = arith.maximumf %315, %316 : vector<28x168xf32>
    %318 = arith.truncf %317 : vector<28x168xf32> to vector<28x168xbf16>
    %c0_262 = arith.constant 0 : index
    %c0_263 = arith.constant 0 : index
    %c0_264 = arith.constant 0 : index
    %319 = vector.load %arg4[%c0_262, %c0_263, %c0_264] : memref<2x14x28xbf16, #tpu.memory_space<vmem>>, vector<1x14x28xbf16>
    %320 = vector.shape_cast %319 : vector<1x14x28xbf16> to vector<14x28xbf16>
    %cst_265 = arith.constant dense<0.000000e+00> : vector<14x168xf32>
    %321 = tpu.matmul %320, %318, %cst_265 {dimension_numbers = #tpu.dot_dimension_numbers<[1], [0], [0], [1], [0, 0, 1, 1], [], []>} : vector<14x28xbf16>, vector<28x168xbf16>, vector<14x168xf32> -> vector<14x168xf32>
    %c1_266 = arith.constant 1 : index
    %c0_267 = arith.constant 0 : index
    %c0_268 = arith.constant 0 : index
    %322 = vector.load %arg4[%c1_266, %c0_267, %c0_268] : memref<2x14x28xbf16, #tpu.memory_space<vmem>>, vector<1x14x28xbf16>
    %323 = vector.shape_cast %322 : vector<1x14x28xbf16> to vector<14x28xbf16>
    %cst_269 = arith.constant dense<0.000000e+00> : vector<14x168xf32>
    %324 = tpu.matmul %323, %318, %cst_269 {dimension_numbers = #tpu.dot_dimension_numbers<[1], [0], [0], [1], [0, 0, 1, 1], [], []>} : vector<14x28xbf16>, vector<28x168xbf16>, vector<14x168xf32> -> vector<14x168xf32>
    %325 = arith.maximumf %321, %324 : vector<14x168xf32>
    %326 = arith.truncf %325 : vector<14x168xf32> to vector<14x168xbf16>
    %c0_270 = arith.constant 0 : index
    %c0_271 = arith.constant 0 : index
    %c0_272 = arith.constant 0 : index
    %327 = vector.load %arg5[%c0_270, %c0_271, %c0_272] : memref<2x168x84xbf16, #tpu.memory_space<vmem>>, vector<1x168x84xbf16>
    %328 = vector.shape_cast %327 : vector<1x168x84xbf16> to vector<168x84xbf16>
    %cst_273 = arith.constant dense<0.000000e+00> : vector<14x84xf32>
    %329 = tpu.matmul %326, %328, %cst_273 {dimension_numbers = #tpu.dot_dimension_numbers<[1], [0], [0], [1], [0, 0, 1, 1], [], []>} : vector<14x168xbf16>, vector<168x84xbf16>, vector<14x84xf32> -> vector<14x84xf32>
    %c1_274 = arith.constant 1 : index
    %c0_275 = arith.constant 0 : index
    %c0_276 = arith.constant 0 : index
    %330 = vector.load %arg5[%c1_274, %c0_275, %c0_276] : memref<2x168x84xbf16, #tpu.memory_space<vmem>>, vector<1x168x84xbf16>
    %331 = vector.shape_cast %330 : vector<1x168x84xbf16> to vector<168x84xbf16>
    %cst_277 = arith.constant dense<0.000000e+00> : vector<14x84xf32>
    %332 = tpu.matmul %326, %331, %cst_277 {dimension_numbers = #tpu.dot_dimension_numbers<[1], [0], [0], [1], [0, 0, 1, 1], [], []>} : vector<14x168xbf16>, vector<168x84xbf16>, vector<14x84xf32> -> vector<14x84xf32>
    %333 = arith.maximumf %329, %332 : vector<14x84xf32>
    %334 = arith.truncf %333 : vector<14x84xf32> to vector<14x84xbf16>
    %335 = vector.extract_strided_slice %334 {offsets = [0, 0], sizes = [10, 84], strides = [1, 1]} : vector<14x84xbf16> to vector<10x84xbf16>
    %c0_278 = arith.constant 0 : index
    %c0_279 = arith.constant 0 : index
    %c0_280 = arith.constant 0 : index
    %336 = vector.load %arg6[%c0_278, %c0_279, %c0_280] : memref<5x84x160xbf16, #tpu.memory_space<vmem>>, vector<1x84x160xbf16>
    %337 = vector.shape_cast %336 : vector<1x84x160xbf16> to vector<84x160xbf16>
    %cst_281 = arith.constant dense<0.000000e+00> : vector<10x160xf32>
    %338 = tpu.matmul %335, %337, %cst_281 {dimension_numbers = #tpu.dot_dimension_numbers<[1], [0], [0], [1], [0, 0, 1, 1], [], []>} : vector<10x84xbf16>, vector<84x160xbf16>, vector<10x160xf32> -> vector<10x160xf32>
    %339 = vector.extract_strided_slice %334 {offsets = [1, 0], sizes = [10, 84], strides = [1, 1]} : vector<14x84xbf16> to vector<10x84xbf16>
    %c1_282 = arith.constant 1 : index
    %c0_283 = arith.constant 0 : index
    %c0_284 = arith.constant 0 : index
    %340 = vector.load %arg6[%c1_282, %c0_283, %c0_284] : memref<5x84x160xbf16, #tpu.memory_space<vmem>>, vector<1x84x160xbf16>
    %341 = vector.shape_cast %340 : vector<1x84x160xbf16> to vector<84x160xbf16>
    %cst_285 = arith.constant dense<0.000000e+00> : vector<10x160xf32>
    %342 = tpu.matmul %339, %341, %cst_285 {dimension_numbers = #tpu.dot_dimension_numbers<[1], [0], [0], [1], [0, 0, 1, 1], [], []>} : vector<10x84xbf16>, vector<84x160xbf16>, vector<10x160xf32> -> vector<10x160xf32>
    %343 = vector.extract_strided_slice %334 {offsets = [2, 0], sizes = [10, 84], strides = [1, 1]} : vector<14x84xbf16> to vector<10x84xbf16>
    %c2_286 = arith.constant 2 : index
    %c0_287 = arith.constant 0 : index
    %c0_288 = arith.constant 0 : index
    %344 = vector.load %arg6[%c2_286, %c0_287, %c0_288] : memref<5x84x160xbf16, #tpu.memory_space<vmem>>, vector<1x84x160xbf16>
    %345 = vector.shape_cast %344 : vector<1x84x160xbf16> to vector<84x160xbf16>
    %cst_289 = arith.constant dense<0.000000e+00> : vector<10x160xf32>
    %346 = tpu.matmul %343, %345, %cst_289 {dimension_numbers = #tpu.dot_dimension_numbers<[1], [0], [0], [1], [0, 0, 1, 1], [], []>} : vector<10x84xbf16>, vector<84x160xbf16>, vector<10x160xf32> -> vector<10x160xf32>
    %347 = vector.extract_strided_slice %334 {offsets = [3, 0], sizes = [10, 84], strides = [1, 1]} : vector<14x84xbf16> to vector<10x84xbf16>
    %c3_290 = arith.constant 3 : index
    %c0_291 = arith.constant 0 : index
    %c0_292 = arith.constant 0 : index
    %348 = vector.load %arg6[%c3_290, %c0_291, %c0_292] : memref<5x84x160xbf16, #tpu.memory_space<vmem>>, vector<1x84x160xbf16>
    %349 = vector.shape_cast %348 : vector<1x84x160xbf16> to vector<84x160xbf16>
    %cst_293 = arith.constant dense<0.000000e+00> : vector<10x160xf32>
    %350 = tpu.matmul %347, %349, %cst_293 {dimension_numbers = #tpu.dot_dimension_numbers<[1], [0], [0], [1], [0, 0, 1, 1], [], []>} : vector<10x84xbf16>, vector<84x160xbf16>, vector<10x160xf32> -> vector<10x160xf32>
    %351 = vector.extract_strided_slice %334 {offsets = [4, 0], sizes = [10, 84], strides = [1, 1]} : vector<14x84xbf16> to vector<10x84xbf16>
    %c4_294 = arith.constant 4 : index
    %c0_295 = arith.constant 0 : index
    %c0_296 = arith.constant 0 : index
    %352 = vector.load %arg6[%c4_294, %c0_295, %c0_296] : memref<5x84x160xbf16, #tpu.memory_space<vmem>>, vector<1x84x160xbf16>
    %353 = vector.shape_cast %352 : vector<1x84x160xbf16> to vector<84x160xbf16>
    %cst_297 = arith.constant dense<0.000000e+00> : vector<10x160xf32>
    %354 = tpu.matmul %351, %353, %cst_297 {dimension_numbers = #tpu.dot_dimension_numbers<[1], [0], [0], [1], [0, 0, 1, 1], [], []>} : vector<10x84xbf16>, vector<84x160xbf16>, vector<10x160xf32> -> vector<10x160xf32>
    %355 = arith.addf %338, %342 : vector<10x160xf32>
    %356 = arith.addf %346, %350 : vector<10x160xf32>
    %357 = arith.addf %355, %356 : vector<10x160xf32>
    %358 = arith.addf %357, %354 : vector<10x160xf32>
    %c0_298 = arith.constant 0 : index
    %c0_299 = arith.constant 0 : index
    %359 = vector.load %arg7[%c0_298, %c0_299] : memref<1x160xf32, #tpu.memory_space<vmem>>, vector<1x160xf32>
    %360 = vector.broadcast %359 : vector<1x160xf32> to vector<10x160xf32>
    %361 = arith.addf %358, %360 : vector<10x160xf32>
    %cst_300 = arith.constant 0.000000e+00 : f32
    %362 = vector.broadcast %cst_300 : f32 to vector<10x160xf32>
    %363 = arith.maximumf %361, %362 : vector<10x160xf32>
    %364 = arith.truncf %363 : vector<10x160xf32> to vector<10x160xbf16>
    %c0_301 = arith.constant 0 : index
    %c0_302 = arith.constant 0 : index
    %c0_303 = arith.constant 0 : index
    %365 = vector.load %arg8[%c0_301, %c0_302, %c0_303] : memref<2x5x10xbf16, #tpu.memory_space<vmem>>, vector<1x5x10xbf16>
    %366 = vector.shape_cast %365 : vector<1x5x10xbf16> to vector<5x10xbf16>
    %cst_304 = arith.constant dense<0.000000e+00> : vector<5x160xf32>
    %367 = tpu.matmul %366, %364, %cst_304 {dimension_numbers = #tpu.dot_dimension_numbers<[1], [0], [0], [1], [0, 0, 1, 1], [], []>} : vector<5x10xbf16>, vector<10x160xbf16>, vector<5x160xf32> -> vector<5x160xf32>
    %c1_305 = arith.constant 1 : index
    %c0_306 = arith.constant 0 : index
    %c0_307 = arith.constant 0 : index
    %368 = vector.load %arg8[%c1_305, %c0_306, %c0_307] : memref<2x5x10xbf16, #tpu.memory_space<vmem>>, vector<1x5x10xbf16>
    %369 = vector.shape_cast %368 : vector<1x5x10xbf16> to vector<5x10xbf16>
    %cst_308 = arith.constant dense<0.000000e+00> : vector<5x160xf32>
    %370 = tpu.matmul %369, %364, %cst_308 {dimension_numbers = #tpu.dot_dimension_numbers<[1], [0], [0], [1], [0, 0, 1, 1], [], []>} : vector<5x10xbf16>, vector<10x160xbf16>, vector<5x160xf32> -> vector<5x160xf32>
    %371 = arith.maximumf %367, %370 : vector<5x160xf32>
    %372 = arith.truncf %371 : vector<5x160xf32> to vector<5x160xbf16>
    %c0_309 = arith.constant 0 : index
    %c0_310 = arith.constant 0 : index
    %c0_311 = arith.constant 0 : index
    %373 = vector.load %arg9[%c0_309, %c0_310, %c0_311] : memref<2x160x80xbf16, #tpu.memory_space<vmem>>, vector<1x160x80xbf16>
    %374 = vector.shape_cast %373 : vector<1x160x80xbf16> to vector<160x80xbf16>
    %cst_312 = arith.constant dense<0.000000e+00> : vector<5x80xf32>
    %375 = tpu.matmul %372, %374, %cst_312 {dimension_numbers = #tpu.dot_dimension_numbers<[1], [0], [0], [1], [0, 0, 1, 1], [], []>} : vector<5x160xbf16>, vector<160x80xbf16>, vector<5x80xf32> -> vector<5x80xf32>
    %c1_313 = arith.constant 1 : index
    %c0_314 = arith.constant 0 : index
    %c0_315 = arith.constant 0 : index
    %376 = vector.load %arg9[%c1_313, %c0_314, %c0_315] : memref<2x160x80xbf16, #tpu.memory_space<vmem>>, vector<1x160x80xbf16>
    %377 = vector.shape_cast %376 : vector<1x160x80xbf16> to vector<160x80xbf16>
    %cst_316 = arith.constant dense<0.000000e+00> : vector<5x80xf32>
    %378 = tpu.matmul %372, %377, %cst_316 {dimension_numbers = #tpu.dot_dimension_numbers<[1], [0], [0], [1], [0, 0, 1, 1], [], []>} : vector<5x160xbf16>, vector<160x80xbf16>, vector<5x80xf32> -> vector<5x80xf32>
    %379 = arith.maximumf %375, %378 : vector<5x80xf32>
    %380 = arith.truncf %379 : vector<5x80xf32> to vector<5x80xbf16>
    %381 = arith.index_cast %c4_i32 : i32 to index
    %c0_317 = arith.constant 0 : index
    %c0_318 = arith.constant 0 : index
    %382 = vector.load %arg17[%381, %c0_317, %c0_318] : memref<8x5x80xbf16, #tpu.memory_space<vmem>>, vector<1x5x80xbf16>
    %383 = vector.shape_cast %382 : vector<1x5x80xbf16> to vector<5x80xbf16>
    %384 = vector.shape_cast %380 : vector<5x80xbf16> to vector<1x5x80xbf16>
    tpu.vector_store %arg17[%381, %c0_317, %c0_318], %384 {strides = array<i32>} : memref<8x5x80xbf16, #tpu.memory_space<vmem>>, vector<1x5x80xbf16>,
    %c5_i32 = arith.constant 5 : i32
    %385 = arith.index_cast %c5_i32 : i32 to index
    %c0_319 = arith.constant 0 : index
    %c0_320 = arith.constant 0 : index
    %386 = vector.load %arg1[%385, %c0_319, %c0_320] : memref<8x28x160xbf16, #tpu.memory_space<vmem>>, vector<1x28x160xbf16>
    %387 = vector.shape_cast %386 : vector<1x28x160xbf16> to vector<28x160xbf16>
    %c0_321 = arith.constant 0 : index
    %c0_322 = arith.constant 0 : index
    %388 = vector.load %arg2[%c0_321, %c0_322] : memref<160x168xbf16, #tpu.memory_space<vmem>>, vector<160x168xbf16>
    %cst_323 = arith.constant dense<0.000000e+00> : vector<28x168xf32>
    %389 = tpu.matmul %387, %388, %cst_323 {dimension_numbers = #tpu.dot_dimension_numbers<[1], [0], [0], [1], [0, 0, 1, 1], [], []>} : vector<28x160xbf16>, vector<160x168xbf16>, vector<28x168xf32> -> vector<28x168xf32>
    %c0_324 = arith.constant 0 : index
    %c0_325 = arith.constant 0 : index
    %390 = vector.load %arg3[%c0_324, %c0_325] : memref<1x168xf32, #tpu.memory_space<vmem>>, vector<1x168xf32>
    %391 = vector.broadcast %390 : vector<1x168xf32> to vector<28x168xf32>
    %392 = arith.addf %389, %391 : vector<28x168xf32>
    %cst_326 = arith.constant 0.000000e+00 : f32
    %393 = vector.broadcast %cst_326 : f32 to vector<28x168xf32>
    %394 = arith.maximumf %392, %393 : vector<28x168xf32>
    %395 = arith.truncf %394 : vector<28x168xf32> to vector<28x168xbf16>
    %c0_327 = arith.constant 0 : index
    %c0_328 = arith.constant 0 : index
    %c0_329 = arith.constant 0 : index
    %396 = vector.load %arg4[%c0_327, %c0_328, %c0_329] : memref<2x14x28xbf16, #tpu.memory_space<vmem>>, vector<1x14x28xbf16>
    %397 = vector.shape_cast %396 : vector<1x14x28xbf16> to vector<14x28xbf16>
    %cst_330 = arith.constant dense<0.000000e+00> : vector<14x168xf32>
    %398 = tpu.matmul %397, %395, %cst_330 {dimension_numbers = #tpu.dot_dimension_numbers<[1], [0], [0], [1], [0, 0, 1, 1], [], []>} : vector<14x28xbf16>, vector<28x168xbf16>, vector<14x168xf32> -> vector<14x168xf32>
    %c1_331 = arith.constant 1 : index
    %c0_332 = arith.constant 0 : index
    %c0_333 = arith.constant 0 : index
    %399 = vector.load %arg4[%c1_331, %c0_332, %c0_333] : memref<2x14x28xbf16, #tpu.memory_space<vmem>>, vector<1x14x28xbf16>
    %400 = vector.shape_cast %399 : vector<1x14x28xbf16> to vector<14x28xbf16>
    %cst_334 = arith.constant dense<0.000000e+00> : vector<14x168xf32>
    %401 = tpu.matmul %400, %395, %cst_334 {dimension_numbers = #tpu.dot_dimension_numbers<[1], [0], [0], [1], [0, 0, 1, 1], [], []>} : vector<14x28xbf16>, vector<28x168xbf16>, vector<14x168xf32> -> vector<14x168xf32>
    %402 = arith.maximumf %398, %401 : vector<14x168xf32>
    %403 = arith.truncf %402 : vector<14x168xf32> to vector<14x168xbf16>
    %c0_335 = arith.constant 0 : index
    %c0_336 = arith.constant 0 : index
    %c0_337 = arith.constant 0 : index
    %404 = vector.load %arg5[%c0_335, %c0_336, %c0_337] : memref<2x168x84xbf16, #tpu.memory_space<vmem>>, vector<1x168x84xbf16>
    %405 = vector.shape_cast %404 : vector<1x168x84xbf16> to vector<168x84xbf16>
    %cst_338 = arith.constant dense<0.000000e+00> : vector<14x84xf32>
    %406 = tpu.matmul %403, %405, %cst_338 {dimension_numbers = #tpu.dot_dimension_numbers<[1], [0], [0], [1], [0, 0, 1, 1], [], []>} : vector<14x168xbf16>, vector<168x84xbf16>, vector<14x84xf32> -> vector<14x84xf32>
    %c1_339 = arith.constant 1 : index
    %c0_340 = arith.constant 0 : index
    %c0_341 = arith.constant 0 : index
    %407 = vector.load %arg5[%c1_339, %c0_340, %c0_341] : memref<2x168x84xbf16, #tpu.memory_space<vmem>>, vector<1x168x84xbf16>
    %408 = vector.shape_cast %407 : vector<1x168x84xbf16> to vector<168x84xbf16>
    %cst_342 = arith.constant dense<0.000000e+00> : vector<14x84xf32>
    %409 = tpu.matmul %403, %408, %cst_342 {dimension_numbers = #tpu.dot_dimension_numbers<[1], [0], [0], [1], [0, 0, 1, 1], [], []>} : vector<14x168xbf16>, vector<168x84xbf16>, vector<14x84xf32> -> vector<14x84xf32>
    %410 = arith.maximumf %406, %409 : vector<14x84xf32>
    %411 = arith.truncf %410 : vector<14x84xf32> to vector<14x84xbf16>
    %412 = vector.extract_strided_slice %411 {offsets = [0, 0], sizes = [10, 84], strides = [1, 1]} : vector<14x84xbf16> to vector<10x84xbf16>
    %c0_343 = arith.constant 0 : index
    %c0_344 = arith.constant 0 : index
    %c0_345 = arith.constant 0 : index
    %413 = vector.load %arg6[%c0_343, %c0_344, %c0_345] : memref<5x84x160xbf16, #tpu.memory_space<vmem>>, vector<1x84x160xbf16>
    %414 = vector.shape_cast %413 : vector<1x84x160xbf16> to vector<84x160xbf16>
    %cst_346 = arith.constant dense<0.000000e+00> : vector<10x160xf32>
    %415 = tpu.matmul %412, %414, %cst_346 {dimension_numbers = #tpu.dot_dimension_numbers<[1], [0], [0], [1], [0, 0, 1, 1], [], []>} : vector<10x84xbf16>, vector<84x160xbf16>, vector<10x160xf32> -> vector<10x160xf32>
    %416 = vector.extract_strided_slice %411 {offsets = [1, 0], sizes = [10, 84], strides = [1, 1]} : vector<14x84xbf16> to vector<10x84xbf16>
    %c1_347 = arith.constant 1 : index
    %c0_348 = arith.constant 0 : index
    %c0_349 = arith.constant 0 : index
    %417 = vector.load %arg6[%c1_347, %c0_348, %c0_349] : memref<5x84x160xbf16, #tpu.memory_space<vmem>>, vector<1x84x160xbf16>
    %418 = vector.shape_cast %417 : vector<1x84x160xbf16> to vector<84x160xbf16>
    %cst_350 = arith.constant dense<0.000000e+00> : vector<10x160xf32>
    %419 = tpu.matmul %416, %418, %cst_350 {dimension_numbers = #tpu.dot_dimension_numbers<[1], [0], [0], [1], [0, 0, 1, 1], [], []>} : vector<10x84xbf16>, vector<84x160xbf16>, vector<10x160xf32> -> vector<10x160xf32>
    %420 = vector.extract_strided_slice %411 {offsets = [2, 0], sizes = [10, 84], strides = [1, 1]} : vector<14x84xbf16> to vector<10x84xbf16>
    %c2_351 = arith.constant 2 : index
    %c0_352 = arith.constant 0 : index
    %c0_353 = arith.constant 0 : index
    %421 = vector.load %arg6[%c2_351, %c0_352, %c0_353] : memref<5x84x160xbf16, #tpu.memory_space<vmem>>, vector<1x84x160xbf16>
    %422 = vector.shape_cast %421 : vector<1x84x160xbf16> to vector<84x160xbf16>
    %cst_354 = arith.constant dense<0.000000e+00> : vector<10x160xf32>
    %423 = tpu.matmul %420, %422, %cst_354 {dimension_numbers = #tpu.dot_dimension_numbers<[1], [0], [0], [1], [0, 0, 1, 1], [], []>} : vector<10x84xbf16>, vector<84x160xbf16>, vector<10x160xf32> -> vector<10x160xf32>
    %424 = vector.extract_strided_slice %411 {offsets = [3, 0], sizes = [10, 84], strides = [1, 1]} : vector<14x84xbf16> to vector<10x84xbf16>
    %c3_355 = arith.constant 3 : index
    %c0_356 = arith.constant 0 : index
    %c0_357 = arith.constant 0 : index
    %425 = vector.load %arg6[%c3_355, %c0_356, %c0_357] : memref<5x84x160xbf16, #tpu.memory_space<vmem>>, vector<1x84x160xbf16>
    %426 = vector.shape_cast %425 : vector<1x84x160xbf16> to vector<84x160xbf16>
    %cst_358 = arith.constant dense<0.000000e+00> : vector<10x160xf32>
    %427 = tpu.matmul %424, %426, %cst_358 {dimension_numbers = #tpu.dot_dimension_numbers<[1], [0], [0], [1], [0, 0, 1, 1], [], []>} : vector<10x84xbf16>, vector<84x160xbf16>, vector<10x160xf32> -> vector<10x160xf32>
    %428 = vector.extract_strided_slice %411 {offsets = [4, 0], sizes = [10, 84], strides = [1, 1]} : vector<14x84xbf16> to vector<10x84xbf16>
    %c4_359 = arith.constant 4 : index
    %c0_360 = arith.constant 0 : index
    %c0_361 = arith.constant 0 : index
    %429 = vector.load %arg6[%c4_359, %c0_360, %c0_361] : memref<5x84x160xbf16, #tpu.memory_space<vmem>>, vector<1x84x160xbf16>
    %430 = vector.shape_cast %429 : vector<1x84x160xbf16> to vector<84x160xbf16>
    %cst_362 = arith.constant dense<0.000000e+00> : vector<10x160xf32>
    %431 = tpu.matmul %428, %430, %cst_362 {dimension_numbers = #tpu.dot_dimension_numbers<[1], [0], [0], [1], [0, 0, 1, 1], [], []>} : vector<10x84xbf16>, vector<84x160xbf16>, vector<10x160xf32> -> vector<10x160xf32>
    %432 = arith.addf %415, %419 : vector<10x160xf32>
    %433 = arith.addf %423, %427 : vector<10x160xf32>
    %434 = arith.addf %432, %433 : vector<10x160xf32>
    %435 = arith.addf %434, %431 : vector<10x160xf32>
    %c0_363 = arith.constant 0 : index
    %c0_364 = arith.constant 0 : index
    %436 = vector.load %arg7[%c0_363, %c0_364] : memref<1x160xf32, #tpu.memory_space<vmem>>, vector<1x160xf32>
    %437 = vector.broadcast %436 : vector<1x160xf32> to vector<10x160xf32>
    %438 = arith.addf %435, %437 : vector<10x160xf32>
    %cst_365 = arith.constant 0.000000e+00 : f32
    %439 = vector.broadcast %cst_365 : f32 to vector<10x160xf32>
    %440 = arith.maximumf %438, %439 : vector<10x160xf32>
    %441 = arith.truncf %440 : vector<10x160xf32> to vector<10x160xbf16>
    %c0_366 = arith.constant 0 : index
    %c0_367 = arith.constant 0 : index
    %c0_368 = arith.constant 0 : index
    %442 = vector.load %arg8[%c0_366, %c0_367, %c0_368] : memref<2x5x10xbf16, #tpu.memory_space<vmem>>, vector<1x5x10xbf16>
    %443 = vector.shape_cast %442 : vector<1x5x10xbf16> to vector<5x10xbf16>
    %cst_369 = arith.constant dense<0.000000e+00> : vector<5x160xf32>
    %444 = tpu.matmul %443, %441, %cst_369 {dimension_numbers = #tpu.dot_dimension_numbers<[1], [0], [0], [1], [0, 0, 1, 1], [], []>} : vector<5x10xbf16>, vector<10x160xbf16>, vector<5x160xf32> -> vector<5x160xf32>
    %c1_370 = arith.constant 1 : index
    %c0_371 = arith.constant 0 : index
    %c0_372 = arith.constant 0 : index
    %445 = vector.load %arg8[%c1_370, %c0_371, %c0_372] : memref<2x5x10xbf16, #tpu.memory_space<vmem>>, vector<1x5x10xbf16>
    %446 = vector.shape_cast %445 : vector<1x5x10xbf16> to vector<5x10xbf16>
    %cst_373 = arith.constant dense<0.000000e+00> : vector<5x160xf32>
    %447 = tpu.matmul %446, %441, %cst_373 {dimension_numbers = #tpu.dot_dimension_numbers<[1], [0], [0], [1], [0, 0, 1, 1], [], []>} : vector<5x10xbf16>, vector<10x160xbf16>, vector<5x160xf32> -> vector<5x160xf32>
    %448 = arith.maximumf %444, %447 : vector<5x160xf32>
    %449 = arith.truncf %448 : vector<5x160xf32> to vector<5x160xbf16>
    %c0_374 = arith.constant 0 : index
    %c0_375 = arith.constant 0 : index
    %c0_376 = arith.constant 0 : index
    %450 = vector.load %arg9[%c0_374, %c0_375, %c0_376] : memref<2x160x80xbf16, #tpu.memory_space<vmem>>, vector<1x160x80xbf16>
    %451 = vector.shape_cast %450 : vector<1x160x80xbf16> to vector<160x80xbf16>
    %cst_377 = arith.constant dense<0.000000e+00> : vector<5x80xf32>
    %452 = tpu.matmul %449, %451, %cst_377 {dimension_numbers = #tpu.dot_dimension_numbers<[1], [0], [0], [1], [0, 0, 1, 1], [], []>} : vector<5x160xbf16>, vector<160x80xbf16>, vector<5x80xf32> -> vector<5x80xf32>
    %c1_378 = arith.constant 1 : index
    %c0_379 = arith.constant 0 : index
    %c0_380 = arith.constant 0 : index
    %453 = vector.load %arg9[%c1_378, %c0_379, %c0_380] : memref<2x160x80xbf16, #tpu.memory_space<vmem>>, vector<1x160x80xbf16>
    %454 = vector.shape_cast %453 : vector<1x160x80xbf16> to vector<160x80xbf16>
    %cst_381 = arith.constant dense<0.000000e+00> : vector<5x80xf32>
    %455 = tpu.matmul %449, %454, %cst_381 {dimension_numbers = #tpu.dot_dimension_numbers<[1], [0], [0], [1], [0, 0, 1, 1], [], []>} : vector<5x160xbf16>, vector<160x80xbf16>, vector<5x80xf32> -> vector<5x80xf32>
    %456 = arith.maximumf %452, %455 : vector<5x80xf32>
    %457 = arith.truncf %456 : vector<5x80xf32> to vector<5x80xbf16>
    %458 = arith.index_cast %c5_i32 : i32 to index
    %c0_382 = arith.constant 0 : index
    %c0_383 = arith.constant 0 : index
    %459 = vector.load %arg17[%458, %c0_382, %c0_383] : memref<8x5x80xbf16, #tpu.memory_space<vmem>>, vector<1x5x80xbf16>
    %460 = vector.shape_cast %459 : vector<1x5x80xbf16> to vector<5x80xbf16>
    %461 = vector.shape_cast %457 : vector<5x80xbf16> to vector<1x5x80xbf16>
    tpu.vector_store %arg17[%458, %c0_382, %c0_383], %461 {strides = array<i32>} : memref<8x5x80xbf16, #tpu.memory_space<vmem>>, vector<1x5x80xbf16>,
    %c6_i32 = arith.constant 6 : i32
    %462 = arith.index_cast %c6_i32 : i32 to index
    %c0_384 = arith.constant 0 : index
    %c0_385 = arith.constant 0 : index
    %463 = vector.load %arg1[%462, %c0_384, %c0_385] : memref<8x28x160xbf16, #tpu.memory_space<vmem>>, vector<1x28x160xbf16>
    %464 = vector.shape_cast %463 : vector<1x28x160xbf16> to vector<28x160xbf16>
    %c0_386 = arith.constant 0 : index
    %c0_387 = arith.constant 0 : index
    %465 = vector.load %arg2[%c0_386, %c0_387] : memref<160x168xbf16, #tpu.memory_space<vmem>>, vector<160x168xbf16>
    %cst_388 = arith.constant dense<0.000000e+00> : vector<28x168xf32>
    %466 = tpu.matmul %464, %465, %cst_388 {dimension_numbers = #tpu.dot_dimension_numbers<[1], [0], [0], [1], [0, 0, 1, 1], [], []>} : vector<28x160xbf16>, vector<160x168xbf16>, vector<28x168xf32> -> vector<28x168xf32>
    %c0_389 = arith.constant 0 : index
    %c0_390 = arith.constant 0 : index
    %467 = vector.load %arg3[%c0_389, %c0_390] : memref<1x168xf32, #tpu.memory_space<vmem>>, vector<1x168xf32>
    %468 = vector.broadcast %467 : vector<1x168xf32> to vector<28x168xf32>
    %469 = arith.addf %466, %468 : vector<28x168xf32>
    %cst_391 = arith.constant 0.000000e+00 : f32
    %470 = vector.broadcast %cst_391 : f32 to vector<28x168xf32>
    %471 = arith.maximumf %469, %470 : vector<28x168xf32>
    %472 = arith.truncf %471 : vector<28x168xf32> to vector<28x168xbf16>
    %c0_392 = arith.constant 0 : index
    %c0_393 = arith.constant 0 : index
    %c0_394 = arith.constant 0 : index
    %473 = vector.load %arg4[%c0_392, %c0_393, %c0_394] : memref<2x14x28xbf16, #tpu.memory_space<vmem>>, vector<1x14x28xbf16>
    %474 = vector.shape_cast %473 : vector<1x14x28xbf16> to vector<14x28xbf16>
    %cst_395 = arith.constant dense<0.000000e+00> : vector<14x168xf32>
    %475 = tpu.matmul %474, %472, %cst_395 {dimension_numbers = #tpu.dot_dimension_numbers<[1], [0], [0], [1], [0, 0, 1, 1], [], []>} : vector<14x28xbf16>, vector<28x168xbf16>, vector<14x168xf32> -> vector<14x168xf32>
    %c1_396 = arith.constant 1 : index
    %c0_397 = arith.constant 0 : index
    %c0_398 = arith.constant 0 : index
    %476 = vector.load %arg4[%c1_396, %c0_397, %c0_398] : memref<2x14x28xbf16, #tpu.memory_space<vmem>>, vector<1x14x28xbf16>
    %477 = vector.shape_cast %476 : vector<1x14x28xbf16> to vector<14x28xbf16>
    %cst_399 = arith.constant dense<0.000000e+00> : vector<14x168xf32>
    %478 = tpu.matmul %477, %472, %cst_399 {dimension_numbers = #tpu.dot_dimension_numbers<[1], [0], [0], [1], [0, 0, 1, 1], [], []>} : vector<14x28xbf16>, vector<28x168xbf16>, vector<14x168xf32> -> vector<14x168xf32>
    %479 = arith.maximumf %475, %478 : vector<14x168xf32>
    %480 = arith.truncf %479 : vector<14x168xf32> to vector<14x168xbf16>
    %c0_400 = arith.constant 0 : index
    %c0_401 = arith.constant 0 : index
    %c0_402 = arith.constant 0 : index
    %481 = vector.load %arg5[%c0_400, %c0_401, %c0_402] : memref<2x168x84xbf16, #tpu.memory_space<vmem>>, vector<1x168x84xbf16>
    %482 = vector.shape_cast %481 : vector<1x168x84xbf16> to vector<168x84xbf16>
    %cst_403 = arith.constant dense<0.000000e+00> : vector<14x84xf32>
    %483 = tpu.matmul %480, %482, %cst_403 {dimension_numbers = #tpu.dot_dimension_numbers<[1], [0], [0], [1], [0, 0, 1, 1], [], []>} : vector<14x168xbf16>, vector<168x84xbf16>, vector<14x84xf32> -> vector<14x84xf32>
    %c1_404 = arith.constant 1 : index
    %c0_405 = arith.constant 0 : index
    %c0_406 = arith.constant 0 : index
    %484 = vector.load %arg5[%c1_404, %c0_405, %c0_406] : memref<2x168x84xbf16, #tpu.memory_space<vmem>>, vector<1x168x84xbf16>
    %485 = vector.shape_cast %484 : vector<1x168x84xbf16> to vector<168x84xbf16>
    %cst_407 = arith.constant dense<0.000000e+00> : vector<14x84xf32>
    %486 = tpu.matmul %480, %485, %cst_407 {dimension_numbers = #tpu.dot_dimension_numbers<[1], [0], [0], [1], [0, 0, 1, 1], [], []>} : vector<14x168xbf16>, vector<168x84xbf16>, vector<14x84xf32> -> vector<14x84xf32>
    %487 = arith.maximumf %483, %486 : vector<14x84xf32>
    %488 = arith.truncf %487 : vector<14x84xf32> to vector<14x84xbf16>
    %489 = vector.extract_strided_slice %488 {offsets = [0, 0], sizes = [10, 84], strides = [1, 1]} : vector<14x84xbf16> to vector<10x84xbf16>
    %c0_408 = arith.constant 0 : index
    %c0_409 = arith.constant 0 : index
    %c0_410 = arith.constant 0 : index
    %490 = vector.load %arg6[%c0_408, %c0_409, %c0_410] : memref<5x84x160xbf16, #tpu.memory_space<vmem>>, vector<1x84x160xbf16>
    %491 = vector.shape_cast %490 : vector<1x84x160xbf16> to vector<84x160xbf16>
    %cst_411 = arith.constant dense<0.000000e+00> : vector<10x160xf32>
    %492 = tpu.matmul %489, %491, %cst_411 {dimension_numbers = #tpu.dot_dimension_numbers<[1], [0], [0], [1], [0, 0, 1, 1], [], []>} : vector<10x84xbf16>, vector<84x160xbf16>, vector<10x160xf32> -> vector<10x160xf32>
    %493 = vector.extract_strided_slice %488 {offsets = [1, 0], sizes = [10, 84], strides = [1, 1]} : vector<14x84xbf16> to vector<10x84xbf16>
    %c1_412 = arith.constant 1 : index
    %c0_413 = arith.constant 0 : index
    %c0_414 = arith.constant 0 : index
    %494 = vector.load %arg6[%c1_412, %c0_413, %c0_414] : memref<5x84x160xbf16, #tpu.memory_space<vmem>>, vector<1x84x160xbf16>
    %495 = vector.shape_cast %494 : vector<1x84x160xbf16> to vector<84x160xbf16>
    %cst_415 = arith.constant dense<0.000000e+00> : vector<10x160xf32>
    %496 = tpu.matmul %493, %495, %cst_415 {dimension_numbers = #tpu.dot_dimension_numbers<[1], [0], [0], [1], [0, 0, 1, 1], [], []>} : vector<10x84xbf16>, vector<84x160xbf16>, vector<10x160xf32> -> vector<10x160xf32>
    %497 = vector.extract_strided_slice %488 {offsets = [2, 0], sizes = [10, 84], strides = [1, 1]} : vector<14x84xbf16> to vector<10x84xbf16>
    %c2_416 = arith.constant 2 : index
    %c0_417 = arith.constant 0 : index
    %c0_418 = arith.constant 0 : index
    %498 = vector.load %arg6[%c2_416, %c0_417, %c0_418] : memref<5x84x160xbf16, #tpu.memory_space<vmem>>, vector<1x84x160xbf16>
    %499 = vector.shape_cast %498 : vector<1x84x160xbf16> to vector<84x160xbf16>
    %cst_419 = arith.constant dense<0.000000e+00> : vector<10x160xf32>
    %500 = tpu.matmul %497, %499, %cst_419 {dimension_numbers = #tpu.dot_dimension_numbers<[1], [0], [0], [1], [0, 0, 1, 1], [], []>} : vector<10x84xbf16>, vector<84x160xbf16>, vector<10x160xf32> -> vector<10x160xf32>
    %501 = vector.extract_strided_slice %488 {offsets = [3, 0], sizes = [10, 84], strides = [1, 1]} : vector<14x84xbf16> to vector<10x84xbf16>
    %c3_420 = arith.constant 3 : index
    %c0_421 = arith.constant 0 : index
    %c0_422 = arith.constant 0 : index
    %502 = vector.load %arg6[%c3_420, %c0_421, %c0_422] : memref<5x84x160xbf16, #tpu.memory_space<vmem>>, vector<1x84x160xbf16>
    %503 = vector.shape_cast %502 : vector<1x84x160xbf16> to vector<84x160xbf16>
    %cst_423 = arith.constant dense<0.000000e+00> : vector<10x160xf32>
    %504 = tpu.matmul %501, %503, %cst_423 {dimension_numbers = #tpu.dot_dimension_numbers<[1], [0], [0], [1], [0, 0, 1, 1], [], []>} : vector<10x84xbf16>, vector<84x160xbf16>, vector<10x160xf32> -> vector<10x160xf32>
    %505 = vector.extract_strided_slice %488 {offsets = [4, 0], sizes = [10, 84], strides = [1, 1]} : vector<14x84xbf16> to vector<10x84xbf16>
    %c4_424 = arith.constant 4 : index
    %c0_425 = arith.constant 0 : index
    %c0_426 = arith.constant 0 : index
    %506 = vector.load %arg6[%c4_424, %c0_425, %c0_426] : memref<5x84x160xbf16, #tpu.memory_space<vmem>>, vector<1x84x160xbf16>
    %507 = vector.shape_cast %506 : vector<1x84x160xbf16> to vector<84x160xbf16>
    %cst_427 = arith.constant dense<0.000000e+00> : vector<10x160xf32>
    %508 = tpu.matmul %505, %507, %cst_427 {dimension_numbers = #tpu.dot_dimension_numbers<[1], [0], [0], [1], [0, 0, 1, 1], [], []>} : vector<10x84xbf16>, vector<84x160xbf16>, vector<10x160xf32> -> vector<10x160xf32>
    %509 = arith.addf %492, %496 : vector<10x160xf32>
    %510 = arith.addf %500, %504 : vector<10x160xf32>
    %511 = arith.addf %509, %510 : vector<10x160xf32>
    %512 = arith.addf %511, %508 : vector<10x160xf32>
    %c0_428 = arith.constant 0 : index
    %c0_429 = arith.constant 0 : index
    %513 = vector.load %arg7[%c0_428, %c0_429] : memref<1x160xf32, #tpu.memory_space<vmem>>, vector<1x160xf32>
    %514 = vector.broadcast %513 : vector<1x160xf32> to vector<10x160xf32>
    %515 = arith.addf %512, %514 : vector<10x160xf32>
    %cst_430 = arith.constant 0.000000e+00 : f32
    %516 = vector.broadcast %cst_430 : f32 to vector<10x160xf32>
    %517 = arith.maximumf %515, %516 : vector<10x160xf32>
    %518 = arith.truncf %517 : vector<10x160xf32> to vector<10x160xbf16>
    %c0_431 = arith.constant 0 : index
    %c0_432 = arith.constant 0 : index
    %c0_433 = arith.constant 0 : index
    %519 = vector.load %arg8[%c0_431, %c0_432, %c0_433] : memref<2x5x10xbf16, #tpu.memory_space<vmem>>, vector<1x5x10xbf16>
    %520 = vector.shape_cast %519 : vector<1x5x10xbf16> to vector<5x10xbf16>
    %cst_434 = arith.constant dense<0.000000e+00> : vector<5x160xf32>
    %521 = tpu.matmul %520, %518, %cst_434 {dimension_numbers = #tpu.dot_dimension_numbers<[1], [0], [0], [1], [0, 0, 1, 1], [], []>} : vector<5x10xbf16>, vector<10x160xbf16>, vector<5x160xf32> -> vector<5x160xf32>
    %c1_435 = arith.constant 1 : index
    %c0_436 = arith.constant 0 : index
    %c0_437 = arith.constant 0 : index
    %522 = vector.load %arg8[%c1_435, %c0_436, %c0_437] : memref<2x5x10xbf16, #tpu.memory_space<vmem>>, vector<1x5x10xbf16>
    %523 = vector.shape_cast %522 : vector<1x5x10xbf16> to vector<5x10xbf16>
    %cst_438 = arith.constant dense<0.000000e+00> : vector<5x160xf32>
    %524 = tpu.matmul %523, %518, %cst_438 {dimension_numbers = #tpu.dot_dimension_numbers<[1], [0], [0], [1], [0, 0, 1, 1], [], []>} : vector<5x10xbf16>, vector<10x160xbf16>, vector<5x160xf32> -> vector<5x160xf32>
    %525 = arith.maximumf %521, %524 : vector<5x160xf32>
    %526 = arith.truncf %525 : vector<5x160xf32> to vector<5x160xbf16>
    %c0_439 = arith.constant 0 : index
    %c0_440 = arith.constant 0 : index
    %c0_441 = arith.constant 0 : index
    %527 = vector.load %arg9[%c0_439, %c0_440, %c0_441] : memref<2x160x80xbf16, #tpu.memory_space<vmem>>, vector<1x160x80xbf16>
    %528 = vector.shape_cast %527 : vector<1x160x80xbf16> to vector<160x80xbf16>
    %cst_442 = arith.constant dense<0.000000e+00> : vector<5x80xf32>
    %529 = tpu.matmul %526, %528, %cst_442 {dimension_numbers = #tpu.dot_dimension_numbers<[1], [0], [0], [1], [0, 0, 1, 1], [], []>} : vector<5x160xbf16>, vector<160x80xbf16>, vector<5x80xf32> -> vector<5x80xf32>
    %c1_443 = arith.constant 1 : index
    %c0_444 = arith.constant 0 : index
    %c0_445 = arith.constant 0 : index
    %530 = vector.load %arg9[%c1_443, %c0_444, %c0_445] : memref<2x160x80xbf16, #tpu.memory_space<vmem>>, vector<1x160x80xbf16>
    %531 = vector.shape_cast %530 : vector<1x160x80xbf16> to vector<160x80xbf16>
    %cst_446 = arith.constant dense<0.000000e+00> : vector<5x80xf32>
    %532 = tpu.matmul %526, %531, %cst_446 {dimension_numbers = #tpu.dot_dimension_numbers<[1], [0], [0], [1], [0, 0, 1, 1], [], []>} : vector<5x160xbf16>, vector<160x80xbf16>, vector<5x80xf32> -> vector<5x80xf32>
    %533 = arith.maximumf %529, %532 : vector<5x80xf32>
    %534 = arith.truncf %533 : vector<5x80xf32> to vector<5x80xbf16>
    %535 = arith.index_cast %c6_i32 : i32 to index
    %c0_447 = arith.constant 0 : index
    %c0_448 = arith.constant 0 : index
    %536 = vector.load %arg17[%535, %c0_447, %c0_448] : memref<8x5x80xbf16, #tpu.memory_space<vmem>>, vector<1x5x80xbf16>
    %537 = vector.shape_cast %536 : vector<1x5x80xbf16> to vector<5x80xbf16>
    %538 = vector.shape_cast %534 : vector<5x80xbf16> to vector<1x5x80xbf16>
    tpu.vector_store %arg17[%535, %c0_447, %c0_448], %538 {strides = array<i32>} : memref<8x5x80xbf16, #tpu.memory_space<vmem>>, vector<1x5x80xbf16>,
    %c7_i32 = arith.constant 7 : i32
    %539 = arith.index_cast %c7_i32 : i32 to index
    %c0_449 = arith.constant 0 : index
    %c0_450 = arith.constant 0 : index
    %540 = vector.load %arg1[%539, %c0_449, %c0_450] : memref<8x28x160xbf16, #tpu.memory_space<vmem>>, vector<1x28x160xbf16>
    %541 = vector.shape_cast %540 : vector<1x28x160xbf16> to vector<28x160xbf16>
    %c0_451 = arith.constant 0 : index
    %c0_452 = arith.constant 0 : index
    %542 = vector.load %arg2[%c0_451, %c0_452] : memref<160x168xbf16, #tpu.memory_space<vmem>>, vector<160x168xbf16>
    %cst_453 = arith.constant dense<0.000000e+00> : vector<28x168xf32>
    %543 = tpu.matmul %541, %542, %cst_453 {dimension_numbers = #tpu.dot_dimension_numbers<[1], [0], [0], [1], [0, 0, 1, 1], [], []>} : vector<28x160xbf16>, vector<160x168xbf16>, vector<28x168xf32> -> vector<28x168xf32>
    %c0_454 = arith.constant 0 : index
    %c0_455 = arith.constant 0 : index
    %544 = vector.load %arg3[%c0_454, %c0_455] : memref<1x168xf32, #tpu.memory_space<vmem>>, vector<1x168xf32>
    %545 = vector.broadcast %544 : vector<1x168xf32> to vector<28x168xf32>
    %546 = arith.addf %543, %545 : vector<28x168xf32>
    %cst_456 = arith.constant 0.000000e+00 : f32
    %547 = vector.broadcast %cst_456 : f32 to vector<28x168xf32>
    %548 = arith.maximumf %546, %547 : vector<28x168xf32>
    %549 = arith.truncf %548 : vector<28x168xf32> to vector<28x168xbf16>
    %c0_457 = arith.constant 0 : index
    %c0_458 = arith.constant 0 : index
    %c0_459 = arith.constant 0 : index
    %550 = vector.load %arg4[%c0_457, %c0_458, %c0_459] : memref<2x14x28xbf16, #tpu.memory_space<vmem>>, vector<1x14x28xbf16>
    %551 = vector.shape_cast %550 : vector<1x14x28xbf16> to vector<14x28xbf16>
    %cst_460 = arith.constant dense<0.000000e+00> : vector<14x168xf32>
    %552 = tpu.matmul %551, %549, %cst_460 {dimension_numbers = #tpu.dot_dimension_numbers<[1], [0], [0], [1], [0, 0, 1, 1], [], []>} : vector<14x28xbf16>, vector<28x168xbf16>, vector<14x168xf32> -> vector<14x168xf32>
    %c1_461 = arith.constant 1 : index
    %c0_462 = arith.constant 0 : index
    %c0_463 = arith.constant 0 : index
    %553 = vector.load %arg4[%c1_461, %c0_462, %c0_463] : memref<2x14x28xbf16, #tpu.memory_space<vmem>>, vector<1x14x28xbf16>
    %554 = vector.shape_cast %553 : vector<1x14x28xbf16> to vector<14x28xbf16>
    %cst_464 = arith.constant dense<0.000000e+00> : vector<14x168xf32>
    %555 = tpu.matmul %554, %549, %cst_464 {dimension_numbers = #tpu.dot_dimension_numbers<[1], [0], [0], [1], [0, 0, 1, 1], [], []>} : vector<14x28xbf16>, vector<28x168xbf16>, vector<14x168xf32> -> vector<14x168xf32>
    %556 = arith.maximumf %552, %555 : vector<14x168xf32>
    %557 = arith.truncf %556 : vector<14x168xf32> to vector<14x168xbf16>
    %c0_465 = arith.constant 0 : index
    %c0_466 = arith.constant 0 : index
    %c0_467 = arith.constant 0 : index
    %558 = vector.load %arg5[%c0_465, %c0_466, %c0_467] : memref<2x168x84xbf16, #tpu.memory_space<vmem>>, vector<1x168x84xbf16>
    %559 = vector.shape_cast %558 : vector<1x168x84xbf16> to vector<168x84xbf16>
    %cst_468 = arith.constant dense<0.000000e+00> : vector<14x84xf32>
    %560 = tpu.matmul %557, %559, %cst_468 {dimension_numbers = #tpu.dot_dimension_numbers<[1], [0], [0], [1], [0, 0, 1, 1], [], []>} : vector<14x168xbf16>, vector<168x84xbf16>, vector<14x84xf32> -> vector<14x84xf32>
    %c1_469 = arith.constant 1 : index
    %c0_470 = arith.constant 0 : index
    %c0_471 = arith.constant 0 : index
    %561 = vector.load %arg5[%c1_469, %c0_470, %c0_471] : memref<2x168x84xbf16, #tpu.memory_space<vmem>>, vector<1x168x84xbf16>
    %562 = vector.shape_cast %561 : vector<1x168x84xbf16> to vector<168x84xbf16>
    %cst_472 = arith.constant dense<0.000000e+00> : vector<14x84xf32>
    %563 = tpu.matmul %557, %562, %cst_472 {dimension_numbers = #tpu.dot_dimension_numbers<[1], [0], [0], [1], [0, 0, 1, 1], [], []>} : vector<14x168xbf16>, vector<168x84xbf16>, vector<14x84xf32> -> vector<14x84xf32>
    %564 = arith.maximumf %560, %563 : vector<14x84xf32>
    %565 = arith.truncf %564 : vector<14x84xf32> to vector<14x84xbf16>
    %566 = vector.extract_strided_slice %565 {offsets = [0, 0], sizes = [10, 84], strides = [1, 1]} : vector<14x84xbf16> to vector<10x84xbf16>
    %c0_473 = arith.constant 0 : index
    %c0_474 = arith.constant 0 : index
    %c0_475 = arith.constant 0 : index
    %567 = vector.load %arg6[%c0_473, %c0_474, %c0_475] : memref<5x84x160xbf16, #tpu.memory_space<vmem>>, vector<1x84x160xbf16>
    %568 = vector.shape_cast %567 : vector<1x84x160xbf16> to vector<84x160xbf16>
    %cst_476 = arith.constant dense<0.000000e+00> : vector<10x160xf32>
    %569 = tpu.matmul %566, %568, %cst_476 {dimension_numbers = #tpu.dot_dimension_numbers<[1], [0], [0], [1], [0, 0, 1, 1], [], []>} : vector<10x84xbf16>, vector<84x160xbf16>, vector<10x160xf32> -> vector<10x160xf32>
    %570 = vector.extract_strided_slice %565 {offsets = [1, 0], sizes = [10, 84], strides = [1, 1]} : vector<14x84xbf16> to vector<10x84xbf16>
    %c1_477 = arith.constant 1 : index
    %c0_478 = arith.constant 0 : index
    %c0_479 = arith.constant 0 : index
    %571 = vector.load %arg6[%c1_477, %c0_478, %c0_479] : memref<5x84x160xbf16, #tpu.memory_space<vmem>>, vector<1x84x160xbf16>
    %572 = vector.shape_cast %571 : vector<1x84x160xbf16> to vector<84x160xbf16>
    %cst_480 = arith.constant dense<0.000000e+00> : vector<10x160xf32>
    %573 = tpu.matmul %570, %572, %cst_480 {dimension_numbers = #tpu.dot_dimension_numbers<[1], [0], [0], [1], [0, 0, 1, 1], [], []>} : vector<10x84xbf16>, vector<84x160xbf16>, vector<10x160xf32> -> vector<10x160xf32>
    %574 = vector.extract_strided_slice %565 {offsets = [2, 0], sizes = [10, 84], strides = [1, 1]} : vector<14x84xbf16> to vector<10x84xbf16>
    %c2_481 = arith.constant 2 : index
    %c0_482 = arith.constant 0 : index
    %c0_483 = arith.constant 0 : index
    %575 = vector.load %arg6[%c2_481, %c0_482, %c0_483] : memref<5x84x160xbf16, #tpu.memory_space<vmem>>, vector<1x84x160xbf16>
    %576 = vector.shape_cast %575 : vector<1x84x160xbf16> to vector<84x160xbf16>
    %cst_484 = arith.constant dense<0.000000e+00> : vector<10x160xf32>
    %577 = tpu.matmul %574, %576, %cst_484 {dimension_numbers = #tpu.dot_dimension_numbers<[1], [0], [0], [1], [0, 0, 1, 1], [], []>} : vector<10x84xbf16>, vector<84x160xbf16>, vector<10x160xf32> -> vector<10x160xf32>
    %578 = vector.extract_strided_slice %565 {offsets = [3, 0], sizes = [10, 84], strides = [1, 1]} : vector<14x84xbf16> to vector<10x84xbf16>
    %c3_485 = arith.constant 3 : index
    %c0_486 = arith.constant 0 : index
    %c0_487 = arith.constant 0 : index
    %579 = vector.load %arg6[%c3_485, %c0_486, %c0_487] : memref<5x84x160xbf16, #tpu.memory_space<vmem>>, vector<1x84x160xbf16>
    %580 = vector.shape_cast %579 : vector<1x84x160xbf16> to vector<84x160xbf16>
    %cst_488 = arith.constant dense<0.000000e+00> : vector<10x160xf32>
    %581 = tpu.matmul %578, %580, %cst_488 {dimension_numbers = #tpu.dot_dimension_numbers<[1], [0], [0], [1], [0, 0, 1, 1], [], []>} : vector<10x84xbf16>, vector<84x160xbf16>, vector<10x160xf32> -> vector<10x160xf32>
    %582 = vector.extract_strided_slice %565 {offsets = [4, 0], sizes = [10, 84], strides = [1, 1]} : vector<14x84xbf16> to vector<10x84xbf16>
    %c4_489 = arith.constant 4 : index
    %c0_490 = arith.constant 0 : index
    %c0_491 = arith.constant 0 : index
    %583 = vector.load %arg6[%c4_489, %c0_490, %c0_491] : memref<5x84x160xbf16, #tpu.memory_space<vmem>>, vector<1x84x160xbf16>
    %584 = vector.shape_cast %583 : vector<1x84x160xbf16> to vector<84x160xbf16>
    %cst_492 = arith.constant dense<0.000000e+00> : vector<10x160xf32>
    %585 = tpu.matmul %582, %584, %cst_492 {dimension_numbers = #tpu.dot_dimension_numbers<[1], [0], [0], [1], [0, 0, 1, 1], [], []>} : vector<10x84xbf16>, vector<84x160xbf16>, vector<10x160xf32> -> vector<10x160xf32>
    %586 = arith.addf %569, %573 : vector<10x160xf32>
    %587 = arith.addf %577, %581 : vector<10x160xf32>
    %588 = arith.addf %586, %587 : vector<10x160xf32>
    %589 = arith.addf %588, %585 : vector<10x160xf32>
    %c0_493 = arith.constant 0 : index
    %c0_494 = arith.constant 0 : index
    %590 = vector.load %arg7[%c0_493, %c0_494] : memref<1x160xf32, #tpu.memory_space<vmem>>, vector<1x160xf32>
    %591 = vector.broadcast %590 : vector<1x160xf32> to vector<10x160xf32>
    %592 = arith.addf %589, %591 : vector<10x160xf32>
    %cst_495 = arith.constant 0.000000e+00 : f32
    %593 = vector.broadcast %cst_495 : f32 to vector<10x160xf32>
    %594 = arith.maximumf %592, %593 : vector<10x160xf32>
    %595 = arith.truncf %594 : vector<10x160xf32> to vector<10x160xbf16>
    %c0_496 = arith.constant 0 : index
    %c0_497 = arith.constant 0 : index
    %c0_498 = arith.constant 0 : index
    %596 = vector.load %arg8[%c0_496, %c0_497, %c0_498] : memref<2x5x10xbf16, #tpu.memory_space<vmem>>, vector<1x5x10xbf16>
    %597 = vector.shape_cast %596 : vector<1x5x10xbf16> to vector<5x10xbf16>
    %cst_499 = arith.constant dense<0.000000e+00> : vector<5x160xf32>
    %598 = tpu.matmul %597, %595, %cst_499 {dimension_numbers = #tpu.dot_dimension_numbers<[1], [0], [0], [1], [0, 0, 1, 1], [], []>} : vector<5x10xbf16>, vector<10x160xbf16>, vector<5x160xf32> -> vector<5x160xf32>
    %c1_500 = arith.constant 1 : index
    %c0_501 = arith.constant 0 : index
    %c0_502 = arith.constant 0 : index
    %599 = vector.load %arg8[%c1_500, %c0_501, %c0_502] : memref<2x5x10xbf16, #tpu.memory_space<vmem>>, vector<1x5x10xbf16>
    %600 = vector.shape_cast %599 : vector<1x5x10xbf16> to vector<5x10xbf16>
    %cst_503 = arith.constant dense<0.000000e+00> : vector<5x160xf32>
    %601 = tpu.matmul %600, %595, %cst_503 {dimension_numbers = #tpu.dot_dimension_numbers<[1], [0], [0], [1], [0, 0, 1, 1], [], []>} : vector<5x10xbf16>, vector<10x160xbf16>, vector<5x160xf32> -> vector<5x160xf32>
    %602 = arith.maximumf %598, %601 : vector<5x160xf32>
    %603 = arith.truncf %602 : vector<5x160xf32> to vector<5x160xbf16>
    %c0_504 = arith.constant 0 : index
    %c0_505 = arith.constant 0 : index
    %c0_506 = arith.constant 0 : index
    %604 = vector.load %arg9[%c0_504, %c0_505, %c0_506] : memref<2x160x80xbf16, #tpu.memory_space<vmem>>, vector<1x160x80xbf16>
    %605 = vector.shape_cast %604 : vector<1x160x80xbf16> to vector<160x80xbf16>
    %cst_507 = arith.constant dense<0.000000e+00> : vector<5x80xf32>
    %606 = tpu.matmul %603, %605, %cst_507 {dimension_numbers = #tpu.dot_dimension_numbers<[1], [0], [0], [1], [0, 0, 1, 1], [], []>} : vector<5x160xbf16>, vector<160x80xbf16>, vector<5x80xf32> -> vector<5x80xf32>
    %c1_508 = arith.constant 1 : index
    %c0_509 = arith.constant 0 : index
    %c0_510 = arith.constant 0 : index
    %607 = vector.load %arg9[%c1_508, %c0_509, %c0_510] : memref<2x160x80xbf16, #tpu.memory_space<vmem>>, vector<1x160x80xbf16>
    %608 = vector.shape_cast %607 : vector<1x160x80xbf16> to vector<160x80xbf16>
    %cst_511 = arith.constant dense<0.000000e+00> : vector<5x80xf32>
    %609 = tpu.matmul %603, %608, %cst_511 {dimension_numbers = #tpu.dot_dimension_numbers<[1], [0], [0], [1], [0, 0, 1, 1], [], []>} : vector<5x160xbf16>, vector<160x80xbf16>, vector<5x80xf32> -> vector<5x80xf32>
    %610 = arith.maximumf %606, %609 : vector<5x80xf32>
    %611 = arith.truncf %610 : vector<5x80xf32> to vector<5x80xbf16>
    %612 = arith.index_cast %c7_i32 : i32 to index
    %c0_512 = arith.constant 0 : index
    %c0_513 = arith.constant 0 : index
    %613 = vector.load %arg17[%612, %c0_512, %c0_513] : memref<8x5x80xbf16, #tpu.memory_space<vmem>>, vector<1x5x80xbf16>
    %614 = vector.shape_cast %613 : vector<1x5x80xbf16> to vector<5x80xbf16>
    %615 = vector.shape_cast %611 : vector<5x80xbf16> to vector<1x5x80xbf16>
    tpu.vector_store %arg17[%612, %c0_512, %c0_513], %615 {strides = array<i32>} : memref<8x5x80xbf16, #tpu.memory_space<vmem>>, vector<1x5x80xbf16>,
    %c8_i32 = arith.constant 8 : i32
    %c0_514 = arith.constant 0 : index
    %c0_515 = arith.constant 0 : index
    %c0_516 = arith.constant 0 : index
    %616 = vector.load %arg17[%c0_514, %c0_515, %c0_516] : memref<8x5x80xbf16, #tpu.memory_space<vmem>>, vector<8x5x80xbf16>
    %617 = vector.extract_strided_slice %616 {offsets = [0, 0, 0], sizes = [8, 1, 80], strides = [1, 1, 1]} : vector<8x5x80xbf16> to vector<8x1x80xbf16>
    %618 = vector.shape_cast %617 : vector<8x1x80xbf16> to vector<8x80xbf16>
    %c0_517 = arith.constant 0 : index
    %c0_518 = arith.constant 0 : index
    %c0_519 = arith.constant 0 : index
    %619 = vector.load %arg10[%c0_517, %c0_518, %c0_519] : memref<5x80x128xbf16, #tpu.memory_space<vmem>>, vector<1x80x128xbf16>
    %620 = vector.shape_cast %619 : vector<1x80x128xbf16> to vector<80x128xbf16>
    %cst_520 = arith.constant dense<0.000000e+00> : vector<8x128xf32>
    %621 = tpu.matmul %618, %620, %cst_520 {dimension_numbers = #tpu.dot_dimension_numbers<[1], [0], [0], [1], [0, 0, 1, 1], [], []>} : vector<8x80xbf16>, vector<80x128xbf16>, vector<8x128xf32> -> vector<8x128xf32>
    %622 = vector.extract_strided_slice %616 {offsets = [0, 1, 0], sizes = [8, 1, 80], strides = [1, 1, 1]} : vector<8x5x80xbf16> to vector<8x1x80xbf16>
    %623 = vector.shape_cast %622 : vector<8x1x80xbf16> to vector<8x80xbf16>
    %c1_521 = arith.constant 1 : index
    %c0_522 = arith.constant 0 : index
    %c0_523 = arith.constant 0 : index
    %624 = vector.load %arg10[%c1_521, %c0_522, %c0_523] : memref<5x80x128xbf16, #tpu.memory_space<vmem>>, vector<1x80x128xbf16>
    %625 = vector.shape_cast %624 : vector<1x80x128xbf16> to vector<80x128xbf16>
    %cst_524 = arith.constant dense<0.000000e+00> : vector<8x128xf32>
    %626 = tpu.matmul %623, %625, %cst_524 {dimension_numbers = #tpu.dot_dimension_numbers<[1], [0], [0], [1], [0, 0, 1, 1], [], []>} : vector<8x80xbf16>, vector<80x128xbf16>, vector<8x128xf32> -> vector<8x128xf32>
    %627 = vector.extract_strided_slice %616 {offsets = [0, 2, 0], sizes = [8, 1, 80], strides = [1, 1, 1]} : vector<8x5x80xbf16> to vector<8x1x80xbf16>
    %628 = vector.shape_cast %627 : vector<8x1x80xbf16> to vector<8x80xbf16>
    %c2_525 = arith.constant 2 : index
    %c0_526 = arith.constant 0 : index
    %c0_527 = arith.constant 0 : index
    %629 = vector.load %arg10[%c2_525, %c0_526, %c0_527] : memref<5x80x128xbf16, #tpu.memory_space<vmem>>, vector<1x80x128xbf16>
    %630 = vector.shape_cast %629 : vector<1x80x128xbf16> to vector<80x128xbf16>
    %cst_528 = arith.constant dense<0.000000e+00> : vector<8x128xf32>
    %631 = tpu.matmul %628, %630, %cst_528 {dimension_numbers = #tpu.dot_dimension_numbers<[1], [0], [0], [1], [0, 0, 1, 1], [], []>} : vector<8x80xbf16>, vector<80x128xbf16>, vector<8x128xf32> -> vector<8x128xf32>
    %632 = vector.extract_strided_slice %616 {offsets = [0, 3, 0], sizes = [8, 1, 80], strides = [1, 1, 1]} : vector<8x5x80xbf16> to vector<8x1x80xbf16>
    %633 = vector.shape_cast %632 : vector<8x1x80xbf16> to vector<8x80xbf16>
    %c3_529 = arith.constant 3 : index
    %c0_530 = arith.constant 0 : index
    %c0_531 = arith.constant 0 : index
    %634 = vector.load %arg10[%c3_529, %c0_530, %c0_531] : memref<5x80x128xbf16, #tpu.memory_space<vmem>>, vector<1x80x128xbf16>
    %635 = vector.shape_cast %634 : vector<1x80x128xbf16> to vector<80x128xbf16>
    %cst_532 = arith.constant dense<0.000000e+00> : vector<8x128xf32>
    %636 = tpu.matmul %633, %635, %cst_532 {dimension_numbers = #tpu.dot_dimension_numbers<[1], [0], [0], [1], [0, 0, 1, 1], [], []>} : vector<8x80xbf16>, vector<80x128xbf16>, vector<8x128xf32> -> vector<8x128xf32>
    %637 = vector.extract_strided_slice %616 {offsets = [0, 4, 0], sizes = [8, 1, 80], strides = [1, 1, 1]} : vector<8x5x80xbf16> to vector<8x1x80xbf16>
    %638 = vector.shape_cast %637 : vector<8x1x80xbf16> to vector<8x80xbf16>
    %c4_533 = arith.constant 4 : index
    %c0_534 = arith.constant 0 : index
    %c0_535 = arith.constant 0 : index
    %639 = vector.load %arg10[%c4_533, %c0_534, %c0_535] : memref<5x80x128xbf16, #tpu.memory_space<vmem>>, vector<1x80x128xbf16>
    %640 = vector.shape_cast %639 : vector<1x80x128xbf16> to vector<80x128xbf16>
    %cst_536 = arith.constant dense<0.000000e+00> : vector<8x128xf32>
    %641 = tpu.matmul %638, %640, %cst_536 {dimension_numbers = #tpu.dot_dimension_numbers<[1], [0], [0], [1], [0, 0, 1, 1], [], []>} : vector<8x80xbf16>, vector<80x128xbf16>, vector<8x128xf32> -> vector<8x128xf32>
    %642 = arith.addf %621, %626 : vector<8x128xf32>
    %643 = arith.addf %631, %636 : vector<8x128xf32>
    %644 = arith.addf %642, %643 : vector<8x128xf32>
    %645 = arith.addf %644, %641 : vector<8x128xf32>
    %c0_537 = arith.constant 0 : index
    %c0_538 = arith.constant 0 : index
    %646 = vector.load %arg11[%c0_537, %c0_538] : memref<1x128xf32, #tpu.memory_space<vmem>>, vector<1x128xf32>
    %647 = vector.broadcast %646 : vector<1x128xf32> to vector<8x128xf32>
    %648 = arith.addf %645, %647 : vector<8x128xf32>
    %cst_539 = arith.constant 0.000000e+00 : f32
    %649 = vector.broadcast %cst_539 : f32 to vector<8x128xf32>
    %650 = arith.maximumf %648, %649 : vector<8x128xf32>
    %651 = arith.truncf %650 : vector<8x128xf32> to vector<8x128xbf16>
    %c0_540 = arith.constant 0 : index
    %c0_541 = arith.constant 0 : index
    %652 = vector.load %arg12[%c0_540, %c0_541] : memref<128x128xbf16, #tpu.memory_space<vmem>>, vector<128x128xbf16>
    %cst_542 = arith.constant dense<0.000000e+00> : vector<8x128xf32>
    %653 = tpu.matmul %651, %652, %cst_542 {dimension_numbers = #tpu.dot_dimension_numbers<[1], [0], [0], [1], [0, 0, 1, 1], [], []>} : vector<8x128xbf16>, vector<128x128xbf16>, vector<8x128xf32> -> vector<8x128xf32>
    %c0_543 = arith.constant 0 : index
    %c0_544 = arith.constant 0 : index
    %654 = vector.load %arg13[%c0_543, %c0_544] : memref<1x128xf32, #tpu.memory_space<vmem>>, vector<1x128xf32>
    %655 = vector.broadcast %654 : vector<1x128xf32> to vector<8x128xf32>
    %656 = arith.addf %653, %655 : vector<8x128xf32>
    %cst_545 = arith.constant 0.000000e+00 : f32
    %657 = vector.broadcast %cst_545 : f32 to vector<8x128xf32>
    %658 = arith.maximumf %656, %657 : vector<8x128xf32>
    %659 = arith.truncf %658 : vector<8x128xf32> to vector<8x128xbf16>
    %c0_546 = arith.constant 0 : index
    %c0_547 = arith.constant 0 : index
    %660 = vector.load %arg14[%c0_546, %c0_547] : memref<128x128xbf16, #tpu.memory_space<vmem>>, vector<128x128xbf16>
    %cst_548 = arith.constant dense<0.000000e+00> : vector<8x128xf32>
    %661 = tpu.matmul %659, %660, %cst_548 {dimension_numbers = #tpu.dot_dimension_numbers<[1], [0], [0], [1], [0, 0, 1, 1], [], []>} : vector<8x128xbf16>, vector<128x128xbf16>, vector<8x128xf32> -> vector<8x128xf32>
    %c0_549 = arith.constant 0 : index
    %c0_550 = arith.constant 0 : index
    %662 = vector.load %arg15[%c0_549, %c0_550] : memref<1x128xf32, #tpu.memory_space<vmem>>, vector<1x128xf32>
    %663 = vector.broadcast %662 : vector<1x128xf32> to vector<8x128xf32>
    %664 = arith.addf %661, %663 : vector<8x128xf32>
    %c0_551 = arith.constant 0 : index
    %c0_552 = arith.constant 0 : index
    %665 = vector.load %arg16[%c0_551, %c0_552] : memref<8x128xf32, #tpu.memory_space<vmem>>, vector<8x128xf32>
    tpu.vector_store %arg16[%c0_551, %c0_552], %664 {strides = array<i32>} : memref<8x128xf32, #tpu.memory_space<vmem>>, vector<8x128xf32>,
    return
  }
  func.func @transform_0(%arg0: i32) -> (i32, i32, i32) {
    %c0_i32 = arith.constant 0 : i32
    %c0_i32_0 = arith.constant 0 : i32
    %c0_i32_1 = arith.constant 0 : i32
    return %arg0, %c0_i32, %c0_i32_0 : i32, i32, i32
  }
  func.func @transform_1(%arg0: i32) -> (i32, i32) {
    %c0_i32 = arith.constant 0 : i32
    %c0_i32_0 = arith.constant 0 : i32
    %c0_i32_1 = arith.constant 0 : i32
    return %c0_i32, %c0_i32_0 : i32, i32
  }
  func.func @transform_2(%arg0: i32) -> (i32, i32) {
    %c0_i32 = arith.constant 0 : i32
    %c0_i32_0 = arith.constant 0 : i32
    %c0_i32_1 = arith.constant 0 : i32
    return %c0_i32, %c0_i32_0 : i32, i32
  }
  func.func @transform_3(%arg0: i32) -> (i32, i32, i32) {
    %c0_i32 = arith.constant 0 : i32
    %c0_i32_0 = arith.constant 0 : i32
    %c0_i32_1 = arith.constant 0 : i32
    %c0_i32_2 = arith.constant 0 : i32
    return %c0_i32, %c0_i32_0, %c0_i32_1 : i32, i32, i32
  }
  func.func @transform_4(%arg0: i32) -> (i32, i32, i32) {
    %c0_i32 = arith.constant 0 : i32
    %c0_i32_0 = arith.constant 0 : i32
    %c0_i32_1 = arith.constant 0 : i32
    %c0_i32_2 = arith.constant 0 : i32
    return %c0_i32, %c0_i32_0, %c0_i32_1 : i32, i32, i32
  }
  func.func @transform_5(%arg0: i32) -> (i32, i32, i32) {
    %c0_i32 = arith.constant 0 : i32
    %c0_i32_0 = arith.constant 0 : i32
    %c0_i32_1 = arith.constant 0 : i32
    %c0_i32_2 = arith.constant 0 : i32
    return %c0_i32, %c0_i32_0, %c0_i32_1 : i32, i32, i32
  }
  func.func @transform_6(%arg0: i32) -> (i32, i32) {
    %c0_i32 = arith.constant 0 : i32
    %c0_i32_0 = arith.constant 0 : i32
    %c0_i32_1 = arith.constant 0 : i32
    return %c0_i32, %c0_i32_0 : i32, i32
  }
  func.func @transform_7(%arg0: i32) -> (i32, i32, i32) {
    %c0_i32 = arith.constant 0 : i32
    %c0_i32_0 = arith.constant 0 : i32
    %c0_i32_1 = arith.constant 0 : i32
    %c0_i32_2 = arith.constant 0 : i32
    return %c0_i32, %c0_i32_0, %c0_i32_1 : i32, i32, i32
  }
  func.func @transform_8(%arg0: i32) -> (i32, i32, i32) {
    %c0_i32 = arith.constant 0 : i32
    %c0_i32_0 = arith.constant 0 : i32
    %c0_i32_1 = arith.constant 0 : i32
    %c0_i32_2 = arith.constant 0 : i32
    return %c0_i32, %c0_i32_0, %c0_i32_1 : i32, i32, i32
  }
  func.func @transform_9(%arg0: i32) -> (i32, i32, i32) {
    %c0_i32 = arith.constant 0 : i32
    %c0_i32_0 = arith.constant 0 : i32
    %c0_i32_1 = arith.constant 0 : i32
    %c0_i32_2 = arith.constant 0 : i32
    return %c0_i32, %c0_i32_0, %c0_i32_1 : i32, i32, i32
  }
  func.func @transform_10(%arg0: i32) -> (i32, i32) {
    %c0_i32 = arith.constant 0 : i32
    %c0_i32_0 = arith.constant 0 : i32
    %c0_i32_1 = arith.constant 0 : i32
    return %c0_i32, %c0_i32_0 : i32, i32
  }
  func.func @transform_11(%arg0: i32) -> (i32, i32) {
    %c0_i32 = arith.constant 0 : i32
    %c0_i32_0 = arith.constant 0 : i32
    %c0_i32_1 = arith.constant 0 : i32
    return %c0_i32, %c0_i32_0 : i32, i32
  }
  func.func @transform_12(%arg0: i32) -> (i32, i32) {
    %c0_i32 = arith.constant 0 : i32
    %c0_i32_0 = arith.constant 0 : i32
    %c0_i32_1 = arith.constant 0 : i32
    return %c0_i32, %c0_i32_0 : i32, i32
  }
  func.func @transform_13(%arg0: i32) -> (i32, i32) {
    %c0_i32 = arith.constant 0 : i32
    %c0_i32_0 = arith.constant 0 : i32
    %c0_i32_1 = arith.constant 0 : i32
    return %c0_i32, %c0_i32_0 : i32, i32
  }
  func.func @transform_14(%arg0: i32) -> (i32, i32) {
    %c0_i32 = arith.constant 0 : i32
    %c0_i32_0 = arith.constant 0 : i32
    %c0_i32_1 = arith.constant 0 : i32
    return %c0_i32, %c0_i32_0 : i32, i32
  }
  func.func @transform_15(%arg0: i32) -> (i32, i32) {
    %c0_i32 = arith.constant 0 : i32
    %c0_i32_0 = arith.constant 0 : i32
    return %arg0, %c0_i32 : i32, i32
  }
}

</mosaic_0001>

<bundles_post_ra>
// kernel: lenet_forward.1
= control target key start
LH: loop header
LB: loop body
LE: loop exit
PB: predicated region body
PF: predicated region fallthrough
CT: control target
= control target key end

     0   :  { %vm205_vm0 = vcmask 261120   ;;  %v17251_v24 = vmov 0   ;;  %v77_v29 = vlaneseq  ;;  %vm288_vm1 = vcmask 1045504   ;;  %s21452_s1 = inlined_call_operand.vmem [shape: bf16[160,168], index: 1, kind: input, shape index: {}]   ;;  %s21453_s0 = inlined_call_operand.vmem [shape: bf16[8,28,160], index: 0, kind: input, shape index: {}]   ;;  %s21454_s3 = inlined_call_operand.vmem [shape: bf16[2,14,28], index: 3, kind: input, shape index: {}]   ;;  %s21455_s4 = inlined_call_operand.vmem [shape: bf16[2,168,84], index: 4, kind: input, shape index: {}]   ;;  %s21456_s2 = inlined_call_operand.vmem [shape: f32[1,168], index: 2, kind: input, shape index: {}]   ;;  %s21457_s5 = inlined_call_operand.vmem [shape: bf16[5,84,160], index: 5, kind: input, shape index: {}]   ;;  %s21458_s8 = inlined_call_operand.vmem [shape: bf16[2,160,80], index: 8, kind: input, shape index: {}]   ;;  %s21459_s6 = inlined_call_operand.vmem [shape: f32[1,160], index: 6, kind: input, shape index: {}]   ;;  %s21460_s7 = inlined_call_operand.vmem [shape: bf16[2,5,10], index: 7, kind: input, shape index: {}]   ;;  %s21461_s9 = inlined_call_operand.vmem [shape: bf16[5,80,128], index: 9, kind: input, shape index: {}]   ;;  %s21462_s11 = inlined_call_operand.vmem [shape: bf16[128,128], index: 11, kind: input, shape index: {}]   ;;  %s21463_s13 = inlined_call_operand.vmem [shape: bf16[128,128], index: 13, kind: input, shape index: {}]   ;;  %s21464_s10 = inlined_call_operand.vmem [shape: f32[1,128], index: 10, kind: input, shape index: {}]   ;;  %s21465_s12 = inlined_call_operand.vmem [shape: f32[1,128], index: 12, kind: input, shape index: {}]   ;;  %s21466_s14 = inlined_call_operand.vmem [shape: f32[1,128], index: 14, kind: input, shape index: {}]   ;;  %s21467_s15 = inlined_call_operand.vmem [shape: f32[8,128], index: 15, kind: output, shape index: {}]  }
   0x1   :  { %v15882_v0 = vld [vmem:[%s21452_s1 + $0x4] ss:$8 sps:$4 sm:$0xff]   ;;  %v15884_v1 = vld [vmem:[%s21452_s1] ss:$8 sps:$4 sm:$0xff]   ;;  %v15885_v2 = vld [vmem:[%s21452_s1 + $0x14] ss:$8 sps:$4 sm:$0xff]   ;;  %327 = vmatprep.mubr.bf16.mxu1 %v17251_v24 }
   0x2   :  { %212 = vmatprep.subr.bf16.mxu0 %v15882_v0  ;;  %v15887_v3 = vld [vmem:[%s21452_s1 + $0x10] ss:$8 sps:$4 sm:$0xff]   ;;  %v15888_v4 = vld [vmem:[%s21452_s1 + $0x24] ss:$8 sps:$4 sm:$0xff]   ;;  %v15890_v5 = vld [vmem:[%s21452_s1 + $0x20] ss:$8 sps:$4 sm:$0xff]  }
   0x3   :  { %213 = vmatpush1.bf16.msra.mxu0 %v15884_v1  ;;  %v15891_v6 = vld [vmem:[%s21452_s1 + $0x34] ss:$8 sps:$4 sm:$0xff]   ;;  %v15893_v7 = vld [vmem:[%s21452_s1 + $0x30] ss:$8 sps:$4 sm:$0xff]   ;;  %v15894_v8 = vld [vmem:[%s21452_s1 + $0x44] ss:$8 sps:$4 sm:$0xff]  }
   0x4   :  { %214 = vmatprep.subr.bf16.mxu0 %v15885_v2  ;;  %v15914_v9 = vld [vmem:[%s21453_s0 + $0x4] ss:$8 sps:$4 sm:$0xff]   ;;  %v15896_v10 = vld [vmem:[%s21452_s1 + $0x40] ss:$8 sps:$4 sm:$0xff]   ;;  %v15897_v11 = vld [vmem:[%s21452_s1 + $0x54] ss:$8 sps:$4 sm:$0xff]  }
   0x5   :  { %13572 = vmatprep.mubr.msk.bf16.mxu0 %vm205_vm0, %v15914_v9  ;;  %v15899_v12 = vld [vmem:[%s21452_s1 + $0x50] ss:$8 sps:$4 sm:$0xff]   ;;  %v15900_v13 = vld [vmem:[%s21452_s1 + $0x64] ss:$8 sps:$4 sm:$0xff]   ;;  %v15902_v14 = vld [vmem:[%s21452_s1 + $0x60] ss:$8 sps:$4 sm:$0xff]  }
   0x6   :  { %v15903_v15 = vld [vmem:[%s21452_s1 + $0x74] ss:$8 sps:$4 sm:$0xff]   ;;  %v15905_v16 = vld [vmem:[%s21452_s1 + $0x70] ss:$8 sps:$4 sm:$0xff]   ;;  %v15906_v17 = vld [vmem:[%s21452_s1 + $0x84] ss:$8 sps:$4 sm:$0xff]  }
   0x7   :  { %215 = vmatpush1.bf16.msra.mxu0 %v15887_v3  ;;  %v15908_v18 = vld [vmem:[%s21452_s1 + $0x80] ss:$8 sps:$4 sm:$0xff]   ;;  %v15909_v19 = vld [vmem:[%s21452_s1 + $0x94] ss:$8 sps:$4 sm:$0xff]   ;;  %v15911_v20 = vld [vmem:[%s21452_s1 + $0x90] ss:$8 sps:$4 sm:$0xff]  }
   0x8   :  { %216 = vmatprep.subr.bf16.mxu0 %v15888_v4  ;;  %v15912_v21 = vld [vmem:[%s21453_s0] ss:$8 sps:$4 sm:$0xff]   ;;  %v15915_v22 = vld [vmem:[%s21453_s0 + $0x14] ss:$8 sps:$4 sm:$0x3f]   ;;  %v15927_v28 = vld [vmem:[%s21455_s4 + $0x6c] sm:$0xff]  }
   0x9   :  { %v15917_v23 = vld [vmem:[%s21453_s0 + $0x10] ss:$8 sps:$4 sm:$0x3f]   ;;  %v15923_v26 = vld [vmem:[%s21455_s4 + $0x5c] sm:$0xff]   ;;  %v15925_v27 = vld [vmem:[%s21455_s4 + $0x64] sm:$0xff]   ;;  %v78_v31 = vshrl.u32 %v77_v29, 7 }
   0xa   :  { %v15921_v25 = vld [vmem:[%s21455_s4 + $0x54] sm:$0xff]   ;;  %v15931_v32 = vld [vmem:[%s21455_s4 + $0x7c] sm:$0xff]   ;;  %v15933_v35 = vld [vmem:[%s21455_s4 + $0x84] sm:$0xff]   ;;  %vm284_vm2 = vcmask 228352   ;;  %vm486_vm3 = vcmask 1043456   ;;  %vm482_vm4 = vcmask 326656  }
   0xb   :  { %217 = vmatpush1.bf16.msra.mxu0 %v15890_v5  ;;  %v15929_v30 = vld [vmem:[%s21455_s4 + $0x74] sm:$0xff]   ;;  %v17433_v33 = vsub.s32 0, %v78_v31  ;;  %v17435_v34 = vsub.s32 1, %v78_v31  ;;  %v75_v36 = vld [vmem:[%s21456_s2] sm:$0x3]  ;;  %vm752_vm5 = vcmask 1041408  }
   0xc   :  { %218 = vmatprep.subr.bf16.mxu0 %v15891_v6  ;;  %v15918_v3 = vld [vmem:[%s21454_s3] sm:$0x7f]   ;;  %v15919_v5 = vld [vmem:[%s21454_s3 + $0x8] sm:$0x7f]   ;;  %v15926_v9 = vld [vmem:[%s21455_s4 + $0x18] sm:$0xff]   ;;  %vm748_vm6 = vcmask 687104  }
   0xd   :  { %v80_v37 = vrot.slane %v75_v36, %v17433_v33  ;;  %v84_v38 = vrot.slane %v75_v36, %v17435_v34  ;;  %v15920_v6 = vld [vmem:[%s21455_s4] sm:$0xff]   ;;  %vm1306_vm7 = vcmask 1044480   ;;  %vm1302_vm8 = vcmask 80896  }
   0xe   :  { %vm1650_vm9 = vcmask 649216   ;;  %vm1651_vm10 = vsmask.f32 2304  ;;  %vm17253_vm12 = vmmov 0   ;;  %vm12827_vm13 = vcmask 1041409  }
   0xf   :  { %219 = vmatpush1.bf16.msra.mxu0 %v15893_v7  ;;  %v15922_v7 = vld [vmem:[%s21455_s4 + $0x8] sm:$0xff]   ;;  %vm17918_vm11 = vmand %vm1650_vm9, %vm1651_vm10  ;;  %vm12833_vm14 = vcmask 1043459   ;;  %vm12830_vm15 = vcmask 1042434  }
  0x10   :  { %220 = vmatprep.subr.bf16.mxu0 %v15894_v8  ;;  %v15924_v8 = vld [vmem:[%s21455_s4 + $0x10] sm:$0xff]  }
  0x13   :  { %221 = vmatpush1.bf16.msra.mxu0 %v15896_v10  ;;  %v15928_v10 = vld [vmem:[%s21455_s4 + $0x20] sm:$0xff]  }
  0x14   :  { %222 = vmatprep.subr.bf16.mxu0 %v15897_v11  ;;  %v15930_v11 = vld [vmem:[%s21455_s4 + $0x28] sm:$0xff]  }
  0x17   :  { %223 = vmatpush1.bf16.msra.mxu0 %v15899_v12  ;;  %v15932_v12 = vld [vmem:[%s21455_s4 + $0x30] sm:$0xff]  }
  0x18   :  { %224 = vmatprep.subr.bf16.mxu0 %v15900_v13  ;;  %v15934_v13 = vld [vmem:[%s21455_s4 + $0x38] sm:$0xff]  }
  0x1b   :  { %225 = vmatpush1.bf16.msra.mxu0 %v15902_v14  ;;  %v15935_v14 = vld [vmem:[%s21455_s4 + $0x8c] sm:$0xff]  }
  0x1c   :  { %226 = vmatprep.subr.bf16.mxu0 %v15903_v15  ;;  %v15936_v15 = vld [vmem:[%s21455_s4 + $0x40] sm:$0xff]  }
  0x1f   :  { %227 = vmatpush1.bf16.msra.mxu0 %v15905_v16  ;;  %v15937_v16 = vld [vmem:[%s21455_s4 + $0x94] sm:$0xff]  }
  0x20   :  { %228 = vmatprep.subr.bf16.mxu0 %v15906_v17  ;;  %v15938_v17 = vld [vmem:[%s21455_s4 + $0x48] sm:$0xff]  }
  0x23   :  { %229 = vmatpush1.bf16.msra.mxu0 %v15908_v18  ;;  %v15939_v18 = vld [vmem:[%s21455_s4 + $0x9c] sm:$0xff]  }
  0x24   :  { %230 = vmatprep.subr.bf16.mxu0 %v15909_v19  ;;  %v15940_v19 = vld [vmem:[%s21455_s4 + $0x50] ss:$0 sps:$4 sm:$0xff]  }
  0x27   :  { %231 = vmatpush1.bf16.msra.mxu0 %v15911_v20  ;;  %v15941_v20 = vld [vmem:[%s21455_s4 + $0xa4] ss:$0 sps:$4 sm:$0xff]  }
  0x28   :  { %619 = vmatprep.subr.bf16.mxu0 %v17251_v24 }
  0x2a   :  { %245 = vmatmul.mubr.bf16.vlgmr.msra.gmra.mrb[0].mxu0 %v15912_v21  ;;  %v488_v21 = vsel %vm486_vm3, %v15940_v19, 0 }
  0x2b   :  { %13573 = vmatprep.mubr.msk.bf16.mxu0 %vm205_vm0, %v15915_v22  ;;  %620 = vmatpush1.bf16.msra.mxu0 %v15921_v25  ;;  %v617_v22 = vsel %vm486_vm3, %v15941_v20, 0 }
  0x2c   :  { %621 = vmatprep.subr.bf16.mxu0 %v17251_v24 }
  0x2f   :  { %622 = vmatpush1.bf16.msra.mxu0 %v15923_v26 }
  0x30   :  { %623 = vmatprep.subr.bf16.mxu0 %v17251_v24 }
  0x32   :  { %255 = vmatmul.mubr.bf16.gmra.mrb[4].mxu0 %v15917_v23  ;;  %v15944_v23 = vld [vmem:[%s21457_s5 + $0x5c] ss:$8 sps:$4 sm:$0xff]  }
  0x33   :  { %624 = vmatpush1.bf16.msra.mxu0 %v15925_v27 }
  0x34   :  { %625 = vmatprep.subr.bf16.mxu0 %v17251_v24 }
  0x37   :  { %626 = vmatpush1.bf16.msra.mxu0 %v15927_v28 }
  0x38   :  { %627 = vmatprep.subr.bf16.mxu0 %v17251_v24 }
  0x3b   :  { %628 = vmatpush1.bf16.msra.mxu0 %v15929_v30 }
  0x3c   :  { %629 = vmatprep.subr.bf16.mxu0 %v17251_v24 }
  0x3f   :  { %630 = vmatpush1.bf16.msra.mxu0 %v15931_v32 }
  0x40   :  { %631 = vmatprep.subr.bf16.mxu0 %v17251_v24 }
  0x43   :  { %632 = vmatpush1.bf16.msra.mxu0 %v15933_v35 }
  0x44   :  { %633 = vmatprep.subr.bf16.mxu0 %v17251_v24 }
  0x47   :  { %634 = vmatpush1.bf16.msra.mxu0 %v15935_v14  ;;  %v13673_v14 = vld [vmem:[%s21457_s5 + $0x158] sm:$0x33] }
  0x48   :  { %635 = vmatprep.subr.bf16.mxu0 %v17251_v24 }
  0x4b   :  { %636 = vmatpush1.bf16.msra.mxu0 %v15937_v16  ;;  %v13685_v16 = vcombine.high %v13673_v14, %v13673_v14 }
  0x4c   :  { %637 = vmatprep.subr.bf16.mxu0 %v17251_v24 }
  0x4f   :  { %638 = vmatpush1.bf16.msra.mxu0 %v15939_v18 }
  0x50   :  { %639 = vmatprep.subr.bf16.mxu0 %v17251_v24 }
  0x53   :  { %640 = vmatpush1.bf16.msra.mxu0 %v617_v22  ;;  %v15976_v22 = vld [vmem:[%s21457_s5 + $0x160] ss:$8 sps:$4 sm:$0xff]  }
  0xfd   :  { %v246_v39 = vpop.f32.mrb[0].mxu0 }
  0xfe   :  { %v247_v40 = vadd.f32 %v246_v39, %v80_v37  ;;  %v248_v41 = vpop.f32.mrb[1].mxu0  ;;  %v15942_v39 = vld [vmem:[%s21457_s5 + $0x58] ss:$8 sps:$4 sm:$0xff]  }
  0xff   :  { %v249_v42 = vadd.f32 %v248_v41, %v84_v38  ;;  %v250_v43 = vpop.f32.mrb[2].mxu0  ;;  %v15947_v41 = vld [vmem:[%s21457_s5 + $0x6c] ss:$8 sps:$4 sm:$0xff]  }
 0x100   :  { %v251_v44 = vadd.f32 %v250_v43, %v80_v37  ;;  %v252_v45 = vpop.f32.mrb[3].mxu0  ;;  %v265_v47 = vmax.f32 %v247_v40, 0.0  ;;  %v15945_v43 = vld [vmem:[%s21457_s5 + $0x68] ss:$8 sps:$4 sm:$0xff]  }
 0x101   :  { %v253_v46 = vadd.f32 %v252_v45, %v84_v38  ;;  %v266_v49 = vmax.f32 %v249_v42, 0.0  ;;  %v15948_v45 = vld [vmem:[%s21457_s5 + $0x78] ss:$8 sps:$4 sm:$0xff]  }
 0x102   :  { %v267_v48 = vmax.f32 %v251_v44, 0.0  ;;  %v15950_v44 = vld [vmem:[%s21457_s5 + $0x7c] ss:$8 sps:$4 sm:$0xff]  }
 0x103   :  { %v268_v50 = vmax.f32 %v253_v46, 0.0  ;;  %v15953_v46 = vld [vmem:[%s21457_s5 + $0x8c] ss:$8 sps:$4 sm:$0xff]  }
 0x104   :  { %v273_v51 = vpack.c.bf16 %v267_v48, %v265_v47  ;;  %v15951_v47 = vld [vmem:[%s21457_s5 + $0x88] ss:$8 sps:$4 sm:$0xff]   ;;  %v15956_v48 = vld [vmem:[%s21457_s5 + $0x9c] ss:$8 sps:$4 sm:$0xff]  }
 0x105   :  { %v256_v52 = vpop.f32.mrb[4].mxu0  ;;  %v274_v53 = vpack.c.bf16 %v268_v50, %v266_v49  ;;  %v15954_v49 = vld [vmem:[%s21457_s5 + $0x98] ss:$8 sps:$4 sm:$0xff]   ;;  %v13637_v50 = vld [vmem:[%s21457_s5 + $0xa8] sm:$0x33] }
 0x106   :  { %v257_v54 = vadd.f32 %v256_v52, %v80_v37  ;;  %v258_v55 = vpop.f32.mrb[5].mxu0  ;;  %v13648_v52 = vcombine.low %v13637_v50, %v13637_v50 }
 0x107   :  { %v259_v56 = vadd.f32 %v258_v55, %v84_v38  ;;  %v260_v57 = vpop.f32.mrb[6].mxu0  ;;  %295 = vmatprep.subr.bf16.mxu1 %v274_v53 }
 0x108   :  { %v261_v58 = vadd.f32 %v260_v57, %v80_v37  ;;  %v262_v59 = vpop.f32.mrb[7].mxu0  ;;  %296 = vmatpush1.bf16.msra.mxu1 %v273_v51  ;;  %v269_v61 = vmax.f32 %v257_v54, 0.0  ;;  %v754_v54 = vsel %vm752_vm5, %v13648_v52, 0 }
 0x109   :  { %v263_v60 = vadd.f32 %v262_v59, %v84_v38  ;;  %v270_v63 = vmax.f32 %v259_v56, 0.0 }
 0x10a   :  { %v271_v62 = vmax.f32 %v261_v58, 0.0 }
 0x10b   :  { %v272_v0 = vmax.f32 %v263_v60, 0.0 }
 0x10c   :  { %v275_v1 = vpack.c.bf16 %v271_v62, %v269_v61 }
 0x10d   :  { %v276_v2 = vpack.c.bf16 %v272_v0, %v270_v63 }
 0x10e   :  { %v290_v4 = vsel %vm288_vm1, %v275_v1, 0 }
 0x10f   :  { %13575 = vmatprep.subr.msk.bf16.mxu1 %vm288_vm1, %v276_v2 }
 0x110   :  { %298 = vmatpush1.bf16.msra.mxu1 %v290_v4 }
 0x111   :  { %349 = vmatprep.subr.bf16.mxu1 %v274_v53  ;;  %v15961_v53 = vld [vmem:[%s21457_s5 + $0x10c] ss:$8 sps:$4 sm:$0xff]  }
 0x113   :  { %13576 = vmatmul.mubr.msk.bf16.vlgmr.msra.gmra.mrb[0].mxu1 %vm284_vm2, %v15918_v3 }
 0x114   :  { %350 = vmatpush1.bf16.msra.mxu1 %v273_v51  ;;  %381 = vmatprep.mubr.bf16.mxu1 %v17251_v24  ;;  %v13649_v51 = vcombine.high %v13637_v50, %v13637_v50  ;;  %v16005_v50 = vld [vmem:[%s21457_s5 + $0x40] ss:$8 sps:$4 sm:$0xff]  }
 0x115   :  { %13580 = vmatprep.subr.msk.bf16.mxu1 %vm288_vm1, %v276_v2 }
 0x118   :  { %352 = vmatpush1.bf16.msra.mxu1 %v290_v4 }
 0x119   :  { %490 = vmatprep.subr.bf16.mxu1 %v17251_v24 }
 0x11b   :  { %13581 = vmatmul.mubr.msk.bf16.vlgmr.msra.gmra.mrb[4].mxu1 %vm284_vm2, %v15919_v5  ;;  %v15959_v5 = vld [vmem:[%s21457_s5 + $0x108] ss:$8 sps:$4 sm:$0xff]  }
 0x11c   :  { %491 = vmatpush1.bf16.msra.mxu1 %v15920_v6 }
 0x11d   :  { %492 = vmatprep.subr.bf16.mxu1 %v17251_v24 }
 0x120   :  { %493 = vmatpush1.bf16.msra.mxu1 %v15922_v7  ;;  %v15964_v7 = vld [vmem:[%s21457_s5 + $0x11c] ss:$8 sps:$4 sm:$0xff]  }
 0x121   :  { %494 = vmatprep.subr.bf16.mxu1 %v17251_v24 }
 0x124   :  { %495 = vmatpush1.bf16.msra.mxu1 %v15924_v8  ;;  %v15962_v8 = vld [vmem:[%s21457_s5 + $0x118] ss:$8 sps:$4 sm:$0xff]  }
 0x125   :  { %496 = vmatprep.subr.bf16.mxu1 %v17251_v24 }
 0x128   :  { %497 = vmatpush1.bf16.msra.mxu1 %v15926_v9  ;;  %v15967_v9 = vld [vmem:[%s21457_s5 + $0x12c] ss:$8 sps:$4 sm:$0xff]  }
 0x129   :  { %498 = vmatprep.subr.bf16.mxu1 %v17251_v24 }
 0x12c   :  { %499 = vmatpush1.bf16.msra.mxu1 %v15928_v10  ;;  %v15965_v10 = vld [vmem:[%s21457_s5 + $0x128] ss:$8 sps:$4 sm:$0xff]  }
 0x12d   :  { %500 = vmatprep.subr.bf16.mxu1 %v17251_v24 }
 0x130   :  { %501 = vmatpush1.bf16.msra.mxu1 %v15930_v11  ;;  %v15970_v11 = vld [vmem:[%s21457_s5 + $0x13c] ss:$8 sps:$4 sm:$0xff]  }
 0x131   :  { %502 = vmatprep.subr.bf16.mxu1 %v17251_v24 }
 0x134   :  { %503 = vmatpush1.bf16.msra.mxu1 %v15932_v12  ;;  %v15968_v12 = vld [vmem:[%s21457_s5 + $0x138] ss:$8 sps:$4 sm:$0xff]  }
 0x135   :  { %504 = vmatprep.subr.bf16.mxu1 %v17251_v24 }
 0x138   :  { %505 = vmatpush1.bf16.msra.mxu1 %v15934_v13  ;;  %v15973_v13 = vld [vmem:[%s21457_s5 + $0x14c] ss:$8 sps:$4 sm:$0xff]  }
 0x139   :  { %506 = vmatprep.subr.bf16.mxu1 %v17251_v24 }
 0x13c   :  { %507 = vmatpush1.bf16.msra.mxu1 %v15936_v15  ;;  %v15971_v15 = vld [vmem:[%s21457_s5 + $0x148] ss:$8 sps:$4 sm:$0xff]  }
 0x13d   :  { %508 = vmatprep.subr.bf16.mxu1 %v17251_v24 }
 0x140   :  { %509 = vmatpush1.bf16.msra.mxu1 %v15938_v17  ;;  %v13684_v17 = vcombine.low %v13673_v14, %v13673_v14 }
 0x141   :  { %510 = vmatprep.subr.bf16.mxu1 %v17251_v24 }
 0x142   :  { %v888_v18 = vsel %vm752_vm5, %v13684_v17, 0 }
 0x144   :  { %511 = vmatpush1.bf16.msra.mxu1 %v488_v21  ;;  %v15978_v21 = vld [vmem:[%s21457_s5 + $0x164] ss:$8 sps:$4 sm:$0xff]  }
 0x145   :  { %759 = vmatprep.subr.bf16.mxu1 %v15944_v23 }
 0x1e6   :  { %v329_v25 = vpop.f32.mrb[0].mxu1 }
 0x1e7   :  { %v331_v26 = vpop.f32.mrb[1].mxu1 }
 0x1e8   :  { %v333_v27 = vpop.f32.mrb[2].mxu1 }
 0x1e9   :  { %v335_v28 = vpop.f32.mrb[3].mxu1 }
 0x1ee   :  { %v383_v29 = vpop.f32.mrb[4].mxu1 }
 0x1ef   :  { %v392_v30 = vmax.f32 %v329_v25, %v383_v29  ;;  %v385_v31 = vpop.f32.mrb[5].mxu1  ;;  %v15981_v25 = vld [vmem:[%s21457_s5 + $0x174] ss:$8 sps:$4 sm:$0xff]  }
 0x1f0   :  { %v393_v32 = vmax.f32 %v331_v26, %v385_v31  ;;  %v387_v35 = vpop.f32.mrb[6].mxu1  ;;  %v15979_v26 = vld [vmem:[%s21457_s5 + $0x170] ss:$8 sps:$4 sm:$0xff]   ;;  %v15987_v29 = vld [vmem:[%s21457_s5 + $0x194] ss:$8 sps:$4 sm:$0xff]  }
 0x1f1   :  { %v394_v36 = vmax.f32 %v333_v27, %v387_v35  ;;  %v389_v37 = vpop.f32.mrb[7].mxu1  ;;  %v15984_v27 = vld [vmem:[%s21457_s5 + $0x184] ss:$8 sps:$4 sm:$0xff]   ;;  %v15988_v35 = vld [vmem:[%s21457_s5 + $0x1a0] ss:$8 sps:$4 sm:$0xff]  }
 0x1f2   :  { %v395_v38 = vmax.f32 %v335_v28, %v389_v37  ;;  %v15982_v28 = vld [vmem:[%s21457_s5 + $0x180] ss:$8 sps:$4 sm:$0xff]   ;;  %v15990_v31 = vld [vmem:[%s21457_s5 + $0x1a4] ss:$8 sps:$4 sm:$0xff]  }
 0x1f3   :  { %v396_v40 = vpack.c.bf16 %v394_v36, %v392_v30  ;;  %v15985_v30 = vld [vmem:[%s21457_s5 + $0x190] ss:$8 sps:$4 sm:$0xff]  }
 0x1f4   :  { %v397_v42 = vpack.c.bf16 %v395_v38, %v393_v32  ;;  %v13698_v32 = vld [vmem:[%s21457_s5 + $0x1b0] sm:$0x33] }
 0x1f5   :  { %v13710_v36 = vcombine.high %v13698_v32, %v13698_v32  ;;  %v13709_v37 = vcombine.low %v13698_v32, %v13698_v32  ;;  %v16033_v32 = vld [vmem:[%s21458_s8 + $0x30] sm:$0xff]  }
 0x1f6   :  { %13593 = vmatprep.mubr.msk.bf16.mxu1 %vm482_vm4, %v397_v42  ;;  %13626 = vmatprep.mubr.msk.bf16.mxu0 %vm482_vm4, %v397_v42  ;;  %v15998_v42 = vld [vmem:[%s21457_s5 + $0x14] ss:$8 sps:$4 sm:$0xff]  }
 0x1f7   :  { %523 = vmatmul.mubr.bf16.vlgmr.msra.gmra.mrb[8].mxu1 %v396_v40  ;;  %652 = vmatmul.mubr.bf16.vlgmr.msra.gmra.mrb[8].mxu0 %v396_v40  ;;  %v1009_v38 = vsel %vm752_vm5, %v13709_v37, 0  ;;  %v15993_v40 = vld [vmem:[%s21457_s5] ss:$8 sps:$4 sm:$0xff]  }
 0x1f8   :  { %760 = vmatpush1.bf16.msra.mxu1 %v15942_v39  ;;  %791 = vmatprep.mubr.bf16.mxu1 %v17251_v24  ;;  %v15995_v39 = vld [vmem:[%s21457_s5 + $0x4] ss:$8 sps:$4 sm:$0xff]  }
 0x1f9   :  { %761 = vmatprep.subr.bf16.mxu1 %v15947_v41  ;;  %1391 = vmatprep.mubr.bf16.mxu0 %v17251_v24  ;;  %v16036_v37 = vld [vmem:[%s21458_s8 + $0x48] sm:$0xff]  }
 0x1fc   :  { %762 = vmatpush1.bf16.msra.mxu1 %v15945_v43  ;;  %v15996_v43 = vld [vmem:[%s21457_s5 + $0x10] ss:$8 sps:$4 sm:$0xff]  }
 0x1fd   :  { %763 = vmatprep.subr.bf16.mxu1 %v15950_v44  ;;  %v16001_v44 = vld [vmem:[%s21457_s5 + $0x24] ss:$8 sps:$4 sm:$0xff]  }
 0x200   :  { %764 = vmatpush1.bf16.msra.mxu1 %v15948_v45  ;;  %v15999_v45 = vld [vmem:[%s21457_s5 + $0x20] ss:$8 sps:$4 sm:$0xff]  }
 0x201   :  { %765 = vmatprep.subr.bf16.mxu1 %v15953_v46  ;;  %v16004_v46 = vld [vmem:[%s21457_s5 + $0x34] ss:$8 sps:$4 sm:$0xff]  }
 0x204   :  { %766 = vmatpush1.bf16.msra.mxu1 %v15951_v47  ;;  %v16002_v47 = vld [vmem:[%s21457_s5 + $0x30] ss:$8 sps:$4 sm:$0xff]  }
 0x205   :  { %767 = vmatprep.subr.bf16.mxu1 %v15956_v48  ;;  %v16007_v48 = vld [vmem:[%s21457_s5 + $0x44] ss:$8 sps:$4 sm:$0xff]  }
 0x208   :  { %768 = vmatpush1.bf16.msra.mxu1 %v15954_v49  ;;  %v673_v49 = vld [vmem:[%s21457_s5 + $0x50] sm:$0x33] }
 0x209   :  { %13650 = vmatprep.subr.msk.bf16.mxu1 %vm752_vm5, %v13649_v51  ;;  %v13724_v51 = vcombine.high %v673_v49, %v673_v49  ;;  %v13723_v52 = vcombine.low %v673_v49, %v673_v49  ;;  %v16037_v49 = vld [vmem:[%s21458_s8 + $0x50] sm:$0xff]  }
 0x20c   :  { %770 = vmatpush1.bf16.msra.mxu1 %v754_v54  ;;  %v16012_v54 = vld [vmem:[%s21457_s5 + $0xb4] ss:$8 sps:$4 sm:$0xff]  }
 0x20d   :  { %893 = vmatprep.subr.bf16.mxu1 %v15961_v53  ;;  %v1115_v53 = vsel %vm752_vm5, %v13723_v52, 0  ;;  %v16039_v52 = vld [vmem:[%s21458_s8 + $0x60] sm:$0xff]  }
 0x2ca   :  { %v524_v55 = vpop.f32.mrb[8].mxu1  ;;  %v653_v56 = vpop.f32.mrb[8].mxu0 }
 0x2cb   :  { %v660_v57 = vmax.f32 %v524_v55, %v653_v56  ;;  %v526_v58 = vpop.f32.mrb[9].mxu1  ;;  %v655_v59 = vpop.f32.mrb[9].mxu0  ;;  %v16010_v55 = vld [vmem:[%s21457_s5 + $0xb0] ss:$8 sps:$4 sm:$0xff]   ;;  %v16015_v56 = vld [vmem:[%s21457_s5 + $0xc4] ss:$8 sps:$4 sm:$0xff]  }
 0x2cc   :  { %v527_v60 = vpop.f32.mrb[10].mxu1  ;;  %v656_v61 = vpop.f32.mrb[10].mxu0  ;;  %v16018_v58 = vld [vmem:[%s21457_s5 + $0xd4] ss:$8 sps:$4 sm:$0xff]   ;;  %v16016_v59 = vld [vmem:[%s21457_s5 + $0xd0] ss:$8 sps:$4 sm:$0xff]  }
 0x2cd   :  { %v661_v62 = vmax.f32 %v527_v60, %v656_v61  ;;  %v529_v63 = vpop.f32.mrb[11].mxu1  ;;  %v658_v0 = vpop.f32.mrb[11].mxu0  ;;  %v16021_v60 = vld [vmem:[%s21457_s5 + $0xe4] ss:$8 sps:$4 sm:$0xff]   ;;  %v16019_v61 = vld [vmem:[%s21457_s5 + $0xe0] ss:$8 sps:$4 sm:$0xff]  }
 0x2ce   :  { %v13662_v63 = vld [vmem:[%s21457_s5 + $0x100] sm:$0x33]  ;;  %v16022_v0 = vld [vmem:[%s21457_s5 + $0xf0] ss:$8 sps:$4 sm:$0xff]  }
 0x2cf   :  { %v17562_v1 = vpack.c.bf16 %v661_v62, %v660_v57  ;;  %v16013_v57 = vld [vmem:[%s21457_s5 + $0xc0] ss:$8 sps:$4 sm:$0xff]   ;;  %v16024_v62 = vld [vmem:[%s21457_s5 + $0xf4] ss:$8 sps:$4 sm:$0xff]  }
 0x2d1   :  { %v689_v2 = vshll.u32 %v17562_v1, 16  ;;  %v687_v3 = vshrl.u32 %v17562_v1, 16  ;;  %v949_v41 = vrot.slane %v17562_v1, 2 }
 0x2d3   :  { %v691_v4 = vrot.slane %v689_v2, 1  ;;  %v826_v19 = vrot.slane %v687_v3, 1  ;;  %v827_v20 = vrot.slane %v689_v2, 2  ;;  %v13738_v2 = vcombine.high %v13662_v63, %v13662_v63 }
 0x2d5   :  { %v692_v6 = vor.u32 %v691_v4, %v687_v3  ;;  %v828_v23 = vor.u32 %v827_v20, %v826_v19  ;;  %v13737_v3 = vcombine.low %v13662_v63, %v13662_v63  ;;  %v16052_v63 = vld [vmem:[%s21452_s1 + $0x14] ss:$8 sps:$4 sm:$0xff]  }
 0x2d7   :  { %13651 = vmatmul.mubr.msk.bf16.vlgmr.msra.gmra.mrb[12].mxu1 %vm748_vm6, %v692_v6  ;;  %v1223_v4 = vsel %vm752_vm5, %v13737_v3, 0  ;;  %v1279_v6 = vld [vmem:[%s21459_s6] sm:$0x3] }
 0x2d8   :  { %894 = vmatpush1.bf16.msra.mxu1 %v15959_v5  ;;  %925 = vmatprep.mubr.bf16.mxu1 %v17251_v24  ;;  %v1163_v5 = vrot.slane %v17562_v1, 1  ;;  %v16053_v3 = vld [vmem:[%s21452_s1 + $0x20] ss:$8 sps:$4 sm:$0xff]  }
 0x2d9   :  { %895 = vmatprep.subr.bf16.mxu1 %v15964_v7  ;;  %v1284_v7 = vrot.slane %v1279_v6, %v17433_v33 }
 0x2dc   :  { %896 = vmatpush1.bf16.msra.mxu1 %v15962_v8  ;;  %v1288_v8 = vrot.slane %v1279_v6, %v17435_v34  ;;  %v16061_v6 = vld [vmem:[%s21452_s1 + $0x44] ss:$8 sps:$4 sm:$0xff]  }
 0x2dd   :  { %897 = vmatprep.subr.bf16.mxu1 %v15967_v9 }
 0x2e0   :  { %898 = vmatpush1.bf16.msra.mxu1 %v15965_v10 }
 0x2e1   :  { %899 = vmatprep.subr.bf16.mxu1 %v15970_v11 }
 0x2e4   :  { %900 = vmatpush1.bf16.msra.mxu1 %v15968_v12 }
 0x2e5   :  { %901 = vmatprep.subr.bf16.mxu1 %v15973_v13 }
 0x2e8   :  { %902 = vmatpush1.bf16.msra.mxu1 %v15971_v15 }
 0x2e9   :  { %13686 = vmatprep.subr.msk.bf16.mxu1 %vm752_vm5, %v13685_v16 }
 0x2ec   :  { %904 = vmatpush1.bf16.msra.mxu1 %v888_v18 }
 0x2ed   :  { %1014 = vmatprep.subr.bf16.mxu1 %v15978_v21 }
 0x2ef   :  { %13687 = vmatmul.mubr.msk.bf16.vlgmr.msra.gmra.mrb[12].mxu1 %vm748_vm6, %v828_v23  ;;  %v1301_v23 = vld [vmem:[%s21460_s7] sm:$0x7] }
 0x2f0   :  { %1015 = vmatpush1.bf16.msra.mxu1 %v15976_v22  ;;  %1046 = vmatprep.mubr.bf16.mxu1 %v17251_v24 }
 0x2f1   :  { %1016 = vmatprep.subr.bf16.mxu1 %v15981_v25  ;;  %v13743_v25 = vld [vmem:[%s21460_s7 + $0x4] sm:$0x7] }
 0x2f4   :  { %1017 = vmatpush1.bf16.msra.mxu1 %v15979_v26  ;;  %v16027_v26 = vld [vmem:[%s21458_s8] sm:$0xff]  }
 0x2f5   :  { %1018 = vmatprep.subr.bf16.mxu1 %v15984_v27  ;;  %v16028_v27 = vld [vmem:[%s21458_s8 + $0x8] sm:$0xff]  }
 0x2f8   :  { %1019 = vmatpush1.bf16.msra.mxu1 %v15982_v28  ;;  %v16029_v28 = vld [vmem:[%s21458_s8 + $0x10] sm:$0xff]  }
 0x2f9   :  { %1020 = vmatprep.subr.bf16.mxu1 %v15987_v29  ;;  %v16030_v29 = vld [vmem:[%s21458_s8 + $0x18] sm:$0xff]  }
 0x2fc   :  { %1021 = vmatpush1.bf16.msra.mxu1 %v15985_v30  ;;  %v16031_v30 = vld [vmem:[%s21458_s8 + $0x20] sm:$0xff]  }
 0x2fd   :  { %1022 = vmatprep.subr.bf16.mxu1 %v15990_v31  ;;  %v16032_v31 = vld [vmem:[%s21458_s8 + $0x28] sm:$0xff]  }
 0x300   :  { %1023 = vmatpush1.bf16.msra.mxu1 %v15988_v35  ;;  %v16034_v35 = vld [vmem:[%s21458_s8 + $0x38] sm:$0xff]  }
 0x301   :  { %13711 = vmatprep.subr.msk.bf16.mxu1 %vm752_vm5, %v13710_v36  ;;  %v16035_v36 = vld [vmem:[%s21458_s8 + $0x40] sm:$0xff]  }
 0x304   :  { %1025 = vmatpush1.bf16.msra.mxu1 %v1009_v38 }
 0x305   :  { %1120 = vmatprep.subr.bf16.mxu1 %v15995_v39 }
 0x307   :  { %13712 = vmatmul.mubr.msk.bf16.vlgmr.msra.gmra.mrb[12].mxu1 %vm748_vm6, %v949_v41 }
 0x308   :  { %1121 = vmatpush1.bf16.msra.mxu1 %v15993_v40  ;;  %1152 = vmatprep.mubr.bf16.mxu1 %v17251_v24 }
 0x309   :  { %1122 = vmatprep.subr.bf16.mxu1 %v15998_v42 }
 0x30c   :  { %1123 = vmatpush1.bf16.msra.mxu1 %v15996_v43 }
 0x30d   :  { %1124 = vmatprep.subr.bf16.mxu1 %v16001_v44 }
 0x310   :  { %1125 = vmatpush1.bf16.msra.mxu1 %v15999_v45 }
 0x311   :  { %1126 = vmatprep.subr.bf16.mxu1 %v16004_v46 }
 0x314   :  { %1127 = vmatpush1.bf16.msra.mxu1 %v16002_v47 }
 0x315   :  { %1128 = vmatprep.subr.bf16.mxu1 %v16007_v48 }
 0x318   :  { %1129 = vmatpush1.bf16.msra.mxu1 %v16005_v50 }
 0x319   :  { %13725 = vmatprep.subr.msk.bf16.mxu1 %vm752_vm5, %v13724_v51  ;;  %v16038_v51 = vld [vmem:[%s21458_s8 + $0x58] sm:$0xff]  }
 0x31c   :  { %1131 = vmatpush1.bf16.msra.mxu1 %v1115_v53  ;;  %v16040_v53 = vld [vmem:[%s21458_s8 + $0x68] sm:$0xff]  }
 0x31d   :  { %1228 = vmatprep.subr.bf16.mxu1 %v16012_v54  ;;  %v16041_v54 = vld [vmem:[%s21458_s8 + $0x70] sm:$0xff]  }
 0x31f   :  { %13726 = vmatmul.mubr.msk.bf16.vlgmr.msra.gmra.mrb[12].mxu1 %vm748_vm6, %v17562_v1 }
 0x320   :  { %1229 = vmatpush1.bf16.msra.mxu1 %v16010_v55  ;;  %1260 = vmatprep.mubr.bf16.mxu1 %v17251_v24  ;;  %v16042_v55 = vld [vmem:[%s21458_s8 + $0x78] sm:$0xff]  }
 0x321   :  { %1230 = vmatprep.subr.bf16.mxu1 %v16015_v56  ;;  %v16043_v56 = vld [vmem:[%s21458_s8 + $0x80] sm:$0xff]  }
 0x324   :  { %1231 = vmatpush1.bf16.msra.mxu1 %v16013_v57  ;;  %v16044_v57 = vld [vmem:[%s21458_s8 + $0x88] sm:$0xff]  }
 0x325   :  { %1232 = vmatprep.subr.bf16.mxu1 %v16018_v58  ;;  %v16045_v58 = vld [vmem:[%s21458_s8 + $0x90] sm:$0xff]  }
 0x328   :  { %1233 = vmatpush1.bf16.msra.mxu1 %v16016_v59  ;;  %v16046_v59 = vld [vmem:[%s21458_s8 + $0x98] sm:$0xff]  }
 0x329   :  { %1234 = vmatprep.subr.bf16.mxu1 %v16021_v60  ;;  %v16049_v60 = vld [vmem:[%s21452_s1 + $0x4] ss:$8 sps:$4 sm:$0xff]  }
 0x32c   :  { %1235 = vmatpush1.bf16.msra.mxu1 %v16019_v61  ;;  %v16047_v61 = vld [vmem:[%s21452_s1] ss:$8 sps:$4 sm:$0xff]  }
 0x32d   :  { %1236 = vmatprep.subr.bf16.mxu1 %v16024_v62  ;;  %v16077_v62 = vld [vmem:[%s21453_s0 + $0x24] ss:$8 sps:$4 sm:$0xff]  }
 0x330   :  { %1237 = vmatpush1.bf16.msra.mxu1 %v16022_v0  ;;  %v16050_v0 = vld [vmem:[%s21452_s1 + $0x10] ss:$8 sps:$4 sm:$0xff]  }
 0x331   :  { %13739 = vmatprep.subr.msk.bf16.mxu1 %vm752_vm5, %v13738_v2  ;;  %v16055_v2 = vld [vmem:[%s21452_s1 + $0x24] ss:$8 sps:$4 sm:$0xff]  }
 0x334   :  { %1239 = vmatpush1.bf16.msra.mxu1 %v1223_v4  ;;  %v16058_v4 = vld [vmem:[%s21452_s1 + $0x34] ss:$8 sps:$4 sm:$0xff]  }
 0x337   :  { %13740 = vmatmul.mubr.msk.bf16.vlgmr.msra.gmra.mrb[12].mxu1 %vm748_vm6, %v1163_v5  ;;  %v16056_v5 = vld [vmem:[%s21452_s1 + $0x30] ss:$8 sps:$4 sm:$0xff]  }
 0x338   :  { %1345 = vmatprep.mubr.bf16.mxu1 %v17251_v24 }
 0x40a   :  { %v1262_v9 = vpop.f32.mrb[12].mxu1 }
 0x40b   :  { %v1291_v10 = vadd.f32 %v1284_v7, %v1262_v9  ;;  %v1264_v11 = vpop.f32.mrb[13].mxu1  ;;  %v16062_v9 = vld [vmem:[%s21452_s1 + $0x50] ss:$8 sps:$4 sm:$0xff]  }
 0x40c   :  { %v1292_v12 = vadd.f32 %v1288_v8, %v1264_v11  ;;  %v1266_v13 = vpop.f32.mrb[14].mxu1  ;;  %v16065_v11 = vld [vmem:[%s21452_s1 + $0x60] ss:$8 sps:$4 sm:$0xff]  }
 0x40d   :  { %v1293_v14 = vadd.f32 %v1284_v7, %v1266_v13  ;;  %v1268_v15 = vpop.f32.mrb[15].mxu1  ;;  %v1295_v16 = vmax.f32 %v1291_v10, 0.0  ;;  %v16059_v7 = vld [vmem:[%s21452_s1 + $0x40] ss:$8 sps:$4 sm:$0xff]   ;;  %v16067_v10 = vld [vmem:[%s21452_s1 + $0x64] ss:$8 sps:$4 sm:$0xff]  }
 0x40e   :  { %v1294_v1 = vadd.f32 %v1288_v8, %v1268_v15  ;;  %v1296_v18 = vmax.f32 %v1292_v12, 0.0  ;;  %v16064_v8 = vld [vmem:[%s21452_s1 + $0x54] ss:$8 sps:$4 sm:$0xff]   ;;  %v16068_v13 = vld [vmem:[%s21452_s1 + $0x70] ss:$8 sps:$4 sm:$0xff]  }
 0x40f   :  { %v1297_v17 = vmax.f32 %v1293_v14, 0.0  ;;  %v16070_v12 = vld [vmem:[%s21452_s1 + $0x74] ss:$8 sps:$4 sm:$0xff]   ;;  %v16073_v14 = vld [vmem:[%s21452_s1 + $0x84] ss:$8 sps:$4 sm:$0xff]  }
 0x410   :  { %v1298_v19 = vmax.f32 %v1294_v1, 0.0  ;;  %v16071_v15 = vld [vmem:[%s21452_s1 + $0x80] ss:$8 sps:$4 sm:$0xff]   ;;  %v16076_v1 = vld [vmem:[%s21452_s1 + $0x94] ss:$8 sps:$4 sm:$0xff]  }
 0x411   :  { %v1299_v20 = vpack.c.bf16 %v1297_v17, %v1295_v16  ;;  %v16074_v16 = vld [vmem:[%s21452_s1 + $0x90] ss:$8 sps:$4 sm:$0xff]   ;;  %v16079_v17 = vld [vmem:[%s21453_s0 + $0x20] ss:$8 sps:$4 sm:$0xff]  }
 0x412   :  { %v1300_v21 = vpack.c.bf16 %v1298_v19, %v1296_v18  ;;  %v16080_v18 = vld [vmem:[%s21453_s0 + $0x34] ss:$8 sps:$4 sm:$0x3f]   ;;  %v16082_v19 = vld [vmem:[%s21453_s0 + $0x30] ss:$8 sps:$4 sm:$0x3f]  }
 0x413   :  { %v1308_v22 = vsel %vm1306_vm7, %v1299_v20, 0  ;;  %v16087_v20 = vld [vmem:[%s21455_s4 + $0x54] sm:$0xff]  }
 0x414   :  { %13741 = vmatprep.subr.msk.bf16.mxu1 %vm1306_vm7, %v1300_v21  ;;  %13744 = vmatprep.subr.msk.bf16.mxu0 %vm1306_vm7, %v1300_v21  ;;  %v16089_v21 = vld [vmem:[%s21455_s4 + $0x5c] sm:$0xff]  }
 0x415   :  { %1314 = vmatpush1.bf16.msra.mxu1 %v1308_v22  ;;  %1360 = vmatpush1.bf16.msra.mxu0 %v1308_v22  ;;  %v16091_v22 = vld [vmem:[%s21455_s4 + $0x64] sm:$0xff]  }
 0x416   :  { %1487 = vmatprep.subr.bf16.mxu0 %v17251_v24 }
 0x418   :  { %13742 = vmatmul.mubr.msk.bf16.vlgmr.msra.gmra.mrb[16].mxu1 %vm1302_vm8, %v1301_v23  ;;  %13745 = vmatmul.mubr.msk.bf16.vlgmr.msra.gmra.mrb[12].mxu0 %vm1302_vm8, %v13743_v25  ;;  %v16093_v23 = vld [vmem:[%s21455_s4 + $0x6c] sm:$0xff]   ;;  %v16095_v25 = vld [vmem:[%s21455_s4 + $0x74] sm:$0xff]  }
 0x419   :  { %1488 = vmatpush1.bf16.msra.mxu0 %v16027_v26  ;;  %1930 = vmatprep.mubr.bf16.mxu1 %v17251_v24 }
 0x41a   :  { %1489 = vmatprep.subr.bf16.mxu0 %v17251_v24 }
 0x41d   :  { %1490 = vmatpush1.bf16.msra.mxu0 %v16028_v27 }
 0x41e   :  { %1491 = vmatprep.subr.bf16.mxu0 %v17251_v24 }
 0x421   :  { %1492 = vmatpush1.bf16.msra.mxu0 %v16029_v28 }
 0x422   :  { %1493 = vmatprep.subr.bf16.mxu0 %v17251_v24 }
 0x425   :  { %1494 = vmatpush1.bf16.msra.mxu0 %v16030_v29 }
 0x426   :  { %1495 = vmatprep.subr.bf16.mxu0 %v17251_v24 }
 0x429   :  { %1496 = vmatpush1.bf16.msra.mxu0 %v16031_v30  ;;  %v16097_v30 = vld [vmem:[%s21455_s4 + $0x7c] sm:$0xff]  }
 0x42a   :  { %1497 = vmatprep.subr.bf16.mxu0 %v17251_v24 }
 0x42d   :  { %1498 = vmatpush1.bf16.msra.mxu0 %v16032_v31  ;;  %v16099_v31 = vld [vmem:[%s21455_s4 + $0x84] sm:$0xff]  }
 0x42e   :  { %1499 = vmatprep.subr.bf16.mxu0 %v17251_v24 }
 0x431   :  { %1500 = vmatpush1.bf16.msra.mxu0 %v16033_v32 }
 0x432   :  { %1501 = vmatprep.subr.bf16.mxu0 %v17251_v24 }
 0x435   :  { %1502 = vmatpush1.bf16.msra.mxu0 %v16034_v35 }
 0x436   :  { %1503 = vmatprep.subr.bf16.mxu0 %v17251_v24 }
 0x439   :  { %1504 = vmatpush1.bf16.msra.mxu0 %v16035_v36 }
 0x43a   :  { %1505 = vmatprep.subr.bf16.mxu0 %v17251_v24 }
 0x43d   :  { %1506 = vmatpush1.bf16.msra.mxu0 %v16036_v37 }
 0x43e   :  { %1608 = vmatprep.subr.bf16.mxu0 %v17251_v24 }
 0x4eb   :  { %v1347_v38 = vpop.f32.mrb[16].mxu1  ;;  %v1393_v39 = vpop.f32.mrb[12].mxu0 }
 0x4ec   :  { %v1400_v40 = vmax.f32 %v1347_v38, %v1393_v39  ;;  %v1349_v41 = vpop.f32.mrb[17].mxu1  ;;  %v1395_v42 = vpop.f32.mrb[13].mxu0  ;;  %v1653_v38 = vld [vmem:[#allocation2] sm:$0x7] }
 0x4ed   :  { %v1401_v43 = vmax.f32 %v1349_v41, %v1395_v42  ;;  %v1351_v44 = vpop.f32.mrb[18].mxu1  ;;  %v1397_v45 = vpop.f32.mrb[14].mxu0 }
 0x4ee   :  { %v1352_v46 = vpop.f32.mrb[19].mxu1  ;;  %v1398_v47 = vpop.f32.mrb[15].mxu0  ;;  %v1402_v50 = vpack.c.bf16 %v1400_v40, %v1400_v40 }
 0x4ef   :  { %v1403_v48 = vpack.c.bf16 %v1401_v43, %v1401_v43  ;;  %v1681_v43 = vld [vmem:[%s21456_s2] sm:$0x3] }
 0x4f0   :  { %v1686_v44 = vrot.slane %v1681_v43, %v17433_v33  ;;  %v1690_v45 = vrot.slane %v1681_v43, %v17435_v34 }
 0x4f1   :  { %13756 = vmatprep.mubr.msk.bf16.mxu0 %vm205_vm0, %v1403_v48 }
 0x4f2   :  { %1520 = vmatmul.mubr.bf16.vlgmr.msra.gmra.mrb[16].mxu0 %v1402_v50 }
 0x4f3   :  { %1609 = vmatpush1.bf16.msra.mxu0 %v16037_v49  ;;  %13787 = vmatprep.mubr.msk.bf16.mxu0 %vm205_vm0, %v1403_v48 }
 0x4f4   :  { %1610 = vmatprep.subr.bf16.mxu0 %v17251_v24 }
 0x4f7   :  { %1611 = vmatpush1.bf16.msra.mxu0 %v16038_v51 }
 0x4f8   :  { %1612 = vmatprep.subr.bf16.mxu0 %v17251_v24 }
 0x4fb   :  { %1613 = vmatpush1.bf16.msra.mxu0 %v16039_v52 }
 0x4fc   :  { %1614 = vmatprep.subr.bf16.mxu0 %v17251_v24 }
 0x4ff   :  { %1615 = vmatpush1.bf16.msra.mxu0 %v16040_v53 }
 0x500   :  { %1616 = vmatprep.subr.bf16.mxu0 %v17251_v24 }
 0x503   :  { %1617 = vmatpush1.bf16.msra.mxu0 %v16041_v54 }
 0x504   :  { %1618 = vmatprep.subr.bf16.mxu0 %v17251_v24 }
 0x507   :  { %1619 = vmatpush1.bf16.msra.mxu0 %v16042_v55 }
 0x508   :  { %1620 = vmatprep.subr.bf16.mxu0 %v17251_v24 }
 0x50b   :  { %1621 = vmatpush1.bf16.msra.mxu0 %v16043_v56 }
 0x50c   :  { %1622 = vmatprep.subr.bf16.mxu0 %v17251_v24 }
 0x50f   :  { %1623 = vmatpush1.bf16.msra.mxu0 %v16044_v57 }
 0x510   :  { %1624 = vmatprep.subr.bf16.mxu0 %v17251_v24 }
 0x513   :  { %1625 = vmatpush1.bf16.msra.mxu0 %v16045_v58 }
 0x514   :  { %1626 = vmatprep.subr.bf16.mxu0 %v17251_v24 }
 0x517   :  { %1627 = vmatpush1.bf16.msra.mxu0 %v16046_v59 }
 0x518   :  { %1817 = vmatprep.subr.bf16.mxu0 %v16049_v60 }
 0x51a   :  { %1641 = vmatmul.mubr.bf16.vlgmr.msra.gmra.mrb[20].mxu0 %v1402_v50 }
 0x51b   :  { %1818 = vmatpush1.bf16.msra.mxu0 %v16047_v61  ;;  %13816 = vmatprep.mubr.msk.bf16.mxu0 %vm205_vm0, %v16077_v62 }
 0x51c   :  { %1819 = vmatprep.subr.bf16.mxu0 %v16052_v63 }
 0x51f   :  { %1820 = vmatpush1.bf16.msra.mxu0 %v16050_v0 }
 0x520   :  { %1821 = vmatprep.subr.bf16.mxu0 %v16055_v2 }
 0x523   :  { %1822 = vmatpush1.bf16.msra.mxu0 %v16053_v3 }
 0x524   :  { %1823 = vmatprep.subr.bf16.mxu0 %v16058_v4 }
 0x527   :  { %1824 = vmatpush1.bf16.msra.mxu0 %v16056_v5 }
 0x528   :  { %1825 = vmatprep.subr.bf16.mxu0 %v16061_v6 }
 0x52b   :  { %1826 = vmatpush1.bf16.msra.mxu0 %v16059_v7 }
 0x52c   :  { %1827 = vmatprep.subr.bf16.mxu0 %v16064_v8 }
 0x52f   :  { %1828 = vmatpush1.bf16.msra.mxu0 %v16062_v9 }
 0x530   :  { %1829 = vmatprep.subr.bf16.mxu0 %v16067_v10 }
 0x533   :  { %1830 = vmatpush1.bf16.msra.mxu0 %v16065_v11 }
 0x534   :  { %1831 = vmatprep.subr.bf16.mxu0 %v16070_v12  ;;  %v16084_v12 = vld [vmem:[%s21454_s3] sm:$0x7f]  }
 0x537   :  { %1832 = vmatpush1.bf16.msra.mxu0 %v16068_v13  ;;  %v16085_v13 = vld [vmem:[%s21454_s3 + $0x8] sm:$0x7f]  }
 0x538   :  { %1833 = vmatprep.subr.bf16.mxu0 %v16073_v14  ;;  %v16086_v14 = vld [vmem:[%s21455_s4] sm:$0xff]  }
 0x53b   :  { %1834 = vmatpush1.bf16.msra.mxu0 %v16071_v15  ;;  %v16088_v15 = vld [vmem:[%s21455_s4 + $0x8] sm:$0xff]  }
 0x53c   :  { %1835 = vmatprep.subr.bf16.mxu0 %v16076_v1  ;;  %v16090_v1 = vld [vmem:[%s21455_s4 + $0x10] sm:$0xff]  }
 0x53f   :  { %1836 = vmatpush1.bf16.msra.mxu0 %v16074_v16  ;;  %v16092_v16 = vld [vmem:[%s21455_s4 + $0x18] sm:$0xff]  }
 0x540   :  { %2218 = vmatprep.subr.bf16.mxu0 %v17251_v24 }
 0x542   :  { %1850 = vmatmul.mubr.bf16.vlgmr.msra.gmra.mrb[24].mxu0 %v16079_v17  ;;  %v16094_v17 = vld [vmem:[%s21455_s4 + $0x20] sm:$0xff]  }
 0x543   :  { %13817 = vmatprep.mubr.msk.bf16.mxu0 %vm205_vm0, %v16080_v18  ;;  %2219 = vmatpush1.bf16.msra.mxu0 %v16087_v20  ;;  %v16096_v18 = vld [vmem:[%s21455_s4 + $0x28] sm:$0xff]   ;;  %v16100_v20 = vld [vmem:[%s21455_s4 + $0x38] sm:$0xff]  }
 0x544   :  { %2220 = vmatprep.subr.bf16.mxu0 %v17251_v24 }
 0x547   :  { %2221 = vmatpush1.bf16.msra.mxu0 %v16089_v21  ;;  %v16101_v21 = vld [vmem:[%s21455_s4 + $0x8c] sm:$0xff]  }
 0x548   :  { %2222 = vmatprep.subr.bf16.mxu0 %v17251_v24 }
 0x54a   :  { %1860 = vmatmul.mubr.bf16.gmra.mrb[28].mxu0 %v16082_v19  ;;  %v16098_v19 = vld [vmem:[%s21455_s4 + $0x30] sm:$0xff]  }
 0x54b   :  { %2223 = vmatpush1.bf16.msra.mxu0 %v16091_v22  ;;  %v16102_v22 = vld [vmem:[%s21455_s4 + $0x40] sm:$0xff]  }
 0x54c   :  { %2224 = vmatprep.subr.bf16.mxu0 %v17251_v24 }
 0x54f   :  { %2225 = vmatpush1.bf16.msra.mxu0 %v16093_v23  ;;  %v16103_v23 = vld [vmem:[%s21455_s4 + $0x94] sm:$0xff]  }
 0x550   :  { %2226 = vmatprep.subr.bf16.mxu0 %v17251_v24 }
 0x553   :  { %2227 = vmatpush1.bf16.msra.mxu0 %v16095_v25  ;;  %v16104_v25 = vld [vmem:[%s21455_s4 + $0x48] sm:$0xff]  }
 0x554   :  { %2228 = vmatprep.subr.bf16.mxu0 %v17251_v24 }
 0x557   :  { %2229 = vmatpush1.bf16.msra.mxu0 %v16097_v30 }
 0x558   :  { %2230 = vmatprep.subr.bf16.mxu0 %v17251_v24 }
 0x55b   :  { %2231 = vmatpush1.bf16.msra.mxu0 %v16099_v31  ;;  %v16110_v31 = vld [vmem:[%s21457_s5 + $0x5c] ss:$8 sps:$4 sm:$0xff]  }
 0x55c   :  { %2232 = vmatprep.subr.bf16.mxu0 %v17251_v24 }
 0x55f   :  { %2233 = vmatpush1.bf16.msra.mxu0 %v16101_v21  ;;  %v16139_v21 = vld [vmem:[%s21457_s5 + $0x14c] ss:$8 sps:$4 sm:$0xff]  }
 0x560   :  { %2234 = vmatprep.subr.bf16.mxu0 %v17251_v24 }
 0x563   :  { %2235 = vmatpush1.bf16.msra.mxu0 %v16103_v23  ;;  %v16137_v23 = vld [vmem:[%s21457_s5 + $0x148] ss:$8 sps:$4 sm:$0xff]  }
 0x564   :  { %2236 = vmatprep.subr.bf16.mxu0 %v17251_v24 }
 0x5c5   :  { %v1521_v26 = vpop.f32.mrb[16].mxu0 }
 0x5c6   :  { %v1523_v27 = vpop.f32.mrb[17].mxu0 }
 0x5c7   :  { %v1524_v28 = vpop.f32.mrb[18].mxu0  ;;  %v16106_v27 = vld [vmem:[%s21455_s4 + $0x50] ss:$0 sps:$4 sm:$0xff]  }
 0x5c8   :  { %v1525_v29 = vpop.f32.mrb[19].mxu0  ;;  %v16107_v28 = vld [vmem:[%s21455_s4 + $0xa4] ss:$0 sps:$4 sm:$0xff]  }
 0x5c9   :  { %v2088_v29 = vsel %vm486_vm3, %v16106_v27, 0  ;;  %v2216_v30 = vsel %vm486_vm3, %v16107_v28, 0 }
 0x5ed   :  { %v1642_v32 = vpop.f32.mrb[20].mxu0 }
 0x5ee   :  { %v1648_v35 = vmax.f32 %v1521_v26, %v1642_v32  ;;  %v1644_v36 = vpop.f32.mrb[21].mxu0  ;;  %v16105_v26 = vld [vmem:[%s21455_s4 + $0x9c] sm:$0xff]  }
 0x5ef   :  { %v1645_v39 = vpop.f32.mrb[22].mxu0  ;;  %2237 = vmatpush1.bf16.msra.mxu0 %v16105_v26 }
 0x5f0   :  { %v1649_v40 = vpack.c.bf16 %v1648_v35, %v1648_v35  ;;  %v1646_v41 = vpop.f32.mrb[23].mxu0  ;;  %2238 = vmatprep.subr.bf16.mxu0 %v17251_v24 }
 0x5f2   :  { %v1654_v42 = vsel %vm17918_vm11, %v1649_v40, %v1653_v38 }
 0x5f3   :  { %1655 = vst [vmem:[#allocation2] sm:$0x7] %v1654_v42  ;;  %2239 = vmatpush1.bf16.msra.mxu0 %v2216_v30  ;;  %v16144_v30 = vld [vmem:[%s21457_s5 + $0x164] ss:$8 sps:$4 sm:$0xff]  }
 0x615   :  { %v1851_v46 = vpop.f32.mrb[24].mxu0 }
 0x616   :  { %v1852_v47 = vadd.f32 %v1851_v46, %v1686_v44  ;;  %v1853_v48 = vpop.f32.mrb[25].mxu0 }
 0x617   :  { %v1854_v49 = vadd.f32 %v1853_v48, %v1690_v45  ;;  %v1855_v50 = vpop.f32.mrb[26].mxu0 }
 0x618   :  { %v1856_v51 = vadd.f32 %v1855_v50, %v1686_v44  ;;  %v1857_v52 = vpop.f32.mrb[27].mxu0  ;;  %v1870_v54 = vmax.f32 %v1852_v47, 0.0  ;;  %v16113_v50 = vld [vmem:[%s21457_s5 + $0x6c] ss:$8 sps:$4 sm:$0xff]  }
 0x619   :  { %v1858_v53 = vadd.f32 %v1857_v52, %v1690_v45  ;;  %v1871_v56 = vmax.f32 %v1854_v49, 0.0  ;;  %v16108_v49 = vld [vmem:[%s21457_s5 + $0x58] ss:$8 sps:$4 sm:$0xff]   ;;  %v16116_v52 = vld [vmem:[%s21457_s5 + $0x7c] ss:$8 sps:$4 sm:$0xff]  }
 0x61a   :  { %v1872_v55 = vmax.f32 %v1856_v51, 0.0  ;;  %v16111_v51 = vld [vmem:[%s21457_s5 + $0x68] ss:$8 sps:$4 sm:$0xff]  }
 0x61b   :  { %v1873_v57 = vmax.f32 %v1858_v53, 0.0  ;;  %v16114_v53 = vld [vmem:[%s21457_s5 + $0x78] ss:$8 sps:$4 sm:$0xff]  }
 0x61c   :  { %v1878_v58 = vpack.c.bf16 %v1872_v55, %v1870_v54  ;;  %v16119_v54 = vld [vmem:[%s21457_s5 + $0x8c] ss:$8 sps:$4 sm:$0xff]   ;;  %v16117_v55 = vld [vmem:[%s21457_s5 + $0x88] ss:$8 sps:$4 sm:$0xff]  }
 0x61d   :  { %v1879_v59 = vpack.c.bf16 %v1873_v57, %v1871_v56  ;;  %v1861_v60 = vpop.f32.mrb[28].mxu0  ;;  %v16122_v56 = vld [vmem:[%s21457_s5 + $0x9c] ss:$8 sps:$4 sm:$0xff]   ;;  %v16120_v57 = vld [vmem:[%s21457_s5 + $0x98] ss:$8 sps:$4 sm:$0xff]  }
 0x61e   :  { %v1862_v61 = vadd.f32 %v1861_v60, %v1686_v44  ;;  %v1863_v62 = vpop.f32.mrb[29].mxu0 }
 0x61f   :  { %v1864_v63 = vadd.f32 %v1863_v62, %v1690_v45  ;;  %v1865_v0 = vpop.f32.mrb[30].mxu0  ;;  %1898 = vmatprep.subr.bf16.mxu1 %v1879_v59 }
 0x620   :  { %v1866_v2 = vadd.f32 %v1865_v0, %v1686_v44  ;;  %v1867_v3 = vpop.f32.mrb[31].mxu0  ;;  %1899 = vmatpush1.bf16.msra.mxu1 %v1878_v58  ;;  %v1874_v5 = vmax.f32 %v1862_v61, 0.0  ;;  %v16127_v61 = vld [vmem:[%s21457_s5 + $0x10c] ss:$8 sps:$4 sm:$0xff]  }
 0x621   :  { %v1868_v4 = vadd.f32 %v1867_v3, %v1690_v45  ;;  %v1875_v7 = vmax.f32 %v1864_v63, 0.0 }
 0x622   :  { %v1876_v6 = vmax.f32 %v1866_v2, 0.0 }
 0x623   :  { %v1877_v8 = vmax.f32 %v1868_v4, 0.0 }
 0x624   :  { %v1880_v9 = vpack.c.bf16 %v1876_v6, %v1874_v5 }
 0x625   :  { %v1881_v10 = vpack.c.bf16 %v1877_v8, %v1875_v7 }
 0x626   :  { %v1893_v11 = vsel %vm288_vm1, %v1880_v9, 0 }
 0x627   :  { %13819 = vmatprep.subr.msk.bf16.mxu1 %vm288_vm1, %v1881_v10 }
 0x628   :  { %1901 = vmatpush1.bf16.msra.mxu1 %v1893_v11 }
 0x629   :  { %1951 = vmatprep.subr.bf16.mxu1 %v1879_v59 }
 0x62b   :  { %13820 = vmatmul.mubr.msk.bf16.vlgmr.msra.gmra.mrb[20].mxu1 %vm284_vm2, %v16084_v12 }
 0x62c   :  { %1952 = vmatpush1.bf16.msra.mxu1 %v1878_v58  ;;  %1983 = vmatprep.mubr.bf16.mxu1 %v17251_v24  ;;  %v13881_v58 = vld [vmem:[%s21457_s5 + $0xa8] sm:$0x33] }
 0x62d   :  { %13824 = vmatprep.subr.msk.bf16.mxu1 %vm288_vm1, %v1881_v10  ;;  %v13893_v59 = vcombine.high %v13881_v58, %v13881_v58  ;;  %v13892_v60 = vcombine.low %v13881_v58, %v13881_v58  ;;  %v2272_v58 = vld [vmem:[%s21457_s5 + $0x50] sm:$0x33] }
 0x62f   :  { %v2350_v62 = vsel %vm752_vm5, %v13892_v60, 0  ;;  %v13968_v60 = vcombine.high %v2272_v58, %v2272_v58 }
 0x630   :  { %1954 = vmatpush1.bf16.msra.mxu1 %v1893_v11 }
 0x631   :  { %2090 = vmatprep.subr.bf16.mxu1 %v17251_v24 }
 0x633   :  { %13825 = vmatmul.mubr.msk.bf16.vlgmr.msra.gmra.mrb[24].mxu1 %vm284_vm2, %v16085_v13 }
 0x634   :  { %2091 = vmatpush1.bf16.msra.mxu1 %v16086_v14  ;;  %v16125_v14 = vld [vmem:[%s21457_s5 + $0x108] ss:$8 sps:$4 sm:$0xff]  }
 0x635   :  { %2092 = vmatprep.subr.bf16.mxu1 %v17251_v24 }
 0x638   :  { %2093 = vmatpush1.bf16.msra.mxu1 %v16088_v15 }
 0x639   :  { %2094 = vmatprep.subr.bf16.mxu1 %v17251_v24 }
 0x63c   :  { %2095 = vmatpush1.bf16.msra.mxu1 %v16090_v1  ;;  %v16130_v1 = vld [vmem:[%s21457_s5 + $0x11c] ss:$8 sps:$4 sm:$0xff]  }
 0x63d   :  { %2096 = vmatprep.subr.bf16.mxu1 %v17251_v24 }
 0x640   :  { %2097 = vmatpush1.bf16.msra.mxu1 %v16092_v16  ;;  %v16128_v16 = vld [vmem:[%s21457_s5 + $0x118] ss:$8 sps:$4 sm:$0xff]  }
 0x641   :  { %2098 = vmatprep.subr.bf16.mxu1 %v17251_v24 }
 0x644   :  { %2099 = vmatpush1.bf16.msra.mxu1 %v16094_v17  ;;  %v16133_v17 = vld [vmem:[%s21457_s5 + $0x12c] ss:$8 sps:$4 sm:$0xff]  }
 0x645   :  { %2100 = vmatprep.subr.bf16.mxu1 %v17251_v24 }
 0x648   :  { %2101 = vmatpush1.bf16.msra.mxu1 %v16096_v18  ;;  %v16131_v18 = vld [vmem:[%s21457_s5 + $0x128] ss:$8 sps:$4 sm:$0xff]  }
 0x649   :  { %2102 = vmatprep.subr.bf16.mxu1 %v17251_v24 }
 0x64c   :  { %2103 = vmatpush1.bf16.msra.mxu1 %v16098_v19  ;;  %v16136_v19 = vld [vmem:[%s21457_s5 + $0x13c] ss:$8 sps:$4 sm:$0xff]  }
 0x64d   :  { %2104 = vmatprep.subr.bf16.mxu1 %v17251_v24 }
 0x650   :  { %2105 = vmatpush1.bf16.msra.mxu1 %v16100_v20  ;;  %v16134_v20 = vld [vmem:[%s21457_s5 + $0x138] ss:$8 sps:$4 sm:$0xff]  }
 0x651   :  { %2106 = vmatprep.subr.bf16.mxu1 %v17251_v24 }
 0x654   :  { %2107 = vmatpush1.bf16.msra.mxu1 %v16102_v22  ;;  %v13917_v22 = vld [vmem:[%s21457_s5 + $0x158] sm:$0x33] }
 0x655   :  { %2108 = vmatprep.subr.bf16.mxu1 %v17251_v24  ;;  %v13928_v26 = vcombine.low %v13917_v22, %v13917_v22 }
 0x657   :  { %v2482_v27 = vsel %vm752_vm5, %v13928_v26, 0 }
 0x658   :  { %2109 = vmatpush1.bf16.msra.mxu1 %v16104_v25  ;;  %v13929_v25 = vcombine.high %v13917_v22, %v13917_v22 }
 0x659   :  { %2110 = vmatprep.subr.bf16.mxu1 %v17251_v24 }
 0x65c   :  { %2111 = vmatpush1.bf16.msra.mxu1 %v2088_v29 }
 0x65d   :  { %2355 = vmatprep.subr.bf16.mxu1 %v16110_v31  ;;  %v16142_v31 = vld [vmem:[%s21457_s5 + $0x160] ss:$8 sps:$4 sm:$0xff]  }
 0x6fe   :  { %v1932_v32 = vpop.f32.mrb[20].mxu1 }
 0x6ff   :  { %v1934_v35 = vpop.f32.mrb[21].mxu1 }
 0x700   :  { %v1936_v36 = vpop.f32.mrb[22].mxu1 }
 0x701   :  { %v1938_v38 = vpop.f32.mrb[23].mxu1 }
 0x706   :  { %v1985_v39 = vpop.f32.mrb[24].mxu1 }
 0x707   :  { %v1994_v40 = vmax.f32 %v1932_v32, %v1985_v39  ;;  %v1987_v41 = vpop.f32.mrb[25].mxu1  ;;  %v16148_v39 = vld [vmem:[%s21457_s5 + $0x180] ss:$8 sps:$4 sm:$0xff]  }
 0x708   :  { %v1995_v42 = vmax.f32 %v1934_v35, %v1987_v41  ;;  %v1989_v43 = vpop.f32.mrb[26].mxu1  ;;  %v16147_v35 = vld [vmem:[%s21457_s5 + $0x174] ss:$8 sps:$4 sm:$0xff]   ;;  %v16151_v41 = vld [vmem:[%s21457_s5 + $0x190] ss:$8 sps:$4 sm:$0xff]  }
 0x709   :  { %v1996_v44 = vmax.f32 %v1936_v36, %v1989_v43  ;;  %v1991_v45 = vpop.f32.mrb[27].mxu1  ;;  %v16145_v36 = vld [vmem:[%s21457_s5 + $0x170] ss:$8 sps:$4 sm:$0xff]  }
 0x70a   :  { %v1997_v46 = vmax.f32 %v1938_v38, %v1991_v45  ;;  %v16150_v38 = vld [vmem:[%s21457_s5 + $0x184] ss:$8 sps:$4 sm:$0xff]   ;;  %v13942_v43 = vld [vmem:[%s21457_s5 + $0x1b0] sm:$0x33] }
 0x70b   :  { %v1998_v47 = vpack.c.bf16 %v1996_v44, %v1994_v40  ;;  %v16153_v40 = vld [vmem:[%s21457_s5 + $0x194] ss:$8 sps:$4 sm:$0xff]   ;;  %v16154_v44 = vld [vmem:[%s21457_s5 + $0x1a0] ss:$8 sps:$4 sm:$0xff]   ;;  %v13954_v45 = vcombine.high %v13942_v43, %v13942_v43 }
 0x70c   :  { %v1999_v48 = vpack.c.bf16 %v1997_v46, %v1995_v42  ;;  %v16156_v42 = vld [vmem:[%s21457_s5 + $0x1a4] ss:$8 sps:$4 sm:$0xff]   ;;  %v13953_v46 = vcombine.low %v13942_v43, %v13942_v43 }
 0x70d   :  { %v16198_v43 = vld [vmem:[%s21458_s8 + $0x28] sm:$0xff]  }
 0x70e   :  { %13837 = vmatprep.mubr.msk.bf16.mxu1 %vm482_vm4, %v1999_v48  ;;  %13870 = vmatprep.mubr.msk.bf16.mxu0 %vm482_vm4, %v1999_v48  ;;  %v16161_v48 = vld [vmem:[%s21457_s5 + $0x4] ss:$8 sps:$4 sm:$0xff]  }
 0x70f   :  { %2123 = vmatmul.mubr.bf16.vlgmr.msra.gmra.mrb[28].mxu1 %v1998_v47  ;;  %2251 = vmatmul.mubr.bf16.vlgmr.msra.gmra.mrb[32].mxu0 %v1998_v47  ;;  %v2602_v47 = vsel %vm752_vm5, %v13953_v46, 0  ;;  %v16201_v46 = vld [vmem:[%s21458_s8 + $0x40] sm:$0xff]  }
 0x710   :  { %2356 = vmatpush1.bf16.msra.mxu1 %v16108_v49  ;;  %2387 = vmatprep.mubr.bf16.mxu1 %v17251_v24  ;;  %v16159_v49 = vld [vmem:[%s21457_s5] ss:$8 sps:$4 sm:$0xff]  }
 0x711   :  { %2357 = vmatprep.subr.bf16.mxu1 %v16113_v50  ;;  %2936 = vmatprep.mubr.bf16.mxu0 %v17251_v24 }
 0x714   :  { %2358 = vmatpush1.bf16.msra.mxu1 %v16111_v51  ;;  %v16164_v51 = vld [vmem:[%s21457_s5 + $0x14] ss:$8 sps:$4 sm:$0xff]  }
 0x715   :  { %2359 = vmatprep.subr.bf16.mxu1 %v16116_v52  ;;  %v16162_v52 = vld [vmem:[%s21457_s5 + $0x10] ss:$8 sps:$4 sm:$0xff]  }
 0x718   :  { %2360 = vmatpush1.bf16.msra.mxu1 %v16114_v53  ;;  %v16167_v53 = vld [vmem:[%s21457_s5 + $0x24] ss:$8 sps:$4 sm:$0xff]  }
 0x719   :  { %2361 = vmatprep.subr.bf16.mxu1 %v16119_v54  ;;  %v16165_v54 = vld [vmem:[%s21457_s5 + $0x20] ss:$8 sps:$4 sm:$0xff]  }
 0x71c   :  { %2362 = vmatpush1.bf16.msra.mxu1 %v16117_v55  ;;  %v16170_v55 = vld [vmem:[%s21457_s5 + $0x34] ss:$8 sps:$4 sm:$0xff]  }
 0x71d   :  { %2363 = vmatprep.subr.bf16.mxu1 %v16122_v56  ;;  %v16168_v56 = vld [vmem:[%s21457_s5 + $0x30] ss:$8 sps:$4 sm:$0xff]  }
 0x720   :  { %2364 = vmatpush1.bf16.msra.mxu1 %v16120_v57  ;;  %v16173_v57 = vld [vmem:[%s21457_s5 + $0x44] ss:$8 sps:$4 sm:$0xff]  }
 0x721   :  { %13894 = vmatprep.subr.msk.bf16.mxu1 %vm752_vm5, %v13893_v59  ;;  %v16171_v59 = vld [vmem:[%s21457_s5 + $0x40] ss:$8 sps:$4 sm:$0xff]  }
 0x724   :  { %2366 = vmatpush1.bf16.msra.mxu1 %v2350_v62 }
 0x725   :  { %2487 = vmatprep.subr.bf16.mxu1 %v16127_v61  ;;  %v13967_v61 = vcombine.low %v2272_v58, %v2272_v58 }
 0x727   :  { %v2708_v62 = vsel %vm752_vm5, %v13967_v61, 0  ;;  %v16204_v61 = vld [vmem:[%s21458_s8 + $0x58] sm:$0xff]  }
 0x7e2   :  { %v2124_v63 = vpop.f32.mrb[28].mxu1  ;;  %v2252_v0 = vpop.f32.mrb[32].mxu0 }
 0x7e3   :  { %v2259_v2 = vmax.f32 %v2124_v63, %v2252_v0  ;;  %v2126_v3 = vpop.f32.mrb[29].mxu1  ;;  %v2254_v4 = vpop.f32.mrb[33].mxu0  ;;  %v16178_v63 = vld [vmem:[%s21457_s5 + $0xb4] ss:$8 sps:$4 sm:$0xff]   ;;  %v16176_v0 = vld [vmem:[%s21457_s5 + $0xb0] ss:$8 sps:$4 sm:$0xff]  }
 0x7e4   :  { %v2127_v5 = vpop.f32.mrb[30].mxu1  ;;  %v2255_v6 = vpop.f32.mrb[34].mxu0  ;;  %v16179_v3 = vld [vmem:[%s21457_s5 + $0xc0] ss:$8 sps:$4 sm:$0xff]   ;;  %v16184_v4 = vld [vmem:[%s21457_s5 + $0xd4] ss:$8 sps:$4 sm:$0xff]  }
 0x7e5   :  { %v2260_v7 = vmax.f32 %v2127_v5, %v2255_v6  ;;  %v2129_v8 = vpop.f32.mrb[31].mxu1  ;;  %v2257_v9 = vpop.f32.mrb[35].mxu0  ;;  %v16182_v5 = vld [vmem:[%s21457_s5 + $0xd0] ss:$8 sps:$4 sm:$0xff]   ;;  %v16187_v6 = vld [vmem:[%s21457_s5 + $0xe4] ss:$8 sps:$4 sm:$0xff]  }
 0x7e6   :  { %v16190_v8 = vld [vmem:[%s21457_s5 + $0xf4] ss:$8 sps:$4 sm:$0xff]   ;;  %v13906_v9 = vld [vmem:[%s21457_s5 + $0x100] sm:$0x33] }
 0x7e7   :  { %v18044_v10 = vpack.c.bf16 %v2260_v7, %v2259_v2  ;;  %v16181_v2 = vld [vmem:[%s21457_s5 + $0xc4] ss:$8 sps:$4 sm:$0xff]   ;;  %v16185_v7 = vld [vmem:[%s21457_s5 + $0xe0] ss:$8 sps:$4 sm:$0xff]  }
 0x7e9   :  { %v2287_v11 = vshll.u32 %v18044_v10, 16  ;;  %v2285_v12 = vshrl.u32 %v18044_v10, 16  ;;  %v2542_v50 = vrot.slane %v18044_v10, 2 }
 0x7eb   :  { %v2289_v13 = vrot.slane %v2287_v11, 1  ;;  %v2420_v28 = vrot.slane %v2285_v12, 1  ;;  %v2421_v29 = vrot.slane %v2287_v11, 2  ;;  %v16188_v11 = vld [vmem:[%s21457_s5 + $0xf0] ss:$8 sps:$4 sm:$0xff]  }
 0x7ed   :  { %v2290_v15 = vor.u32 %v2289_v13, %v2285_v12  ;;  %v2422_v32 = vor.u32 %v2421_v29, %v2420_v28  ;;  %v13982_v12 = vcombine.high %v13906_v9, %v13906_v9  ;;  %v13981_v13 = vcombine.low %v13906_v9, %v13906_v9  ;;  %v16243_v9 = vld [vmem:[%s21453_s0 + $0x44] ss:$8 sps:$4 sm:$0xff]  }
 0x7ef   :  { %13895 = vmatmul.mubr.msk.bf16.vlgmr.msra.gmra.mrb[32].mxu1 %vm748_vm6, %v2290_v15  ;;  %v2756_v15 = vrot.slane %v18044_v10, 1 }
 0x7f0   :  { %2488 = vmatpush1.bf16.msra.mxu1 %v16125_v14  ;;  %2519 = vmatprep.mubr.bf16.mxu1 %v17251_v24  ;;  %v2816_v14 = vsel %vm752_vm5, %v13981_v13, 0  ;;  %v16221_v13 = vld [vmem:[%s21452_s1 + $0x24] ss:$8 sps:$4 sm:$0xff]  }
 0x7f1   :  { %2489 = vmatprep.subr.bf16.mxu1 %v16130_v1  ;;  %v2872_v1 = vld [vmem:[%s21459_s6] sm:$0x3] }
 0x7f4   :  { %2490 = vmatpush1.bf16.msra.mxu1 %v16128_v16  ;;  %v2877_v16 = vrot.slane %v2872_v1, %v17433_v33 }
 0x7f5   :  { %2491 = vmatprep.subr.bf16.mxu1 %v16133_v17  ;;  %v2881_v17 = vrot.slane %v2872_v1, %v17435_v34  ;;  %v16222_v1 = vld [vmem:[%s21452_s1 + $0x30] ss:$8 sps:$4 sm:$0xff]  }
 0x7f8   :  { %2492 = vmatpush1.bf16.msra.mxu1 %v16131_v18 }
 0x7f9   :  { %2493 = vmatprep.subr.bf16.mxu1 %v16136_v19 }
 0x7fc   :  { %2494 = vmatpush1.bf16.msra.mxu1 %v16134_v20 }
 0x7fd   :  { %2495 = vmatprep.subr.bf16.mxu1 %v16139_v21 }
 0x800   :  { %2496 = vmatpush1.bf16.msra.mxu1 %v16137_v23 }
 0x801   :  { %13930 = vmatprep.subr.msk.bf16.mxu1 %vm752_vm5, %v13929_v25 }
 0x804   :  { %2498 = vmatpush1.bf16.msra.mxu1 %v2482_v27 }
 0x805   :  { %2607 = vmatprep.subr.bf16.mxu1 %v16144_v30 }
 0x807   :  { %13931 = vmatmul.mubr.msk.bf16.vlgmr.msra.gmra.mrb[32].mxu1 %vm748_vm6, %v2422_v32 }
 0x808   :  { %2608 = vmatpush1.bf16.msra.mxu1 %v16142_v31  ;;  %2639 = vmatprep.mubr.bf16.mxu1 %v17251_v24 }
 0x809   :  { %2609 = vmatprep.subr.bf16.mxu1 %v16147_v35  ;;  %v2894_v35 = vld [vmem:[%s21460_s7] sm:$0x7] }
 0x80c   :  { %2610 = vmatpush1.bf16.msra.mxu1 %v16145_v36  ;;  %v13987_v36 = vld [vmem:[%s21460_s7 + $0x4] sm:$0x7] }
 0x80d   :  { %2611 = vmatprep.subr.bf16.mxu1 %v16150_v38  ;;  %v16193_v38 = vld [vmem:[%s21458_s8] sm:$0xff]  }
 0x810   :  { %2612 = vmatpush1.bf16.msra.mxu1 %v16148_v39  ;;  %v16194_v39 = vld [vmem:[%s21458_s8 + $0x8] sm:$0xff]  }
 0x811   :  { %2613 = vmatprep.subr.bf16.mxu1 %v16153_v40  ;;  %v16195_v40 = vld [vmem:[%s21458_s8 + $0x10] sm:$0xff]  }
 0x814   :  { %2614 = vmatpush1.bf16.msra.mxu1 %v16151_v41  ;;  %v16196_v41 = vld [vmem:[%s21458_s8 + $0x18] sm:$0xff]  }
 0x815   :  { %2615 = vmatprep.subr.bf16.mxu1 %v16156_v42  ;;  %v16197_v42 = vld [vmem:[%s21458_s8 + $0x20] sm:$0xff]  }
 0x818   :  { %2616 = vmatpush1.bf16.msra.mxu1 %v16154_v44  ;;  %v16199_v44 = vld [vmem:[%s21458_s8 + $0x30] sm:$0xff]  }
 0x819   :  { %13955 = vmatprep.subr.msk.bf16.mxu1 %vm752_vm5, %v13954_v45  ;;  %v16200_v45 = vld [vmem:[%s21458_s8 + $0x38] sm:$0xff]  }
 0x81c   :  { %2618 = vmatpush1.bf16.msra.mxu1 %v2602_v47  ;;  %v16202_v47 = vld [vmem:[%s21458_s8 + $0x48] sm:$0xff]  }
 0x81d   :  { %2713 = vmatprep.subr.bf16.mxu1 %v16161_v48 }
 0x81f   :  { %13956 = vmatmul.mubr.msk.bf16.vlgmr.msra.gmra.mrb[32].mxu1 %vm748_vm6, %v2542_v50 }
 0x820   :  { %2714 = vmatpush1.bf16.msra.mxu1 %v16159_v49  ;;  %2745 = vmatprep.mubr.bf16.mxu1 %v17251_v24 }
 0x821   :  { %2715 = vmatprep.subr.bf16.mxu1 %v16164_v51 }
 0x824   :  { %2716 = vmatpush1.bf16.msra.mxu1 %v16162_v52 }
 0x825   :  { %2717 = vmatprep.subr.bf16.mxu1 %v16167_v53 }
 0x828   :  { %2718 = vmatpush1.bf16.msra.mxu1 %v16165_v54 }
 0x829   :  { %2719 = vmatprep.subr.bf16.mxu1 %v16170_v55 }
 0x82c   :  { %2720 = vmatpush1.bf16.msra.mxu1 %v16168_v56 }
 0x82d   :  { %2721 = vmatprep.subr.bf16.mxu1 %v16173_v57 }
 0x830   :  { %2722 = vmatpush1.bf16.msra.mxu1 %v16171_v59  ;;  %v16203_v59 = vld [vmem:[%s21458_s8 + $0x50] sm:$0xff]  }
 0x831   :  { %13969 = vmatprep.subr.msk.bf16.mxu1 %vm752_vm5, %v13968_v60 }
 0x834   :  { %2724 = vmatpush1.bf16.msra.mxu1 %v2708_v62  ;;  %v16205_v62 = vld [vmem:[%s21458_s8 + $0x60] sm:$0xff]  }
 0x835   :  { %2821 = vmatprep.subr.bf16.mxu1 %v16178_v63  ;;  %v16206_v63 = vld [vmem:[%s21458_s8 + $0x68] sm:$0xff]  }
 0x837   :  { %13970 = vmatmul.mubr.msk.bf16.vlgmr.msra.gmra.mrb[32].mxu1 %vm748_vm6, %v18044_v10 }
 0x838   :  { %2822 = vmatpush1.bf16.msra.mxu1 %v16176_v0  ;;  %2853 = vmatprep.mubr.bf16.mxu1 %v17251_v24  ;;  %v16207_v0 = vld [vmem:[%s21458_s8 + $0x70] sm:$0xff]  }
 0x839   :  { %2823 = vmatprep.subr.bf16.mxu1 %v16181_v2  ;;  %v16208_v2 = vld [vmem:[%s21458_s8 + $0x78] sm:$0xff]  }
 0x83c   :  { %2824 = vmatpush1.bf16.msra.mxu1 %v16179_v3  ;;  %v16209_v3 = vld [vmem:[%s21458_s8 + $0x80] sm:$0xff]  }
 0x83d   :  { %2825 = vmatprep.subr.bf16.mxu1 %v16184_v4  ;;  %v16210_v4 = vld [vmem:[%s21458_s8 + $0x88] sm:$0xff]  }
 0x840   :  { %2826 = vmatpush1.bf16.msra.mxu1 %v16182_v5  ;;  %v16211_v5 = vld [vmem:[%s21458_s8 + $0x90] sm:$0xff]  }
 0x841   :  { %2827 = vmatprep.subr.bf16.mxu1 %v16187_v6  ;;  %v16212_v6 = vld [vmem:[%s21458_s8 + $0x98] sm:$0xff]  }
 0x844   :  { %2828 = vmatpush1.bf16.msra.mxu1 %v16185_v7  ;;  %v16215_v7 = vld [vmem:[%s21452_s1 + $0x4] ss:$8 sps:$4 sm:$0xff]  }
 0x845   :  { %2829 = vmatprep.subr.bf16.mxu1 %v16190_v8  ;;  %v16213_v8 = vld [vmem:[%s21452_s1] ss:$8 sps:$4 sm:$0xff]  }
 0x848   :  { %2830 = vmatpush1.bf16.msra.mxu1 %v16188_v11  ;;  %v16218_v11 = vld [vmem:[%s21452_s1 + $0x14] ss:$8 sps:$4 sm:$0xff]  }
 0x849   :  { %13983 = vmatprep.subr.msk.bf16.mxu1 %vm752_vm5, %v13982_v12  ;;  %v16216_v12 = vld [vmem:[%s21452_s1 + $0x10] ss:$8 sps:$4 sm:$0xff]  }
 0x84c   :  { %2832 = vmatpush1.bf16.msra.mxu1 %v2816_v14  ;;  %v16219_v14 = vld [vmem:[%s21452_s1 + $0x20] ss:$8 sps:$4 sm:$0xff]  }
 0x84f   :  { %13984 = vmatmul.mubr.msk.bf16.vlgmr.msra.gmra.mrb[32].mxu1 %vm748_vm6, %v2756_v15  ;;  %v16224_v15 = vld [vmem:[%s21452_s1 + $0x34] ss:$8 sps:$4 sm:$0xff]  }
 0x850   :  { %3517 = vmatprep.mubr.bf16.mxu1 %v17251_v24 }
 0x922   :  { %v2855_v18 = vpop.f32.mrb[32].mxu1 }
 0x923   :  { %v2884_v19 = vadd.f32 %v2877_v16, %v2855_v18  ;;  %v2857_v20 = vpop.f32.mrb[33].mxu1  ;;  %v16230_v18 = vld [vmem:[%s21452_s1 + $0x54] ss:$8 sps:$4 sm:$0xff]  }
 0x924   :  { %v2885_v21 = vadd.f32 %v2881_v17, %v2857_v20  ;;  %v2859_v22 = vpop.f32.mrb[34].mxu1  ;;  %v16233_v20 = vld [vmem:[%s21452_s1 + $0x64] ss:$8 sps:$4 sm:$0xff]  }
 0x925   :  { %v2886_v23 = vadd.f32 %v2877_v16, %v2859_v22  ;;  %v2861_v25 = vpop.f32.mrb[35].mxu1  ;;  %v2888_v26 = vmax.f32 %v2884_v19, 0.0  ;;  %v16227_v16 = vld [vmem:[%s21452_s1 + $0x44] ss:$8 sps:$4 sm:$0xff]   ;;  %v16228_v19 = vld [vmem:[%s21452_s1 + $0x50] ss:$8 sps:$4 sm:$0xff]  }
 0x926   :  { %v2887_v10 = vadd.f32 %v2881_v17, %v2861_v25  ;;  %v2889_v28 = vmax.f32 %v2885_v21, 0.0  ;;  %v16225_v17 = vld [vmem:[%s21452_s1 + $0x40] ss:$8 sps:$4 sm:$0xff]   ;;  %v16236_v22 = vld [vmem:[%s21452_s1 + $0x74] ss:$8 sps:$4 sm:$0xff]  }
 0x927   :  { %v2890_v27 = vmax.f32 %v2886_v23, 0.0  ;;  %v16231_v21 = vld [vmem:[%s21452_s1 + $0x60] ss:$8 sps:$4 sm:$0xff]   ;;  %v16234_v23 = vld [vmem:[%s21452_s1 + $0x70] ss:$8 sps:$4 sm:$0xff]  }
 0x928   :  { %v2891_v29 = vmax.f32 %v2887_v10, 0.0  ;;  %v16239_v25 = vld [vmem:[%s21452_s1 + $0x84] ss:$8 sps:$4 sm:$0xff]   ;;  %v16237_v10 = vld [vmem:[%s21452_s1 + $0x80] ss:$8 sps:$4 sm:$0xff]  }
 0x929   :  { %v2892_v30 = vpack.c.bf16 %v2890_v27, %v2888_v26  ;;  %v16242_v26 = vld [vmem:[%s21452_s1 + $0x94] ss:$8 sps:$4 sm:$0xff]   ;;  %v16240_v27 = vld [vmem:[%s21452_s1 + $0x90] ss:$8 sps:$4 sm:$0xff]  }
 0x92a   :  { %v2893_v31 = vpack.c.bf16 %v2891_v29, %v2889_v28  ;;  %v16245_v28 = vld [vmem:[%s21453_s0 + $0x40] ss:$8 sps:$4 sm:$0xff]   ;;  %v16246_v29 = vld [vmem:[%s21453_s0 + $0x54] ss:$8 sps:$4 sm:$0x3f]  }
 0x92b   :  { %v2899_v32 = vsel %vm1306_vm7, %v2892_v30, 0  ;;  %v16248_v30 = vld [vmem:[%s21453_s0 + $0x50] ss:$8 sps:$4 sm:$0x3f]  }
 0x92c   :  { %13985 = vmatprep.subr.msk.bf16.mxu0 %vm1306_vm7, %v2893_v31 }
 0x92d   :  { %2905 = vmatpush1.bf16.msra.mxu0 %v2899_v32 }
 0x92e   :  { %13988 = vmatprep.subr.msk.bf16.mxu0 %vm1306_vm7, %v2893_v31  ;;  %v16252_v31 = vld [vmem:[%s21455_s4 + $0x54] sm:$0xff]  }
 0x930   :  { %13986 = vmatmul.mubr.msk.bf16.vlgmr.msra.gmra.mrb[36].mxu0 %vm1302_vm8, %v2894_v35  ;;  %v16256_v35 = vld [vmem:[%s21455_s4 + $0x64] sm:$0xff]  }
 0x931   :  { %2950 = vmatpush1.bf16.msra.mxu0 %v2899_v32  ;;  %2981 = vmatprep.mubr.bf16.mxu0 %v17251_v24  ;;  %v16254_v32 = vld [vmem:[%s21455_s4 + $0x5c] sm:$0xff]  }
 0x932   :  { %3077 = vmatprep.subr.bf16.mxu0 %v17251_v24 }
 0x938   :  { %13989 = vmatmul.mubr.msk.bf16.vlgmr.msra.gmra.mrb[40].mxu0 %vm1302_vm8, %v13987_v36  ;;  %v16258_v36 = vld [vmem:[%s21455_s4 + $0x6c] sm:$0xff]  }
 0x939   :  { %3078 = vmatpush1.bf16.msra.mxu0 %v16193_v38  ;;  %v16260_v38 = vld [vmem:[%s21455_s4 + $0x74] sm:$0xff]  }
 0x93a   :  { %3079 = vmatprep.subr.bf16.mxu0 %v17251_v24 }
 0x93d   :  { %3080 = vmatpush1.bf16.msra.mxu0 %v16194_v39 }
 0x93e   :  { %3081 = vmatprep.subr.bf16.mxu0 %v17251_v24 }
 0x941   :  { %3082 = vmatpush1.bf16.msra.mxu0 %v16195_v40 }
 0x942   :  { %3083 = vmatprep.subr.bf16.mxu0 %v17251_v24 }
 0x945   :  { %3084 = vmatpush1.bf16.msra.mxu0 %v16196_v41 }
 0x946   :  { %3085 = vmatprep.subr.bf16.mxu0 %v17251_v24 }
 0x949   :  { %3086 = vmatpush1.bf16.msra.mxu0 %v16197_v42 }
 0x94a   :  { %3087 = vmatprep.subr.bf16.mxu0 %v17251_v24 }
 0x94d   :  { %3088 = vmatpush1.bf16.msra.mxu0 %v16198_v43  ;;  %v16262_v43 = vld [vmem:[%s21455_s4 + $0x7c] sm:$0xff]  }
 0x94e   :  { %3089 = vmatprep.subr.bf16.mxu0 %v17251_v24 }
 0x951   :  { %3090 = vmatpush1.bf16.msra.mxu0 %v16199_v44  ;;  %v16264_v44 = vld [vmem:[%s21455_s4 + $0x84] sm:$0xff]  }
 0x952   :  { %3091 = vmatprep.subr.bf16.mxu0 %v17251_v24 }
 0x955   :  { %3092 = vmatpush1.bf16.msra.mxu0 %v16200_v45 }
 0x956   :  { %3093 = vmatprep.subr.bf16.mxu0 %v17251_v24 }
 0x959   :  { %3094 = vmatpush1.bf16.msra.mxu0 %v16201_v46 }
 0x95a   :  { %3095 = vmatprep.subr.bf16.mxu0 %v17251_v24 }
 0x95d   :  { %3096 = vmatpush1.bf16.msra.mxu0 %v16202_v47 }
 0x95e   :  { %3197 = vmatprep.subr.bf16.mxu0 %v17251_v24 }
 0xa03   :  { %v2938_v48 = vpop.f32.mrb[36].mxu0 }
 0xa04   :  { %v2940_v49 = vpop.f32.mrb[37].mxu0 }
 0xa05   :  { %v2942_v50 = vpop.f32.mrb[38].mxu0 }
 0xa06   :  { %v2943_v51 = vpop.f32.mrb[39].mxu0 }
 0xa0b   :  { %v2983_v52 = vpop.f32.mrb[40].mxu0 }
 0xa0c   :  { %v2990_v53 = vmax.f32 %v2938_v48, %v2983_v52  ;;  %v2985_v54 = vpop.f32.mrb[41].mxu0  ;;  %v3240_v48 = vld [vmem:[#allocation2 + $0x4] sm:$0x7] }
 0xa0d   :  { %v2991_v55 = vmax.f32 %v2940_v49, %v2985_v54  ;;  %v2987_v56 = vpop.f32.mrb[42].mxu0 }
 0xa0e   :  { %v2988_v57 = vpop.f32.mrb[43].mxu0  ;;  %v2992_v60 = vpack.c.bf16 %v2990_v53, %v2990_v53  ;;  %v3268_v53 = vld [vmem:[%s21456_s2] sm:$0x3] }
 0xa0f   :  { %v2993_v58 = vpack.c.bf16 %v2991_v55, %v2991_v55  ;;  %v3273_v54 = vrot.slane %v3268_v53, %v17433_v33  ;;  %v3277_v55 = vrot.slane %v3268_v53, %v17435_v34 }
 0xa11   :  { %14000 = vmatprep.mubr.msk.bf16.mxu0 %vm205_vm0, %v2993_v58 }
 0xa12   :  { %3110 = vmatmul.mubr.bf16.vlgmr.msra.gmra.mrb[44].mxu0 %v2992_v60 }
 0xa13   :  { %3198 = vmatpush1.bf16.msra.mxu0 %v16203_v59  ;;  %14031 = vmatprep.mubr.msk.bf16.mxu0 %vm205_vm0, %v2993_v58 }
 0xa14   :  { %3199 = vmatprep.subr.bf16.mxu0 %v17251_v24 }
 0xa17   :  { %3200 = vmatpush1.bf16.msra.mxu0 %v16204_v61 }
 0xa18   :  { %3201 = vmatprep.subr.bf16.mxu0 %v17251_v24 }
 0xa1b   :  { %3202 = vmatpush1.bf16.msra.mxu0 %v16205_v62 }
 0xa1c   :  { %3203 = vmatprep.subr.bf16.mxu0 %v17251_v24 }
 0xa1f   :  { %3204 = vmatpush1.bf16.msra.mxu0 %v16206_v63 }
 0xa20   :  { %3205 = vmatprep.subr.bf16.mxu0 %v17251_v24 }
 0xa23   :  { %3206 = vmatpush1.bf16.msra.mxu0 %v16207_v0 }
 0xa24   :  { %3207 = vmatprep.subr.bf16.mxu0 %v17251_v24 }
 0xa27   :  { %3208 = vmatpush1.bf16.msra.mxu0 %v16208_v2 }
 0xa28   :  { %3209 = vmatprep.subr.bf16.mxu0 %v17251_v24 }
 0xa2b   :  { %3210 = vmatpush1.bf16.msra.mxu0 %v16209_v3 }
 0xa2c   :  { %3211 = vmatprep.subr.bf16.mxu0 %v17251_v24 }
 0xa2f   :  { %3212 = vmatpush1.bf16.msra.mxu0 %v16210_v4 }
 0xa30   :  { %3213 = vmatprep.subr.bf16.mxu0 %v17251_v24 }
 0xa33   :  { %3214 = vmatpush1.bf16.msra.mxu0 %v16211_v5 }
 0xa34   :  { %3215 = vmatprep.subr.bf16.mxu0 %v17251_v24 }
 0xa37   :  { %3216 = vmatpush1.bf16.msra.mxu0 %v16212_v6 }
 0xa38   :  { %3404 = vmatprep.subr.bf16.mxu0 %v16215_v7 }
 0xa3a   :  { %3230 = vmatmul.mubr.bf16.vlgmr.msra.gmra.mrb[48].mxu0 %v2992_v60 }
 0xa3b   :  { %3405 = vmatpush1.bf16.msra.mxu0 %v16213_v8  ;;  %14060 = vmatprep.mubr.msk.bf16.mxu0 %vm205_vm0, %v16243_v9 }
 0xa3c   :  { %3406 = vmatprep.subr.bf16.mxu0 %v16218_v11 }
 0xa3f   :  { %3407 = vmatpush1.bf16.msra.mxu0 %v16216_v12 }
 0xa40   :  { %3408 = vmatprep.subr.bf16.mxu0 %v16221_v13 }
 0xa43   :  { %3409 = vmatpush1.bf16.msra.mxu0 %v16219_v14 }
 0xa44   :  { %3410 = vmatprep.subr.bf16.mxu0 %v16224_v15 }
 0xa47   :  { %3411 = vmatpush1.bf16.msra.mxu0 %v16222_v1 }
 0xa48   :  { %3412 = vmatprep.subr.bf16.mxu0 %v16227_v16 }
 0xa4b   :  { %3413 = vmatpush1.bf16.msra.mxu0 %v16225_v17 }
 0xa4c   :  { %3414 = vmatprep.subr.bf16.mxu0 %v16230_v18 }
 0xa4f   :  { %3415 = vmatpush1.bf16.msra.mxu0 %v16228_v19 }
 0xa50   :  { %3416 = vmatprep.subr.bf16.mxu0 %v16233_v20 }
 0xa53   :  { %3417 = vmatpush1.bf16.msra.mxu0 %v16231_v21 }
 0xa54   :  { %3418 = vmatprep.subr.bf16.mxu0 %v16236_v22  ;;  %v16249_v22 = vld [vmem:[%s21454_s3] sm:$0x7f]  }
 0xa57   :  { %3419 = vmatpush1.bf16.msra.mxu0 %v16234_v23  ;;  %v16250_v23 = vld [vmem:[%s21454_s3 + $0x8] sm:$0x7f]  }
 0xa58   :  { %3420 = vmatprep.subr.bf16.mxu0 %v16239_v25  ;;  %v16251_v25 = vld [vmem:[%s21455_s4] sm:$0xff]  }
 0xa5b   :  { %3421 = vmatpush1.bf16.msra.mxu0 %v16237_v10  ;;  %v16253_v10 = vld [vmem:[%s21455_s4 + $0x8] sm:$0xff]  }
 0xa5c   :  { %3422 = vmatprep.subr.bf16.mxu0 %v16242_v26  ;;  %v16255_v26 = vld [vmem:[%s21455_s4 + $0x10] sm:$0xff]  }
 0xa5f   :  { %3423 = vmatpush1.bf16.msra.mxu0 %v16240_v27  ;;  %v16257_v27 = vld [vmem:[%s21455_s4 + $0x18] sm:$0xff]  }
 0xa60   :  { %3805 = vmatprep.subr.bf16.mxu0 %v17251_v24 }
 0xa62   :  { %3437 = vmatmul.mubr.bf16.vlgmr.msra.gmra.mrb[52].mxu0 %v16245_v28  ;;  %v16259_v28 = vld [vmem:[%s21455_s4 + $0x20] sm:$0xff]  }
 0xa63   :  { %14061 = vmatprep.mubr.msk.bf16.mxu0 %vm205_vm0, %v16246_v29  ;;  %3806 = vmatpush1.bf16.msra.mxu0 %v16252_v31  ;;  %v16261_v29 = vld [vmem:[%s21455_s4 + $0x28] sm:$0xff]   ;;  %v16265_v31 = vld [vmem:[%s21455_s4 + $0x38] sm:$0xff]  }
 0xa64   :  { %3807 = vmatprep.subr.bf16.mxu0 %v17251_v24 }
 0xa67   :  { %3808 = vmatpush1.bf16.msra.mxu0 %v16254_v32  ;;  %v16266_v32 = vld [vmem:[%s21455_s4 + $0x8c] sm:$0xff]  }
 0xa68   :  { %3809 = vmatprep.subr.bf16.mxu0 %v17251_v24 }
 0xa6a   :  { %3447 = vmatmul.mubr.bf16.gmra.mrb[56].mxu0 %v16248_v30  ;;  %v16263_v30 = vld [vmem:[%s21455_s4 + $0x30] sm:$0xff]  }
 0xa6b   :  { %3810 = vmatpush1.bf16.msra.mxu0 %v16256_v35  ;;  %v16267_v35 = vld [vmem:[%s21455_s4 + $0x40] sm:$0xff]  }
 0xa6c   :  { %3811 = vmatprep.subr.bf16.mxu0 %v17251_v24 }
 0xa6f   :  { %3812 = vmatpush1.bf16.msra.mxu0 %v16258_v36  ;;  %v16268_v36 = vld [vmem:[%s21455_s4 + $0x94] sm:$0xff]  }
 0xa70   :  { %3813 = vmatprep.subr.bf16.mxu0 %v17251_v24 }
 0xa73   :  { %3814 = vmatpush1.bf16.msra.mxu0 %v16260_v38  ;;  %v16269_v38 = vld [vmem:[%s21455_s4 + $0x48] sm:$0xff]  }
 0xa74   :  { %3815 = vmatprep.subr.bf16.mxu0 %v17251_v24 }
 0xa77   :  { %3816 = vmatpush1.bf16.msra.mxu0 %v16262_v43 }
 0xa78   :  { %3817 = vmatprep.subr.bf16.mxu0 %v17251_v24 }
 0xa7b   :  { %3818 = vmatpush1.bf16.msra.mxu0 %v16264_v44  ;;  %v16275_v44 = vld [vmem:[%s21457_s5 + $0x5c] ss:$8 sps:$4 sm:$0xff]  }
 0xa7c   :  { %3819 = vmatprep.subr.bf16.mxu0 %v17251_v24 }
 0xa7f   :  { %3820 = vmatpush1.bf16.msra.mxu0 %v16266_v32  ;;  %v16304_v32 = vld [vmem:[%s21457_s5 + $0x14c] ss:$8 sps:$4 sm:$0xff]  }
 0xa80   :  { %3821 = vmatprep.subr.bf16.mxu0 %v17251_v24 }
 0xa83   :  { %3822 = vmatpush1.bf16.msra.mxu0 %v16268_v36  ;;  %v16302_v36 = vld [vmem:[%s21457_s5 + $0x148] ss:$8 sps:$4 sm:$0xff]  }
 0xa84   :  { %3823 = vmatprep.subr.bf16.mxu0 %v17251_v24 }
 0xae5   :  { %v3111_v39 = vpop.f32.mrb[44].mxu0 }
 0xae6   :  { %v3113_v40 = vpop.f32.mrb[45].mxu0 }
 0xae7   :  { %v3114_v41 = vpop.f32.mrb[46].mxu0  ;;  %v16271_v40 = vld [vmem:[%s21455_s4 + $0x50] ss:$0 sps:$4 sm:$0xff]  }
 0xae8   :  { %v3115_v42 = vpop.f32.mrb[47].mxu0  ;;  %v16272_v41 = vld [vmem:[%s21455_s4 + $0xa4] ss:$0 sps:$4 sm:$0xff]  }
 0xae9   :  { %v3675_v42 = vsel %vm486_vm3, %v16271_v40, 0  ;;  %v3803_v43 = vsel %vm486_vm3, %v16272_v41, 0 }
 0xb0d   :  { %v3231_v45 = vpop.f32.mrb[48].mxu0 }
 0xb0e   :  { %v3237_v46 = vmax.f32 %v3111_v39, %v3231_v45  ;;  %v3233_v47 = vpop.f32.mrb[49].mxu0  ;;  %v16270_v39 = vld [vmem:[%s21455_s4 + $0x9c] sm:$0xff]  }
 0xb0f   :  { %v3234_v49 = vpop.f32.mrb[50].mxu0  ;;  %3824 = vmatpush1.bf16.msra.mxu0 %v16270_v39 }
 0xb10   :  { %v3238_v50 = vpack.c.bf16 %v3237_v46, %v3237_v46  ;;  %v3235_v51 = vpop.f32.mrb[51].mxu0  ;;  %3825 = vmatprep.subr.bf16.mxu0 %v17251_v24 }
 0xb12   :  { %v3241_v52 = vsel %vm17918_vm11, %v3238_v50, %v3240_v48 }
 0xb13   :  { %3242 = vst [vmem:[#allocation2 + $0x4] sm:$0x7] %v3241_v52  ;;  %3826 = vmatpush1.bf16.msra.mxu0 %v3803_v43  ;;  %v16309_v43 = vld [vmem:[%s21457_s5 + $0x164] ss:$8 sps:$4 sm:$0xff]  }
 0xb35   :  { %v3438_v56 = vpop.f32.mrb[52].mxu0 }
 0xb36   :  { %v3439_v57 = vadd.f32 %v3438_v56, %v3273_v54  ;;  %v3440_v58 = vpop.f32.mrb[53].mxu0 }
 0xb37   :  { %v3441_v59 = vadd.f32 %v3440_v58, %v3277_v55  ;;  %v3442_v60 = vpop.f32.mrb[54].mxu0 }
 0xb38   :  { %v3443_v61 = vadd.f32 %v3442_v60, %v3273_v54  ;;  %v3444_v62 = vpop.f32.mrb[55].mxu0  ;;  %v3457_v0 = vmax.f32 %v3439_v57, 0.0  ;;  %v16278_v60 = vld [vmem:[%s21457_s5 + $0x6c] ss:$8 sps:$4 sm:$0xff]  }
 0xb39   :  { %v3445_v63 = vadd.f32 %v3444_v62, %v3277_v55  ;;  %v3458_v3 = vmax.f32 %v3441_v59, 0.0  ;;  %v16273_v59 = vld [vmem:[%s21457_s5 + $0x58] ss:$8 sps:$4 sm:$0xff]   ;;  %v16281_v62 = vld [vmem:[%s21457_s5 + $0x7c] ss:$8 sps:$4 sm:$0xff]  }
 0xb3a   :  { %v3459_v2 = vmax.f32 %v3443_v61, 0.0  ;;  %v16276_v61 = vld [vmem:[%s21457_s5 + $0x68] ss:$8 sps:$4 sm:$0xff]  }
 0xb3b   :  { %v3460_v4 = vmax.f32 %v3445_v63, 0.0  ;;  %v16279_v63 = vld [vmem:[%s21457_s5 + $0x78] ss:$8 sps:$4 sm:$0xff]  }
 0xb3c   :  { %v3465_v5 = vpack.c.bf16 %v3459_v2, %v3457_v0  ;;  %v16284_v0 = vld [vmem:[%s21457_s5 + $0x8c] ss:$8 sps:$4 sm:$0xff]   ;;  %v16282_v2 = vld [vmem:[%s21457_s5 + $0x88] ss:$8 sps:$4 sm:$0xff]  }
 0xb3d   :  { %v3466_v6 = vpack.c.bf16 %v3460_v4, %v3458_v3  ;;  %v3448_v7 = vpop.f32.mrb[56].mxu0  ;;  %v16287_v3 = vld [vmem:[%s21457_s5 + $0x9c] ss:$8 sps:$4 sm:$0xff]   ;;  %v16285_v4 = vld [vmem:[%s21457_s5 + $0x98] ss:$8 sps:$4 sm:$0xff]  }
 0xb3e   :  { %v3449_v8 = vadd.f32 %v3448_v7, %v3273_v54  ;;  %v3450_v9 = vpop.f32.mrb[57].mxu0 }
 0xb3f   :  { %v3451_v11 = vadd.f32 %v3450_v9, %v3277_v55  ;;  %v3452_v12 = vpop.f32.mrb[58].mxu0  ;;  %3485 = vmatprep.subr.bf16.mxu1 %v3466_v6 }
 0xb40   :  { %v3453_v13 = vadd.f32 %v3452_v12, %v3273_v54  ;;  %v3454_v14 = vpop.f32.mrb[59].mxu0  ;;  %3486 = vmatpush1.bf16.msra.mxu1 %v3465_v5  ;;  %v3461_v1 = vmax.f32 %v3449_v8, 0.0  ;;  %v16292_v8 = vld [vmem:[%s21457_s5 + $0x10c] ss:$8 sps:$4 sm:$0xff]  }
 0xb41   :  { %v3455_v15 = vadd.f32 %v3454_v14, %v3277_v55  ;;  %v3462_v17 = vmax.f32 %v3451_v11, 0.0 }
 0xb42   :  { %v3463_v16 = vmax.f32 %v3453_v13, 0.0 }
 0xb43   :  { %v3464_v18 = vmax.f32 %v3455_v15, 0.0 }
 0xb44   :  { %v3467_v19 = vpack.c.bf16 %v3463_v16, %v3461_v1 }
 0xb45   :  { %v3468_v20 = vpack.c.bf16 %v3464_v18, %v3462_v17 }
 0xb46   :  { %v3480_v21 = vsel %vm288_vm1, %v3467_v19, 0 }
 0xb47   :  { %14063 = vmatprep.subr.msk.bf16.mxu1 %vm288_vm1, %v3468_v20 }
 0xb48   :  { %3488 = vmatpush1.bf16.msra.mxu1 %v3480_v21 }
 0xb49   :  { %3538 = vmatprep.subr.bf16.mxu1 %v3466_v6 }
 0xb4b   :  { %14064 = vmatmul.mubr.msk.bf16.vlgmr.msra.gmra.mrb[36].mxu1 %vm284_vm2, %v16249_v22 }
 0xb4c   :  { %3539 = vmatpush1.bf16.msra.mxu1 %v3465_v5  ;;  %3570 = vmatprep.mubr.bf16.mxu1 %v17251_v24  ;;  %v14125_v5 = vld [vmem:[%s21457_s5 + $0xa8] sm:$0x33] }
 0xb4d   :  { %14068 = vmatprep.subr.msk.bf16.mxu1 %vm288_vm1, %v3468_v20  ;;  %v14137_v6 = vcombine.high %v14125_v5, %v14125_v5  ;;  %v14136_v7 = vcombine.low %v14125_v5, %v14125_v5  ;;  %v3859_v5 = vld [vmem:[%s21457_s5 + $0x50] sm:$0x33] }
 0xb4f   :  { %v3937_v9 = vsel %vm752_vm5, %v14136_v7, 0  ;;  %v14212_v7 = vcombine.high %v3859_v5, %v3859_v5 }
 0xb50   :  { %3541 = vmatpush1.bf16.msra.mxu1 %v3480_v21 }
 0xb51   :  { %3677 = vmatprep.subr.bf16.mxu1 %v17251_v24 }
 0xb53   :  { %14069 = vmatmul.mubr.msk.bf16.vlgmr.msra.gmra.mrb[40].mxu1 %vm284_vm2, %v16250_v23 }
 0xb54   :  { %3678 = vmatpush1.bf16.msra.mxu1 %v16251_v25  ;;  %v16290_v25 = vld [vmem:[%s21457_s5 + $0x108] ss:$8 sps:$4 sm:$0xff]  }
 0xb55   :  { %3679 = vmatprep.subr.bf16.mxu1 %v17251_v24 }
 0xb58   :  { %3680 = vmatpush1.bf16.msra.mxu1 %v16253_v10 }
 0xb59   :  { %3681 = vmatprep.subr.bf16.mxu1 %v17251_v24 }
 0xb5c   :  { %3682 = vmatpush1.bf16.msra.mxu1 %v16255_v26  ;;  %v16295_v26 = vld [vmem:[%s21457_s5 + $0x11c] ss:$8 sps:$4 sm:$0xff]  }
 0xb5d   :  { %3683 = vmatprep.subr.bf16.mxu1 %v17251_v24 }
 0xb60   :  { %3684 = vmatpush1.bf16.msra.mxu1 %v16257_v27  ;;  %v16293_v27 = vld [vmem:[%s21457_s5 + $0x118] ss:$8 sps:$4 sm:$0xff]  }
 0xb61   :  { %3685 = vmatprep.subr.bf16.mxu1 %v17251_v24 }
 0xb64   :  { %3686 = vmatpush1.bf16.msra.mxu1 %v16259_v28  ;;  %v16298_v28 = vld [vmem:[%s21457_s5 + $0x12c] ss:$8 sps:$4 sm:$0xff]  }
 0xb65   :  { %3687 = vmatprep.subr.bf16.mxu1 %v17251_v24 }
 0xb68   :  { %3688 = vmatpush1.bf16.msra.mxu1 %v16261_v29  ;;  %v16296_v29 = vld [vmem:[%s21457_s5 + $0x128] ss:$8 sps:$4 sm:$0xff]  }
 0xb69   :  { %3689 = vmatprep.subr.bf16.mxu1 %v17251_v24 }
 0xb6c   :  { %3690 = vmatpush1.bf16.msra.mxu1 %v16263_v30  ;;  %v16301_v30 = vld [vmem:[%s21457_s5 + $0x13c] ss:$8 sps:$4 sm:$0xff]  }
 0xb6d   :  { %3691 = vmatprep.subr.bf16.mxu1 %v17251_v24 }
 0xb70   :  { %3692 = vmatpush1.bf16.msra.mxu1 %v16265_v31  ;;  %v16299_v31 = vld [vmem:[%s21457_s5 + $0x138] ss:$8 sps:$4 sm:$0xff]  }
 0xb71   :  { %3693 = vmatprep.subr.bf16.mxu1 %v17251_v24 }
 0xb74   :  { %3694 = vmatpush1.bf16.msra.mxu1 %v16267_v35  ;;  %v14161_v35 = vld [vmem:[%s21457_s5 + $0x158] sm:$0x33] }
 0xb75   :  { %3695 = vmatprep.subr.bf16.mxu1 %v17251_v24  ;;  %v14172_v39 = vcombine.low %v14161_v35, %v14161_v35 }
 0xb77   :  { %v4069_v40 = vsel %vm752_vm5, %v14172_v39, 0 }
 0xb78   :  { %3696 = vmatpush1.bf16.msra.mxu1 %v16269_v38  ;;  %v14173_v38 = vcombine.high %v14161_v35, %v14161_v35 }
 0xb79   :  { %3697 = vmatprep.subr.bf16.mxu1 %v17251_v24 }
 0xb7c   :  { %3698 = vmatpush1.bf16.msra.mxu1 %v3675_v42 }
 0xb7d   :  { %3942 = vmatprep.subr.bf16.mxu1 %v16275_v44  ;;  %v16307_v44 = vld [vmem:[%s21457_s5 + $0x160] ss:$8 sps:$4 sm:$0xff]  }
 0xc1e   :  { %v3519_v45 = vpop.f32.mrb[36].mxu1 }
 0xc1f   :  { %v3521_v46 = vpop.f32.mrb[37].mxu1 }
 0xc20   :  { %v3523_v47 = vpop.f32.mrb[38].mxu1 }
 0xc21   :  { %v3525_v48 = vpop.f32.mrb[39].mxu1 }
 0xc26   :  { %v3572_v49 = vpop.f32.mrb[40].mxu1 }
 0xc27   :  { %v3581_v50 = vmax.f32 %v3519_v45, %v3572_v49  ;;  %v3574_v51 = vpop.f32.mrb[41].mxu1  ;;  %v16313_v49 = vld [vmem:[%s21457_s5 + $0x180] ss:$8 sps:$4 sm:$0xff]  }
 0xc28   :  { %v3582_v52 = vmax.f32 %v3521_v46, %v3574_v51  ;;  %v3576_v53 = vpop.f32.mrb[42].mxu1  ;;  %v16312_v46 = vld [vmem:[%s21457_s5 + $0x174] ss:$8 sps:$4 sm:$0xff]   ;;  %v16316_v51 = vld [vmem:[%s21457_s5 + $0x190] ss:$8 sps:$4 sm:$0xff]  }
 0xc29   :  { %v3583_v54 = vmax.f32 %v3523_v47, %v3576_v53  ;;  %v3578_v55 = vpop.f32.mrb[43].mxu1  ;;  %v16310_v47 = vld [vmem:[%s21457_s5 + $0x170] ss:$8 sps:$4 sm:$0xff]  }
 0xc2a   :  { %v3584_v56 = vmax.f32 %v3525_v48, %v3578_v55  ;;  %v16315_v48 = vld [vmem:[%s21457_s5 + $0x184] ss:$8 sps:$4 sm:$0xff]   ;;  %v14186_v53 = vld [vmem:[%s21457_s5 + $0x1b0] sm:$0x33] }
 0xc2b   :  { %v3585_v57 = vpack.c.bf16 %v3583_v54, %v3581_v50  ;;  %v16318_v50 = vld [vmem:[%s21457_s5 + $0x194] ss:$8 sps:$4 sm:$0xff]   ;;  %v16319_v54 = vld [vmem:[%s21457_s5 + $0x1a0] ss:$8 sps:$4 sm:$0xff]   ;;  %v14198_v55 = vcombine.high %v14186_v53, %v14186_v53 }
 0xc2c   :  { %v3586_v58 = vpack.c.bf16 %v3584_v56, %v3582_v52  ;;  %v16321_v52 = vld [vmem:[%s21457_s5 + $0x1a4] ss:$8 sps:$4 sm:$0xff]   ;;  %v14197_v56 = vcombine.low %v14186_v53, %v14186_v53 }
 0xc2d   :  { %v16363_v53 = vld [vmem:[%s21458_s8 + $0x28] sm:$0xff]  }
 0xc2e   :  { %14081 = vmatprep.mubr.msk.bf16.mxu1 %vm482_vm4, %v3586_v58  ;;  %14114 = vmatprep.mubr.msk.bf16.mxu0 %vm482_vm4, %v3586_v58  ;;  %v16326_v58 = vld [vmem:[%s21457_s5 + $0x4] ss:$8 sps:$4 sm:$0xff]  }
 0xc2f   :  { %3710 = vmatmul.mubr.bf16.vlgmr.msra.gmra.mrb[44].mxu1 %v3585_v57  ;;  %3838 = vmatmul.mubr.bf16.vlgmr.msra.gmra.mrb[60].mxu0 %v3585_v57  ;;  %v4189_v57 = vsel %vm752_vm5, %v14197_v56, 0  ;;  %v16366_v56 = vld [vmem:[%s21458_s8 + $0x40] sm:$0xff]  }
 0xc30   :  { %3943 = vmatpush1.bf16.msra.mxu1 %v16273_v59  ;;  %3974 = vmatprep.mubr.bf16.mxu1 %v17251_v24  ;;  %v16324_v59 = vld [vmem:[%s21457_s5] ss:$8 sps:$4 sm:$0xff]  }
 0xc31   :  { %3944 = vmatprep.subr.bf16.mxu1 %v16278_v60  ;;  %4523 = vmatprep.mubr.bf16.mxu0 %v17251_v24 }
 0xc34   :  { %3945 = vmatpush1.bf16.msra.mxu1 %v16276_v61  ;;  %v16329_v61 = vld [vmem:[%s21457_s5 + $0x14] ss:$8 sps:$4 sm:$0xff]  }
 0xc35   :  { %3946 = vmatprep.subr.bf16.mxu1 %v16281_v62  ;;  %v16327_v62 = vld [vmem:[%s21457_s5 + $0x10] ss:$8 sps:$4 sm:$0xff]  }
 0xc38   :  { %3947 = vmatpush1.bf16.msra.mxu1 %v16279_v63  ;;  %v16332_v63 = vld [vmem:[%s21457_s5 + $0x24] ss:$8 sps:$4 sm:$0xff]  }
 0xc39   :  { %3948 = vmatprep.subr.bf16.mxu1 %v16284_v0  ;;  %v16330_v0 = vld [vmem:[%s21457_s5 + $0x20] ss:$8 sps:$4 sm:$0xff]  }
 0xc3c   :  { %3949 = vmatpush1.bf16.msra.mxu1 %v16282_v2  ;;  %v16335_v2 = vld [vmem:[%s21457_s5 + $0x34] ss:$8 sps:$4 sm:$0xff]  }
 0xc3d   :  { %3950 = vmatprep.subr.bf16.mxu1 %v16287_v3  ;;  %v16333_v3 = vld [vmem:[%s21457_s5 + $0x30] ss:$8 sps:$4 sm:$0xff]  }
 0xc40   :  { %3951 = vmatpush1.bf16.msra.mxu1 %v16285_v4  ;;  %v16338_v4 = vld [vmem:[%s21457_s5 + $0x44] ss:$8 sps:$4 sm:$0xff]  }
 0xc41   :  { %14138 = vmatprep.subr.msk.bf16.mxu1 %vm752_vm5, %v14137_v6  ;;  %v16336_v6 = vld [vmem:[%s21457_s5 + $0x40] ss:$8 sps:$4 sm:$0xff]  }
 0xc44   :  { %3953 = vmatpush1.bf16.msra.mxu1 %v3937_v9 }
 0xc45   :  { %4074 = vmatprep.subr.bf16.mxu1 %v16292_v8  ;;  %v14211_v8 = vcombine.low %v3859_v5, %v3859_v5 }
 0xc47   :  { %v4295_v9 = vsel %vm752_vm5, %v14211_v8, 0  ;;  %v16369_v8 = vld [vmem:[%s21458_s8 + $0x58] sm:$0xff]  }
 0xd02   :  { %v3711_v11 = vpop.f32.mrb[44].mxu1  ;;  %v3839_v12 = vpop.f32.mrb[60].mxu0 }
 0xd03   :  { %v3846_v13 = vmax.f32 %v3711_v11, %v3839_v12  ;;  %v3713_v14 = vpop.f32.mrb[45].mxu1  ;;  %v3841_v15 = vpop.f32.mrb[61].mxu0  ;;  %v16343_v11 = vld [vmem:[%s21457_s5 + $0xb4] ss:$8 sps:$4 sm:$0xff]   ;;  %v16341_v12 = vld [vmem:[%s21457_s5 + $0xb0] ss:$8 sps:$4 sm:$0xff]  }
 0xd04   :  { %v3714_v1 = vpop.f32.mrb[46].mxu1  ;;  %v3842_v16 = vpop.f32.mrb[62].mxu0  ;;  %v16344_v14 = vld [vmem:[%s21457_s5 + $0xc0] ss:$8 sps:$4 sm:$0xff]   ;;  %v16349_v15 = vld [vmem:[%s21457_s5 + $0xd4] ss:$8 sps:$4 sm:$0xff]  }
 0xd05   :  { %v3847_v17 = vmax.f32 %v3714_v1, %v3842_v16  ;;  %v3716_v18 = vpop.f32.mrb[47].mxu1  ;;  %v3844_v19 = vpop.f32.mrb[63].mxu0  ;;  %v16347_v1 = vld [vmem:[%s21457_s5 + $0xd0] ss:$8 sps:$4 sm:$0xff]   ;;  %v16352_v16 = vld [vmem:[%s21457_s5 + $0xe4] ss:$8 sps:$4 sm:$0xff]  }
 0xd06   :  { %v16355_v18 = vld [vmem:[%s21457_s5 + $0xf4] ss:$8 sps:$4 sm:$0xff]   ;;  %v14150_v19 = vld [vmem:[%s21457_s5 + $0x100] sm:$0x33] }
 0xd07   :  { %v18522_v20 = vpack.c.bf16 %v3847_v17, %v3846_v13  ;;  %v16346_v13 = vld [vmem:[%s21457_s5 + $0xc4] ss:$8 sps:$4 sm:$0xff]   ;;  %v16350_v17 = vld [vmem:[%s21457_s5 + $0xe0] ss:$8 sps:$4 sm:$0xff]  }
 0xd09   :  { %v3874_v21 = vshll.u32 %v18522_v20, 16  ;;  %v3872_v22 = vshrl.u32 %v18522_v20, 16  ;;  %v4129_v60 = vrot.slane %v18522_v20, 2 }
 0xd0b   :  { %v3876_v23 = vrot.slane %v3874_v21, 1  ;;  %v4007_v41 = vrot.slane %v3872_v22, 1  ;;  %v4008_v42 = vrot.slane %v3874_v21, 2  ;;  %v16353_v21 = vld [vmem:[%s21457_s5 + $0xf0] ss:$8 sps:$4 sm:$0xff]  }
 0xd0d   :  { %v3877_v10 = vor.u32 %v3876_v23, %v3872_v22  ;;  %v4009_v45 = vor.u32 %v4008_v42, %v4007_v41  ;;  %v14226_v22 = vcombine.high %v14150_v19, %v14150_v19  ;;  %v14225_v23 = vcombine.low %v14150_v19, %v14150_v19  ;;  %v16408_v19 = vld [vmem:[%s21453_s0 + $0x64] ss:$8 sps:$4 sm:$0xff]  }
 0xd0f   :  { %14139 = vmatmul.mubr.msk.bf16.vlgmr.msra.gmra.mrb[48].mxu1 %vm748_vm6, %v3877_v10  ;;  %v4343_v10 = vrot.slane %v18522_v20, 1 }
 0xd10   :  { %4075 = vmatpush1.bf16.msra.mxu1 %v16290_v25  ;;  %4106 = vmatprep.mubr.bf16.mxu1 %v17251_v24  ;;  %v4403_v25 = vsel %vm752_vm5, %v14225_v23, 0  ;;  %v16386_v23 = vld [vmem:[%s21452_s1 + $0x24] ss:$8 sps:$4 sm:$0xff]  }
 0xd11   :  { %4076 = vmatprep.subr.bf16.mxu1 %v16295_v26  ;;  %v4459_v26 = vld [vmem:[%s21459_s6] sm:$0x3] }
 0xd14   :  { %4077 = vmatpush1.bf16.msra.mxu1 %v16293_v27  ;;  %v4464_v27 = vrot.slane %v4459_v26, %v17433_v33 }
 0xd15   :  { %4078 = vmatprep.subr.bf16.mxu1 %v16298_v28  ;;  %v4468_v28 = vrot.slane %v4459_v26, %v17435_v34  ;;  %v16387_v26 = vld [vmem:[%s21452_s1 + $0x30] ss:$8 sps:$4 sm:$0xff]  }
 0xd18   :  { %4079 = vmatpush1.bf16.msra.mxu1 %v16296_v29 }
 0xd19   :  { %4080 = vmatprep.subr.bf16.mxu1 %v16301_v30 }
 0xd1c   :  { %4081 = vmatpush1.bf16.msra.mxu1 %v16299_v31 }
 0xd1d   :  { %4082 = vmatprep.subr.bf16.mxu1 %v16304_v32 }
 0xd20   :  { %4083 = vmatpush1.bf16.msra.mxu1 %v16302_v36 }
 0xd21   :  { %14174 = vmatprep.subr.msk.bf16.mxu1 %vm752_vm5, %v14173_v38 }
 0xd24   :  { %4085 = vmatpush1.bf16.msra.mxu1 %v4069_v40 }
 0xd25   :  { %4194 = vmatprep.subr.bf16.mxu1 %v16309_v43 }
 0xd27   :  { %14175 = vmatmul.mubr.msk.bf16.vlgmr.msra.gmra.mrb[48].mxu1 %vm748_vm6, %v4009_v45 }
 0xd28   :  { %4195 = vmatpush1.bf16.msra.mxu1 %v16307_v44  ;;  %4226 = vmatprep.mubr.bf16.mxu1 %v17251_v24 }
 0xd29   :  { %4196 = vmatprep.subr.bf16.mxu1 %v16312_v46  ;;  %v4481_v46 = vld [vmem:[%s21460_s7] sm:$0x7] }
 0xd2c   :  { %4197 = vmatpush1.bf16.msra.mxu1 %v16310_v47  ;;  %v14231_v47 = vld [vmem:[%s21460_s7 + $0x4] sm:$0x7] }
 0xd2d   :  { %4198 = vmatprep.subr.bf16.mxu1 %v16315_v48  ;;  %v16358_v48 = vld [vmem:[%s21458_s8] sm:$0xff]  }
 0xd30   :  { %4199 = vmatpush1.bf16.msra.mxu1 %v16313_v49  ;;  %v16359_v49 = vld [vmem:[%s21458_s8 + $0x8] sm:$0xff]  }
 0xd31   :  { %4200 = vmatprep.subr.bf16.mxu1 %v16318_v50  ;;  %v16360_v50 = vld [vmem:[%s21458_s8 + $0x10] sm:$0xff]  }
 0xd34   :  { %4201 = vmatpush1.bf16.msra.mxu1 %v16316_v51  ;;  %v16361_v51 = vld [vmem:[%s21458_s8 + $0x18] sm:$0xff]  }
 0xd35   :  { %4202 = vmatprep.subr.bf16.mxu1 %v16321_v52  ;;  %v16362_v52 = vld [vmem:[%s21458_s8 + $0x20] sm:$0xff]  }
 0xd38   :  { %4203 = vmatpush1.bf16.msra.mxu1 %v16319_v54  ;;  %v16364_v54 = vld [vmem:[%s21458_s8 + $0x30] sm:$0xff]  }
 0xd39   :  { %14199 = vmatprep.subr.msk.bf16.mxu1 %vm752_vm5, %v14198_v55  ;;  %v16365_v55 = vld [vmem:[%s21458_s8 + $0x38] sm:$0xff]  }
 0xd3c   :  { %4205 = vmatpush1.bf16.msra.mxu1 %v4189_v57  ;;  %v16367_v57 = vld [vmem:[%s21458_s8 + $0x48] sm:$0xff]  }
 0xd3d   :  { %4300 = vmatprep.subr.bf16.mxu1 %v16326_v58 }
 0xd3f   :  { %14200 = vmatmul.mubr.msk.bf16.vlgmr.msra.gmra.mrb[48].mxu1 %vm748_vm6, %v4129_v60 }
 0xd40   :  { %4301 = vmatpush1.bf16.msra.mxu1 %v16324_v59  ;;  %4332 = vmatprep.mubr.bf16.mxu1 %v17251_v24 }
 0xd41   :  { %4302 = vmatprep.subr.bf16.mxu1 %v16329_v61 }
 0xd44   :  { %4303 = vmatpush1.bf16.msra.mxu1 %v16327_v62 }
 0xd45   :  { %4304 = vmatprep.subr.bf16.mxu1 %v16332_v63 }
 0xd48   :  { %4305 = vmatpush1.bf16.msra.mxu1 %v16330_v0 }
 0xd49   :  { %4306 = vmatprep.subr.bf16.mxu1 %v16335_v2 }
 0xd4c   :  { %4307 = vmatpush1.bf16.msra.mxu1 %v16333_v3 }
 0xd4d   :  { %4308 = vmatprep.subr.bf16.mxu1 %v16338_v4 }
 0xd50   :  { %4309 = vmatpush1.bf16.msra.mxu1 %v16336_v6  ;;  %v16368_v6 = vld [vmem:[%s21458_s8 + $0x50] sm:$0xff]  }
 0xd51   :  { %14213 = vmatprep.subr.msk.bf16.mxu1 %vm752_vm5, %v14212_v7 }
 0xd54   :  { %4311 = vmatpush1.bf16.msra.mxu1 %v4295_v9  ;;  %v16370_v9 = vld [vmem:[%s21458_s8 + $0x60] sm:$0xff]  }
 0xd55   :  { %4408 = vmatprep.subr.bf16.mxu1 %v16343_v11  ;;  %v16371_v11 = vld [vmem:[%s21458_s8 + $0x68] sm:$0xff]  }
 0xd57   :  { %14214 = vmatmul.mubr.msk.bf16.vlgmr.msra.gmra.mrb[48].mxu1 %vm748_vm6, %v18522_v20 }
 0xd58   :  { %4409 = vmatpush1.bf16.msra.mxu1 %v16341_v12  ;;  %4440 = vmatprep.mubr.bf16.mxu1 %v17251_v24  ;;  %v16372_v12 = vld [vmem:[%s21458_s8 + $0x70] sm:$0xff]  }
 0xd59   :  { %4410 = vmatprep.subr.bf16.mxu1 %v16346_v13  ;;  %v16373_v13 = vld [vmem:[%s21458_s8 + $0x78] sm:$0xff]  }
 0xd5c   :  { %4411 = vmatpush1.bf16.msra.mxu1 %v16344_v14  ;;  %v16374_v14 = vld [vmem:[%s21458_s8 + $0x80] sm:$0xff]  }
 0xd5d   :  { %4412 = vmatprep.subr.bf16.mxu1 %v16349_v15  ;;  %v16375_v15 = vld [vmem:[%s21458_s8 + $0x88] sm:$0xff]  }
 0xd60   :  { %4413 = vmatpush1.bf16.msra.mxu1 %v16347_v1  ;;  %v16376_v1 = vld [vmem:[%s21458_s8 + $0x90] sm:$0xff]  }
 0xd61   :  { %4414 = vmatprep.subr.bf16.mxu1 %v16352_v16  ;;  %v16377_v16 = vld [vmem:[%s21458_s8 + $0x98] sm:$0xff]  }
 0xd64   :  { %4415 = vmatpush1.bf16.msra.mxu1 %v16350_v17  ;;  %v16380_v17 = vld [vmem:[%s21452_s1 + $0x4] ss:$8 sps:$4 sm:$0xff]  }
 0xd65   :  { %4416 = vmatprep.subr.bf16.mxu1 %v16355_v18  ;;  %v16378_v18 = vld [vmem:[%s21452_s1] ss:$8 sps:$4 sm:$0xff]  }
 0xd68   :  { %4417 = vmatpush1.bf16.msra.mxu1 %v16353_v21  ;;  %v16383_v21 = vld [vmem:[%s21452_s1 + $0x14] ss:$8 sps:$4 sm:$0xff]  }
 0xd69   :  { %14227 = vmatprep.subr.msk.bf16.mxu1 %vm752_vm5, %v14226_v22  ;;  %v16381_v22 = vld [vmem:[%s21452_s1 + $0x10] ss:$8 sps:$4 sm:$0xff]  }
 0xd6c   :  { %4419 = vmatpush1.bf16.msra.mxu1 %v4403_v25  ;;  %v16384_v25 = vld [vmem:[%s21452_s1 + $0x20] ss:$8 sps:$4 sm:$0xff]  }
 0xd6f   :  { %14228 = vmatmul.mubr.msk.bf16.vlgmr.msra.gmra.mrb[48].mxu1 %vm748_vm6, %v4343_v10  ;;  %v16389_v10 = vld [vmem:[%s21452_s1 + $0x34] ss:$8 sps:$4 sm:$0xff]  }
 0xd70   :  { %5104 = vmatprep.mubr.bf16.mxu1 %v17251_v24 }
 0xe42   :  { %v4442_v29 = vpop.f32.mrb[48].mxu1 }
 0xe43   :  { %v4471_v30 = vadd.f32 %v4464_v27, %v4442_v29  ;;  %v4444_v31 = vpop.f32.mrb[49].mxu1  ;;  %v16395_v29 = vld [vmem:[%s21452_s1 + $0x54] ss:$8 sps:$4 sm:$0xff]  }
 0xe44   :  { %v4472_v32 = vadd.f32 %v4468_v28, %v4444_v31  ;;  %v4446_v35 = vpop.f32.mrb[50].mxu1  ;;  %v16398_v31 = vld [vmem:[%s21452_s1 + $0x64] ss:$8 sps:$4 sm:$0xff]  }
 0xe45   :  { %v4473_v36 = vadd.f32 %v4464_v27, %v4446_v35  ;;  %v4448_v38 = vpop.f32.mrb[51].mxu1  ;;  %v4475_v39 = vmax.f32 %v4471_v30, 0.0  ;;  %v16392_v27 = vld [vmem:[%s21452_s1 + $0x44] ss:$8 sps:$4 sm:$0xff]   ;;  %v16393_v30 = vld [vmem:[%s21452_s1 + $0x50] ss:$8 sps:$4 sm:$0xff]  }
 0xe46   :  { %v4474_v20 = vadd.f32 %v4468_v28, %v4448_v38  ;;  %v4476_v41 = vmax.f32 %v4472_v32, 0.0  ;;  %v16390_v28 = vld [vmem:[%s21452_s1 + $0x40] ss:$8 sps:$4 sm:$0xff]   ;;  %v16401_v35 = vld [vmem:[%s21452_s1 + $0x74] ss:$8 sps:$4 sm:$0xff]  }
 0xe47   :  { %v4477_v40 = vmax.f32 %v4473_v36, 0.0  ;;  %v16396_v32 = vld [vmem:[%s21452_s1 + $0x60] ss:$8 sps:$4 sm:$0xff]   ;;  %v16399_v36 = vld [vmem:[%s21452_s1 + $0x70] ss:$8 sps:$4 sm:$0xff]  }
 0xe48   :  { %v4478_v42 = vmax.f32 %v4474_v20, 0.0  ;;  %v16404_v38 = vld [vmem:[%s21452_s1 + $0x84] ss:$8 sps:$4 sm:$0xff]   ;;  %v16402_v20 = vld [vmem:[%s21452_s1 + $0x80] ss:$8 sps:$4 sm:$0xff]  }
 0xe49   :  { %v4479_v43 = vpack.c.bf16 %v4477_v40, %v4475_v39  ;;  %v16407_v39 = vld [vmem:[%s21452_s1 + $0x94] ss:$8 sps:$4 sm:$0xff]   ;;  %v16405_v40 = vld [vmem:[%s21452_s1 + $0x90] ss:$8 sps:$4 sm:$0xff]  }
 0xe4a   :  { %v4480_v44 = vpack.c.bf16 %v4478_v42, %v4476_v41  ;;  %v16410_v41 = vld [vmem:[%s21453_s0 + $0x60] ss:$8 sps:$4 sm:$0xff]   ;;  %v16411_v42 = vld [vmem:[%s21453_s0 + $0x74] ss:$8 sps:$4 sm:$0x3f]  }
 0xe4b   :  { %v4486_v45 = vsel %vm1306_vm7, %v4479_v43, 0  ;;  %v16413_v43 = vld [vmem:[%s21453_s0 + $0x70] ss:$8 sps:$4 sm:$0x3f]  }
 0xe4c   :  { %14229 = vmatprep.subr.msk.bf16.mxu0 %vm1306_vm7, %v4480_v44 }
 0xe4d   :  { %4492 = vmatpush1.bf16.msra.mxu0 %v4486_v45 }
 0xe4e   :  { %14232 = vmatprep.subr.msk.bf16.mxu0 %vm1306_vm7, %v4480_v44  ;;  %v16418_v44 = vld [vmem:[%s21455_s4 + $0x54] sm:$0xff]  }
 0xe50   :  { %14230 = vmatmul.mubr.msk.bf16.vlgmr.msra.gmra.mrb[64].mxu0 %vm1302_vm8, %v4481_v46  ;;  %v16422_v46 = vld [vmem:[%s21455_s4 + $0x64] sm:$0xff]  }
 0xe51   :  { %4537 = vmatpush1.bf16.msra.mxu0 %v4486_v45  ;;  %4568 = vmatprep.mubr.bf16.mxu0 %v17251_v24  ;;  %v16420_v45 = vld [vmem:[%s21455_s4 + $0x5c] sm:$0xff]  }
 0xe52   :  { %4664 = vmatprep.subr.bf16.mxu0 %v17251_v24 }
 0xe58   :  { %14233 = vmatmul.mubr.msk.bf16.vlgmr.msra.gmra.mrb[68].mxu0 %vm1302_vm8, %v14231_v47  ;;  %v16424_v47 = vld [vmem:[%s21455_s4 + $0x6c] sm:$0xff]  }
 0xe59   :  { %4665 = vmatpush1.bf16.msra.mxu0 %v16358_v48  ;;  %v16426_v48 = vld [vmem:[%s21455_s4 + $0x74] sm:$0xff]  }
 0xe5a   :  { %4666 = vmatprep.subr.bf16.mxu0 %v17251_v24 }
 0xe5d   :  { %4667 = vmatpush1.bf16.msra.mxu0 %v16359_v49 }
 0xe5e   :  { %4668 = vmatprep.subr.bf16.mxu0 %v17251_v24 }
 0xe61   :  { %4669 = vmatpush1.bf16.msra.mxu0 %v16360_v50 }
 0xe62   :  { %4670 = vmatprep.subr.bf16.mxu0 %v17251_v24 }
 0xe65   :  { %4671 = vmatpush1.bf16.msra.mxu0 %v16361_v51 }
 0xe66   :  { %4672 = vmatprep.subr.bf16.mxu0 %v17251_v24 }
 0xe69   :  { %4673 = vmatpush1.bf16.msra.mxu0 %v16362_v52 }
 0xe6a   :  { %4674 = vmatprep.subr.bf16.mxu0 %v17251_v24 }
 0xe6d   :  { %4675 = vmatpush1.bf16.msra.mxu0 %v16363_v53  ;;  %v16428_v53 = vld [vmem:[%s21455_s4 + $0x7c] sm:$0xff]  }
 0xe6e   :  { %4676 = vmatprep.subr.bf16.mxu0 %v17251_v24 }
 0xe71   :  { %4677 = vmatpush1.bf16.msra.mxu0 %v16364_v54  ;;  %v16430_v54 = vld [vmem:[%s21455_s4 + $0x84] sm:$0xff]  }
 0xe72   :  { %4678 = vmatprep.subr.bf16.mxu0 %v17251_v24 }
 0xe75   :  { %4679 = vmatpush1.bf16.msra.mxu0 %v16365_v55 }
 0xe76   :  { %4680 = vmatprep.subr.bf16.mxu0 %v17251_v24 }
 0xe79   :  { %4681 = vmatpush1.bf16.msra.mxu0 %v16366_v56 }
 0xe7a   :  { %4682 = vmatprep.subr.bf16.mxu0 %v17251_v24 }
 0xe7d   :  { %4683 = vmatpush1.bf16.msra.mxu0 %v16367_v57 }
 0xe7e   :  { %4784 = vmatprep.subr.bf16.mxu0 %v17251_v24 }
 0xf23   :  { %v4525_v58 = vpop.f32.mrb[64].mxu0 }
 0xf24   :  { %v4527_v59 = vpop.f32.mrb[65].mxu0 }
 0xf25   :  { %v4529_v60 = vpop.f32.mrb[66].mxu0 }
 0xf26   :  { %v4530_v61 = vpop.f32.mrb[67].mxu0 }
 0xf2b   :  { %v4570_v62 = vpop.f32.mrb[68].mxu0 }
 0xf2c   :  { %v4577_v63 = vmax.f32 %v4525_v58, %v4570_v62  ;;  %v4572_v0 = vpop.f32.mrb[69].mxu0  ;;  %v4827_v58 = vld [vmem:[#allocation2 + $0x8] sm:$0x7] }
 0xf2d   :  { %v4578_v2 = vmax.f32 %v4527_v59, %v4572_v0  ;;  %v4574_v3 = vpop.f32.mrb[70].mxu0 }
 0xf2e   :  { %v4575_v4 = vpop.f32.mrb[71].mxu0  ;;  %v4579_v7 = vpack.c.bf16 %v4577_v63, %v4577_v63  ;;  %v4855_v63 = vld [vmem:[%s21456_s2] sm:$0x3] }
 0xf2f   :  { %v4580_v5 = vpack.c.bf16 %v4578_v2, %v4578_v2  ;;  %v4860_v0 = vrot.slane %v4855_v63, %v17433_v33  ;;  %v4864_v2 = vrot.slane %v4855_v63, %v17435_v34 }
 0xf31   :  { %14244 = vmatprep.mubr.msk.bf16.mxu0 %vm205_vm0, %v4580_v5 }
 0xf32   :  { %4697 = vmatmul.mubr.bf16.vlgmr.msra.gmra.mrb[72].mxu0 %v4579_v7 }
 0xf33   :  { %4785 = vmatpush1.bf16.msra.mxu0 %v16368_v6  ;;  %14275 = vmatprep.mubr.msk.bf16.mxu0 %vm205_vm0, %v4580_v5 }
 0xf34   :  { %4786 = vmatprep.subr.bf16.mxu0 %v17251_v24 }
 0xf37   :  { %4787 = vmatpush1.bf16.msra.mxu0 %v16369_v8 }
 0xf38   :  { %4788 = vmatprep.subr.bf16.mxu0 %v17251_v24 }
 0xf3b   :  { %4789 = vmatpush1.bf16.msra.mxu0 %v16370_v9 }
 0xf3c   :  { %4790 = vmatprep.subr.bf16.mxu0 %v17251_v24 }
 0xf3f   :  { %4791 = vmatpush1.bf16.msra.mxu0 %v16371_v11 }
 0xf40   :  { %4792 = vmatprep.subr.bf16.mxu0 %v17251_v24 }
 0xf43   :  { %4793 = vmatpush1.bf16.msra.mxu0 %v16372_v12 }
 0xf44   :  { %4794 = vmatprep.subr.bf16.mxu0 %v17251_v24 }
 0xf47   :  { %4795 = vmatpush1.bf16.msra.mxu0 %v16373_v13 }
 0xf48   :  { %4796 = vmatprep.subr.bf16.mxu0 %v17251_v24 }
 0xf4b   :  { %4797 = vmatpush1.bf16.msra.mxu0 %v16374_v14 }
 0xf4c   :  { %4798 = vmatprep.subr.bf16.mxu0 %v17251_v24 }
 0xf4f   :  { %4799 = vmatpush1.bf16.msra.mxu0 %v16375_v15 }
 0xf50   :  { %4800 = vmatprep.subr.bf16.mxu0 %v17251_v24 }
 0xf53   :  { %4801 = vmatpush1.bf16.msra.mxu0 %v16376_v1 }
 0xf54   :  { %4802 = vmatprep.subr.bf16.mxu0 %v17251_v24 }
 0xf57   :  { %4803 = vmatpush1.bf16.msra.mxu0 %v16377_v16 }
 0xf58   :  { %4991 = vmatprep.subr.bf16.mxu0 %v16380_v17 }
 0xf5a   :  { %4817 = vmatmul.mubr.bf16.vlgmr.msra.gmra.mrb[76].mxu0 %v4579_v7 }
 0xf5b   :  { %4992 = vmatpush1.bf16.msra.mxu0 %v16378_v18  ;;  %14304 = vmatprep.mubr.msk.bf16.mxu0 %vm205_vm0, %v16408_v19 }
 0xf5c   :  { %4993 = vmatprep.subr.bf16.mxu0 %v16383_v21 }
 0xf5f   :  { %4994 = vmatpush1.bf16.msra.mxu0 %v16381_v22 }
 0xf60   :  { %4995 = vmatprep.subr.bf16.mxu0 %v16386_v23 }
 0xf63   :  { %4996 = vmatpush1.bf16.msra.mxu0 %v16384_v25 }
 0xf64   :  { %4997 = vmatprep.subr.bf16.mxu0 %v16389_v10 }
 0xf67   :  { %4998 = vmatpush1.bf16.msra.mxu0 %v16387_v26 }
 0xf68   :  { %4999 = vmatprep.subr.bf16.mxu0 %v16392_v27 }
 0xf6b   :  { %5000 = vmatpush1.bf16.msra.mxu0 %v16390_v28 }
 0xf6c   :  { %5001 = vmatprep.subr.bf16.mxu0 %v16395_v29 }
 0xf6f   :  { %5002 = vmatpush1.bf16.msra.mxu0 %v16393_v30 }
 0xf70   :  { %5003 = vmatprep.subr.bf16.mxu0 %v16398_v31 }
 0xf73   :  { %5004 = vmatpush1.bf16.msra.mxu0 %v16396_v32 }
 0xf74   :  { %5005 = vmatprep.subr.bf16.mxu0 %v16401_v35  ;;  %v16415_v35 = vld [vmem:[%s21454_s3] sm:$0x7f]  }
 0xf77   :  { %5006 = vmatpush1.bf16.msra.mxu0 %v16399_v36  ;;  %v16416_v36 = vld [vmem:[%s21454_s3 + $0x8] sm:$0x7f]  }
 0xf78   :  { %5007 = vmatprep.subr.bf16.mxu0 %v16404_v38  ;;  %v16417_v38 = vld [vmem:[%s21455_s4] sm:$0xff]  }
 0xf7b   :  { %5008 = vmatpush1.bf16.msra.mxu0 %v16402_v20  ;;  %v16419_v20 = vld [vmem:[%s21455_s4 + $0x8] sm:$0xff]  }
 0xf7c   :  { %5009 = vmatprep.subr.bf16.mxu0 %v16407_v39  ;;  %v16421_v39 = vld [vmem:[%s21455_s4 + $0x10] sm:$0xff]  }
 0xf7f   :  { %5010 = vmatpush1.bf16.msra.mxu0 %v16405_v40  ;;  %v16423_v40 = vld [vmem:[%s21455_s4 + $0x18] sm:$0xff]  }
 0xf80   :  { %5392 = vmatprep.subr.bf16.mxu0 %v17251_v24 }
 0xf82   :  { %5024 = vmatmul.mubr.bf16.vlgmr.msra.gmra.mrb[80].mxu0 %v16410_v41  ;;  %v16425_v41 = vld [vmem:[%s21455_s4 + $0x20] sm:$0xff]  }
 0xf83   :  { %14305 = vmatprep.mubr.msk.bf16.mxu0 %vm205_vm0, %v16411_v42  ;;  %5393 = vmatpush1.bf16.msra.mxu0 %v16418_v44  ;;  %v16427_v42 = vld [vmem:[%s21455_s4 + $0x28] sm:$0xff]   ;;  %v16431_v44 = vld [vmem:[%s21455_s4 + $0x38] sm:$0xff]  }
 0xf84   :  { %5394 = vmatprep.subr.bf16.mxu0 %v17251_v24 }
 0xf87   :  { %5395 = vmatpush1.bf16.msra.mxu0 %v16420_v45  ;;  %v16432_v45 = vld [vmem:[%s21455_s4 + $0x8c] sm:$0xff]  }
 0xf88   :  { %5396 = vmatprep.subr.bf16.mxu0 %v17251_v24 }
 0xf8a   :  { %5034 = vmatmul.mubr.bf16.gmra.mrb[84].mxu0 %v16413_v43  ;;  %v16429_v43 = vld [vmem:[%s21455_s4 + $0x30] sm:$0xff]  }
 0xf8b   :  { %5397 = vmatpush1.bf16.msra.mxu0 %v16422_v46  ;;  %v16433_v46 = vld [vmem:[%s21455_s4 + $0x40] sm:$0xff]  }
 0xf8c   :  { %5398 = vmatprep.subr.bf16.mxu0 %v17251_v24 }
 0xf8f   :  { %5399 = vmatpush1.bf16.msra.mxu0 %v16424_v47  ;;  %v16434_v47 = vld [vmem:[%s21455_s4 + $0x94] sm:$0xff]  }
 0xf90   :  { %5400 = vmatprep.subr.bf16.mxu0 %v17251_v24 }
 0xf93   :  { %5401 = vmatpush1.bf16.msra.mxu0 %v16426_v48  ;;  %v16435_v48 = vld [vmem:[%s21455_s4 + $0x48] sm:$0xff]  }
 0xf94   :  { %5402 = vmatprep.subr.bf16.mxu0 %v17251_v24 }
 0xf97   :  { %5403 = vmatpush1.bf16.msra.mxu0 %v16428_v53 }
 0xf98   :  { %5404 = vmatprep.subr.bf16.mxu0 %v17251_v24 }
 0xf9b   :  { %5405 = vmatpush1.bf16.msra.mxu0 %v16430_v54  ;;  %v16441_v54 = vld [vmem:[%s21457_s5 + $0x5c] ss:$8 sps:$4 sm:$0xff]  }
 0xf9c   :  { %5406 = vmatprep.subr.bf16.mxu0 %v17251_v24 }
 0xf9f   :  { %5407 = vmatpush1.bf16.msra.mxu0 %v16432_v45  ;;  %v16470_v45 = vld [vmem:[%s21457_s5 + $0x14c] ss:$8 sps:$4 sm:$0xff]  }
 0xfa0   :  { %5408 = vmatprep.subr.bf16.mxu0 %v17251_v24 }
 0xfa3   :  { %5409 = vmatpush1.bf16.msra.mxu0 %v16434_v47  ;;  %v16468_v47 = vld [vmem:[%s21457_s5 + $0x148] ss:$8 sps:$4 sm:$0xff]  }
 0xfa4   :  { %5410 = vmatprep.subr.bf16.mxu0 %v17251_v24 }
0x1005   :  { %v4698_v49 = vpop.f32.mrb[72].mxu0 }
0x1006   :  { %v4700_v50 = vpop.f32.mrb[73].mxu0 }
0x1007   :  { %v4701_v51 = vpop.f32.mrb[74].mxu0  ;;  %v16437_v50 = vld [vmem:[%s21455_s4 + $0x50] ss:$0 sps:$4 sm:$0xff]  }
0x1008   :  { %v4702_v52 = vpop.f32.mrb[75].mxu0  ;;  %v16438_v51 = vld [vmem:[%s21455_s4 + $0xa4] ss:$0 sps:$4 sm:$0xff]  }
0x1009   :  { %v5262_v52 = vsel %vm486_vm3, %v16437_v50, 0  ;;  %v5390_v53 = vsel %vm486_vm3, %v16438_v51, 0 }
0x102d   :  { %v4818_v55 = vpop.f32.mrb[76].mxu0 }
0x102e   :  { %v4824_v56 = vmax.f32 %v4698_v49, %v4818_v55  ;;  %v4820_v57 = vpop.f32.mrb[77].mxu0  ;;  %v16436_v49 = vld [vmem:[%s21455_s4 + $0x9c] sm:$0xff]  }
0x102f   :  { %v4821_v59 = vpop.f32.mrb[78].mxu0  ;;  %5411 = vmatpush1.bf16.msra.mxu0 %v16436_v49 }
0x1030   :  { %v4825_v60 = vpack.c.bf16 %v4824_v56, %v4824_v56  ;;  %v4822_v61 = vpop.f32.mrb[79].mxu0  ;;  %5412 = vmatprep.subr.bf16.mxu0 %v17251_v24 }
0x1032   :  { %v4828_v62 = vsel %vm17918_vm11, %v4825_v60, %v4827_v58 }
0x1033   :  { %4829 = vst [vmem:[#allocation2 + $0x8] sm:$0x7] %v4828_v62  ;;  %5413 = vmatpush1.bf16.msra.mxu0 %v5390_v53  ;;  %v16475_v53 = vld [vmem:[%s21457_s5 + $0x164] ss:$8 sps:$4 sm:$0xff]  }
0x1055   :  { %v5025_v3 = vpop.f32.mrb[80].mxu0 }
0x1056   :  { %v5026_v4 = vadd.f32 %v5025_v3, %v4860_v0  ;;  %v5027_v5 = vpop.f32.mrb[81].mxu0 }
0x1057   :  { %v5028_v6 = vadd.f32 %v5027_v5, %v4864_v2  ;;  %v5029_v7 = vpop.f32.mrb[82].mxu0 }
0x1058   :  { %v5030_v8 = vadd.f32 %v5029_v7, %v4860_v0  ;;  %v5031_v9 = vpop.f32.mrb[83].mxu0  ;;  %v5044_v12 = vmax.f32 %v5026_v4, 0.0  ;;  %v16444_v7 = vld [vmem:[%s21457_s5 + $0x6c] ss:$8 sps:$4 sm:$0xff]  }
0x1059   :  { %v5032_v11 = vadd.f32 %v5031_v9, %v4864_v2  ;;  %v5045_v14 = vmax.f32 %v5028_v6, 0.0  ;;  %v16439_v6 = vld [vmem:[%s21457_s5 + $0x58] ss:$8 sps:$4 sm:$0xff]   ;;  %v16447_v9 = vld [vmem:[%s21457_s5 + $0x7c] ss:$8 sps:$4 sm:$0xff]  }
0x105a   :  { %v5046_v13 = vmax.f32 %v5030_v8, 0.0  ;;  %v16442_v8 = vld [vmem:[%s21457_s5 + $0x68] ss:$8 sps:$4 sm:$0xff]  }
0x105b   :  { %v5047_v15 = vmax.f32 %v5032_v11, 0.0  ;;  %v16445_v11 = vld [vmem:[%s21457_s5 + $0x78] ss:$8 sps:$4 sm:$0xff]  }
0x105c   :  { %v5052_v1 = vpack.c.bf16 %v5046_v13, %v5044_v12  ;;  %v16450_v12 = vld [vmem:[%s21457_s5 + $0x8c] ss:$8 sps:$4 sm:$0xff]   ;;  %v16448_v13 = vld [vmem:[%s21457_s5 + $0x88] ss:$8 sps:$4 sm:$0xff]  }
0x105d   :  { %v5053_v16 = vpack.c.bf16 %v5047_v15, %v5045_v14  ;;  %v5035_v17 = vpop.f32.mrb[84].mxu0  ;;  %v16453_v14 = vld [vmem:[%s21457_s5 + $0x9c] ss:$8 sps:$4 sm:$0xff]   ;;  %v16451_v15 = vld [vmem:[%s21457_s5 + $0x98] ss:$8 sps:$4 sm:$0xff]  }
0x105e   :  { %v5036_v18 = vadd.f32 %v5035_v17, %v4860_v0  ;;  %v5037_v19 = vpop.f32.mrb[85].mxu0 }
0x105f   :  { %v5038_v21 = vadd.f32 %v5037_v19, %v4864_v2  ;;  %v5039_v22 = vpop.f32.mrb[86].mxu0  ;;  %5072 = vmatprep.subr.bf16.mxu1 %v5053_v16 }
0x1060   :  { %v5040_v23 = vadd.f32 %v5039_v22, %v4860_v0  ;;  %v5041_v25 = vpop.f32.mrb[87].mxu0  ;;  %5073 = vmatpush1.bf16.msra.mxu1 %v5052_v1  ;;  %v5048_v26 = vmax.f32 %v5036_v18, 0.0  ;;  %v16458_v18 = vld [vmem:[%s21457_s5 + $0x10c] ss:$8 sps:$4 sm:$0xff]  }
0x1061   :  { %v5042_v10 = vadd.f32 %v5041_v25, %v4864_v2  ;;  %v5049_v28 = vmax.f32 %v5038_v21, 0.0 }
0x1062   :  { %v5050_v27 = vmax.f32 %v5040_v23, 0.0 }
0x1063   :  { %v5051_v29 = vmax.f32 %v5042_v10, 0.0 }
0x1064   :  { %v5054_v30 = vpack.c.bf16 %v5050_v27, %v5048_v26 }
0x1065   :  { %v5055_v31 = vpack.c.bf16 %v5051_v29, %v5049_v28 }
0x1066   :  { %v5067_v32 = vsel %vm288_vm1, %v5054_v30, 0 }
0x1067   :  { %14307 = vmatprep.subr.msk.bf16.mxu1 %vm288_vm1, %v5055_v31 }
0x1068   :  { %5075 = vmatpush1.bf16.msra.mxu1 %v5067_v32 }
0x1069   :  { %5125 = vmatprep.subr.bf16.mxu1 %v5053_v16 }
0x106b   :  { %14308 = vmatmul.mubr.msk.bf16.vlgmr.msra.gmra.mrb[52].mxu1 %vm284_vm2, %v16415_v35 }
0x106c   :  { %5126 = vmatpush1.bf16.msra.mxu1 %v5052_v1  ;;  %5157 = vmatprep.mubr.bf16.mxu1 %v17251_v24  ;;  %v14369_v1 = vld [vmem:[%s21457_s5 + $0xa8] sm:$0x33] }
0x106d   :  { %14312 = vmatprep.subr.msk.bf16.mxu1 %vm288_vm1, %v5055_v31  ;;  %v14381_v16 = vcombine.high %v14369_v1, %v14369_v1  ;;  %v14380_v17 = vcombine.low %v14369_v1, %v14369_v1  ;;  %v5446_v1 = vld [vmem:[%s21457_s5 + $0x50] sm:$0x33] }
0x106f   :  { %v5524_v19 = vsel %vm752_vm5, %v14380_v17, 0  ;;  %v14456_v17 = vcombine.high %v5446_v1, %v5446_v1 }
0x1070   :  { %5128 = vmatpush1.bf16.msra.mxu1 %v5067_v32 }
0x1071   :  { %5264 = vmatprep.subr.bf16.mxu1 %v17251_v24 }
0x1073   :  { %14313 = vmatmul.mubr.msk.bf16.vlgmr.msra.gmra.mrb[56].mxu1 %vm284_vm2, %v16416_v36 }
0x1074   :  { %5265 = vmatpush1.bf16.msra.mxu1 %v16417_v38  ;;  %v16456_v38 = vld [vmem:[%s21457_s5 + $0x108] ss:$8 sps:$4 sm:$0xff]  }
0x1075   :  { %5266 = vmatprep.subr.bf16.mxu1 %v17251_v24 }
0x1078   :  { %5267 = vmatpush1.bf16.msra.mxu1 %v16419_v20 }
0x1079   :  { %5268 = vmatprep.subr.bf16.mxu1 %v17251_v24 }
0x107c   :  { %5269 = vmatpush1.bf16.msra.mxu1 %v16421_v39  ;;  %v16461_v39 = vld [vmem:[%s21457_s5 + $0x11c] ss:$8 sps:$4 sm:$0xff]  }
0x107d   :  { %5270 = vmatprep.subr.bf16.mxu1 %v17251_v24 }
0x1080   :  { %5271 = vmatpush1.bf16.msra.mxu1 %v16423_v40  ;;  %v16459_v40 = vld [vmem:[%s21457_s5 + $0x118] ss:$8 sps:$4 sm:$0xff]  }
0x1081   :  { %5272 = vmatprep.subr.bf16.mxu1 %v17251_v24 }
0x1084   :  { %5273 = vmatpush1.bf16.msra.mxu1 %v16425_v41  ;;  %v16464_v41 = vld [vmem:[%s21457_s5 + $0x12c] ss:$8 sps:$4 sm:$0xff]  }
0x1085   :  { %5274 = vmatprep.subr.bf16.mxu1 %v17251_v24 }
0x1088   :  { %5275 = vmatpush1.bf16.msra.mxu1 %v16427_v42  ;;  %v16462_v42 = vld [vmem:[%s21457_s5 + $0x128] ss:$8 sps:$4 sm:$0xff]  }
0x1089   :  { %5276 = vmatprep.subr.bf16.mxu1 %v17251_v24 }
0x108c   :  { %5277 = vmatpush1.bf16.msra.mxu1 %v16429_v43  ;;  %v16467_v43 = vld [vmem:[%s21457_s5 + $0x13c] ss:$8 sps:$4 sm:$0xff]  }
0x108d   :  { %5278 = vmatprep.subr.bf16.mxu1 %v17251_v24 }
0x1090   :  { %5279 = vmatpush1.bf16.msra.mxu1 %v16431_v44  ;;  %v16465_v44 = vld [vmem:[%s21457_s5 + $0x138] ss:$8 sps:$4 sm:$0xff]  }
0x1091   :  { %5280 = vmatprep.subr.bf16.mxu1 %v17251_v24 }
0x1094   :  { %5281 = vmatpush1.bf16.msra.mxu1 %v16433_v46  ;;  %v14405_v46 = vld [vmem:[%s21457_s5 + $0x158] sm:$0x33] }
0x1095   :  { %5282 = vmatprep.subr.bf16.mxu1 %v17251_v24  ;;  %v14416_v49 = vcombine.low %v14405_v46, %v14405_v46 }
0x1097   :  { %v5656_v50 = vsel %vm752_vm5, %v14416_v49, 0 }
0x1098   :  { %5283 = vmatpush1.bf16.msra.mxu1 %v16435_v48  ;;  %v14417_v48 = vcombine.high %v14405_v46, %v14405_v46 }
0x1099   :  { %5284 = vmatprep.subr.bf16.mxu1 %v17251_v24 }
0x109c   :  { %5285 = vmatpush1.bf16.msra.mxu1 %v5262_v52 }
0x109d   :  { %5529 = vmatprep.subr.bf16.mxu1 %v16441_v54  ;;  %v16473_v54 = vld [vmem:[%s21457_s5 + $0x160] ss:$8 sps:$4 sm:$0xff]  }
0x113e   :  { %v5106_v55 = vpop.f32.mrb[52].mxu1 }
0x113f   :  { %v5108_v56 = vpop.f32.mrb[53].mxu1 }
0x1140   :  { %v5110_v57 = vpop.f32.mrb[54].mxu1 }
0x1141   :  { %v5112_v58 = vpop.f32.mrb[55].mxu1 }
0x1146   :  { %v5159_v59 = vpop.f32.mrb[56].mxu1 }
0x1147   :  { %v5168_v60 = vmax.f32 %v5106_v55, %v5159_v59  ;;  %v5161_v61 = vpop.f32.mrb[57].mxu1  ;;  %v16479_v59 = vld [vmem:[%s21457_s5 + $0x180] ss:$8 sps:$4 sm:$0xff]  }
0x1148   :  { %v5169_v62 = vmax.f32 %v5108_v56, %v5161_v61  ;;  %v5163_v63 = vpop.f32.mrb[58].mxu1  ;;  %v16478_v56 = vld [vmem:[%s21457_s5 + $0x174] ss:$8 sps:$4 sm:$0xff]   ;;  %v16482_v61 = vld [vmem:[%s21457_s5 + $0x190] ss:$8 sps:$4 sm:$0xff]  }
0x1149   :  { %v5170_v0 = vmax.f32 %v5110_v57, %v5163_v63  ;;  %v5165_v2 = vpop.f32.mrb[59].mxu1  ;;  %v16476_v57 = vld [vmem:[%s21457_s5 + $0x170] ss:$8 sps:$4 sm:$0xff]  }
0x114a   :  { %v5171_v3 = vmax.f32 %v5112_v58, %v5165_v2  ;;  %v16481_v58 = vld [vmem:[%s21457_s5 + $0x184] ss:$8 sps:$4 sm:$0xff]   ;;  %v14430_v63 = vld [vmem:[%s21457_s5 + $0x1b0] sm:$0x33] }
0x114b   :  { %v5172_v4 = vpack.c.bf16 %v5170_v0, %v5168_v60  ;;  %v16484_v60 = vld [vmem:[%s21457_s5 + $0x194] ss:$8 sps:$4 sm:$0xff]   ;;  %v16485_v0 = vld [vmem:[%s21457_s5 + $0x1a0] ss:$8 sps:$4 sm:$0xff]   ;;  %v14442_v2 = vcombine.high %v14430_v63, %v14430_v63 }
0x114c   :  { %v5173_v5 = vpack.c.bf16 %v5171_v3, %v5169_v62  ;;  %v16487_v62 = vld [vmem:[%s21457_s5 + $0x1a4] ss:$8 sps:$4 sm:$0xff]   ;;  %v14441_v3 = vcombine.low %v14430_v63, %v14430_v63 }
0x114d   :  { %v16529_v63 = vld [vmem:[%s21458_s8 + $0x28] sm:$0xff]  }
0x114e   :  { %14325 = vmatprep.mubr.msk.bf16.mxu1 %vm482_vm4, %v5173_v5  ;;  %14358 = vmatprep.mubr.msk.bf16.mxu0 %vm482_vm4, %v5173_v5  ;;  %v16492_v5 = vld [vmem:[%s21457_s5 + $0x4] ss:$8 sps:$4 sm:$0xff]  }
0x114f   :  { %5297 = vmatmul.mubr.bf16.vlgmr.msra.gmra.mrb[60].mxu1 %v5172_v4  ;;  %5425 = vmatmul.mubr.bf16.vlgmr.msra.gmra.mrb[88].mxu0 %v5172_v4  ;;  %v5776_v4 = vsel %vm752_vm5, %v14441_v3, 0  ;;  %v16532_v3 = vld [vmem:[%s21458_s8 + $0x40] sm:$0xff]  }
0x1150   :  { %5530 = vmatpush1.bf16.msra.mxu1 %v16439_v6  ;;  %5561 = vmatprep.mubr.bf16.mxu1 %v17251_v24  ;;  %v16490_v6 = vld [vmem:[%s21457_s5] ss:$8 sps:$4 sm:$0xff]  }
0x1151   :  { %5531 = vmatprep.subr.bf16.mxu1 %v16444_v7  ;;  %6110 = vmatprep.mubr.bf16.mxu0 %v17251_v24 }
0x1154   :  { %5532 = vmatpush1.bf16.msra.mxu1 %v16442_v8  ;;  %v16495_v8 = vld [vmem:[%s21457_s5 + $0x14] ss:$8 sps:$4 sm:$0xff]  }
0x1155   :  { %5533 = vmatprep.subr.bf16.mxu1 %v16447_v9  ;;  %v16493_v9 = vld [vmem:[%s21457_s5 + $0x10] ss:$8 sps:$4 sm:$0xff]  }
0x1158   :  { %5534 = vmatpush1.bf16.msra.mxu1 %v16445_v11  ;;  %v16498_v11 = vld [vmem:[%s21457_s5 + $0x24] ss:$8 sps:$4 sm:$0xff]  }
0x1159   :  { %5535 = vmatprep.subr.bf16.mxu1 %v16450_v12  ;;  %v16496_v12 = vld [vmem:[%s21457_s5 + $0x20] ss:$8 sps:$4 sm:$0xff]  }
0x115c   :  { %5536 = vmatpush1.bf16.msra.mxu1 %v16448_v13  ;;  %v16501_v13 = vld [vmem:[%s21457_s5 + $0x34] ss:$8 sps:$4 sm:$0xff]  }
0x115d   :  { %5537 = vmatprep.subr.bf16.mxu1 %v16453_v14  ;;  %v16499_v14 = vld [vmem:[%s21457_s5 + $0x30] ss:$8 sps:$4 sm:$0xff]  }
0x1160   :  { %5538 = vmatpush1.bf16.msra.mxu1 %v16451_v15  ;;  %v16504_v15 = vld [vmem:[%s21457_s5 + $0x44] ss:$8 sps:$4 sm:$0xff]  }
0x1161   :  { %14382 = vmatprep.subr.msk.bf16.mxu1 %vm752_vm5, %v14381_v16  ;;  %v16502_v16 = vld [vmem:[%s21457_s5 + $0x40] ss:$8 sps:$4 sm:$0xff]  }
0x1164   :  { %5540 = vmatpush1.bf16.msra.mxu1 %v5524_v19 }
0x1165   :  { %5661 = vmatprep.subr.bf16.mxu1 %v16458_v18  ;;  %v14455_v18 = vcombine.low %v5446_v1, %v5446_v1 }
0x1167   :  { %v5882_v19 = vsel %vm752_vm5, %v14455_v18, 0  ;;  %v16535_v18 = vld [vmem:[%s21458_s8 + $0x58] sm:$0xff]  }
0x1222   :  { %v5298_v21 = vpop.f32.mrb[60].mxu1  ;;  %v5426_v22 = vpop.f32.mrb[88].mxu0 }
0x1223   :  { %v5433_v23 = vmax.f32 %v5298_v21, %v5426_v22  ;;  %v5300_v25 = vpop.f32.mrb[61].mxu1  ;;  %v5428_v10 = vpop.f32.mrb[89].mxu0  ;;  %v16509_v21 = vld [vmem:[%s21457_s5 + $0xb4] ss:$8 sps:$4 sm:$0xff]   ;;  %v16507_v22 = vld [vmem:[%s21457_s5 + $0xb0] ss:$8 sps:$4 sm:$0xff]  }
0x1224   :  { %v5301_v26 = vpop.f32.mrb[62].mxu1  ;;  %v5429_v27 = vpop.f32.mrb[90].mxu0  ;;  %v16510_v25 = vld [vmem:[%s21457_s5 + $0xc0] ss:$8 sps:$4 sm:$0xff]   ;;  %v16515_v10 = vld [vmem:[%s21457_s5 + $0xd4] ss:$8 sps:$4 sm:$0xff]  }
0x1225   :  { %v5434_v28 = vmax.f32 %v5301_v26, %v5429_v27  ;;  %v5303_v29 = vpop.f32.mrb[63].mxu1  ;;  %v5431_v30 = vpop.f32.mrb[91].mxu0  ;;  %v16513_v26 = vld [vmem:[%s21457_s5 + $0xd0] ss:$8 sps:$4 sm:$0xff]   ;;  %v16518_v27 = vld [vmem:[%s21457_s5 + $0xe4] ss:$8 sps:$4 sm:$0xff]  }
0x1226   :  { %v16521_v29 = vld [vmem:[%s21457_s5 + $0xf4] ss:$8 sps:$4 sm:$0xff]   ;;  %v14394_v30 = vld [vmem:[%s21457_s5 + $0x100] sm:$0x33] }
0x1227   :  { %v19000_v31 = vpack.c.bf16 %v5434_v28, %v5433_v23  ;;  %v16512_v23 = vld [vmem:[%s21457_s5 + $0xc4] ss:$8 sps:$4 sm:$0xff]   ;;  %v16516_v28 = vld [vmem:[%s21457_s5 + $0xe0] ss:$8 sps:$4 sm:$0xff]  }
0x1229   :  { %v5461_v32 = vshll.u32 %v19000_v31, 16  ;;  %v5459_v35 = vshrl.u32 %v19000_v31, 16  ;;  %v5716_v7 = vrot.slane %v19000_v31, 2 }
0x122b   :  { %v5463_v36 = vrot.slane %v5461_v32, 1  ;;  %v5594_v51 = vrot.slane %v5459_v35, 1  ;;  %v5595_v52 = vrot.slane %v5461_v32, 2  ;;  %v16519_v32 = vld [vmem:[%s21457_s5 + $0xf0] ss:$8 sps:$4 sm:$0xff]  }
0x122d   :  { %v5464_v20 = vor.u32 %v5463_v36, %v5459_v35  ;;  %v5596_v55 = vor.u32 %v5595_v52, %v5594_v51  ;;  %v14470_v35 = vcombine.high %v14394_v30, %v14394_v30  ;;  %v14469_v36 = vcombine.low %v14394_v30, %v14394_v30  ;;  %v16574_v30 = vld [vmem:[%s21453_s0 + $0x84] ss:$8 sps:$4 sm:$0xff]  }
0x122f   :  { %14383 = vmatmul.mubr.msk.bf16.vlgmr.msra.gmra.mrb[64].mxu1 %vm748_vm6, %v5464_v20  ;;  %v5930_v20 = vrot.slane %v19000_v31, 1 }
0x1230   :  { %5662 = vmatpush1.bf16.msra.mxu1 %v16456_v38  ;;  %5693 = vmatprep.mubr.bf16.mxu1 %v17251_v24  ;;  %v5990_v38 = vsel %vm752_vm5, %v14469_v36, 0  ;;  %v16552_v36 = vld [vmem:[%s21452_s1 + $0x24] ss:$8 sps:$4 sm:$0xff]  }
0x1231   :  { %5663 = vmatprep.subr.bf16.mxu1 %v16461_v39  ;;  %v6046_v39 = vld [vmem:[%s21459_s6] sm:$0x3] }
0x1234   :  { %5664 = vmatpush1.bf16.msra.mxu1 %v16459_v40  ;;  %v6051_v40 = vrot.slane %v6046_v39, %v17433_v33 }
0x1235   :  { %5665 = vmatprep.subr.bf16.mxu1 %v16464_v41  ;;  %v6055_v41 = vrot.slane %v6046_v39, %v17435_v34  ;;  %v16553_v39 = vld [vmem:[%s21452_s1 + $0x30] ss:$8 sps:$4 sm:$0xff]  }
0x1238   :  { %5666 = vmatpush1.bf16.msra.mxu1 %v16462_v42 }
0x1239   :  { %5667 = vmatprep.subr.bf16.mxu1 %v16467_v43 }
0x123c   :  { %5668 = vmatpush1.bf16.msra.mxu1 %v16465_v44 }
0x123d   :  { %5669 = vmatprep.subr.bf16.mxu1 %v16470_v45 }
0x1240   :  { %5670 = vmatpush1.bf16.msra.mxu1 %v16468_v47 }
0x1241   :  { %14418 = vmatprep.subr.msk.bf16.mxu1 %vm752_vm5, %v14417_v48 }
0x1244   :  { %5672 = vmatpush1.bf16.msra.mxu1 %v5656_v50 }
0x1245   :  { %5781 = vmatprep.subr.bf16.mxu1 %v16475_v53 }
0x1247   :  { %14419 = vmatmul.mubr.msk.bf16.vlgmr.msra.gmra.mrb[64].mxu1 %vm748_vm6, %v5596_v55 }
0x1248   :  { %5782 = vmatpush1.bf16.msra.mxu1 %v16473_v54  ;;  %5813 = vmatprep.mubr.bf16.mxu1 %v17251_v24 }
0x1249   :  { %5783 = vmatprep.subr.bf16.mxu1 %v16478_v56  ;;  %v6068_v56 = vld [vmem:[%s21460_s7] sm:$0x7] }
0x124c   :  { %5784 = vmatpush1.bf16.msra.mxu1 %v16476_v57  ;;  %v14475_v57 = vld [vmem:[%s21460_s7 + $0x4] sm:$0x7] }
0x124d   :  { %5785 = vmatprep.subr.bf16.mxu1 %v16481_v58  ;;  %v16524_v58 = vld [vmem:[%s21458_s8] sm:$0xff]  }
0x1250   :  { %5786 = vmatpush1.bf16.msra.mxu1 %v16479_v59  ;;  %v16525_v59 = vld [vmem:[%s21458_s8 + $0x8] sm:$0xff]  }
0x1251   :  { %5787 = vmatprep.subr.bf16.mxu1 %v16484_v60  ;;  %v16526_v60 = vld [vmem:[%s21458_s8 + $0x10] sm:$0xff]  }
0x1254   :  { %5788 = vmatpush1.bf16.msra.mxu1 %v16482_v61  ;;  %v16527_v61 = vld [vmem:[%s21458_s8 + $0x18] sm:$0xff]  }
0x1255   :  { %5789 = vmatprep.subr.bf16.mxu1 %v16487_v62  ;;  %v16528_v62 = vld [vmem:[%s21458_s8 + $0x20] sm:$0xff]  }
0x1258   :  { %5790 = vmatpush1.bf16.msra.mxu1 %v16485_v0  ;;  %v16530_v0 = vld [vmem:[%s21458_s8 + $0x30] sm:$0xff]  }
0x1259   :  { %14443 = vmatprep.subr.msk.bf16.mxu1 %vm752_vm5, %v14442_v2  ;;  %v16531_v2 = vld [vmem:[%s21458_s8 + $0x38] sm:$0xff]  }
0x125c   :  { %5792 = vmatpush1.bf16.msra.mxu1 %v5776_v4  ;;  %v16533_v4 = vld [vmem:[%s21458_s8 + $0x48] sm:$0xff]  }
0x125d   :  { %5887 = vmatprep.subr.bf16.mxu1 %v16492_v5 }
0x125f   :  { %14444 = vmatmul.mubr.msk.bf16.vlgmr.msra.gmra.mrb[64].mxu1 %vm748_vm6, %v5716_v7 }
0x1260   :  { %5888 = vmatpush1.bf16.msra.mxu1 %v16490_v6  ;;  %5919 = vmatprep.mubr.bf16.mxu1 %v17251_v24 }
0x1261   :  { %5889 = vmatprep.subr.bf16.mxu1 %v16495_v8 }
0x1264   :  { %5890 = vmatpush1.bf16.msra.mxu1 %v16493_v9 }
0x1265   :  { %5891 = vmatprep.subr.bf16.mxu1 %v16498_v11 }
0x1268   :  { %5892 = vmatpush1.bf16.msra.mxu1 %v16496_v12 }
0x1269   :  { %5893 = vmatprep.subr.bf16.mxu1 %v16501_v13 }
0x126c   :  { %5894 = vmatpush1.bf16.msra.mxu1 %v16499_v14 }
0x126d   :  { %5895 = vmatprep.subr.bf16.mxu1 %v16504_v15 }
0x1270   :  { %5896 = vmatpush1.bf16.msra.mxu1 %v16502_v16  ;;  %v16534_v16 = vld [vmem:[%s21458_s8 + $0x50] sm:$0xff]  }
0x1271   :  { %14457 = vmatprep.subr.msk.bf16.mxu1 %vm752_vm5, %v14456_v17 }
0x1274   :  { %5898 = vmatpush1.bf16.msra.mxu1 %v5882_v19  ;;  %v16536_v19 = vld [vmem:[%s21458_s8 + $0x60] sm:$0xff]  }
0x1275   :  { %5995 = vmatprep.subr.bf16.mxu1 %v16509_v21  ;;  %v16537_v21 = vld [vmem:[%s21458_s8 + $0x68] sm:$0xff]  }
0x1277   :  { %14458 = vmatmul.mubr.msk.bf16.vlgmr.msra.gmra.mrb[64].mxu1 %vm748_vm6, %v19000_v31 }
0x1278   :  { %5996 = vmatpush1.bf16.msra.mxu1 %v16507_v22  ;;  %6027 = vmatprep.mubr.bf16.mxu1 %v17251_v24  ;;  %v16538_v22 = vld [vmem:[%s21458_s8 + $0x70] sm:$0xff]  }
0x1279   :  { %5997 = vmatprep.subr.bf16.mxu1 %v16512_v23  ;;  %v16539_v23 = vld [vmem:[%s21458_s8 + $0x78] sm:$0xff]  }
0x127c   :  { %5998 = vmatpush1.bf16.msra.mxu1 %v16510_v25  ;;  %v16540_v25 = vld [vmem:[%s21458_s8 + $0x80] sm:$0xff]  }
0x127d   :  { %5999 = vmatprep.subr.bf16.mxu1 %v16515_v10  ;;  %v16541_v10 = vld [vmem:[%s21458_s8 + $0x88] sm:$0xff]  }
0x1280   :  { %6000 = vmatpush1.bf16.msra.mxu1 %v16513_v26  ;;  %v16542_v26 = vld [vmem:[%s21458_s8 + $0x90] sm:$0xff]  }
0x1281   :  { %6001 = vmatprep.subr.bf16.mxu1 %v16518_v27  ;;  %v16543_v27 = vld [vmem:[%s21458_s8 + $0x98] sm:$0xff]  }
0x1284   :  { %6002 = vmatpush1.bf16.msra.mxu1 %v16516_v28  ;;  %v16546_v28 = vld [vmem:[%s21452_s1 + $0x4] ss:$8 sps:$4 sm:$0xff]  }
0x1285   :  { %6003 = vmatprep.subr.bf16.mxu1 %v16521_v29  ;;  %v16544_v29 = vld [vmem:[%s21452_s1] ss:$8 sps:$4 sm:$0xff]  }
0x1288   :  { %6004 = vmatpush1.bf16.msra.mxu1 %v16519_v32  ;;  %v16549_v32 = vld [vmem:[%s21452_s1 + $0x14] ss:$8 sps:$4 sm:$0xff]  }
0x1289   :  { %14471 = vmatprep.subr.msk.bf16.mxu1 %vm752_vm5, %v14470_v35  ;;  %v16547_v35 = vld [vmem:[%s21452_s1 + $0x10] ss:$8 sps:$4 sm:$0xff]  }
0x128c   :  { %6006 = vmatpush1.bf16.msra.mxu1 %v5990_v38  ;;  %v16550_v38 = vld [vmem:[%s21452_s1 + $0x20] ss:$8 sps:$4 sm:$0xff]  }
0x128f   :  { %14472 = vmatmul.mubr.msk.bf16.vlgmr.msra.gmra.mrb[64].mxu1 %vm748_vm6, %v5930_v20  ;;  %v16555_v20 = vld [vmem:[%s21452_s1 + $0x34] ss:$8 sps:$4 sm:$0xff]  }
0x1290   :  { %6691 = vmatprep.mubr.bf16.mxu1 %v17251_v24 }
0x1362   :  { %v6029_v42 = vpop.f32.mrb[64].mxu1 }
0x1363   :  { %v6058_v43 = vadd.f32 %v6051_v40, %v6029_v42  ;;  %v6031_v44 = vpop.f32.mrb[65].mxu1  ;;  %v16561_v42 = vld [vmem:[%s21452_s1 + $0x54] ss:$8 sps:$4 sm:$0xff]  }
0x1364   :  { %v6059_v45 = vadd.f32 %v6055_v41, %v6031_v44  ;;  %v6033_v46 = vpop.f32.mrb[66].mxu1  ;;  %v16564_v44 = vld [vmem:[%s21452_s1 + $0x64] ss:$8 sps:$4 sm:$0xff]  }
0x1365   :  { %v6060_v47 = vadd.f32 %v6051_v40, %v6033_v46  ;;  %v6035_v48 = vpop.f32.mrb[67].mxu1  ;;  %v6062_v49 = vmax.f32 %v6058_v43, 0.0  ;;  %v16558_v40 = vld [vmem:[%s21452_s1 + $0x44] ss:$8 sps:$4 sm:$0xff]   ;;  %v16559_v43 = vld [vmem:[%s21452_s1 + $0x50] ss:$8 sps:$4 sm:$0xff]  }
0x1366   :  { %v6061_v31 = vadd.f32 %v6055_v41, %v6035_v48  ;;  %v6063_v51 = vmax.f32 %v6059_v45, 0.0  ;;  %v16556_v41 = vld [vmem:[%s21452_s1 + $0x40] ss:$8 sps:$4 sm:$0xff]   ;;  %v16567_v46 = vld [vmem:[%s21452_s1 + $0x74] ss:$8 sps:$4 sm:$0xff]  }
0x1367   :  { %v6064_v50 = vmax.f32 %v6060_v47, 0.0  ;;  %v16562_v45 = vld [vmem:[%s21452_s1 + $0x60] ss:$8 sps:$4 sm:$0xff]   ;;  %v16565_v47 = vld [vmem:[%s21452_s1 + $0x70] ss:$8 sps:$4 sm:$0xff]  }
0x1368   :  { %v6065_v52 = vmax.f32 %v6061_v31, 0.0  ;;  %v16570_v48 = vld [vmem:[%s21452_s1 + $0x84] ss:$8 sps:$4 sm:$0xff]   ;;  %v16568_v31 = vld [vmem:[%s21452_s1 + $0x80] ss:$8 sps:$4 sm:$0xff]  }
0x1369   :  { %v6066_v53 = vpack.c.bf16 %v6064_v50, %v6062_v49  ;;  %v16573_v49 = vld [vmem:[%s21452_s1 + $0x94] ss:$8 sps:$4 sm:$0xff]   ;;  %v16571_v50 = vld [vmem:[%s21452_s1 + $0x90] ss:$8 sps:$4 sm:$0xff]  }
0x136a   :  { %v6067_v54 = vpack.c.bf16 %v6065_v52, %v6063_v51  ;;  %v16576_v51 = vld [vmem:[%s21453_s0 + $0x80] ss:$8 sps:$4 sm:$0xff]   ;;  %v16577_v52 = vld [vmem:[%s21453_s0 + $0x94] ss:$8 sps:$4 sm:$0x3f]  }
0x136b   :  { %v6073_v55 = vsel %vm1306_vm7, %v6066_v53, 0  ;;  %v16579_v53 = vld [vmem:[%s21453_s0 + $0x90] ss:$8 sps:$4 sm:$0x3f]  }
0x136c   :  { %14473 = vmatprep.subr.msk.bf16.mxu0 %vm1306_vm7, %v6067_v54 }
0x136d   :  { %6079 = vmatpush1.bf16.msra.mxu0 %v6073_v55 }
0x136e   :  { %14476 = vmatprep.subr.msk.bf16.mxu0 %vm1306_vm7, %v6067_v54  ;;  %v16583_v54 = vld [vmem:[%s21455_s4 + $0x54] sm:$0xff]  }
0x1370   :  { %14474 = vmatmul.mubr.msk.bf16.vlgmr.msra.gmra.mrb[92].mxu0 %vm1302_vm8, %v6068_v56  ;;  %v16587_v56 = vld [vmem:[%s21455_s4 + $0x64] sm:$0xff]  }
0x1371   :  { %6124 = vmatpush1.bf16.msra.mxu0 %v6073_v55  ;;  %6155 = vmatprep.mubr.bf16.mxu0 %v17251_v24  ;;  %v16585_v55 = vld [vmem:[%s21455_s4 + $0x5c] sm:$0xff]  }
0x1372   :  { %6251 = vmatprep.subr.bf16.mxu0 %v17251_v24 }
0x1378   :  { %14477 = vmatmul.mubr.msk.bf16.vlgmr.msra.gmra.mrb[96].mxu0 %vm1302_vm8, %v14475_v57  ;;  %v16589_v57 = vld [vmem:[%s21455_s4 + $0x6c] sm:$0xff]  }
0x1379   :  { %6252 = vmatpush1.bf16.msra.mxu0 %v16524_v58  ;;  %v16591_v58 = vld [vmem:[%s21455_s4 + $0x74] sm:$0xff]  }
0x137a   :  { %6253 = vmatprep.subr.bf16.mxu0 %v17251_v24 }
0x137d   :  { %6254 = vmatpush1.bf16.msra.mxu0 %v16525_v59 }
0x137e   :  { %6255 = vmatprep.subr.bf16.mxu0 %v17251_v24 }
0x1381   :  { %6256 = vmatpush1.bf16.msra.mxu0 %v16526_v60 }
0x1382   :  { %6257 = vmatprep.subr.bf16.mxu0 %v17251_v24 }
0x1385   :  { %6258 = vmatpush1.bf16.msra.mxu0 %v16527_v61 }
0x1386   :  { %6259 = vmatprep.subr.bf16.mxu0 %v17251_v24 }
0x1389   :  { %6260 = vmatpush1.bf16.msra.mxu0 %v16528_v62 }
0x138a   :  { %6261 = vmatprep.subr.bf16.mxu0 %v17251_v24 }
0x138d   :  { %6262 = vmatpush1.bf16.msra.mxu0 %v16529_v63  ;;  %v16593_v63 = vld [vmem:[%s21455_s4 + $0x7c] sm:$0xff]  }
0x138e   :  { %6263 = vmatprep.subr.bf16.mxu0 %v17251_v24 }
0x1391   :  { %6264 = vmatpush1.bf16.msra.mxu0 %v16530_v0  ;;  %v16595_v0 = vld [vmem:[%s21455_s4 + $0x84] sm:$0xff]  }
0x1392   :  { %6265 = vmatprep.subr.bf16.mxu0 %v17251_v24 }
0x1395   :  { %6266 = vmatpush1.bf16.msra.mxu0 %v16531_v2 }
0x1396   :  { %6267 = vmatprep.subr.bf16.mxu0 %v17251_v24 }
0x1399   :  { %6268 = vmatpush1.bf16.msra.mxu0 %v16532_v3 }
0x139a   :  { %6269 = vmatprep.subr.bf16.mxu0 %v17251_v24 }
0x139d   :  { %6270 = vmatpush1.bf16.msra.mxu0 %v16533_v4 }
0x139e   :  { %6371 = vmatprep.subr.bf16.mxu0 %v17251_v24 }
0x1443   :  { %v6112_v5 = vpop.f32.mrb[92].mxu0 }
0x1444   :  { %v6114_v6 = vpop.f32.mrb[93].mxu0 }
0x1445   :  { %v6116_v7 = vpop.f32.mrb[94].mxu0 }
0x1446   :  { %v6117_v8 = vpop.f32.mrb[95].mxu0 }
0x144b   :  { %v6157_v9 = vpop.f32.mrb[96].mxu0 }
0x144c   :  { %v6164_v11 = vmax.f32 %v6112_v5, %v6157_v9  ;;  %v6159_v12 = vpop.f32.mrb[97].mxu0  ;;  %v6414_v5 = vld [vmem:[#allocation2 + $0xc] sm:$0x7] }
0x144d   :  { %v6165_v13 = vmax.f32 %v6114_v6, %v6159_v12  ;;  %v6161_v14 = vpop.f32.mrb[98].mxu0 }
0x144e   :  { %v6162_v15 = vpop.f32.mrb[99].mxu0  ;;  %v6166_v17 = vpack.c.bf16 %v6164_v11, %v6164_v11  ;;  %v6442_v11 = vld [vmem:[%s21456_s2] sm:$0x3] }
0x144f   :  { %v6167_v1 = vpack.c.bf16 %v6165_v13, %v6165_v13  ;;  %v6447_v12 = vrot.slane %v6442_v11, %v17433_v33  ;;  %v6451_v13 = vrot.slane %v6442_v11, %v17435_v34 }
0x1451   :  { %14488 = vmatprep.mubr.msk.bf16.mxu0 %vm205_vm0, %v6167_v1 }
0x1452   :  { %6284 = vmatmul.mubr.bf16.vlgmr.msra.gmra.mrb[100].mxu0 %v6166_v17 }
0x1453   :  { %6372 = vmatpush1.bf16.msra.mxu0 %v16534_v16  ;;  %14519 = vmatprep.mubr.msk.bf16.mxu0 %vm205_vm0, %v6167_v1 }
0x1454   :  { %6373 = vmatprep.subr.bf16.mxu0 %v17251_v24 }
0x1457   :  { %6374 = vmatpush1.bf16.msra.mxu0 %v16535_v18 }
0x1458   :  { %6375 = vmatprep.subr.bf16.mxu0 %v17251_v24 }
0x145b   :  { %6376 = vmatpush1.bf16.msra.mxu0 %v16536_v19 }
0x145c   :  { %6377 = vmatprep.subr.bf16.mxu0 %v17251_v24 }
0x145f   :  { %6378 = vmatpush1.bf16.msra.mxu0 %v16537_v21 }
0x1460   :  { %6379 = vmatprep.subr.bf16.mxu0 %v17251_v24 }
0x1463   :  { %6380 = vmatpush1.bf16.msra.mxu0 %v16538_v22 }
0x1464   :  { %6381 = vmatprep.subr.bf16.mxu0 %v17251_v24 }
0x1467   :  { %6382 = vmatpush1.bf16.msra.mxu0 %v16539_v23 }
0x1468   :  { %6383 = vmatprep.subr.bf16.mxu0 %v17251_v24 }
0x146b   :  { %6384 = vmatpush1.bf16.msra.mxu0 %v16540_v25 }
0x146c   :  { %6385 = vmatprep.subr.bf16.mxu0 %v17251_v24 }
0x146f   :  { %6386 = vmatpush1.bf16.msra.mxu0 %v16541_v10 }
0x1470   :  { %6387 = vmatprep.subr.bf16.mxu0 %v17251_v24 }
0x1473   :  { %6388 = vmatpush1.bf16.msra.mxu0 %v16542_v26 }
0x1474   :  { %6389 = vmatprep.subr.bf16.mxu0 %v17251_v24 }
0x1477   :  { %6390 = vmatpush1.bf16.msra.mxu0 %v16543_v27 }
0x1478   :  { %6578 = vmatprep.subr.bf16.mxu0 %v16546_v28 }
0x147a   :  { %6404 = vmatmul.mubr.bf16.vlgmr.msra.gmra.mrb[104].mxu0 %v6166_v17 }
0x147b   :  { %6579 = vmatpush1.bf16.msra.mxu0 %v16544_v29  ;;  %14548 = vmatprep.mubr.msk.bf16.mxu0 %vm205_vm0, %v16574_v30 }
0x147c   :  { %6580 = vmatprep.subr.bf16.mxu0 %v16549_v32 }
0x147f   :  { %6581 = vmatpush1.bf16.msra.mxu0 %v16547_v35 }
0x1480   :  { %6582 = vmatprep.subr.bf16.mxu0 %v16552_v36 }
0x1483   :  { %6583 = vmatpush1.bf16.msra.mxu0 %v16550_v38 }
0x1484   :  { %6584 = vmatprep.subr.bf16.mxu0 %v16555_v20 }
0x1487   :  { %6585 = vmatpush1.bf16.msra.mxu0 %v16553_v39 }
0x1488   :  { %6586 = vmatprep.subr.bf16.mxu0 %v16558_v40 }
0x148b   :  { %6587 = vmatpush1.bf16.msra.mxu0 %v16556_v41 }
0x148c   :  { %6588 = vmatprep.subr.bf16.mxu0 %v16561_v42 }
0x148f   :  { %6589 = vmatpush1.bf16.msra.mxu0 %v16559_v43 }
0x1490   :  { %6590 = vmatprep.subr.bf16.mxu0 %v16564_v44 }
0x1493   :  { %6591 = vmatpush1.bf16.msra.mxu0 %v16562_v45 }
0x1494   :  { %6592 = vmatprep.subr.bf16.mxu0 %v16567_v46  ;;  %v16580_v46 = vld [vmem:[%s21454_s3] sm:$0x7f]  }
0x1497   :  { %6593 = vmatpush1.bf16.msra.mxu0 %v16565_v47  ;;  %v16581_v47 = vld [vmem:[%s21454_s3 + $0x8] sm:$0x7f]  }
0x1498   :  { %6594 = vmatprep.subr.bf16.mxu0 %v16570_v48  ;;  %v16582_v48 = vld [vmem:[%s21455_s4] sm:$0xff]  }
0x149b   :  { %6595 = vmatpush1.bf16.msra.mxu0 %v16568_v31  ;;  %v16584_v31 = vld [vmem:[%s21455_s4 + $0x8] sm:$0xff]  }
0x149c   :  { %6596 = vmatprep.subr.bf16.mxu0 %v16573_v49  ;;  %v16586_v49 = vld [vmem:[%s21455_s4 + $0x10] sm:$0xff]  }
0x149f   :  { %6597 = vmatpush1.bf16.msra.mxu0 %v16571_v50  ;;  %v16588_v50 = vld [vmem:[%s21455_s4 + $0x18] sm:$0xff]  }
0x14a0   :  { %6979 = vmatprep.subr.bf16.mxu0 %v17251_v24 }
0x14a2   :  { %6611 = vmatmul.mubr.bf16.vlgmr.msra.gmra.mrb[108].mxu0 %v16576_v51  ;;  %v16590_v51 = vld [vmem:[%s21455_s4 + $0x20] sm:$0xff]  }
0x14a3   :  { %14549 = vmatprep.mubr.msk.bf16.mxu0 %vm205_vm0, %v16577_v52  ;;  %6980 = vmatpush1.bf16.msra.mxu0 %v16583_v54  ;;  %v16592_v52 = vld [vmem:[%s21455_s4 + $0x28] sm:$0xff]   ;;  %v16596_v54 = vld [vmem:[%s21455_s4 + $0x38] sm:$0xff]  }
0x14a4   :  { %6981 = vmatprep.subr.bf16.mxu0 %v17251_v24 }
0x14a7   :  { %6982 = vmatpush1.bf16.msra.mxu0 %v16585_v55  ;;  %v16597_v55 = vld [vmem:[%s21455_s4 + $0x8c] sm:$0xff]  }
0x14a8   :  { %6983 = vmatprep.subr.bf16.mxu0 %v17251_v24 }
0x14aa   :  { %6621 = vmatmul.mubr.bf16.gmra.mrb[112].mxu0 %v16579_v53  ;;  %v16594_v53 = vld [vmem:[%s21455_s4 + $0x30] sm:$0xff]  }
0x14ab   :  { %6984 = vmatpush1.bf16.msra.mxu0 %v16587_v56  ;;  %v16598_v56 = vld [vmem:[%s21455_s4 + $0x40] sm:$0xff]  }
0x14ac   :  { %6985 = vmatprep.subr.bf16.mxu0 %v17251_v24 }
0x14af   :  { %6986 = vmatpush1.bf16.msra.mxu0 %v16589_v57  ;;  %v16599_v57 = vld [vmem:[%s21455_s4 + $0x94] sm:$0xff]  }
0x14b0   :  { %6987 = vmatprep.subr.bf16.mxu0 %v17251_v24 }
0x14b3   :  { %6988 = vmatpush1.bf16.msra.mxu0 %v16591_v58  ;;  %v16600_v58 = vld [vmem:[%s21455_s4 + $0x48] sm:$0xff]  }
0x14b4   :  { %6989 = vmatprep.subr.bf16.mxu0 %v17251_v24 }
0x14b7   :  { %6990 = vmatpush1.bf16.msra.mxu0 %v16593_v63 }
0x14b8   :  { %6991 = vmatprep.subr.bf16.mxu0 %v17251_v24 }
0x14bb   :  { %6992 = vmatpush1.bf16.msra.mxu0 %v16595_v0  ;;  %v16606_v0 = vld [vmem:[%s21457_s5 + $0x5c] ss:$8 sps:$4 sm:$0xff]  }
0x14bc   :  { %6993 = vmatprep.subr.bf16.mxu0 %v17251_v24 }
0x14bf   :  { %6994 = vmatpush1.bf16.msra.mxu0 %v16597_v55  ;;  %v16635_v55 = vld [vmem:[%s21457_s5 + $0x14c] ss:$8 sps:$4 sm:$0xff]  }
0x14c0   :  { %6995 = vmatprep.subr.bf16.mxu0 %v17251_v24 }
0x14c3   :  { %6996 = vmatpush1.bf16.msra.mxu0 %v16599_v57  ;;  %v16633_v57 = vld [vmem:[%s21457_s5 + $0x148] ss:$8 sps:$4 sm:$0xff]  }
0x14c4   :  { %6997 = vmatprep.subr.bf16.mxu0 %v17251_v24 }
0x1525   :  { %v6285_v59 = vpop.f32.mrb[100].mxu0 }
0x1526   :  { %v6287_v60 = vpop.f32.mrb[101].mxu0 }
0x1527   :  { %v6288_v61 = vpop.f32.mrb[102].mxu0  ;;  %v16602_v60 = vld [vmem:[%s21455_s4 + $0x50] ss:$0 sps:$4 sm:$0xff]  }
0x1528   :  { %v6289_v62 = vpop.f32.mrb[103].mxu0  ;;  %v16603_v61 = vld [vmem:[%s21455_s4 + $0xa4] ss:$0 sps:$4 sm:$0xff]  }
0x1529   :  { %v6849_v62 = vsel %vm486_vm3, %v16602_v60, 0  ;;  %v6977_v63 = vsel %vm486_vm3, %v16603_v61, 0 }
0x154d   :  { %v6405_v2 = vpop.f32.mrb[104].mxu0 }
0x154e   :  { %v6411_v3 = vmax.f32 %v6285_v59, %v6405_v2  ;;  %v6407_v4 = vpop.f32.mrb[105].mxu0  ;;  %v16601_v59 = vld [vmem:[%s21455_s4 + $0x9c] sm:$0xff]  }
0x154f   :  { %v6408_v6 = vpop.f32.mrb[106].mxu0  ;;  %6998 = vmatpush1.bf16.msra.mxu0 %v16601_v59 }
0x1550   :  { %v6412_v7 = vpack.c.bf16 %v6411_v3, %v6411_v3  ;;  %v6409_v8 = vpop.f32.mrb[107].mxu0  ;;  %6999 = vmatprep.subr.bf16.mxu0 %v17251_v24 }
0x1552   :  { %v6415_v9 = vsel %vm17918_vm11, %v6412_v7, %v6414_v5 }
0x1553   :  { %6416 = vst [vmem:[#allocation2 + $0xc] sm:$0x7] %v6415_v9  ;;  %7000 = vmatpush1.bf16.msra.mxu0 %v6977_v63  ;;  %v16640_v63 = vld [vmem:[%s21457_s5 + $0x164] ss:$8 sps:$4 sm:$0xff]  }
0x1575   :  { %v6612_v14 = vpop.f32.mrb[108].mxu0 }
0x1576   :  { %v6613_v15 = vadd.f32 %v6612_v14, %v6447_v12  ;;  %v6614_v1 = vpop.f32.mrb[109].mxu0 }
0x1577   :  { %v6615_v16 = vadd.f32 %v6614_v1, %v6451_v13  ;;  %v6616_v17 = vpop.f32.mrb[110].mxu0 }
0x1578   :  { %v6617_v18 = vadd.f32 %v6616_v17, %v6447_v12  ;;  %v6618_v19 = vpop.f32.mrb[111].mxu0  ;;  %v6631_v22 = vmax.f32 %v6613_v15, 0.0  ;;  %v16609_v17 = vld [vmem:[%s21457_s5 + $0x6c] ss:$8 sps:$4 sm:$0xff]  }
0x1579   :  { %v6619_v21 = vadd.f32 %v6618_v19, %v6451_v13  ;;  %v6632_v25 = vmax.f32 %v6615_v16, 0.0  ;;  %v16604_v16 = vld [vmem:[%s21457_s5 + $0x58] ss:$8 sps:$4 sm:$0xff]   ;;  %v16612_v19 = vld [vmem:[%s21457_s5 + $0x7c] ss:$8 sps:$4 sm:$0xff]  }
0x157a   :  { %v6633_v23 = vmax.f32 %v6617_v18, 0.0  ;;  %v16607_v18 = vld [vmem:[%s21457_s5 + $0x68] ss:$8 sps:$4 sm:$0xff]  }
0x157b   :  { %v6634_v10 = vmax.f32 %v6619_v21, 0.0  ;;  %v16610_v21 = vld [vmem:[%s21457_s5 + $0x78] ss:$8 sps:$4 sm:$0xff]  }
0x157c   :  { %v6639_v26 = vpack.c.bf16 %v6633_v23, %v6631_v22  ;;  %v16615_v22 = vld [vmem:[%s21457_s5 + $0x8c] ss:$8 sps:$4 sm:$0xff]   ;;  %v16613_v23 = vld [vmem:[%s21457_s5 + $0x88] ss:$8 sps:$4 sm:$0xff]  }
0x157d   :  { %v6640_v27 = vpack.c.bf16 %v6634_v10, %v6632_v25  ;;  %v6622_v28 = vpop.f32.mrb[112].mxu0  ;;  %v16618_v25 = vld [vmem:[%s21457_s5 + $0x9c] ss:$8 sps:$4 sm:$0xff]   ;;  %v16616_v10 = vld [vmem:[%s21457_s5 + $0x98] ss:$8 sps:$4 sm:$0xff]  }
0x157e   :  { %v6623_v29 = vadd.f32 %v6622_v28, %v6447_v12  ;;  %v6624_v30 = vpop.f32.mrb[113].mxu0 }
0x157f   :  { %v6625_v32 = vadd.f32 %v6624_v30, %v6451_v13  ;;  %v6626_v35 = vpop.f32.mrb[114].mxu0  ;;  %6659 = vmatprep.subr.bf16.mxu1 %v6640_v27 }
0x1580   :  { %v6627_v36 = vadd.f32 %v6626_v35, %v6447_v12  ;;  %v6628_v38 = vpop.f32.mrb[115].mxu0  ;;  %6660 = vmatpush1.bf16.msra.mxu1 %v6639_v26  ;;  %v6635_v39 = vmax.f32 %v6623_v29, 0.0  ;;  %v16623_v29 = vld [vmem:[%s21457_s5 + $0x10c] ss:$8 sps:$4 sm:$0xff]  }
0x1581   :  { %v6629_v20 = vadd.f32 %v6628_v38, %v6451_v13  ;;  %v6636_v41 = vmax.f32 %v6625_v32, 0.0 }
0x1582   :  { %v6637_v40 = vmax.f32 %v6627_v36, 0.0 }
0x1583   :  { %v6638_v42 = vmax.f32 %v6629_v20, 0.0 }
0x1584   :  { %v6641_v43 = vpack.c.bf16 %v6637_v40, %v6635_v39 }
0x1585   :  { %v6642_v44 = vpack.c.bf16 %v6638_v42, %v6636_v41 }
0x1586   :  { %v6654_v45 = vsel %vm288_vm1, %v6641_v43, 0 }
0x1587   :  { %14551 = vmatprep.subr.msk.bf16.mxu1 %vm288_vm1, %v6642_v44 }
0x1588   :  { %6662 = vmatpush1.bf16.msra.mxu1 %v6654_v45 }
0x1589   :  { %6712 = vmatprep.subr.bf16.mxu1 %v6640_v27 }
0x158b   :  { %14552 = vmatmul.mubr.msk.bf16.vlgmr.msra.gmra.mrb[68].mxu1 %vm284_vm2, %v16580_v46 }
0x158c   :  { %6713 = vmatpush1.bf16.msra.mxu1 %v6639_v26  ;;  %6744 = vmatprep.mubr.bf16.mxu1 %v17251_v24  ;;  %v14613_v26 = vld [vmem:[%s21457_s5 + $0xa8] sm:$0x33] }
0x158d   :  { %14556 = vmatprep.subr.msk.bf16.mxu1 %vm288_vm1, %v6642_v44  ;;  %v14625_v27 = vcombine.high %v14613_v26, %v14613_v26  ;;  %v14624_v28 = vcombine.low %v14613_v26, %v14613_v26  ;;  %v7033_v26 = vld [vmem:[%s21457_s5 + $0x50] sm:$0x33] }
0x158f   :  { %v7111_v30 = vsel %vm752_vm5, %v14624_v28, 0  ;;  %v14700_v28 = vcombine.high %v7033_v26, %v7033_v26 }
0x1590   :  { %6715 = vmatpush1.bf16.msra.mxu1 %v6654_v45 }
0x1591   :  { %6851 = vmatprep.subr.bf16.mxu1 %v17251_v24 }
0x1593   :  { %14557 = vmatmul.mubr.msk.bf16.vlgmr.msra.gmra.mrb[72].mxu1 %vm284_vm2, %v16581_v47 }
0x1594   :  { %6852 = vmatpush1.bf16.msra.mxu1 %v16582_v48  ;;  %v16621_v48 = vld [vmem:[%s21457_s5 + $0x108] ss:$8 sps:$4 sm:$0xff]  }
0x1595   :  { %6853 = vmatprep.subr.bf16.mxu1 %v17251_v24 }
0x1598   :  { %6854 = vmatpush1.bf16.msra.mxu1 %v16584_v31 }
0x1599   :  { %6855 = vmatprep.subr.bf16.mxu1 %v17251_v24 }
0x159c   :  { %6856 = vmatpush1.bf16.msra.mxu1 %v16586_v49  ;;  %v16626_v49 = vld [vmem:[%s21457_s5 + $0x11c] ss:$8 sps:$4 sm:$0xff]  }
0x159d   :  { %6857 = vmatprep.subr.bf16.mxu1 %v17251_v24 }
0x15a0   :  { %6858 = vmatpush1.bf16.msra.mxu1 %v16588_v50  ;;  %v16624_v50 = vld [vmem:[%s21457_s5 + $0x118] ss:$8 sps:$4 sm:$0xff]  }
0x15a1   :  { %6859 = vmatprep.subr.bf16.mxu1 %v17251_v24 }
0x15a4   :  { %6860 = vmatpush1.bf16.msra.mxu1 %v16590_v51  ;;  %v16629_v51 = vld [vmem:[%s21457_s5 + $0x12c] ss:$8 sps:$4 sm:$0xff]  }
0x15a5   :  { %6861 = vmatprep.subr.bf16.mxu1 %v17251_v24 }
0x15a8   :  { %6862 = vmatpush1.bf16.msra.mxu1 %v16592_v52  ;;  %v16627_v52 = vld [vmem:[%s21457_s5 + $0x128] ss:$8 sps:$4 sm:$0xff]  }
0x15a9   :  { %6863 = vmatprep.subr.bf16.mxu1 %v17251_v24 }
0x15ac   :  { %6864 = vmatpush1.bf16.msra.mxu1 %v16594_v53  ;;  %v16632_v53 = vld [vmem:[%s21457_s5 + $0x13c] ss:$8 sps:$4 sm:$0xff]  }
0x15ad   :  { %6865 = vmatprep.subr.bf16.mxu1 %v17251_v24 }
0x15b0   :  { %6866 = vmatpush1.bf16.msra.mxu1 %v16596_v54  ;;  %v16630_v54 = vld [vmem:[%s21457_s5 + $0x138] ss:$8 sps:$4 sm:$0xff]  }
0x15b1   :  { %6867 = vmatprep.subr.bf16.mxu1 %v17251_v24 }
0x15b4   :  { %6868 = vmatpush1.bf16.msra.mxu1 %v16598_v56  ;;  %v14649_v56 = vld [vmem:[%s21457_s5 + $0x158] sm:$0x33] }
0x15b5   :  { %6869 = vmatprep.subr.bf16.mxu1 %v17251_v24  ;;  %v14660_v59 = vcombine.low %v14649_v56, %v14649_v56 }
0x15b7   :  { %v7243_v60 = vsel %vm752_vm5, %v14660_v59, 0 }
0x15b8   :  { %6870 = vmatpush1.bf16.msra.mxu1 %v16600_v58  ;;  %v14661_v58 = vcombine.high %v14649_v56, %v14649_v56 }
0x15b9   :  { %6871 = vmatprep.subr.bf16.mxu1 %v17251_v24 }
0x15bc   :  { %6872 = vmatpush1.bf16.msra.mxu1 %v6849_v62 }
0x15bd   :  { %7116 = vmatprep.subr.bf16.mxu1 %v16606_v0  ;;  %v16638_v0 = vld [vmem:[%s21457_s5 + $0x160] ss:$8 sps:$4 sm:$0xff]  }
0x165e   :  { %v6693_v2 = vpop.f32.mrb[68].mxu1 }
0x165f   :  { %v6695_v3 = vpop.f32.mrb[69].mxu1 }
0x1660   :  { %v6697_v4 = vpop.f32.mrb[70].mxu1 }
0x1661   :  { %v6699_v5 = vpop.f32.mrb[71].mxu1 }
0x1666   :  { %v6746_v6 = vpop.f32.mrb[72].mxu1 }
0x1667   :  { %v6755_v7 = vmax.f32 %v6693_v2, %v6746_v6  ;;  %v6748_v8 = vpop.f32.mrb[73].mxu1  ;;  %v16644_v6 = vld [vmem:[%s21457_s5 + $0x180] ss:$8 sps:$4 sm:$0xff]  }
0x1668   :  { %v6756_v9 = vmax.f32 %v6695_v3, %v6748_v8  ;;  %v6750_v11 = vpop.f32.mrb[74].mxu1  ;;  %v16643_v3 = vld [vmem:[%s21457_s5 + $0x174] ss:$8 sps:$4 sm:$0xff]   ;;  %v16647_v8 = vld [vmem:[%s21457_s5 + $0x190] ss:$8 sps:$4 sm:$0xff]  }
0x1669   :  { %v6757_v12 = vmax.f32 %v6697_v4, %v6750_v11  ;;  %v6752_v13 = vpop.f32.mrb[75].mxu1  ;;  %v16641_v4 = vld [vmem:[%s21457_s5 + $0x170] ss:$8 sps:$4 sm:$0xff]  }
0x166a   :  { %v6758_v14 = vmax.f32 %v6699_v5, %v6752_v13  ;;  %v16646_v5 = vld [vmem:[%s21457_s5 + $0x184] ss:$8 sps:$4 sm:$0xff]   ;;  %v14674_v11 = vld [vmem:[%s21457_s5 + $0x1b0] sm:$0x33] }
0x166b   :  { %v6759_v15 = vpack.c.bf16 %v6757_v12, %v6755_v7  ;;  %v16649_v7 = vld [vmem:[%s21457_s5 + $0x194] ss:$8 sps:$4 sm:$0xff]   ;;  %v16650_v12 = vld [vmem:[%s21457_s5 + $0x1a0] ss:$8 sps:$4 sm:$0xff]   ;;  %v14686_v13 = vcombine.high %v14674_v11, %v14674_v11 }
0x166c   :  { %v6760_v1 = vpack.c.bf16 %v6758_v14, %v6756_v9  ;;  %v16652_v9 = vld [vmem:[%s21457_s5 + $0x1a4] ss:$8 sps:$4 sm:$0xff]   ;;  %v14685_v14 = vcombine.low %v14674_v11, %v14674_v11 }
0x166d   :  { %v16694_v11 = vld [vmem:[%s21458_s8 + $0x28] sm:$0xff]  }
0x166e   :  { %14569 = vmatprep.mubr.msk.bf16.mxu1 %vm482_vm4, %v6760_v1  ;;  %14602 = vmatprep.mubr.msk.bf16.mxu0 %vm482_vm4, %v6760_v1  ;;  %v16657_v1 = vld [vmem:[%s21457_s5 + $0x4] ss:$8 sps:$4 sm:$0xff]  }
0x166f   :  { %6884 = vmatmul.mubr.bf16.vlgmr.msra.gmra.mrb[76].mxu1 %v6759_v15  ;;  %7012 = vmatmul.mubr.bf16.vlgmr.msra.gmra.mrb[116].mxu0 %v6759_v15  ;;  %v7363_v15 = vsel %vm752_vm5, %v14685_v14, 0  ;;  %v16697_v14 = vld [vmem:[%s21458_s8 + $0x40] sm:$0xff]  }
0x1670   :  { %7117 = vmatpush1.bf16.msra.mxu1 %v16604_v16  ;;  %7148 = vmatprep.mubr.bf16.mxu1 %v17251_v24  ;;  %v16655_v16 = vld [vmem:[%s21457_s5] ss:$8 sps:$4 sm:$0xff]  }
0x1671   :  { %7118 = vmatprep.subr.bf16.mxu1 %v16609_v17  ;;  %7697 = vmatprep.mubr.bf16.mxu0 %v17251_v24 }
0x1674   :  { %7119 = vmatpush1.bf16.msra.mxu1 %v16607_v18  ;;  %v16660_v18 = vld [vmem:[%s21457_s5 + $0x14] ss:$8 sps:$4 sm:$0xff]  }
0x1675   :  { %7120 = vmatprep.subr.bf16.mxu1 %v16612_v19  ;;  %v16658_v19 = vld [vmem:[%s21457_s5 + $0x10] ss:$8 sps:$4 sm:$0xff]  }
0x1678   :  { %7121 = vmatpush1.bf16.msra.mxu1 %v16610_v21  ;;  %v16663_v21 = vld [vmem:[%s21457_s5 + $0x24] ss:$8 sps:$4 sm:$0xff]  }
0x1679   :  { %7122 = vmatprep.subr.bf16.mxu1 %v16615_v22  ;;  %v16661_v22 = vld [vmem:[%s21457_s5 + $0x20] ss:$8 sps:$4 sm:$0xff]  }
0x167c   :  { %7123 = vmatpush1.bf16.msra.mxu1 %v16613_v23  ;;  %v16666_v23 = vld [vmem:[%s21457_s5 + $0x34] ss:$8 sps:$4 sm:$0xff]  }
0x167d   :  { %7124 = vmatprep.subr.bf16.mxu1 %v16618_v25  ;;  %v16664_v25 = vld [vmem:[%s21457_s5 + $0x30] ss:$8 sps:$4 sm:$0xff]  }
0x1680   :  { %7125 = vmatpush1.bf16.msra.mxu1 %v16616_v10  ;;  %v16669_v10 = vld [vmem:[%s21457_s5 + $0x44] ss:$8 sps:$4 sm:$0xff]  }
0x1681   :  { %14626 = vmatprep.subr.msk.bf16.mxu1 %vm752_vm5, %v14625_v27  ;;  %v16667_v27 = vld [vmem:[%s21457_s5 + $0x40] ss:$8 sps:$4 sm:$0xff]  }
0x1684   :  { %7127 = vmatpush1.bf16.msra.mxu1 %v7111_v30 }
0x1685   :  { %7248 = vmatprep.subr.bf16.mxu1 %v16623_v29  ;;  %v14699_v29 = vcombine.low %v7033_v26, %v7033_v26 }
0x1687   :  { %v7469_v30 = vsel %vm752_vm5, %v14699_v29, 0  ;;  %v16700_v29 = vld [vmem:[%s21458_s8 + $0x58] sm:$0xff]  }
0x1742   :  { %v6885_v32 = vpop.f32.mrb[76].mxu1  ;;  %v7013_v35 = vpop.f32.mrb[116].mxu0 }
0x1743   :  { %v7020_v36 = vmax.f32 %v6885_v32, %v7013_v35  ;;  %v6887_v38 = vpop.f32.mrb[77].mxu1  ;;  %v7015_v20 = vpop.f32.mrb[117].mxu0  ;;  %v16674_v32 = vld [vmem:[%s21457_s5 + $0xb4] ss:$8 sps:$4 sm:$0xff]   ;;  %v16672_v35 = vld [vmem:[%s21457_s5 + $0xb0] ss:$8 sps:$4 sm:$0xff]  }
0x1744   :  { %v6888_v39 = vpop.f32.mrb[78].mxu1  ;;  %v7016_v40 = vpop.f32.mrb[118].mxu0  ;;  %v16675_v38 = vld [vmem:[%s21457_s5 + $0xc0] ss:$8 sps:$4 sm:$0xff]   ;;  %v16680_v20 = vld [vmem:[%s21457_s5 + $0xd4] ss:$8 sps:$4 sm:$0xff]  }
0x1745   :  { %v7021_v41 = vmax.f32 %v6888_v39, %v7016_v40  ;;  %v6890_v42 = vpop.f32.mrb[79].mxu1  ;;  %v7018_v43 = vpop.f32.mrb[119].mxu0  ;;  %v16678_v39 = vld [vmem:[%s21457_s5 + $0xd0] ss:$8 sps:$4 sm:$0xff]   ;;  %v16683_v40 = vld [vmem:[%s21457_s5 + $0xe4] ss:$8 sps:$4 sm:$0xff]  }
0x1746   :  { %v16686_v42 = vld [vmem:[%s21457_s5 + $0xf4] ss:$8 sps:$4 sm:$0xff]   ;;  %v14638_v43 = vld [vmem:[%s21457_s5 + $0x100] sm:$0x33] }
0x1747   :  { %v19478_v44 = vpack.c.bf16 %v7021_v41, %v7020_v36  ;;  %v16677_v36 = vld [vmem:[%s21457_s5 + $0xc4] ss:$8 sps:$4 sm:$0xff]   ;;  %v16681_v41 = vld [vmem:[%s21457_s5 + $0xe0] ss:$8 sps:$4 sm:$0xff]  }
0x1749   :  { %v7048_v45 = vshll.u32 %v19478_v44, 16  ;;  %v7046_v46 = vshrl.u32 %v19478_v44, 16  ;;  %v7303_v17 = vrot.slane %v19478_v44, 2 }
0x174b   :  { %v7050_v47 = vrot.slane %v7048_v45, 1  ;;  %v7181_v61 = vrot.slane %v7046_v46, 1  ;;  %v7182_v62 = vrot.slane %v7048_v45, 2  ;;  %v16684_v45 = vld [vmem:[%s21457_s5 + $0xf0] ss:$8 sps:$4 sm:$0xff]  }
0x174d   :  { %v7051_v31 = vor.u32 %v7050_v47, %v7046_v46  ;;  %v7183_v2 = vor.u32 %v7182_v62, %v7181_v61  ;;  %v14714_v46 = vcombine.high %v14638_v43, %v14638_v43  ;;  %v14713_v47 = vcombine.low %v14638_v43, %v14638_v43  ;;  %v16739_v43 = vld [vmem:[%s21453_s0 + $0xa4] ss:$8 sps:$4 sm:$0xff]  }
0x174f   :  { %14627 = vmatmul.mubr.msk.bf16.vlgmr.msra.gmra.mrb[80].mxu1 %vm748_vm6, %v7051_v31  ;;  %v7517_v31 = vrot.slane %v19478_v44, 1 }
0x1750   :  { %7249 = vmatpush1.bf16.msra.mxu1 %v16621_v48  ;;  %7280 = vmatprep.mubr.bf16.mxu1 %v17251_v24  ;;  %v7577_v48 = vsel %vm752_vm5, %v14713_v47, 0  ;;  %v16717_v47 = vld [vmem:[%s21452_s1 + $0x24] ss:$8 sps:$4 sm:$0xff]  }
0x1751   :  { %7250 = vmatprep.subr.bf16.mxu1 %v16626_v49  ;;  %v7633_v49 = vld [vmem:[%s21459_s6] sm:$0x3] }
0x1754   :  { %7251 = vmatpush1.bf16.msra.mxu1 %v16624_v50  ;;  %v7638_v50 = vrot.slane %v7633_v49, %v17433_v33 }
0x1755   :  { %7252 = vmatprep.subr.bf16.mxu1 %v16629_v51  ;;  %v7642_v51 = vrot.slane %v7633_v49, %v17435_v34  ;;  %v16718_v49 = vld [vmem:[%s21452_s1 + $0x30] ss:$8 sps:$4 sm:$0xff]  }
0x1758   :  { %7253 = vmatpush1.bf16.msra.mxu1 %v16627_v52 }
0x1759   :  { %7254 = vmatprep.subr.bf16.mxu1 %v16632_v53 }
0x175c   :  { %7255 = vmatpush1.bf16.msra.mxu1 %v16630_v54 }
0x175d   :  { %7256 = vmatprep.subr.bf16.mxu1 %v16635_v55 }
0x1760   :  { %7257 = vmatpush1.bf16.msra.mxu1 %v16633_v57 }
0x1761   :  { %14662 = vmatprep.subr.msk.bf16.mxu1 %vm752_vm5, %v14661_v58 }
0x1764   :  { %7259 = vmatpush1.bf16.msra.mxu1 %v7243_v60 }
0x1765   :  { %7368 = vmatprep.subr.bf16.mxu1 %v16640_v63 }
0x1767   :  { %14663 = vmatmul.mubr.msk.bf16.vlgmr.msra.gmra.mrb[80].mxu1 %vm748_vm6, %v7183_v2 }
0x1768   :  { %7369 = vmatpush1.bf16.msra.mxu1 %v16638_v0  ;;  %7400 = vmatprep.mubr.bf16.mxu1 %v17251_v24 }
0x1769   :  { %7370 = vmatprep.subr.bf16.mxu1 %v16643_v3  ;;  %v7655_v3 = vld [vmem:[%s21460_s7] sm:$0x7] }
0x176c   :  { %7371 = vmatpush1.bf16.msra.mxu1 %v16641_v4  ;;  %v14719_v4 = vld [vmem:[%s21460_s7 + $0x4] sm:$0x7] }
0x176d   :  { %7372 = vmatprep.subr.bf16.mxu1 %v16646_v5  ;;  %v16689_v5 = vld [vmem:[%s21458_s8] sm:$0xff]  }
0x1770   :  { %7373 = vmatpush1.bf16.msra.mxu1 %v16644_v6  ;;  %v16690_v6 = vld [vmem:[%s21458_s8 + $0x8] sm:$0xff]  }
0x1771   :  { %7374 = vmatprep.subr.bf16.mxu1 %v16649_v7  ;;  %v16691_v7 = vld [vmem:[%s21458_s8 + $0x10] sm:$0xff]  }
0x1774   :  { %7375 = vmatpush1.bf16.msra.mxu1 %v16647_v8  ;;  %v16692_v8 = vld [vmem:[%s21458_s8 + $0x18] sm:$0xff]  }
0x1775   :  { %7376 = vmatprep.subr.bf16.mxu1 %v16652_v9  ;;  %v16693_v9 = vld [vmem:[%s21458_s8 + $0x20] sm:$0xff]  }
0x1778   :  { %7377 = vmatpush1.bf16.msra.mxu1 %v16650_v12  ;;  %v16695_v12 = vld [vmem:[%s21458_s8 + $0x30] sm:$0xff]  }
0x1779   :  { %14687 = vmatprep.subr.msk.bf16.mxu1 %vm752_vm5, %v14686_v13  ;;  %v16696_v13 = vld [vmem:[%s21458_s8 + $0x38] sm:$0xff]  }
0x177c   :  { %7379 = vmatpush1.bf16.msra.mxu1 %v7363_v15  ;;  %v16698_v15 = vld [vmem:[%s21458_s8 + $0x48] sm:$0xff]  }
0x177d   :  { %7474 = vmatprep.subr.bf16.mxu1 %v16657_v1 }
0x177f   :  { %14688 = vmatmul.mubr.msk.bf16.vlgmr.msra.gmra.mrb[80].mxu1 %vm748_vm6, %v7303_v17 }
0x1780   :  { %7475 = vmatpush1.bf16.msra.mxu1 %v16655_v16  ;;  %7506 = vmatprep.mubr.bf16.mxu1 %v17251_v24 }
0x1781   :  { %7476 = vmatprep.subr.bf16.mxu1 %v16660_v18 }
0x1784   :  { %7477 = vmatpush1.bf16.msra.mxu1 %v16658_v19 }
0x1785   :  { %7478 = vmatprep.subr.bf16.mxu1 %v16663_v21 }
0x1788   :  { %7479 = vmatpush1.bf16.msra.mxu1 %v16661_v22 }
0x1789   :  { %7480 = vmatprep.subr.bf16.mxu1 %v16666_v23 }
0x178c   :  { %7481 = vmatpush1.bf16.msra.mxu1 %v16664_v25 }
0x178d   :  { %7482 = vmatprep.subr.bf16.mxu1 %v16669_v10 }
0x1790   :  { %7483 = vmatpush1.bf16.msra.mxu1 %v16667_v27  ;;  %v16699_v27 = vld [vmem:[%s21458_s8 + $0x50] sm:$0xff]  }
0x1791   :  { %14701 = vmatprep.subr.msk.bf16.mxu1 %vm752_vm5, %v14700_v28 }
0x1794   :  { %7485 = vmatpush1.bf16.msra.mxu1 %v7469_v30  ;;  %v16701_v30 = vld [vmem:[%s21458_s8 + $0x60] sm:$0xff]  }
0x1795   :  { %7582 = vmatprep.subr.bf16.mxu1 %v16674_v32  ;;  %v16702_v32 = vld [vmem:[%s21458_s8 + $0x68] sm:$0xff]  }
0x1797   :  { %14702 = vmatmul.mubr.msk.bf16.vlgmr.msra.gmra.mrb[80].mxu1 %vm748_vm6, %v19478_v44 }
0x1798   :  { %7583 = vmatpush1.bf16.msra.mxu1 %v16672_v35  ;;  %7614 = vmatprep.mubr.bf16.mxu1 %v17251_v24  ;;  %v16703_v35 = vld [vmem:[%s21458_s8 + $0x70] sm:$0xff]  }
0x1799   :  { %7584 = vmatprep.subr.bf16.mxu1 %v16677_v36  ;;  %v16704_v36 = vld [vmem:[%s21458_s8 + $0x78] sm:$0xff]  }
0x179c   :  { %7585 = vmatpush1.bf16.msra.mxu1 %v16675_v38  ;;  %v16705_v38 = vld [vmem:[%s21458_s8 + $0x80] sm:$0xff]  }
0x179d   :  { %7586 = vmatprep.subr.bf16.mxu1 %v16680_v20  ;;  %v16706_v20 = vld [vmem:[%s21458_s8 + $0x88] sm:$0xff]  }
0x17a0   :  { %7587 = vmatpush1.bf16.msra.mxu1 %v16678_v39  ;;  %v16707_v39 = vld [vmem:[%s21458_s8 + $0x90] sm:$0xff]  }
0x17a1   :  { %7588 = vmatprep.subr.bf16.mxu1 %v16683_v40  ;;  %v16708_v40 = vld [vmem:[%s21458_s8 + $0x98] sm:$0xff]  }
0x17a4   :  { %7589 = vmatpush1.bf16.msra.mxu1 %v16681_v41  ;;  %v16711_v41 = vld [vmem:[%s21452_s1 + $0x4] ss:$8 sps:$4 sm:$0xff]  }
0x17a5   :  { %7590 = vmatprep.subr.bf16.mxu1 %v16686_v42  ;;  %v16709_v42 = vld [vmem:[%s21452_s1] ss:$8 sps:$4 sm:$0xff]  }
0x17a8   :  { %7591 = vmatpush1.bf16.msra.mxu1 %v16684_v45  ;;  %v16714_v45 = vld [vmem:[%s21452_s1 + $0x14] ss:$8 sps:$4 sm:$0xff]  }
0x17a9   :  { %14715 = vmatprep.subr.msk.bf16.mxu1 %vm752_vm5, %v14714_v46  ;;  %v16712_v46 = vld [vmem:[%s21452_s1 + $0x10] ss:$8 sps:$4 sm:$0xff]  }
0x17ac   :  { %7593 = vmatpush1.bf16.msra.mxu1 %v7577_v48  ;;  %v16715_v48 = vld [vmem:[%s21452_s1 + $0x20] ss:$8 sps:$4 sm:$0xff]  }
0x17af   :  { %14716 = vmatmul.mubr.msk.bf16.vlgmr.msra.gmra.mrb[80].mxu1 %vm748_vm6, %v7517_v31  ;;  %v16720_v31 = vld [vmem:[%s21452_s1 + $0x34] ss:$8 sps:$4 sm:$0xff]  }
0x17b0   :  { %8278 = vmatprep.mubr.bf16.mxu1 %v17251_v24 }
0x1882   :  { %v7616_v52 = vpop.f32.mrb[80].mxu1 }
0x1883   :  { %v7645_v53 = vadd.f32 %v7638_v50, %v7616_v52  ;;  %v7618_v54 = vpop.f32.mrb[81].mxu1  ;;  %v16726_v52 = vld [vmem:[%s21452_s1 + $0x54] ss:$8 sps:$4 sm:$0xff]  }
0x1884   :  { %v7646_v55 = vadd.f32 %v7642_v51, %v7618_v54  ;;  %v7620_v56 = vpop.f32.mrb[82].mxu1  ;;  %v16729_v54 = vld [vmem:[%s21452_s1 + $0x64] ss:$8 sps:$4 sm:$0xff]  }
0x1885   :  { %v7647_v57 = vadd.f32 %v7638_v50, %v7620_v56  ;;  %v7622_v58 = vpop.f32.mrb[83].mxu1  ;;  %v7649_v59 = vmax.f32 %v7645_v53, 0.0  ;;  %v16723_v50 = vld [vmem:[%s21452_s1 + $0x44] ss:$8 sps:$4 sm:$0xff]   ;;  %v16724_v53 = vld [vmem:[%s21452_s1 + $0x50] ss:$8 sps:$4 sm:$0xff]  }
0x1886   :  { %v7648_v44 = vadd.f32 %v7642_v51, %v7622_v58  ;;  %v7650_v61 = vmax.f32 %v7646_v55, 0.0  ;;  %v16721_v51 = vld [vmem:[%s21452_s1 + $0x40] ss:$8 sps:$4 sm:$0xff]   ;;  %v16732_v56 = vld [vmem:[%s21452_s1 + $0x74] ss:$8 sps:$4 sm:$0xff]  }
0x1887   :  { %v7651_v60 = vmax.f32 %v7647_v57, 0.0  ;;  %v16727_v55 = vld [vmem:[%s21452_s1 + $0x60] ss:$8 sps:$4 sm:$0xff]   ;;  %v16730_v57 = vld [vmem:[%s21452_s1 + $0x70] ss:$8 sps:$4 sm:$0xff]  }
0x1888   :  { %v7652_v62 = vmax.f32 %v7648_v44, 0.0  ;;  %v16735_v58 = vld [vmem:[%s21452_s1 + $0x84] ss:$8 sps:$4 sm:$0xff]   ;;  %v16733_v44 = vld [vmem:[%s21452_s1 + $0x80] ss:$8 sps:$4 sm:$0xff]  }
0x1889   :  { %v7653_v63 = vpack.c.bf16 %v7651_v60, %v7649_v59  ;;  %v16738_v59 = vld [vmem:[%s21452_s1 + $0x94] ss:$8 sps:$4 sm:$0xff]   ;;  %v16736_v60 = vld [vmem:[%s21452_s1 + $0x90] ss:$8 sps:$4 sm:$0xff]  }
0x188a   :  { %v7654_v0 = vpack.c.bf16 %v7652_v62, %v7650_v61  ;;  %v16741_v61 = vld [vmem:[%s21453_s0 + $0xa0] ss:$8 sps:$4 sm:$0xff]   ;;  %v16742_v62 = vld [vmem:[%s21453_s0 + $0xb4] ss:$8 sps:$4 sm:$0x3f]  }
0x188b   :  { %v7660_v2 = vsel %vm1306_vm7, %v7653_v63, 0  ;;  %v16744_v63 = vld [vmem:[%s21453_s0 + $0xb0] ss:$8 sps:$4 sm:$0x3f]  }
0x188c   :  { %14717 = vmatprep.subr.msk.bf16.mxu0 %vm1306_vm7, %v7654_v0 }
0x188d   :  { %7666 = vmatpush1.bf16.msra.mxu0 %v7660_v2 }
0x188e   :  { %14720 = vmatprep.subr.msk.bf16.mxu0 %vm1306_vm7, %v7654_v0  ;;  %v16748_v0 = vld [vmem:[%s21455_s4 + $0x54] sm:$0xff]  }
0x1890   :  { %14718 = vmatmul.mubr.msk.bf16.vlgmr.msra.gmra.mrb[120].mxu0 %vm1302_vm8, %v7655_v3  ;;  %v16752_v3 = vld [vmem:[%s21455_s4 + $0x64] sm:$0xff]  }
0x1891   :  { %7711 = vmatpush1.bf16.msra.mxu0 %v7660_v2  ;;  %7742 = vmatprep.mubr.bf16.mxu0 %v17251_v24  ;;  %v16750_v2 = vld [vmem:[%s21455_s4 + $0x5c] sm:$0xff]  }
0x1892   :  { %7838 = vmatprep.subr.bf16.mxu0 %v17251_v24 }
0x1898   :  { %14721 = vmatmul.mubr.msk.bf16.vlgmr.msra.gmra.mrb[124].mxu0 %vm1302_vm8, %v14719_v4  ;;  %v16754_v4 = vld [vmem:[%s21455_s4 + $0x6c] sm:$0xff]  }
0x1899   :  { %7839 = vmatpush1.bf16.msra.mxu0 %v16689_v5  ;;  %v16756_v5 = vld [vmem:[%s21455_s4 + $0x74] sm:$0xff]  }
0x189a   :  { %7840 = vmatprep.subr.bf16.mxu0 %v17251_v24 }
0x189d   :  { %7841 = vmatpush1.bf16.msra.mxu0 %v16690_v6 }
0x189e   :  { %7842 = vmatprep.subr.bf16.mxu0 %v17251_v24 }
0x18a1   :  { %7843 = vmatpush1.bf16.msra.mxu0 %v16691_v7 }
0x18a2   :  { %7844 = vmatprep.subr.bf16.mxu0 %v17251_v24 }
0x18a5   :  { %7845 = vmatpush1.bf16.msra.mxu0 %v16692_v8 }
0x18a6   :  { %7846 = vmatprep.subr.bf16.mxu0 %v17251_v24 }
0x18a9   :  { %7847 = vmatpush1.bf16.msra.mxu0 %v16693_v9 }
0x18aa   :  { %7848 = vmatprep.subr.bf16.mxu0 %v17251_v24 }
0x18ad   :  { %7849 = vmatpush1.bf16.msra.mxu0 %v16694_v11  ;;  %v16758_v11 = vld [vmem:[%s21455_s4 + $0x7c] sm:$0xff]  }
0x18ae   :  { %7850 = vmatprep.subr.bf16.mxu0 %v17251_v24 }
0x18b1   :  { %7851 = vmatpush1.bf16.msra.mxu0 %v16695_v12  ;;  %v16760_v12 = vld [vmem:[%s21455_s4 + $0x84] sm:$0xff]  }
0x18b2   :  { %7852 = vmatprep.subr.bf16.mxu0 %v17251_v24 }
0x18b5   :  { %7853 = vmatpush1.bf16.msra.mxu0 %v16696_v13 }
0x18b6   :  { %7854 = vmatprep.subr.bf16.mxu0 %v17251_v24 }
0x18b9   :  { %7855 = vmatpush1.bf16.msra.mxu0 %v16697_v14 }
0x18ba   :  { %7856 = vmatprep.subr.bf16.mxu0 %v17251_v24 }
0x18bd   :  { %7857 = vmatpush1.bf16.msra.mxu0 %v16698_v15 }
0x18be   :  { %7958 = vmatprep.subr.bf16.mxu0 %v17251_v24 }
0x1963   :  { %v7699_v1 = vpop.f32.mrb[120].mxu0 }
0x1964   :  { %v7701_v16 = vpop.f32.mrb[121].mxu0 }
0x1965   :  { %v7703_v17 = vpop.f32.mrb[122].mxu0 }
0x1966   :  { %v7704_v18 = vpop.f32.mrb[123].mxu0 }
0x196b   :  { %v7744_v19 = vpop.f32.mrb[124].mxu0 }
0x196c   :  { %v7751_v21 = vmax.f32 %v7699_v1, %v7744_v19  ;;  %v7746_v22 = vpop.f32.mrb[125].mxu0  ;;  %v8001_v1 = vld [vmem:[#allocation2 + $0x10] sm:$0x7] }
0x196d   :  { %v7752_v23 = vmax.f32 %v7701_v16, %v7746_v22  ;;  %v7748_v25 = vpop.f32.mrb[126].mxu0 }
0x196e   :  { %v7749_v10 = vpop.f32.mrb[127].mxu0  ;;  %v7753_v28 = vpack.c.bf16 %v7751_v21, %v7751_v21  ;;  %v8029_v21 = vld [vmem:[%s21456_s2] sm:$0x3] }
0x196f   :  { %v7754_v26 = vpack.c.bf16 %v7752_v23, %v7752_v23  ;;  %v8034_v22 = vrot.slane %v8029_v21, %v17433_v33  ;;  %v8038_v23 = vrot.slane %v8029_v21, %v17435_v34 }
0x1971   :  { %14732 = vmatprep.mubr.msk.bf16.mxu0 %vm205_vm0, %v7754_v26 }
0x1972   :  { %7871 = vmatmul.mubr.bf16.vlgmr.msra.gmra.mrb[128].mxu0 %v7753_v28 }
0x1973   :  { %7959 = vmatpush1.bf16.msra.mxu0 %v16699_v27  ;;  %14763 = vmatprep.mubr.msk.bf16.mxu0 %vm205_vm0, %v7754_v26 }
0x1974   :  { %7960 = vmatprep.subr.bf16.mxu0 %v17251_v24 }
0x1977   :  { %7961 = vmatpush1.bf16.msra.mxu0 %v16700_v29 }
0x1978   :  { %7962 = vmatprep.subr.bf16.mxu0 %v17251_v24 }
0x197b   :  { %7963 = vmatpush1.bf16.msra.mxu0 %v16701_v30 }
0x197c   :  { %7964 = vmatprep.subr.bf16.mxu0 %v17251_v24 }
0x197f   :  { %7965 = vmatpush1.bf16.msra.mxu0 %v16702_v32 }
0x1980   :  { %7966 = vmatprep.subr.bf16.mxu0 %v17251_v24 }
0x1983   :  { %7967 = vmatpush1.bf16.msra.mxu0 %v16703_v35 }
0x1984   :  { %7968 = vmatprep.subr.bf16.mxu0 %v17251_v24 }
0x1987   :  { %7969 = vmatpush1.bf16.msra.mxu0 %v16704_v36 }
0x1988   :  { %7970 = vmatprep.subr.bf16.mxu0 %v17251_v24 }
0x198b   :  { %7971 = vmatpush1.bf16.msra.mxu0 %v16705_v38 }
0x198c   :  { %7972 = vmatprep.subr.bf16.mxu0 %v17251_v24 }
0x198f   :  { %7973 = vmatpush1.bf16.msra.mxu0 %v16706_v20 }
0x1990   :  { %7974 = vmatprep.subr.bf16.mxu0 %v17251_v24 }
0x1993   :  { %7975 = vmatpush1.bf16.msra.mxu0 %v16707_v39 }
0x1994   :  { %7976 = vmatprep.subr.bf16.mxu0 %v17251_v24 }
0x1997   :  { %7977 = vmatpush1.bf16.msra.mxu0 %v16708_v40 }
0x1998   :  { %8165 = vmatprep.subr.bf16.mxu0 %v16711_v41 }
0x199a   :  { %7991 = vmatmul.mubr.bf16.vlgmr.msra.gmra.mrb[132].mxu0 %v7753_v28 }
0x199b   :  { %8166 = vmatpush1.bf16.msra.mxu0 %v16709_v42  ;;  %14792 = vmatprep.mubr.msk.bf16.mxu0 %vm205_vm0, %v16739_v43 }
0x199c   :  { %8167 = vmatprep.subr.bf16.mxu0 %v16714_v45 }
0x199f   :  { %8168 = vmatpush1.bf16.msra.mxu0 %v16712_v46 }
0x19a0   :  { %8169 = vmatprep.subr.bf16.mxu0 %v16717_v47 }
0x19a3   :  { %8170 = vmatpush1.bf16.msra.mxu0 %v16715_v48 }
0x19a4   :  { %8171 = vmatprep.subr.bf16.mxu0 %v16720_v31 }
0x19a7   :  { %8172 = vmatpush1.bf16.msra.mxu0 %v16718_v49 }
0x19a8   :  { %8173 = vmatprep.subr.bf16.mxu0 %v16723_v50 }
0x19ab   :  { %8174 = vmatpush1.bf16.msra.mxu0 %v16721_v51 }
0x19ac   :  { %8175 = vmatprep.subr.bf16.mxu0 %v16726_v52 }
0x19af   :  { %8176 = vmatpush1.bf16.msra.mxu0 %v16724_v53 }
0x19b0   :  { %8177 = vmatprep.subr.bf16.mxu0 %v16729_v54 }
0x19b3   :  { %8178 = vmatpush1.bf16.msra.mxu0 %v16727_v55 }
0x19b4   :  { %8179 = vmatprep.subr.bf16.mxu0 %v16732_v56  ;;  %v16745_v56 = vld [vmem:[%s21454_s3] sm:$0x7f]  }
0x19b7   :  { %8180 = vmatpush1.bf16.msra.mxu0 %v16730_v57  ;;  %v16746_v57 = vld [vmem:[%s21454_s3 + $0x8] sm:$0x7f]  }
0x19b8   :  { %8181 = vmatprep.subr.bf16.mxu0 %v16735_v58  ;;  %v16747_v58 = vld [vmem:[%s21455_s4] sm:$0xff]  }
0x19bb   :  { %8182 = vmatpush1.bf16.msra.mxu0 %v16733_v44  ;;  %v16749_v44 = vld [vmem:[%s21455_s4 + $0x8] sm:$0xff]  }
0x19bc   :  { %8183 = vmatprep.subr.bf16.mxu0 %v16738_v59  ;;  %v16751_v59 = vld [vmem:[%s21455_s4 + $0x10] sm:$0xff]  }
0x19bf   :  { %8184 = vmatpush1.bf16.msra.mxu0 %v16736_v60  ;;  %v16753_v60 = vld [vmem:[%s21455_s4 + $0x18] sm:$0xff]  }
0x19c0   :  { %8566 = vmatprep.subr.bf16.mxu0 %v17251_v24 }
0x19c2   :  { %8198 = vmatmul.mubr.bf16.vlgmr.msra.gmra.mrb[136].mxu0 %v16741_v61  ;;  %v16755_v61 = vld [vmem:[%s21455_s4 + $0x20] sm:$0xff]  }
0x19c3   :  { %14793 = vmatprep.mubr.msk.bf16.mxu0 %vm205_vm0, %v16742_v62  ;;  %8567 = vmatpush1.bf16.msra.mxu0 %v16748_v0  ;;  %v16757_v62 = vld [vmem:[%s21455_s4 + $0x28] sm:$0xff]   ;;  %v16761_v0 = vld [vmem:[%s21455_s4 + $0x38] sm:$0xff]  }
0x19c4   :  { %8568 = vmatprep.subr.bf16.mxu0 %v17251_v24 }
0x19c7   :  { %8569 = vmatpush1.bf16.msra.mxu0 %v16750_v2  ;;  %v16762_v2 = vld [vmem:[%s21455_s4 + $0x8c] sm:$0xff]  }
0x19c8   :  { %8570 = vmatprep.subr.bf16.mxu0 %v17251_v24 }
0x19ca   :  { %8208 = vmatmul.mubr.bf16.gmra.mrb[140].mxu0 %v16744_v63  ;;  %v16759_v63 = vld [vmem:[%s21455_s4 + $0x30] sm:$0xff]  }
0x19cb   :  { %8571 = vmatpush1.bf16.msra.mxu0 %v16752_v3  ;;  %v16763_v3 = vld [vmem:[%s21455_s4 + $0x40] sm:$0xff]  }
0x19cc   :  { %8572 = vmatprep.subr.bf16.mxu0 %v17251_v24 }
0x19cf   :  { %8573 = vmatpush1.bf16.msra.mxu0 %v16754_v4  ;;  %v16764_v4 = vld [vmem:[%s21455_s4 + $0x94] sm:$0xff]  }
0x19d0   :  { %8574 = vmatprep.subr.bf16.mxu0 %v17251_v24 }
0x19d3   :  { %8575 = vmatpush1.bf16.msra.mxu0 %v16756_v5  ;;  %v16765_v5 = vld [vmem:[%s21455_s4 + $0x48] sm:$0xff]  }
0x19d4   :  { %8576 = vmatprep.subr.bf16.mxu0 %v17251_v24 }
0x19d7   :  { %8577 = vmatpush1.bf16.msra.mxu0 %v16758_v11 }
0x19d8   :  { %8578 = vmatprep.subr.bf16.mxu0 %v17251_v24 }
0x19db   :  { %8579 = vmatpush1.bf16.msra.mxu0 %v16760_v12  ;;  %v16771_v12 = vld [vmem:[%s21457_s5 + $0x5c] ss:$8 sps:$4 sm:$0xff]  }
0x19dc   :  { %8580 = vmatprep.subr.bf16.mxu0 %v17251_v24 }
0x19df   :  { %8581 = vmatpush1.bf16.msra.mxu0 %v16762_v2  ;;  %v16800_v2 = vld [vmem:[%s21457_s5 + $0x14c] ss:$8 sps:$4 sm:$0xff]  }
0x19e0   :  { %8582 = vmatprep.subr.bf16.mxu0 %v17251_v24 }
0x19e3   :  { %8583 = vmatpush1.bf16.msra.mxu0 %v16764_v4  ;;  %v16798_v4 = vld [vmem:[%s21457_s5 + $0x148] ss:$8 sps:$4 sm:$0xff]  }
0x19e4   :  { %8584 = vmatprep.subr.bf16.mxu0 %v17251_v24 }
0x1a45   :  { %v7872_v6 = vpop.f32.mrb[128].mxu0 }
0x1a46   :  { %v7874_v7 = vpop.f32.mrb[129].mxu0 }
0x1a47   :  { %v7875_v8 = vpop.f32.mrb[130].mxu0  ;;  %v16767_v7 = vld [vmem:[%s21455_s4 + $0x50] ss:$0 sps:$4 sm:$0xff]  }
0x1a48   :  { %v7876_v9 = vpop.f32.mrb[131].mxu0  ;;  %v16768_v8 = vld [vmem:[%s21455_s4 + $0xa4] ss:$0 sps:$4 sm:$0xff]  }
0x1a49   :  { %v8436_v9 = vsel %vm486_vm3, %v16767_v7, 0  ;;  %v8564_v11 = vsel %vm486_vm3, %v16768_v8, 0 }
0x1a6d   :  { %v7992_v13 = vpop.f32.mrb[132].mxu0 }
0x1a6e   :  { %v7998_v14 = vmax.f32 %v7872_v6, %v7992_v13  ;;  %v7994_v15 = vpop.f32.mrb[133].mxu0  ;;  %v16766_v6 = vld [vmem:[%s21455_s4 + $0x9c] sm:$0xff]  }
0x1a6f   :  { %v7995_v16 = vpop.f32.mrb[134].mxu0  ;;  %8585 = vmatpush1.bf16.msra.mxu0 %v16766_v6 }
0x1a70   :  { %v7999_v17 = vpack.c.bf16 %v7998_v14, %v7998_v14  ;;  %v7996_v18 = vpop.f32.mrb[135].mxu0  ;;  %8586 = vmatprep.subr.bf16.mxu0 %v17251_v24 }
0x1a72   :  { %v8002_v19 = vsel %vm17918_vm11, %v7999_v17, %v8001_v1 }
0x1a73   :  { %8003 = vst [vmem:[#allocation2 + $0x10] sm:$0x7] %v8002_v19  ;;  %8587 = vmatpush1.bf16.msra.mxu0 %v8564_v11  ;;  %v16805_v11 = vld [vmem:[%s21457_s5 + $0x164] ss:$8 sps:$4 sm:$0xff]  }
0x1a95   :  { %v8199_v25 = vpop.f32.mrb[136].mxu0 }
0x1a96   :  { %v8200_v10 = vadd.f32 %v8199_v25, %v8034_v22  ;;  %v8201_v26 = vpop.f32.mrb[137].mxu0 }
0x1a97   :  { %v8202_v27 = vadd.f32 %v8201_v26, %v8038_v23  ;;  %v8203_v28 = vpop.f32.mrb[138].mxu0 }
0x1a98   :  { %v8204_v29 = vadd.f32 %v8203_v28, %v8034_v22  ;;  %v8205_v30 = vpop.f32.mrb[139].mxu0  ;;  %v8218_v35 = vmax.f32 %v8200_v10, 0.0  ;;  %v16774_v28 = vld [vmem:[%s21457_s5 + $0x6c] ss:$8 sps:$4 sm:$0xff]  }
0x1a99   :  { %v8206_v32 = vadd.f32 %v8205_v30, %v8038_v23  ;;  %v8219_v38 = vmax.f32 %v8202_v27, 0.0  ;;  %v16769_v27 = vld [vmem:[%s21457_s5 + $0x58] ss:$8 sps:$4 sm:$0xff]   ;;  %v16777_v30 = vld [vmem:[%s21457_s5 + $0x7c] ss:$8 sps:$4 sm:$0xff]  }
0x1a9a   :  { %v8220_v36 = vmax.f32 %v8204_v29, 0.0  ;;  %v16772_v29 = vld [vmem:[%s21457_s5 + $0x68] ss:$8 sps:$4 sm:$0xff]  }
0x1a9b   :  { %v8221_v20 = vmax.f32 %v8206_v32, 0.0  ;;  %v16775_v32 = vld [vmem:[%s21457_s5 + $0x78] ss:$8 sps:$4 sm:$0xff]  }
0x1a9c   :  { %v8226_v39 = vpack.c.bf16 %v8220_v36, %v8218_v35  ;;  %v16780_v35 = vld [vmem:[%s21457_s5 + $0x8c] ss:$8 sps:$4 sm:$0xff]   ;;  %v16778_v36 = vld [vmem:[%s21457_s5 + $0x88] ss:$8 sps:$4 sm:$0xff]  }
0x1a9d   :  { %v8227_v40 = vpack.c.bf16 %v8221_v20, %v8219_v38  ;;  %v8209_v41 = vpop.f32.mrb[140].mxu0  ;;  %v16783_v38 = vld [vmem:[%s21457_s5 + $0x9c] ss:$8 sps:$4 sm:$0xff]   ;;  %v16781_v20 = vld [vmem:[%s21457_s5 + $0x98] ss:$8 sps:$4 sm:$0xff]  }
0x1a9e   :  { %v8210_v42 = vadd.f32 %v8209_v41, %v8034_v22  ;;  %v8211_v43 = vpop.f32.mrb[141].mxu0 }
0x1a9f   :  { %v8212_v45 = vadd.f32 %v8211_v43, %v8038_v23  ;;  %v8213_v46 = vpop.f32.mrb[142].mxu0  ;;  %8246 = vmatprep.subr.bf16.mxu1 %v8227_v40 }
0x1aa0   :  { %v8214_v47 = vadd.f32 %v8213_v46, %v8034_v22  ;;  %v8215_v48 = vpop.f32.mrb[143].mxu0  ;;  %8247 = vmatpush1.bf16.msra.mxu1 %v8226_v39  ;;  %v8222_v49 = vmax.f32 %v8210_v42, 0.0  ;;  %v16788_v42 = vld [vmem:[%s21457_s5 + $0x10c] ss:$8 sps:$4 sm:$0xff]  }
0x1aa1   :  { %v8216_v31 = vadd.f32 %v8215_v48, %v8038_v23  ;;  %v8223_v51 = vmax.f32 %v8212_v45, 0.0 }
0x1aa2   :  { %v8224_v50 = vmax.f32 %v8214_v47, 0.0 }
0x1aa3   :  { %v8225_v52 = vmax.f32 %v8216_v31, 0.0 }
0x1aa4   :  { %v8228_v53 = vpack.c.bf16 %v8224_v50, %v8222_v49 }
0x1aa5   :  { %v8229_v54 = vpack.c.bf16 %v8225_v52, %v8223_v51 }
0x1aa6   :  { %v8241_v55 = vsel %vm288_vm1, %v8228_v53, 0 }
0x1aa7   :  { %14795 = vmatprep.subr.msk.bf16.mxu1 %vm288_vm1, %v8229_v54 }
0x1aa8   :  { %8249 = vmatpush1.bf16.msra.mxu1 %v8241_v55 }
0x1aa9   :  { %8299 = vmatprep.subr.bf16.mxu1 %v8227_v40 }
0x1aab   :  { %14796 = vmatmul.mubr.msk.bf16.vlgmr.msra.gmra.mrb[84].mxu1 %vm284_vm2, %v16745_v56 }
0x1aac   :  { %8300 = vmatpush1.bf16.msra.mxu1 %v8226_v39  ;;  %8331 = vmatprep.mubr.bf16.mxu1 %v17251_v24  ;;  %v14857_v39 = vld [vmem:[%s21457_s5 + $0xa8] sm:$0x33] }
0x1aad   :  { %14800 = vmatprep.subr.msk.bf16.mxu1 %vm288_vm1, %v8229_v54  ;;  %v14869_v40 = vcombine.high %v14857_v39, %v14857_v39  ;;  %v14868_v41 = vcombine.low %v14857_v39, %v14857_v39  ;;  %v8620_v39 = vld [vmem:[%s21457_s5 + $0x50] sm:$0x33] }
0x1aaf   :  { %v8698_v43 = vsel %vm752_vm5, %v14868_v41, 0  ;;  %v14944_v41 = vcombine.high %v8620_v39, %v8620_v39 }
0x1ab0   :  { %8302 = vmatpush1.bf16.msra.mxu1 %v8241_v55 }
0x1ab1   :  { %8438 = vmatprep.subr.bf16.mxu1 %v17251_v24 }
0x1ab3   :  { %14801 = vmatmul.mubr.msk.bf16.vlgmr.msra.gmra.mrb[88].mxu1 %vm284_vm2, %v16746_v57 }
0x1ab4   :  { %8439 = vmatpush1.bf16.msra.mxu1 %v16747_v58  ;;  %v16786_v58 = vld [vmem:[%s21457_s5 + $0x108] ss:$8 sps:$4 sm:$0xff]  }
0x1ab5   :  { %8440 = vmatprep.subr.bf16.mxu1 %v17251_v24 }
0x1ab8   :  { %8441 = vmatpush1.bf16.msra.mxu1 %v16749_v44 }
0x1ab9   :  { %8442 = vmatprep.subr.bf16.mxu1 %v17251_v24 }
0x1abc   :  { %8443 = vmatpush1.bf16.msra.mxu1 %v16751_v59  ;;  %v16791_v59 = vld [vmem:[%s21457_s5 + $0x11c] ss:$8 sps:$4 sm:$0xff]  }
0x1abd   :  { %8444 = vmatprep.subr.bf16.mxu1 %v17251_v24 }
0x1ac0   :  { %8445 = vmatpush1.bf16.msra.mxu1 %v16753_v60  ;;  %v16789_v60 = vld [vmem:[%s21457_s5 + $0x118] ss:$8 sps:$4 sm:$0xff]  }
0x1ac1   :  { %8446 = vmatprep.subr.bf16.mxu1 %v17251_v24 }
0x1ac4   :  { %8447 = vmatpush1.bf16.msra.mxu1 %v16755_v61  ;;  %v16794_v61 = vld [vmem:[%s21457_s5 + $0x12c] ss:$8 sps:$4 sm:$0xff]  }
0x1ac5   :  { %8448 = vmatprep.subr.bf16.mxu1 %v17251_v24 }
0x1ac8   :  { %8449 = vmatpush1.bf16.msra.mxu1 %v16757_v62  ;;  %v16792_v62 = vld [vmem:[%s21457_s5 + $0x128] ss:$8 sps:$4 sm:$0xff]  }
0x1ac9   :  { %8450 = vmatprep.subr.bf16.mxu1 %v17251_v24 }
0x1acc   :  { %8451 = vmatpush1.bf16.msra.mxu1 %v16759_v63  ;;  %v16797_v63 = vld [vmem:[%s21457_s5 + $0x13c] ss:$8 sps:$4 sm:$0xff]  }
0x1acd   :  { %8452 = vmatprep.subr.bf16.mxu1 %v17251_v24 }
0x1ad0   :  { %8453 = vmatpush1.bf16.msra.mxu1 %v16761_v0  ;;  %v16795_v0 = vld [vmem:[%s21457_s5 + $0x138] ss:$8 sps:$4 sm:$0xff]  }
0x1ad1   :  { %8454 = vmatprep.subr.bf16.mxu1 %v17251_v24 }
0x1ad4   :  { %8455 = vmatpush1.bf16.msra.mxu1 %v16763_v3  ;;  %v14893_v3 = vld [vmem:[%s21457_s5 + $0x158] sm:$0x33] }
0x1ad5   :  { %8456 = vmatprep.subr.bf16.mxu1 %v17251_v24  ;;  %v14904_v6 = vcombine.low %v14893_v3, %v14893_v3 }
0x1ad7   :  { %v8830_v7 = vsel %vm752_vm5, %v14904_v6, 0 }
0x1ad8   :  { %8457 = vmatpush1.bf16.msra.mxu1 %v16765_v5  ;;  %v14905_v5 = vcombine.high %v14893_v3, %v14893_v3 }
0x1ad9   :  { %8458 = vmatprep.subr.bf16.mxu1 %v17251_v24 }
0x1adc   :  { %8459 = vmatpush1.bf16.msra.mxu1 %v8436_v9 }
0x1add   :  { %8703 = vmatprep.subr.bf16.mxu1 %v16771_v12  ;;  %v16803_v12 = vld [vmem:[%s21457_s5 + $0x160] ss:$8 sps:$4 sm:$0xff]  }
0x1b7e   :  { %v8280_v13 = vpop.f32.mrb[84].mxu1 }
0x1b7f   :  { %v8282_v14 = vpop.f32.mrb[85].mxu1 }
0x1b80   :  { %v8284_v15 = vpop.f32.mrb[86].mxu1 }
0x1b81   :  { %v8286_v1 = vpop.f32.mrb[87].mxu1 }
0x1b86   :  { %v8333_v16 = vpop.f32.mrb[88].mxu1 }
0x1b87   :  { %v8342_v17 = vmax.f32 %v8280_v13, %v8333_v16  ;;  %v8335_v18 = vpop.f32.mrb[89].mxu1  ;;  %v16809_v16 = vld [vmem:[%s21457_s5 + $0x180] ss:$8 sps:$4 sm:$0xff]  }
0x1b88   :  { %v8343_v19 = vmax.f32 %v8282_v14, %v8335_v18  ;;  %v8337_v21 = vpop.f32.mrb[90].mxu1  ;;  %v16808_v14 = vld [vmem:[%s21457_s5 + $0x174] ss:$8 sps:$4 sm:$0xff]   ;;  %v16812_v18 = vld [vmem:[%s21457_s5 + $0x190] ss:$8 sps:$4 sm:$0xff]  }
0x1b89   :  { %v8344_v22 = vmax.f32 %v8284_v15, %v8337_v21  ;;  %v8339_v23 = vpop.f32.mrb[91].mxu1  ;;  %v16806_v15 = vld [vmem:[%s21457_s5 + $0x170] ss:$8 sps:$4 sm:$0xff]  }
0x1b8a   :  { %v8345_v25 = vmax.f32 %v8286_v1, %v8339_v23  ;;  %v16811_v1 = vld [vmem:[%s21457_s5 + $0x184] ss:$8 sps:$4 sm:$0xff]   ;;  %v14918_v21 = vld [vmem:[%s21457_s5 + $0x1b0] sm:$0x33] }
0x1b8b   :  { %v8346_v10 = vpack.c.bf16 %v8344_v22, %v8342_v17  ;;  %v16814_v17 = vld [vmem:[%s21457_s5 + $0x194] ss:$8 sps:$4 sm:$0xff]   ;;  %v16815_v22 = vld [vmem:[%s21457_s5 + $0x1a0] ss:$8 sps:$4 sm:$0xff]   ;;  %v14930_v23 = vcombine.high %v14918_v21, %v14918_v21 }
0x1b8c   :  { %v8347_v26 = vpack.c.bf16 %v8345_v25, %v8343_v19  ;;  %v16817_v19 = vld [vmem:[%s21457_s5 + $0x1a4] ss:$8 sps:$4 sm:$0xff]   ;;  %v14929_v25 = vcombine.low %v14918_v21, %v14918_v21 }
0x1b8d   :  { %v16859_v21 = vld [vmem:[%s21458_s8 + $0x28] sm:$0xff]  }
0x1b8e   :  { %14813 = vmatprep.mubr.msk.bf16.mxu1 %vm482_vm4, %v8347_v26  ;;  %14846 = vmatprep.mubr.msk.bf16.mxu0 %vm482_vm4, %v8347_v26  ;;  %v16822_v26 = vld [vmem:[%s21457_s5 + $0x4] ss:$8 sps:$4 sm:$0xff]  }
0x1b8f   :  { %8471 = vmatmul.mubr.bf16.vlgmr.msra.gmra.mrb[92].mxu1 %v8346_v10  ;;  %8599 = vmatmul.mubr.bf16.vlgmr.msra.gmra.mrb[144].mxu0 %v8346_v10  ;;  %v8950_v10 = vsel %vm752_vm5, %v14929_v25, 0  ;;  %v16862_v25 = vld [vmem:[%s21458_s8 + $0x40] sm:$0xff]  }
0x1b90   :  { %8704 = vmatpush1.bf16.msra.mxu1 %v16769_v27  ;;  %8735 = vmatprep.mubr.bf16.mxu1 %v17251_v24  ;;  %v16820_v27 = vld [vmem:[%s21457_s5] ss:$8 sps:$4 sm:$0xff]  }
0x1b91   :  { %8705 = vmatprep.subr.bf16.mxu1 %v16774_v28  ;;  %9284 = vmatprep.mubr.bf16.mxu0 %v17251_v24 }
0x1b94   :  { %8706 = vmatpush1.bf16.msra.mxu1 %v16772_v29  ;;  %v16825_v29 = vld [vmem:[%s21457_s5 + $0x14] ss:$8 sps:$4 sm:$0xff]  }
0x1b95   :  { %8707 = vmatprep.subr.bf16.mxu1 %v16777_v30  ;;  %v16823_v30 = vld [vmem:[%s21457_s5 + $0x10] ss:$8 sps:$4 sm:$0xff]  }
0x1b98   :  { %8708 = vmatpush1.bf16.msra.mxu1 %v16775_v32  ;;  %v16828_v32 = vld [vmem:[%s21457_s5 + $0x24] ss:$8 sps:$4 sm:$0xff]  }
0x1b99   :  { %8709 = vmatprep.subr.bf16.mxu1 %v16780_v35  ;;  %v16826_v35 = vld [vmem:[%s21457_s5 + $0x20] ss:$8 sps:$4 sm:$0xff]  }
0x1b9c   :  { %8710 = vmatpush1.bf16.msra.mxu1 %v16778_v36  ;;  %v16831_v36 = vld [vmem:[%s21457_s5 + $0x34] ss:$8 sps:$4 sm:$0xff]  }
0x1b9d   :  { %8711 = vmatprep.subr.bf16.mxu1 %v16783_v38  ;;  %v16829_v38 = vld [vmem:[%s21457_s5 + $0x30] ss:$8 sps:$4 sm:$0xff]  }
0x1ba0   :  { %8712 = vmatpush1.bf16.msra.mxu1 %v16781_v20  ;;  %v16834_v20 = vld [vmem:[%s21457_s5 + $0x44] ss:$8 sps:$4 sm:$0xff]  }
0x1ba1   :  { %14870 = vmatprep.subr.msk.bf16.mxu1 %vm752_vm5, %v14869_v40  ;;  %v16832_v40 = vld [vmem:[%s21457_s5 + $0x40] ss:$8 sps:$4 sm:$0xff]  }
0x1ba4   :  { %8714 = vmatpush1.bf16.msra.mxu1 %v8698_v43 }
0x1ba5   :  { %8835 = vmatprep.subr.bf16.mxu1 %v16788_v42  ;;  %v14943_v42 = vcombine.low %v8620_v39, %v8620_v39 }
0x1ba7   :  { %v9056_v43 = vsel %vm752_vm5, %v14943_v42, 0  ;;  %v16865_v42 = vld [vmem:[%s21458_s8 + $0x58] sm:$0xff]  }
0x1c62   :  { %v8472_v45 = vpop.f32.mrb[92].mxu1  ;;  %v8600_v46 = vpop.f32.mrb[144].mxu0 }
0x1c63   :  { %v8607_v47 = vmax.f32 %v8472_v45, %v8600_v46  ;;  %v8474_v48 = vpop.f32.mrb[93].mxu1  ;;  %v8602_v31 = vpop.f32.mrb[145].mxu0  ;;  %v16839_v45 = vld [vmem:[%s21457_s5 + $0xb4] ss:$8 sps:$4 sm:$0xff]   ;;  %v16837_v46 = vld [vmem:[%s21457_s5 + $0xb0] ss:$8 sps:$4 sm:$0xff]  }
0x1c64   :  { %v8475_v49 = vpop.f32.mrb[94].mxu1  ;;  %v8603_v50 = vpop.f32.mrb[146].mxu0  ;;  %v16840_v48 = vld [vmem:[%s21457_s5 + $0xc0] ss:$8 sps:$4 sm:$0xff]   ;;  %v16845_v31 = vld [vmem:[%s21457_s5 + $0xd4] ss:$8 sps:$4 sm:$0xff]  }
0x1c65   :  { %v8608_v51 = vmax.f32 %v8475_v49, %v8603_v50  ;;  %v8477_v52 = vpop.f32.mrb[95].mxu1  ;;  %v8605_v53 = vpop.f32.mrb[147].mxu0  ;;  %v16843_v49 = vld [vmem:[%s21457_s5 + $0xd0] ss:$8 sps:$4 sm:$0xff]   ;;  %v16848_v50 = vld [vmem:[%s21457_s5 + $0xe4] ss:$8 sps:$4 sm:$0xff]  }
0x1c66   :  { %v16851_v52 = vld [vmem:[%s21457_s5 + $0xf4] ss:$8 sps:$4 sm:$0xff]   ;;  %v14882_v53 = vld [vmem:[%s21457_s5 + $0x100] sm:$0x33] }
0x1c67   :  { %v19956_v54 = vpack.c.bf16 %v8608_v51, %v8607_v47  ;;  %v16842_v47 = vld [vmem:[%s21457_s5 + $0xc4] ss:$8 sps:$4 sm:$0xff]   ;;  %v16846_v51 = vld [vmem:[%s21457_s5 + $0xe0] ss:$8 sps:$4 sm:$0xff]  }
0x1c69   :  { %v8635_v55 = vshll.u32 %v19956_v54, 16  ;;  %v8633_v56 = vshrl.u32 %v19956_v54, 16  ;;  %v8890_v28 = vrot.slane %v19956_v54, 2 }
0x1c6b   :  { %v8637_v57 = vrot.slane %v8635_v55, 1  ;;  %v8768_v8 = vrot.slane %v8633_v56, 1  ;;  %v8769_v9 = vrot.slane %v8635_v55, 2  ;;  %v16849_v55 = vld [vmem:[%s21457_s5 + $0xf0] ss:$8 sps:$4 sm:$0xff]  }
0x1c6d   :  { %v8638_v44 = vor.u32 %v8637_v57, %v8633_v56  ;;  %v8770_v13 = vor.u32 %v8769_v9, %v8768_v8  ;;  %v14958_v56 = vcombine.high %v14882_v53, %v14882_v53  ;;  %v14957_v57 = vcombine.low %v14882_v53, %v14882_v53  ;;  %v16904_v53 = vld [vmem:[%s21453_s0 + $0xc4] ss:$8 sps:$4 sm:$0xff]  }
0x1c6f   :  { %14871 = vmatmul.mubr.msk.bf16.vlgmr.msra.gmra.mrb[96].mxu1 %vm748_vm6, %v8638_v44  ;;  %v9104_v44 = vrot.slane %v19956_v54, 1 }
0x1c70   :  { %8836 = vmatpush1.bf16.msra.mxu1 %v16786_v58  ;;  %8867 = vmatprep.mubr.bf16.mxu1 %v17251_v24  ;;  %v9164_v58 = vsel %vm752_vm5, %v14957_v57, 0  ;;  %v16882_v57 = vld [vmem:[%s21452_s1 + $0x24] ss:$8 sps:$4 sm:$0xff]  }
0x1c71   :  { %8837 = vmatprep.subr.bf16.mxu1 %v16791_v59  ;;  %v9220_v59 = vld [vmem:[%s21459_s6] sm:$0x3] }
0x1c74   :  { %8838 = vmatpush1.bf16.msra.mxu1 %v16789_v60  ;;  %v9225_v60 = vrot.slane %v9220_v59, %v17433_v33 }
0x1c75   :  { %8839 = vmatprep.subr.bf16.mxu1 %v16794_v61  ;;  %v9229_v61 = vrot.slane %v9220_v59, %v17435_v34  ;;  %v16883_v59 = vld [vmem:[%s21452_s1 + $0x30] ss:$8 sps:$4 sm:$0xff]  }
0x1c78   :  { %8840 = vmatpush1.bf16.msra.mxu1 %v16792_v62 }
0x1c79   :  { %8841 = vmatprep.subr.bf16.mxu1 %v16797_v63 }
0x1c7c   :  { %8842 = vmatpush1.bf16.msra.mxu1 %v16795_v0 }
0x1c7d   :  { %8843 = vmatprep.subr.bf16.mxu1 %v16800_v2 }
0x1c80   :  { %8844 = vmatpush1.bf16.msra.mxu1 %v16798_v4 }
0x1c81   :  { %14906 = vmatprep.subr.msk.bf16.mxu1 %vm752_vm5, %v14905_v5 }
0x1c84   :  { %8846 = vmatpush1.bf16.msra.mxu1 %v8830_v7 }
0x1c85   :  { %8955 = vmatprep.subr.bf16.mxu1 %v16805_v11 }
0x1c87   :  { %14907 = vmatmul.mubr.msk.bf16.vlgmr.msra.gmra.mrb[96].mxu1 %vm748_vm6, %v8770_v13 }
0x1c88   :  { %8956 = vmatpush1.bf16.msra.mxu1 %v16803_v12  ;;  %8987 = vmatprep.mubr.bf16.mxu1 %v17251_v24 }
0x1c89   :  { %8957 = vmatprep.subr.bf16.mxu1 %v16808_v14  ;;  %v9242_v14 = vld [vmem:[%s21460_s7] sm:$0x7] }
0x1c8c   :  { %8958 = vmatpush1.bf16.msra.mxu1 %v16806_v15  ;;  %v14963_v15 = vld [vmem:[%s21460_s7 + $0x4] sm:$0x7] }
0x1c8d   :  { %8959 = vmatprep.subr.bf16.mxu1 %v16811_v1  ;;  %v16854_v1 = vld [vmem:[%s21458_s8] sm:$0xff]  }
0x1c90   :  { %8960 = vmatpush1.bf16.msra.mxu1 %v16809_v16  ;;  %v16855_v16 = vld [vmem:[%s21458_s8 + $0x8] sm:$0xff]  }
0x1c91   :  { %8961 = vmatprep.subr.bf16.mxu1 %v16814_v17  ;;  %v16856_v17 = vld [vmem:[%s21458_s8 + $0x10] sm:$0xff]  }
0x1c94   :  { %8962 = vmatpush1.bf16.msra.mxu1 %v16812_v18  ;;  %v16857_v18 = vld [vmem:[%s21458_s8 + $0x18] sm:$0xff]  }
0x1c95   :  { %8963 = vmatprep.subr.bf16.mxu1 %v16817_v19  ;;  %v16858_v19 = vld [vmem:[%s21458_s8 + $0x20] sm:$0xff]  }
0x1c98   :  { %8964 = vmatpush1.bf16.msra.mxu1 %v16815_v22  ;;  %v16860_v22 = vld [vmem:[%s21458_s8 + $0x30] sm:$0xff]  }
0x1c99   :  { %14931 = vmatprep.subr.msk.bf16.mxu1 %vm752_vm5, %v14930_v23  ;;  %v16861_v23 = vld [vmem:[%s21458_s8 + $0x38] sm:$0xff]  }
0x1c9c   :  { %8966 = vmatpush1.bf16.msra.mxu1 %v8950_v10  ;;  %v16863_v10 = vld [vmem:[%s21458_s8 + $0x48] sm:$0xff]  }
0x1c9d   :  { %9061 = vmatprep.subr.bf16.mxu1 %v16822_v26 }
0x1c9f   :  { %14932 = vmatmul.mubr.msk.bf16.vlgmr.msra.gmra.mrb[96].mxu1 %vm748_vm6, %v8890_v28 }
0x1ca0   :  { %9062 = vmatpush1.bf16.msra.mxu1 %v16820_v27  ;;  %9093 = vmatprep.mubr.bf16.mxu1 %v17251_v24 }
0x1ca1   :  { %9063 = vmatprep.subr.bf16.mxu1 %v16825_v29 }
0x1ca4   :  { %9064 = vmatpush1.bf16.msra.mxu1 %v16823_v30 }
0x1ca5   :  { %9065 = vmatprep.subr.bf16.mxu1 %v16828_v32 }
0x1ca8   :  { %9066 = vmatpush1.bf16.msra.mxu1 %v16826_v35 }
0x1ca9   :  { %9067 = vmatprep.subr.bf16.mxu1 %v16831_v36 }
0x1cac   :  { %9068 = vmatpush1.bf16.msra.mxu1 %v16829_v38 }
0x1cad   :  { %9069 = vmatprep.subr.bf16.mxu1 %v16834_v20 }
0x1cb0   :  { %9070 = vmatpush1.bf16.msra.mxu1 %v16832_v40  ;;  %v16864_v40 = vld [vmem:[%s21458_s8 + $0x50] sm:$0xff]  }
0x1cb1   :  { %14945 = vmatprep.subr.msk.bf16.mxu1 %vm752_vm5, %v14944_v41 }
0x1cb4   :  { %9072 = vmatpush1.bf16.msra.mxu1 %v9056_v43  ;;  %v16866_v43 = vld [vmem:[%s21458_s8 + $0x60] sm:$0xff]  }
0x1cb5   :  { %9169 = vmatprep.subr.bf16.mxu1 %v16839_v45  ;;  %v16867_v45 = vld [vmem:[%s21458_s8 + $0x68] sm:$0xff]  }
0x1cb7   :  { %14946 = vmatmul.mubr.msk.bf16.vlgmr.msra.gmra.mrb[96].mxu1 %vm748_vm6, %v19956_v54 }
0x1cb8   :  { %9170 = vmatpush1.bf16.msra.mxu1 %v16837_v46  ;;  %9201 = vmatprep.mubr.bf16.mxu1 %v17251_v24  ;;  %v16868_v46 = vld [vmem:[%s21458_s8 + $0x70] sm:$0xff]  }
0x1cb9   :  { %9171 = vmatprep.subr.bf16.mxu1 %v16842_v47  ;;  %v16869_v47 = vld [vmem:[%s21458_s8 + $0x78] sm:$0xff]  }
0x1cbc   :  { %9172 = vmatpush1.bf16.msra.mxu1 %v16840_v48  ;;  %v16870_v48 = vld [vmem:[%s21458_s8 + $0x80] sm:$0xff]  }
0x1cbd   :  { %9173 = vmatprep.subr.bf16.mxu1 %v16845_v31  ;;  %v16871_v31 = vld [vmem:[%s21458_s8 + $0x88] sm:$0xff]  }
0x1cc0   :  { %9174 = vmatpush1.bf16.msra.mxu1 %v16843_v49  ;;  %v16872_v49 = vld [vmem:[%s21458_s8 + $0x90] sm:$0xff]  }
0x1cc1   :  { %9175 = vmatprep.subr.bf16.mxu1 %v16848_v50  ;;  %v16873_v50 = vld [vmem:[%s21458_s8 + $0x98] sm:$0xff]  }
0x1cc4   :  { %9176 = vmatpush1.bf16.msra.mxu1 %v16846_v51  ;;  %v16876_v51 = vld [vmem:[%s21452_s1 + $0x4] ss:$8 sps:$4 sm:$0xff]  }
0x1cc5   :  { %9177 = vmatprep.subr.bf16.mxu1 %v16851_v52  ;;  %v16874_v52 = vld [vmem:[%s21452_s1] ss:$8 sps:$4 sm:$0xff]  }
0x1cc8   :  { %9178 = vmatpush1.bf16.msra.mxu1 %v16849_v55  ;;  %v16879_v55 = vld [vmem:[%s21452_s1 + $0x14] ss:$8 sps:$4 sm:$0xff]  }
0x1cc9   :  { %14959 = vmatprep.subr.msk.bf16.mxu1 %vm752_vm5, %v14958_v56  ;;  %v16877_v56 = vld [vmem:[%s21452_s1 + $0x10] ss:$8 sps:$4 sm:$0xff]  }
0x1ccc   :  { %9180 = vmatpush1.bf16.msra.mxu1 %v9164_v58  ;;  %v16880_v58 = vld [vmem:[%s21452_s1 + $0x20] ss:$8 sps:$4 sm:$0xff]  }
0x1ccf   :  { %14960 = vmatmul.mubr.msk.bf16.vlgmr.msra.gmra.mrb[96].mxu1 %vm748_vm6, %v9104_v44  ;;  %v16885_v44 = vld [vmem:[%s21452_s1 + $0x34] ss:$8 sps:$4 sm:$0xff]  }
0x1cd0   :  { %9865 = vmatprep.mubr.bf16.mxu1 %v17251_v24 }
0x1da2   :  { %v9203_v62 = vpop.f32.mrb[96].mxu1 }
0x1da3   :  { %v9232_v63 = vadd.f32 %v9225_v60, %v9203_v62  ;;  %v9205_v0 = vpop.f32.mrb[97].mxu1  ;;  %v16891_v62 = vld [vmem:[%s21452_s1 + $0x54] ss:$8 sps:$4 sm:$0xff]  }
0x1da4   :  { %v9233_v2 = vadd.f32 %v9229_v61, %v9205_v0  ;;  %v9207_v3 = vpop.f32.mrb[98].mxu1  ;;  %v16894_v0 = vld [vmem:[%s21452_s1 + $0x64] ss:$8 sps:$4 sm:$0xff]  }
0x1da5   :  { %v9234_v4 = vadd.f32 %v9225_v60, %v9207_v3  ;;  %v9209_v5 = vpop.f32.mrb[99].mxu1  ;;  %v9236_v6 = vmax.f32 %v9232_v63, 0.0  ;;  %v16888_v60 = vld [vmem:[%s21452_s1 + $0x44] ss:$8 sps:$4 sm:$0xff]   ;;  %v16889_v63 = vld [vmem:[%s21452_s1 + $0x50] ss:$8 sps:$4 sm:$0xff]  }
0x1da6   :  { %v9235_v54 = vadd.f32 %v9229_v61, %v9209_v5  ;;  %v9237_v8 = vmax.f32 %v9233_v2, 0.0  ;;  %v16886_v61 = vld [vmem:[%s21452_s1 + $0x40] ss:$8 sps:$4 sm:$0xff]   ;;  %v16897_v3 = vld [vmem:[%s21452_s1 + $0x74] ss:$8 sps:$4 sm:$0xff]  }
0x1da7   :  { %v9238_v7 = vmax.f32 %v9234_v4, 0.0  ;;  %v16892_v2 = vld [vmem:[%s21452_s1 + $0x60] ss:$8 sps:$4 sm:$0xff]   ;;  %v16895_v4 = vld [vmem:[%s21452_s1 + $0x70] ss:$8 sps:$4 sm:$0xff]  }
0x1da8   :  { %v9239_v9 = vmax.f32 %v9235_v54, 0.0  ;;  %v16900_v5 = vld [vmem:[%s21452_s1 + $0x84] ss:$8 sps:$4 sm:$0xff]   ;;  %v16898_v54 = vld [vmem:[%s21452_s1 + $0x80] ss:$8 sps:$4 sm:$0xff]  }
0x1da9   :  { %v9240_v11 = vpack.c.bf16 %v9238_v7, %v9236_v6  ;;  %v16903_v6 = vld [vmem:[%s21452_s1 + $0x94] ss:$8 sps:$4 sm:$0xff]   ;;  %v16901_v7 = vld [vmem:[%s21452_s1 + $0x90] ss:$8 sps:$4 sm:$0xff]  }
0x1daa   :  { %v9241_v12 = vpack.c.bf16 %v9239_v9, %v9237_v8  ;;  %v16906_v8 = vld [vmem:[%s21453_s0 + $0xc0] ss:$8 sps:$4 sm:$0xff]   ;;  %v16907_v9 = vld [vmem:[%s21453_s0 + $0xd4] ss:$8 sps:$4 sm:$0x3f]  }
0x1dab   :  { %v9247_v13 = vsel %vm1306_vm7, %v9240_v11, 0  ;;  %v16909_v11 = vld [vmem:[%s21453_s0 + $0xd0] ss:$8 sps:$4 sm:$0x3f]  }
0x1dac   :  { %14961 = vmatprep.subr.msk.bf16.mxu0 %vm1306_vm7, %v9241_v12 }
0x1dad   :  { %9253 = vmatpush1.bf16.msra.mxu0 %v9247_v13 }
0x1dae   :  { %14964 = vmatprep.subr.msk.bf16.mxu0 %vm1306_vm7, %v9241_v12  ;;  %v16913_v12 = vld [vmem:[%s21455_s4 + $0x54] sm:$0xff]  }
0x1db0   :  { %14962 = vmatmul.mubr.msk.bf16.vlgmr.msra.gmra.mrb[148].mxu0 %vm1302_vm8, %v9242_v14  ;;  %v16917_v14 = vld [vmem:[%s21455_s4 + $0x64] sm:$0xff]  }
0x1db1   :  { %9298 = vmatpush1.bf16.msra.mxu0 %v9247_v13  ;;  %9329 = vmatprep.mubr.bf16.mxu0 %v17251_v24  ;;  %v16915_v13 = vld [vmem:[%s21455_s4 + $0x5c] sm:$0xff]  }
0x1db2   :  { %9425 = vmatprep.subr.bf16.mxu0 %v17251_v24 }
0x1db8   :  { %14965 = vmatmul.mubr.msk.bf16.vlgmr.msra.gmra.mrb[152].mxu0 %vm1302_vm8, %v14963_v15  ;;  %v16919_v15 = vld [vmem:[%s21455_s4 + $0x6c] sm:$0xff]  }
0x1db9   :  { %9426 = vmatpush1.bf16.msra.mxu0 %v16854_v1  ;;  %v16921_v1 = vld [vmem:[%s21455_s4 + $0x74] sm:$0xff]  }
0x1dba   :  { %9427 = vmatprep.subr.bf16.mxu0 %v17251_v24 }
0x1dbd   :  { %9428 = vmatpush1.bf16.msra.mxu0 %v16855_v16 }
0x1dbe   :  { %9429 = vmatprep.subr.bf16.mxu0 %v17251_v24 }
0x1dc1   :  { %9430 = vmatpush1.bf16.msra.mxu0 %v16856_v17 }
0x1dc2   :  { %9431 = vmatprep.subr.bf16.mxu0 %v17251_v24 }
0x1dc5   :  { %9432 = vmatpush1.bf16.msra.mxu0 %v16857_v18 }
0x1dc6   :  { %9433 = vmatprep.subr.bf16.mxu0 %v17251_v24 }
0x1dc9   :  { %9434 = vmatpush1.bf16.msra.mxu0 %v16858_v19 }
0x1dca   :  { %9435 = vmatprep.subr.bf16.mxu0 %v17251_v24 }
0x1dcd   :  { %9436 = vmatpush1.bf16.msra.mxu0 %v16859_v21  ;;  %v16923_v21 = vld [vmem:[%s21455_s4 + $0x7c] sm:$0xff]  }
0x1dce   :  { %9437 = vmatprep.subr.bf16.mxu0 %v17251_v24 }
0x1dd1   :  { %9438 = vmatpush1.bf16.msra.mxu0 %v16860_v22  ;;  %v16925_v22 = vld [vmem:[%s21455_s4 + $0x84] sm:$0xff]  }
0x1dd2   :  { %9439 = vmatprep.subr.bf16.mxu0 %v17251_v24 }
0x1dd5   :  { %9440 = vmatpush1.bf16.msra.mxu0 %v16861_v23 }
0x1dd6   :  { %9441 = vmatprep.subr.bf16.mxu0 %v17251_v24 }
0x1dd9   :  { %9442 = vmatpush1.bf16.msra.mxu0 %v16862_v25 }
0x1dda   :  { %9443 = vmatprep.subr.bf16.mxu0 %v17251_v24 }
0x1ddd   :  { %9444 = vmatpush1.bf16.msra.mxu0 %v16863_v10 }
0x1dde   :  { %9545 = vmatprep.subr.bf16.mxu0 %v17251_v24 }
0x1e83   :  { %v9286_v26 = vpop.f32.mrb[148].mxu0 }
0x1e84   :  { %v9288_v27 = vpop.f32.mrb[149].mxu0 }
0x1e85   :  { %v9290_v28 = vpop.f32.mrb[150].mxu0 }
0x1e86   :  { %v9291_v29 = vpop.f32.mrb[151].mxu0 }
0x1e8b   :  { %v9331_v30 = vpop.f32.mrb[152].mxu0 }
0x1e8c   :  { %v9338_v32 = vmax.f32 %v9286_v26, %v9331_v30  ;;  %v9333_v35 = vpop.f32.mrb[153].mxu0  ;;  %v9588_v26 = vld [vmem:[#allocation2 + $0x14] sm:$0x7] }
0x1e8d   :  { %v9339_v36 = vmax.f32 %v9288_v27, %v9333_v35  ;;  %v9335_v38 = vpop.f32.mrb[154].mxu0 }
0x1e8e   :  { %v9336_v20 = vpop.f32.mrb[155].mxu0  ;;  %v9340_v41 = vpack.c.bf16 %v9338_v32, %v9338_v32  ;;  %v9616_v32 = vld [vmem:[%s21456_s2] sm:$0x3] }
0x1e8f   :  { %v9341_v39 = vpack.c.bf16 %v9339_v36, %v9339_v36  ;;  %v9621_v35 = vrot.slane %v9616_v32, %v17433_v33  ;;  %v9625_v36 = vrot.slane %v9616_v32, %v17435_v34 }
0x1e91   :  { %14976 = vmatprep.mubr.msk.bf16.mxu0 %vm205_vm0, %v9341_v39 }
0x1e92   :  { %9458 = vmatmul.mubr.bf16.vlgmr.msra.gmra.mrb[156].mxu0 %v9340_v41 }
0x1e93   :  { %9546 = vmatpush1.bf16.msra.mxu0 %v16864_v40  ;;  %15007 = vmatprep.mubr.msk.bf16.mxu0 %vm205_vm0, %v9341_v39 }
0x1e94   :  { %9547 = vmatprep.subr.bf16.mxu0 %v17251_v24 }
0x1e97   :  { %9548 = vmatpush1.bf16.msra.mxu0 %v16865_v42 }
0x1e98   :  { %9549 = vmatprep.subr.bf16.mxu0 %v17251_v24 }
0x1e9b   :  { %9550 = vmatpush1.bf16.msra.mxu0 %v16866_v43 }
0x1e9c   :  { %9551 = vmatprep.subr.bf16.mxu0 %v17251_v24 }
0x1e9f   :  { %9552 = vmatpush1.bf16.msra.mxu0 %v16867_v45 }
0x1ea0   :  { %9553 = vmatprep.subr.bf16.mxu0 %v17251_v24 }
0x1ea3   :  { %9554 = vmatpush1.bf16.msra.mxu0 %v16868_v46 }
0x1ea4   :  { %9555 = vmatprep.subr.bf16.mxu0 %v17251_v24 }
0x1ea7   :  { %9556 = vmatpush1.bf16.msra.mxu0 %v16869_v47 }
0x1ea8   :  { %9557 = vmatprep.subr.bf16.mxu0 %v17251_v24 }
0x1eab   :  { %9558 = vmatpush1.bf16.msra.mxu0 %v16870_v48 }
0x1eac   :  { %9559 = vmatprep.subr.bf16.mxu0 %v17251_v24 }
0x1eaf   :  { %9560 = vmatpush1.bf16.msra.mxu0 %v16871_v31 }
0x1eb0   :  { %9561 = vmatprep.subr.bf16.mxu0 %v17251_v24 }
0x1eb3   :  { %9562 = vmatpush1.bf16.msra.mxu0 %v16872_v49 }
0x1eb4   :  { %9563 = vmatprep.subr.bf16.mxu0 %v17251_v24 }
0x1eb7   :  { %9564 = vmatpush1.bf16.msra.mxu0 %v16873_v50 }
0x1eb8   :  { %9752 = vmatprep.subr.bf16.mxu0 %v16876_v51 }
0x1eba   :  { %9578 = vmatmul.mubr.bf16.vlgmr.msra.gmra.mrb[160].mxu0 %v9340_v41 }
0x1ebb   :  { %9753 = vmatpush1.bf16.msra.mxu0 %v16874_v52  ;;  %15036 = vmatprep.mubr.msk.bf16.mxu0 %vm205_vm0, %v16904_v53 }
0x1ebc   :  { %9754 = vmatprep.subr.bf16.mxu0 %v16879_v55 }
0x1ebf   :  { %9755 = vmatpush1.bf16.msra.mxu0 %v16877_v56 }
0x1ec0   :  { %9756 = vmatprep.subr.bf16.mxu0 %v16882_v57 }
0x1ec3   :  { %9757 = vmatpush1.bf16.msra.mxu0 %v16880_v58 }
0x1ec4   :  { %9758 = vmatprep.subr.bf16.mxu0 %v16885_v44 }
0x1ec7   :  { %9759 = vmatpush1.bf16.msra.mxu0 %v16883_v59 }
0x1ec8   :  { %9760 = vmatprep.subr.bf16.mxu0 %v16888_v60 }
0x1ecb   :  { %9761 = vmatpush1.bf16.msra.mxu0 %v16886_v61 }
0x1ecc   :  { %9762 = vmatprep.subr.bf16.mxu0 %v16891_v62 }
0x1ecf   :  { %9763 = vmatpush1.bf16.msra.mxu0 %v16889_v63 }
0x1ed0   :  { %9764 = vmatprep.subr.bf16.mxu0 %v16894_v0 }
0x1ed3   :  { %9765 = vmatpush1.bf16.msra.mxu0 %v16892_v2 }
0x1ed4   :  { %9766 = vmatprep.subr.bf16.mxu0 %v16897_v3  ;;  %v16910_v3 = vld [vmem:[%s21454_s3] sm:$0x7f]  }
0x1ed7   :  { %9767 = vmatpush1.bf16.msra.mxu0 %v16895_v4  ;;  %v16911_v4 = vld [vmem:[%s21454_s3 + $0x8] sm:$0x7f]  }
0x1ed8   :  { %9768 = vmatprep.subr.bf16.mxu0 %v16900_v5  ;;  %v16912_v5 = vld [vmem:[%s21455_s4] sm:$0xff]  }
0x1edb   :  { %9769 = vmatpush1.bf16.msra.mxu0 %v16898_v54  ;;  %v16914_v54 = vld [vmem:[%s21455_s4 + $0x8] sm:$0xff]  }
0x1edc   :  { %9770 = vmatprep.subr.bf16.mxu0 %v16903_v6  ;;  %v16916_v6 = vld [vmem:[%s21455_s4 + $0x10] sm:$0xff]  }
0x1edf   :  { %9771 = vmatpush1.bf16.msra.mxu0 %v16901_v7  ;;  %v16918_v7 = vld [vmem:[%s21455_s4 + $0x18] sm:$0xff]  }
0x1ee0   :  { %10153 = vmatprep.subr.bf16.mxu0 %v17251_v24 }
0x1ee2   :  { %9785 = vmatmul.mubr.bf16.vlgmr.msra.gmra.mrb[164].mxu0 %v16906_v8  ;;  %v16920_v8 = vld [vmem:[%s21455_s4 + $0x20] sm:$0xff]  }
0x1ee3   :  { %15037 = vmatprep.mubr.msk.bf16.mxu0 %vm205_vm0, %v16907_v9  ;;  %10154 = vmatpush1.bf16.msra.mxu0 %v16913_v12  ;;  %v16922_v9 = vld [vmem:[%s21455_s4 + $0x28] sm:$0xff]   ;;  %v16926_v12 = vld [vmem:[%s21455_s4 + $0x38] sm:$0xff]  }
0x1ee4   :  { %10155 = vmatprep.subr.bf16.mxu0 %v17251_v24 }
0x1ee7   :  { %10156 = vmatpush1.bf16.msra.mxu0 %v16915_v13  ;;  %v16927_v13 = vld [vmem:[%s21455_s4 + $0x8c] sm:$0xff]  }
0x1ee8   :  { %10157 = vmatprep.subr.bf16.mxu0 %v17251_v24 }
0x1eea   :  { %9795 = vmatmul.mubr.bf16.gmra.mrb[168].mxu0 %v16909_v11  ;;  %v16924_v11 = vld [vmem:[%s21455_s4 + $0x30] sm:$0xff]  }
0x1eeb   :  { %10158 = vmatpush1.bf16.msra.mxu0 %v16917_v14  ;;  %v16928_v14 = vld [vmem:[%s21455_s4 + $0x40] sm:$0xff]  }
0x1eec   :  { %10159 = vmatprep.subr.bf16.mxu0 %v17251_v24 }
0x1eef   :  { %10160 = vmatpush1.bf16.msra.mxu0 %v16919_v15  ;;  %v16929_v15 = vld [vmem:[%s21455_s4 + $0x94] sm:$0xff]  }
0x1ef0   :  { %10161 = vmatprep.subr.bf16.mxu0 %v17251_v24 }
0x1ef3   :  { %10162 = vmatpush1.bf16.msra.mxu0 %v16921_v1  ;;  %v16930_v1 = vld [vmem:[%s21455_s4 + $0x48] sm:$0xff]  }
0x1ef4   :  { %10163 = vmatprep.subr.bf16.mxu0 %v17251_v24 }
0x1ef7   :  { %10164 = vmatpush1.bf16.msra.mxu0 %v16923_v21 }
0x1ef8   :  { %10165 = vmatprep.subr.bf16.mxu0 %v17251_v24 }
0x1efb   :  { %10166 = vmatpush1.bf16.msra.mxu0 %v16925_v22  ;;  %v16936_v22 = vld [vmem:[%s21457_s5 + $0x5c] ss:$8 sps:$4 sm:$0xff]  }
0x1efc   :  { %10167 = vmatprep.subr.bf16.mxu0 %v17251_v24 }
0x1eff   :  { %10168 = vmatpush1.bf16.msra.mxu0 %v16927_v13  ;;  %v16965_v13 = vld [vmem:[%s21457_s5 + $0x14c] ss:$8 sps:$4 sm:$0xff]  }
0x1f00   :  { %10169 = vmatprep.subr.bf16.mxu0 %v17251_v24 }
0x1f03   :  { %10170 = vmatpush1.bf16.msra.mxu0 %v16929_v15  ;;  %v16963_v15 = vld [vmem:[%s21457_s5 + $0x148] ss:$8 sps:$4 sm:$0xff]  }
0x1f04   :  { %10171 = vmatprep.subr.bf16.mxu0 %v17251_v24 }
0x1f65   :  { %v9459_v16 = vpop.f32.mrb[156].mxu0 }
0x1f66   :  { %v9461_v17 = vpop.f32.mrb[157].mxu0 }
0x1f67   :  { %v9462_v18 = vpop.f32.mrb[158].mxu0  ;;  %v16932_v17 = vld [vmem:[%s21455_s4 + $0x50] ss:$0 sps:$4 sm:$0xff]  }
0x1f68   :  { %v9463_v19 = vpop.f32.mrb[159].mxu0  ;;  %v16933_v18 = vld [vmem:[%s21455_s4 + $0xa4] ss:$0 sps:$4 sm:$0xff]  }
0x1f69   :  { %v10023_v19 = vsel %vm486_vm3, %v16932_v17, 0  ;;  %v10151_v21 = vsel %vm486_vm3, %v16933_v18, 0 }
0x1f8d   :  { %v9579_v23 = vpop.f32.mrb[160].mxu0 }
0x1f8e   :  { %v9585_v25 = vmax.f32 %v9459_v16, %v9579_v23  ;;  %v9581_v10 = vpop.f32.mrb[161].mxu0  ;;  %v16931_v16 = vld [vmem:[%s21455_s4 + $0x9c] sm:$0xff]  }
0x1f8f   :  { %v9582_v27 = vpop.f32.mrb[162].mxu0  ;;  %10172 = vmatpush1.bf16.msra.mxu0 %v16931_v16 }
0x1f90   :  { %v9586_v28 = vpack.c.bf16 %v9585_v25, %v9585_v25  ;;  %v9583_v29 = vpop.f32.mrb[163].mxu0  ;;  %10173 = vmatprep.subr.bf16.mxu0 %v17251_v24 }
0x1f92   :  { %v9589_v30 = vsel %vm17918_vm11, %v9586_v28, %v9588_v26 }
0x1f93   :  { %9590 = vst [vmem:[#allocation2 + $0x14] sm:$0x7] %v9589_v30  ;;  %10174 = vmatpush1.bf16.msra.mxu0 %v10151_v21  ;;  %v16970_v21 = vld [vmem:[%s21457_s5 + $0x164] ss:$8 sps:$4 sm:$0xff]  }
0x1fb5   :  { %v9786_v38 = vpop.f32.mrb[164].mxu0 }
0x1fb6   :  { %v9787_v20 = vadd.f32 %v9786_v38, %v9621_v35  ;;  %v9788_v39 = vpop.f32.mrb[165].mxu0 }
0x1fb7   :  { %v9789_v40 = vadd.f32 %v9788_v39, %v9625_v36  ;;  %v9790_v41 = vpop.f32.mrb[166].mxu0 }
0x1fb8   :  { %v9791_v42 = vadd.f32 %v9790_v41, %v9621_v35  ;;  %v9792_v43 = vpop.f32.mrb[167].mxu0  ;;  %v9805_v46 = vmax.f32 %v9787_v20, 0.0  ;;  %v16939_v41 = vld [vmem:[%s21457_s5 + $0x6c] ss:$8 sps:$4 sm:$0xff]  }
0x1fb9   :  { %v9793_v45 = vadd.f32 %v9792_v43, %v9625_v36  ;;  %v9806_v48 = vmax.f32 %v9789_v40, 0.0  ;;  %v16934_v40 = vld [vmem:[%s21457_s5 + $0x58] ss:$8 sps:$4 sm:$0xff]   ;;  %v16942_v43 = vld [vmem:[%s21457_s5 + $0x7c] ss:$8 sps:$4 sm:$0xff]  }
0x1fba   :  { %v9807_v47 = vmax.f32 %v9791_v42, 0.0  ;;  %v16937_v42 = vld [vmem:[%s21457_s5 + $0x68] ss:$8 sps:$4 sm:$0xff]  }
0x1fbb   :  { %v9808_v31 = vmax.f32 %v9793_v45, 0.0  ;;  %v16940_v45 = vld [vmem:[%s21457_s5 + $0x78] ss:$8 sps:$4 sm:$0xff]  }
0x1fbc   :  { %v9813_v49 = vpack.c.bf16 %v9807_v47, %v9805_v46  ;;  %v16945_v46 = vld [vmem:[%s21457_s5 + $0x8c] ss:$8 sps:$4 sm:$0xff]   ;;  %v16943_v47 = vld [vmem:[%s21457_s5 + $0x88] ss:$8 sps:$4 sm:$0xff]  }
0x1fbd   :  { %v9814_v50 = vpack.c.bf16 %v9808_v31, %v9806_v48  ;;  %v9796_v51 = vpop.f32.mrb[168].mxu0  ;;  %v16948_v48 = vld [vmem:[%s21457_s5 + $0x9c] ss:$8 sps:$4 sm:$0xff]   ;;  %v16946_v31 = vld [vmem:[%s21457_s5 + $0x98] ss:$8 sps:$4 sm:$0xff]  }
0x1fbe   :  { %v9797_v52 = vadd.f32 %v9796_v51, %v9621_v35  ;;  %v9798_v53 = vpop.f32.mrb[169].mxu0 }
0x1fbf   :  { %v9799_v55 = vadd.f32 %v9798_v53, %v9625_v36  ;;  %v9800_v56 = vpop.f32.mrb[170].mxu0  ;;  %9833 = vmatprep.subr.bf16.mxu1 %v9814_v50 }
0x1fc0   :  { %v9801_v57 = vadd.f32 %v9800_v56, %v9621_v35  ;;  %v9802_v58 = vpop.f32.mrb[171].mxu0  ;;  %9834 = vmatpush1.bf16.msra.mxu1 %v9813_v49  ;;  %v9809_v59 = vmax.f32 %v9797_v52, 0.0  ;;  %v16953_v52 = vld [vmem:[%s21457_s5 + $0x10c] ss:$8 sps:$4 sm:$0xff]  }
0x1fc1   :  { %v9803_v44 = vadd.f32 %v9802_v58, %v9625_v36  ;;  %v9810_v61 = vmax.f32 %v9799_v55, 0.0 }
0x1fc2   :  { %v9811_v60 = vmax.f32 %v9801_v57, 0.0 }
0x1fc3   :  { %v9812_v62 = vmax.f32 %v9803_v44, 0.0 }
0x1fc4   :  { %v9815_v63 = vpack.c.bf16 %v9811_v60, %v9809_v59 }
0x1fc5   :  { %v9816_v0 = vpack.c.bf16 %v9812_v62, %v9810_v61 }
0x1fc6   :  { %v9828_v2 = vsel %vm288_vm1, %v9815_v63, 0 }
0x1fc7   :  { %15039 = vmatprep.subr.msk.bf16.mxu1 %vm288_vm1, %v9816_v0 }
0x1fc8   :  { %9836 = vmatpush1.bf16.msra.mxu1 %v9828_v2 }
0x1fc9   :  { %9886 = vmatprep.subr.bf16.mxu1 %v9814_v50 }
0x1fcb   :  { %15040 = vmatmul.mubr.msk.bf16.vlgmr.msra.gmra.mrb[100].mxu1 %vm284_vm2, %v16910_v3 }
0x1fcc   :  { %9887 = vmatpush1.bf16.msra.mxu1 %v9813_v49  ;;  %9918 = vmatprep.mubr.bf16.mxu1 %v17251_v24  ;;  %v15101_v49 = vld [vmem:[%s21457_s5 + $0xa8] sm:$0x33] }
0x1fcd   :  { %15044 = vmatprep.subr.msk.bf16.mxu1 %vm288_vm1, %v9816_v0  ;;  %v15113_v50 = vcombine.high %v15101_v49, %v15101_v49  ;;  %v15112_v51 = vcombine.low %v15101_v49, %v15101_v49  ;;  %v10207_v49 = vld [vmem:[%s21457_s5 + $0x50] sm:$0x33] }
0x1fcf   :  { %v10285_v53 = vsel %vm752_vm5, %v15112_v51, 0  ;;  %v15188_v51 = vcombine.high %v10207_v49, %v10207_v49 }
0x1fd0   :  { %9889 = vmatpush1.bf16.msra.mxu1 %v9828_v2 }
0x1fd1   :  { %10025 = vmatprep.subr.bf16.mxu1 %v17251_v24 }
0x1fd3   :  { %15045 = vmatmul.mubr.msk.bf16.vlgmr.msra.gmra.mrb[104].mxu1 %vm284_vm2, %v16911_v4 }
0x1fd4   :  { %10026 = vmatpush1.bf16.msra.mxu1 %v16912_v5  ;;  %v16951_v5 = vld [vmem:[%s21457_s5 + $0x108] ss:$8 sps:$4 sm:$0xff]  }
0x1fd5   :  { %10027 = vmatprep.subr.bf16.mxu1 %v17251_v24 }
0x1fd8   :  { %10028 = vmatpush1.bf16.msra.mxu1 %v16914_v54 }
0x1fd9   :  { %10029 = vmatprep.subr.bf16.mxu1 %v17251_v24 }
0x1fdc   :  { %10030 = vmatpush1.bf16.msra.mxu1 %v16916_v6  ;;  %v16956_v6 = vld [vmem:[%s21457_s5 + $0x11c] ss:$8 sps:$4 sm:$0xff]  }
0x1fdd   :  { %10031 = vmatprep.subr.bf16.mxu1 %v17251_v24 }
0x1fe0   :  { %10032 = vmatpush1.bf16.msra.mxu1 %v16918_v7  ;;  %v16954_v7 = vld [vmem:[%s21457_s5 + $0x118] ss:$8 sps:$4 sm:$0xff]  }
0x1fe1   :  { %10033 = vmatprep.subr.bf16.mxu1 %v17251_v24 }
0x1fe4   :  { %10034 = vmatpush1.bf16.msra.mxu1 %v16920_v8  ;;  %v16959_v8 = vld [vmem:[%s21457_s5 + $0x12c] ss:$8 sps:$4 sm:$0xff]  }
0x1fe5   :  { %10035 = vmatprep.subr.bf16.mxu1 %v17251_v24 }
0x1fe8   :  { %10036 = vmatpush1.bf16.msra.mxu1 %v16922_v9  ;;  %v16957_v9 = vld [vmem:[%s21457_s5 + $0x128] ss:$8 sps:$4 sm:$0xff]  }
0x1fe9   :  { %10037 = vmatprep.subr.bf16.mxu1 %v17251_v24 }
0x1fec   :  { %10038 = vmatpush1.bf16.msra.mxu1 %v16924_v11  ;;  %v16962_v11 = vld [vmem:[%s21457_s5 + $0x13c] ss:$8 sps:$4 sm:$0xff]  }
0x1fed   :  { %10039 = vmatprep.subr.bf16.mxu1 %v17251_v24 }
0x1ff0   :  { %10040 = vmatpush1.bf16.msra.mxu1 %v16926_v12  ;;  %v16960_v12 = vld [vmem:[%s21457_s5 + $0x138] ss:$8 sps:$4 sm:$0xff]  }
0x1ff1   :  { %10041 = vmatprep.subr.bf16.mxu1 %v17251_v24 }
0x1ff4   :  { %10042 = vmatpush1.bf16.msra.mxu1 %v16928_v14  ;;  %v15137_v14 = vld [vmem:[%s21457_s5 + $0x158] sm:$0x33] }
0x1ff5   :  { %10043 = vmatprep.subr.bf16.mxu1 %v17251_v24  ;;  %v15148_v16 = vcombine.low %v15137_v14, %v15137_v14 }
0x1ff7   :  { %v10417_v17 = vsel %vm752_vm5, %v15148_v16, 0 }
0x1ff8   :  { %10044 = vmatpush1.bf16.msra.mxu1 %v16930_v1  ;;  %v15149_v1 = vcombine.high %v15137_v14, %v15137_v14 }
0x1ff9   :  { %10045 = vmatprep.subr.bf16.mxu1 %v17251_v24 }
0x1ffc   :  { %10046 = vmatpush1.bf16.msra.mxu1 %v10023_v19 }
0x1ffd   :  { %10290 = vmatprep.subr.bf16.mxu1 %v16936_v22  ;;  %v16968_v22 = vld [vmem:[%s21457_s5 + $0x160] ss:$8 sps:$4 sm:$0xff]  }
0x209e   :  { %v9867_v23 = vpop.f32.mrb[100].mxu1 }
0x209f   :  { %v9869_v25 = vpop.f32.mrb[101].mxu1 }
0x20a0   :  { %v9871_v10 = vpop.f32.mrb[102].mxu1 }
0x20a1   :  { %v9873_v26 = vpop.f32.mrb[103].mxu1 }
0x20a6   :  { %v9920_v27 = vpop.f32.mrb[104].mxu1 }
0x20a7   :  { %v9929_v28 = vmax.f32 %v9867_v23, %v9920_v27  ;;  %v9922_v29 = vpop.f32.mrb[105].mxu1  ;;  %v16974_v27 = vld [vmem:[%s21457_s5 + $0x180] ss:$8 sps:$4 sm:$0xff]  }
0x20a8   :  { %v9930_v30 = vmax.f32 %v9869_v25, %v9922_v29  ;;  %v9924_v32 = vpop.f32.mrb[106].mxu1  ;;  %v16973_v25 = vld [vmem:[%s21457_s5 + $0x174] ss:$8 sps:$4 sm:$0xff]   ;;  %v16977_v29 = vld [vmem:[%s21457_s5 + $0x190] ss:$8 sps:$4 sm:$0xff]  }
0x20a9   :  { %v9931_v35 = vmax.f32 %v9871_v10, %v9924_v32  ;;  %v9926_v36 = vpop.f32.mrb[107].mxu1  ;;  %v16971_v10 = vld [vmem:[%s21457_s5 + $0x170] ss:$8 sps:$4 sm:$0xff]  }
0x20aa   :  { %v9932_v38 = vmax.f32 %v9873_v26, %v9926_v36  ;;  %v16976_v26 = vld [vmem:[%s21457_s5 + $0x184] ss:$8 sps:$4 sm:$0xff]   ;;  %v15162_v32 = vld [vmem:[%s21457_s5 + $0x1b0] sm:$0x33] }
0x20ab   :  { %v9933_v20 = vpack.c.bf16 %v9931_v35, %v9929_v28  ;;  %v16979_v28 = vld [vmem:[%s21457_s5 + $0x194] ss:$8 sps:$4 sm:$0xff]   ;;  %v16980_v35 = vld [vmem:[%s21457_s5 + $0x1a0] ss:$8 sps:$4 sm:$0xff]   ;;  %v15174_v36 = vcombine.high %v15162_v32, %v15162_v32 }
0x20ac   :  { %v9934_v39 = vpack.c.bf16 %v9932_v38, %v9930_v30  ;;  %v16982_v30 = vld [vmem:[%s21457_s5 + $0x1a4] ss:$8 sps:$4 sm:$0xff]   ;;  %v15173_v38 = vcombine.low %v15162_v32, %v15162_v32 }
0x20ad   :  { %v17024_v32 = vld [vmem:[%s21458_s8 + $0x28] sm:$0xff]  }
0x20ae   :  { %15057 = vmatprep.mubr.msk.bf16.mxu1 %vm482_vm4, %v9934_v39  ;;  %15090 = vmatprep.mubr.msk.bf16.mxu0 %vm482_vm4, %v9934_v39  ;;  %v16987_v39 = vld [vmem:[%s21457_s5 + $0x4] ss:$8 sps:$4 sm:$0xff]  }
0x20af   :  { %10058 = vmatmul.mubr.bf16.vlgmr.msra.gmra.mrb[108].mxu1 %v9933_v20  ;;  %10186 = vmatmul.mubr.bf16.vlgmr.msra.gmra.mrb[172].mxu0 %v9933_v20  ;;  %v10537_v20 = vsel %vm752_vm5, %v15173_v38, 0  ;;  %v17027_v38 = vld [vmem:[%s21458_s8 + $0x40] sm:$0xff]  }
0x20b0   :  { %10291 = vmatpush1.bf16.msra.mxu1 %v16934_v40  ;;  %10322 = vmatprep.mubr.bf16.mxu1 %v17251_v24  ;;  %v16985_v40 = vld [vmem:[%s21457_s5] ss:$8 sps:$4 sm:$0xff]  }
0x20b1   :  { %10292 = vmatprep.subr.bf16.mxu1 %v16939_v41  ;;  %10871 = vmatprep.mubr.bf16.mxu0 %v17251_v24 }
0x20b4   :  { %10293 = vmatpush1.bf16.msra.mxu1 %v16937_v42  ;;  %v16990_v42 = vld [vmem:[%s21457_s5 + $0x14] ss:$8 sps:$4 sm:$0xff]  }
0x20b5   :  { %10294 = vmatprep.subr.bf16.mxu1 %v16942_v43  ;;  %v16988_v43 = vld [vmem:[%s21457_s5 + $0x10] ss:$8 sps:$4 sm:$0xff]  }
0x20b8   :  { %10295 = vmatpush1.bf16.msra.mxu1 %v16940_v45  ;;  %v16993_v45 = vld [vmem:[%s21457_s5 + $0x24] ss:$8 sps:$4 sm:$0xff]  }
0x20b9   :  { %10296 = vmatprep.subr.bf16.mxu1 %v16945_v46  ;;  %v16991_v46 = vld [vmem:[%s21457_s5 + $0x20] ss:$8 sps:$4 sm:$0xff]  }
0x20bc   :  { %10297 = vmatpush1.bf16.msra.mxu1 %v16943_v47  ;;  %v16996_v47 = vld [vmem:[%s21457_s5 + $0x34] ss:$8 sps:$4 sm:$0xff]  }
0x20bd   :  { %10298 = vmatprep.subr.bf16.mxu1 %v16948_v48  ;;  %v16994_v48 = vld [vmem:[%s21457_s5 + $0x30] ss:$8 sps:$4 sm:$0xff]  }
0x20c0   :  { %10299 = vmatpush1.bf16.msra.mxu1 %v16946_v31  ;;  %v16999_v31 = vld [vmem:[%s21457_s5 + $0x44] ss:$8 sps:$4 sm:$0xff]  }
0x20c1   :  { %15114 = vmatprep.subr.msk.bf16.mxu1 %vm752_vm5, %v15113_v50  ;;  %v16997_v50 = vld [vmem:[%s21457_s5 + $0x40] ss:$8 sps:$4 sm:$0xff]  }
0x20c4   :  { %10301 = vmatpush1.bf16.msra.mxu1 %v10285_v53 }
0x20c5   :  { %10422 = vmatprep.subr.bf16.mxu1 %v16953_v52  ;;  %v15187_v52 = vcombine.low %v10207_v49, %v10207_v49 }
0x20c7   :  { %v10643_v53 = vsel %vm752_vm5, %v15187_v52, 0  ;;  %v17030_v52 = vld [vmem:[%s21458_s8 + $0x58] sm:$0xff]  }
0x2182   :  { %v10059_v55 = vpop.f32.mrb[108].mxu1  ;;  %v10187_v56 = vpop.f32.mrb[172].mxu0 }
0x2183   :  { %v10194_v57 = vmax.f32 %v10059_v55, %v10187_v56  ;;  %v10061_v58 = vpop.f32.mrb[109].mxu1  ;;  %v10189_v44 = vpop.f32.mrb[173].mxu0  ;;  %v17004_v55 = vld [vmem:[%s21457_s5 + $0xb4] ss:$8 sps:$4 sm:$0xff]   ;;  %v17002_v56 = vld [vmem:[%s21457_s5 + $0xb0] ss:$8 sps:$4 sm:$0xff]  }
0x2184   :  { %v10062_v59 = vpop.f32.mrb[110].mxu1  ;;  %v10190_v60 = vpop.f32.mrb[174].mxu0  ;;  %v17005_v58 = vld [vmem:[%s21457_s5 + $0xc0] ss:$8 sps:$4 sm:$0xff]   ;;  %v17010_v44 = vld [vmem:[%s21457_s5 + $0xd4] ss:$8 sps:$4 sm:$0xff]  }
0x2185   :  { %v10195_v61 = vmax.f32 %v10062_v59, %v10190_v60  ;;  %v10064_v62 = vpop.f32.mrb[111].mxu1  ;;  %v10192_v63 = vpop.f32.mrb[175].mxu0  ;;  %v17008_v59 = vld [vmem:[%s21457_s5 + $0xd0] ss:$8 sps:$4 sm:$0xff]   ;;  %v17013_v60 = vld [vmem:[%s21457_s5 + $0xe4] ss:$8 sps:$4 sm:$0xff]  }
0x2186   :  { %v17016_v62 = vld [vmem:[%s21457_s5 + $0xf4] ss:$8 sps:$4 sm:$0xff]   ;;  %v15126_v63 = vld [vmem:[%s21457_s5 + $0x100] sm:$0x33] }
0x2187   :  { %v20434_v0 = vpack.c.bf16 %v10195_v61, %v10194_v57  ;;  %v17007_v57 = vld [vmem:[%s21457_s5 + $0xc4] ss:$8 sps:$4 sm:$0xff]   ;;  %v17011_v61 = vld [vmem:[%s21457_s5 + $0xe0] ss:$8 sps:$4 sm:$0xff]  }
0x2189   :  { %v10222_v2 = vshll.u32 %v20434_v0, 16  ;;  %v10220_v3 = vshrl.u32 %v20434_v0, 16  ;;  %v10477_v41 = vrot.slane %v20434_v0, 2 }
0x218b   :  { %v10224_v4 = vrot.slane %v10222_v2, 1  ;;  %v10355_v18 = vrot.slane %v10220_v3, 1  ;;  %v10356_v19 = vrot.slane %v10222_v2, 2  ;;  %v17014_v2 = vld [vmem:[%s21457_s5 + $0xf0] ss:$8 sps:$4 sm:$0xff]  }
0x218d   :  { %v10225_v54 = vor.u32 %v10224_v4, %v10220_v3  ;;  %v10357_v23 = vor.u32 %v10356_v19, %v10355_v18  ;;  %v15202_v3 = vcombine.high %v15126_v63, %v15126_v63  ;;  %v15201_v4 = vcombine.low %v15126_v63, %v15126_v63  ;;  %v17069_v63 = vld [vmem:[%s21453_s0 + $0xe4] ss:$8 sps:$4 sm:$0xff]  }
0x218f   :  { %15115 = vmatmul.mubr.msk.bf16.vlgmr.msra.gmra.mrb[112].mxu1 %vm748_vm6, %v10225_v54  ;;  %v10691_v54 = vrot.slane %v20434_v0, 1 }
0x2190   :  { %10423 = vmatpush1.bf16.msra.mxu1 %v16951_v5  ;;  %10454 = vmatprep.mubr.bf16.mxu1 %v17251_v24  ;;  %v10751_v5 = vsel %vm752_vm5, %v15201_v4, 0  ;;  %v17047_v4 = vld [vmem:[%s21452_s1 + $0x24] ss:$8 sps:$4 sm:$0xff]  }
0x2191   :  { %10424 = vmatprep.subr.bf16.mxu1 %v16956_v6  ;;  %v10807_v6 = vld [vmem:[%s21459_s6] sm:$0x3] }
0x2194   :  { %10425 = vmatpush1.bf16.msra.mxu1 %v16954_v7  ;;  %v10812_v7 = vrot.slane %v10807_v6, %v17433_v33 }
0x2195   :  { %10426 = vmatprep.subr.bf16.mxu1 %v16959_v8  ;;  %v10816_v8 = vrot.slane %v10807_v6, %v17435_v34  ;;  %v17048_v6 = vld [vmem:[%s21452_s1 + $0x30] ss:$8 sps:$4 sm:$0xff]  }
0x2198   :  { %10427 = vmatpush1.bf16.msra.mxu1 %v16957_v9 }
0x2199   :  { %10428 = vmatprep.subr.bf16.mxu1 %v16962_v11 }
0x219c   :  { %10429 = vmatpush1.bf16.msra.mxu1 %v16960_v12 }
0x219d   :  { %10430 = vmatprep.subr.bf16.mxu1 %v16965_v13 }
0x21a0   :  { %10431 = vmatpush1.bf16.msra.mxu1 %v16963_v15 }
0x21a1   :  { %15150 = vmatprep.subr.msk.bf16.mxu1 %vm752_vm5, %v15149_v1 }
0x21a4   :  { %10433 = vmatpush1.bf16.msra.mxu1 %v10417_v17 }
0x21a5   :  { %10542 = vmatprep.subr.bf16.mxu1 %v16970_v21 }
0x21a7   :  { %15151 = vmatmul.mubr.msk.bf16.vlgmr.msra.gmra.mrb[112].mxu1 %vm748_vm6, %v10357_v23 }
0x21a8   :  { %10543 = vmatpush1.bf16.msra.mxu1 %v16968_v22  ;;  %10574 = vmatprep.mubr.bf16.mxu1 %v17251_v24 }
0x21a9   :  { %10544 = vmatprep.subr.bf16.mxu1 %v16973_v25  ;;  %v10829_v25 = vld [vmem:[%s21460_s7] sm:$0x7] }
0x21ac   :  { %10545 = vmatpush1.bf16.msra.mxu1 %v16971_v10  ;;  %v15207_v10 = vld [vmem:[%s21460_s7 + $0x4] sm:$0x7] }
0x21ad   :  { %10546 = vmatprep.subr.bf16.mxu1 %v16976_v26  ;;  %v17019_v26 = vld [vmem:[%s21458_s8] sm:$0xff]  }
0x21b0   :  { %10547 = vmatpush1.bf16.msra.mxu1 %v16974_v27  ;;  %v17020_v27 = vld [vmem:[%s21458_s8 + $0x8] sm:$0xff]  }
0x21b1   :  { %10548 = vmatprep.subr.bf16.mxu1 %v16979_v28  ;;  %v17021_v28 = vld [vmem:[%s21458_s8 + $0x10] sm:$0xff]  }
0x21b4   :  { %10549 = vmatpush1.bf16.msra.mxu1 %v16977_v29  ;;  %v17022_v29 = vld [vmem:[%s21458_s8 + $0x18] sm:$0xff]  }
0x21b5   :  { %10550 = vmatprep.subr.bf16.mxu1 %v16982_v30  ;;  %v17023_v30 = vld [vmem:[%s21458_s8 + $0x20] sm:$0xff]  }
0x21b8   :  { %10551 = vmatpush1.bf16.msra.mxu1 %v16980_v35  ;;  %v17025_v35 = vld [vmem:[%s21458_s8 + $0x30] sm:$0xff]  }
0x21b9   :  { %15175 = vmatprep.subr.msk.bf16.mxu1 %vm752_vm5, %v15174_v36  ;;  %v17026_v36 = vld [vmem:[%s21458_s8 + $0x38] sm:$0xff]  }
0x21bc   :  { %10553 = vmatpush1.bf16.msra.mxu1 %v10537_v20  ;;  %v17028_v20 = vld [vmem:[%s21458_s8 + $0x48] sm:$0xff]  }
0x21bd   :  { %10648 = vmatprep.subr.bf16.mxu1 %v16987_v39 }
0x21bf   :  { %15176 = vmatmul.mubr.msk.bf16.vlgmr.msra.gmra.mrb[112].mxu1 %vm748_vm6, %v10477_v41 }
0x21c0   :  { %10649 = vmatpush1.bf16.msra.mxu1 %v16985_v40  ;;  %10680 = vmatprep.mubr.bf16.mxu1 %v17251_v24 }
0x21c1   :  { %10650 = vmatprep.subr.bf16.mxu1 %v16990_v42 }
0x21c4   :  { %10651 = vmatpush1.bf16.msra.mxu1 %v16988_v43 }
0x21c5   :  { %10652 = vmatprep.subr.bf16.mxu1 %v16993_v45 }
0x21c8   :  { %10653 = vmatpush1.bf16.msra.mxu1 %v16991_v46 }
0x21c9   :  { %10654 = vmatprep.subr.bf16.mxu1 %v16996_v47 }
0x21cc   :  { %10655 = vmatpush1.bf16.msra.mxu1 %v16994_v48 }
0x21cd   :  { %10656 = vmatprep.subr.bf16.mxu1 %v16999_v31 }
0x21d0   :  { %10657 = vmatpush1.bf16.msra.mxu1 %v16997_v50  ;;  %v17029_v50 = vld [vmem:[%s21458_s8 + $0x50] sm:$0xff]  }
0x21d1   :  { %15189 = vmatprep.subr.msk.bf16.mxu1 %vm752_vm5, %v15188_v51 }
0x21d4   :  { %10659 = vmatpush1.bf16.msra.mxu1 %v10643_v53  ;;  %v17031_v53 = vld [vmem:[%s21458_s8 + $0x60] sm:$0xff]  }
0x21d5   :  { %10756 = vmatprep.subr.bf16.mxu1 %v17004_v55  ;;  %v17032_v55 = vld [vmem:[%s21458_s8 + $0x68] sm:$0xff]  }
0x21d7   :  { %15190 = vmatmul.mubr.msk.bf16.vlgmr.msra.gmra.mrb[112].mxu1 %vm748_vm6, %v20434_v0 }
0x21d8   :  { %10757 = vmatpush1.bf16.msra.mxu1 %v17002_v56  ;;  %10788 = vmatprep.mubr.bf16.mxu1 %v17251_v24  ;;  %v17033_v56 = vld [vmem:[%s21458_s8 + $0x70] sm:$0xff]  }
0x21d9   :  { %10758 = vmatprep.subr.bf16.mxu1 %v17007_v57  ;;  %v17034_v57 = vld [vmem:[%s21458_s8 + $0x78] sm:$0xff]  }
0x21dc   :  { %10759 = vmatpush1.bf16.msra.mxu1 %v17005_v58  ;;  %v17035_v58 = vld [vmem:[%s21458_s8 + $0x80] sm:$0xff]  }
0x21dd   :  { %10760 = vmatprep.subr.bf16.mxu1 %v17010_v44  ;;  %v17036_v44 = vld [vmem:[%s21458_s8 + $0x88] sm:$0xff]  }
0x21e0   :  { %10761 = vmatpush1.bf16.msra.mxu1 %v17008_v59  ;;  %v17037_v59 = vld [vmem:[%s21458_s8 + $0x90] sm:$0xff]  }
0x21e1   :  { %10762 = vmatprep.subr.bf16.mxu1 %v17013_v60  ;;  %v17038_v60 = vld [vmem:[%s21458_s8 + $0x98] sm:$0xff]  }
0x21e4   :  { %10763 = vmatpush1.bf16.msra.mxu1 %v17011_v61  ;;  %v17041_v61 = vld [vmem:[%s21452_s1 + $0x4] ss:$8 sps:$4 sm:$0xff]  }
0x21e5   :  { %10764 = vmatprep.subr.bf16.mxu1 %v17016_v62  ;;  %v17039_v62 = vld [vmem:[%s21452_s1] ss:$8 sps:$4 sm:$0xff]  }
0x21e8   :  { %10765 = vmatpush1.bf16.msra.mxu1 %v17014_v2  ;;  %v17044_v2 = vld [vmem:[%s21452_s1 + $0x14] ss:$8 sps:$4 sm:$0xff]  }
0x21e9   :  { %15203 = vmatprep.subr.msk.bf16.mxu1 %vm752_vm5, %v15202_v3  ;;  %v17042_v3 = vld [vmem:[%s21452_s1 + $0x10] ss:$8 sps:$4 sm:$0xff]  }
0x21ec   :  { %10767 = vmatpush1.bf16.msra.mxu1 %v10751_v5  ;;  %v17045_v5 = vld [vmem:[%s21452_s1 + $0x20] ss:$8 sps:$4 sm:$0xff]  }
0x21ef   :  { %15204 = vmatmul.mubr.msk.bf16.vlgmr.msra.gmra.mrb[112].mxu1 %vm748_vm6, %v10691_v54  ;;  %v17050_v54 = vld [vmem:[%s21452_s1 + $0x34] ss:$8 sps:$4 sm:$0xff]  }
0x21f0   :  { %11452 = vmatprep.mubr.bf16.mxu1 %v17251_v24 }
0x22c2   :  { %v10790_v9 = vpop.f32.mrb[112].mxu1 }
0x22c3   :  { %v10819_v11 = vadd.f32 %v10812_v7, %v10790_v9  ;;  %v10792_v12 = vpop.f32.mrb[113].mxu1  ;;  %v17056_v9 = vld [vmem:[%s21452_s1 + $0x54] ss:$8 sps:$4 sm:$0xff]  }
0x22c4   :  { %v10820_v13 = vadd.f32 %v10816_v8, %v10792_v12  ;;  %v10794_v14 = vpop.f32.mrb[114].mxu1  ;;  %v17059_v12 = vld [vmem:[%s21452_s1 + $0x64] ss:$8 sps:$4 sm:$0xff]  }
0x22c5   :  { %v10821_v15 = vadd.f32 %v10812_v7, %v10794_v14  ;;  %v10796_v1 = vpop.f32.mrb[115].mxu1  ;;  %v10823_v16 = vmax.f32 %v10819_v11, 0.0  ;;  %v17053_v7 = vld [vmem:[%s21452_s1 + $0x44] ss:$8 sps:$4 sm:$0xff]   ;;  %v17054_v11 = vld [vmem:[%s21452_s1 + $0x50] ss:$8 sps:$4 sm:$0xff]  }
0x22c6   :  { %v10822_v0 = vadd.f32 %v10816_v8, %v10796_v1  ;;  %v10824_v18 = vmax.f32 %v10820_v13, 0.0  ;;  %v17051_v8 = vld [vmem:[%s21452_s1 + $0x40] ss:$8 sps:$4 sm:$0xff]   ;;  %v17062_v14 = vld [vmem:[%s21452_s1 + $0x74] ss:$8 sps:$4 sm:$0xff]  }
0x22c7   :  { %v10825_v17 = vmax.f32 %v10821_v15, 0.0  ;;  %v17057_v13 = vld [vmem:[%s21452_s1 + $0x60] ss:$8 sps:$4 sm:$0xff]   ;;  %v17060_v15 = vld [vmem:[%s21452_s1 + $0x70] ss:$8 sps:$4 sm:$0xff]  }
0x22c8   :  { %v10826_v19 = vmax.f32 %v10822_v0, 0.0  ;;  %v17065_v1 = vld [vmem:[%s21452_s1 + $0x84] ss:$8 sps:$4 sm:$0xff]   ;;  %v17063_v0 = vld [vmem:[%s21452_s1 + $0x80] ss:$8 sps:$4 sm:$0xff]  }
0x22c9   :  { %v10827_v21 = vpack.c.bf16 %v10825_v17, %v10823_v16  ;;  %v17068_v16 = vld [vmem:[%s21452_s1 + $0x94] ss:$8 sps:$4 sm:$0xff]   ;;  %v17066_v17 = vld [vmem:[%s21452_s1 + $0x90] ss:$8 sps:$4 sm:$0xff]  }
0x22ca   :  { %v10828_v22 = vpack.c.bf16 %v10826_v19, %v10824_v18  ;;  %v17071_v18 = vld [vmem:[%s21453_s0 + $0xe0] ss:$8 sps:$4 sm:$0xff]   ;;  %v17072_v19 = vld [vmem:[%s21453_s0 + $0xf4] ss:$8 sps:$4 sm:$0x3f]  }
0x22cb   :  { %v10834_v23 = vsel %vm1306_vm7, %v10827_v21, 0  ;;  %v17074_v21 = vld [vmem:[%s21453_s0 + $0xf0] ss:$8 sps:$4 sm:$0x3f]  }
0x22cc   :  { %15205 = vmatprep.subr.msk.bf16.mxu0 %vm1306_vm7, %v10828_v22 }
0x22cd   :  { %10840 = vmatpush1.bf16.msra.mxu0 %v10834_v23 }
0x22ce   :  { %15208 = vmatprep.subr.msk.bf16.mxu0 %vm1306_vm7, %v10828_v22  ;;  %v17078_v22 = vld [vmem:[%s21455_s4 + $0x54] sm:$0xff]  }
0x22d0   :  { %15206 = vmatmul.mubr.msk.bf16.vlgmr.msra.gmra.mrb[176].mxu0 %vm1302_vm8, %v10829_v25  ;;  %v17082_v25 = vld [vmem:[%s21455_s4 + $0x64] sm:$0xff]  }
0x22d1   :  { %10885 = vmatpush1.bf16.msra.mxu0 %v10834_v23  ;;  %10916 = vmatprep.mubr.bf16.mxu0 %v17251_v24  ;;  %v17080_v23 = vld [vmem:[%s21455_s4 + $0x5c] sm:$0xff]  }
0x22d2   :  { %11012 = vmatprep.subr.bf16.mxu0 %v17251_v24 }
0x22d8   :  { %15209 = vmatmul.mubr.msk.bf16.vlgmr.msra.gmra.mrb[180].mxu0 %vm1302_vm8, %v15207_v10  ;;  %v17084_v10 = vld [vmem:[%s21455_s4 + $0x6c] sm:$0xff]  }
0x22d9   :  { %11013 = vmatpush1.bf16.msra.mxu0 %v17019_v26  ;;  %v17086_v26 = vld [vmem:[%s21455_s4 + $0x74] sm:$0xff]  }
0x22da   :  { %11014 = vmatprep.subr.bf16.mxu0 %v17251_v24 }
0x22dd   :  { %11015 = vmatpush1.bf16.msra.mxu0 %v17020_v27 }
0x22de   :  { %11016 = vmatprep.subr.bf16.mxu0 %v17251_v24 }
0x22e1   :  { %11017 = vmatpush1.bf16.msra.mxu0 %v17021_v28 }
0x22e2   :  { %11018 = vmatprep.subr.bf16.mxu0 %v17251_v24 }
0x22e5   :  { %11019 = vmatpush1.bf16.msra.mxu0 %v17022_v29 }
0x22e6   :  { %11020 = vmatprep.subr.bf16.mxu0 %v17251_v24 }
0x22e9   :  { %11021 = vmatpush1.bf16.msra.mxu0 %v17023_v30 }
0x22ea   :  { %11022 = vmatprep.subr.bf16.mxu0 %v17251_v24 }
0x22ed   :  { %11023 = vmatpush1.bf16.msra.mxu0 %v17024_v32  ;;  %v17088_v32 = vld [vmem:[%s21455_s4 + $0x7c] sm:$0xff]  }
0x22ee   :  { %11024 = vmatprep.subr.bf16.mxu0 %v17251_v24 }
0x22f1   :  { %11025 = vmatpush1.bf16.msra.mxu0 %v17025_v35  ;;  %v17090_v35 = vld [vmem:[%s21455_s4 + $0x84] sm:$0xff]  }
0x22f2   :  { %11026 = vmatprep.subr.bf16.mxu0 %v17251_v24 }
0x22f5   :  { %11027 = vmatpush1.bf16.msra.mxu0 %v17026_v36 }
0x22f6   :  { %11028 = vmatprep.subr.bf16.mxu0 %v17251_v24 }
0x22f9   :  { %11029 = vmatpush1.bf16.msra.mxu0 %v17027_v38 }
0x22fa   :  { %11030 = vmatprep.subr.bf16.mxu0 %v17251_v24 }
0x22fd   :  { %11031 = vmatpush1.bf16.msra.mxu0 %v17028_v20 }
0x22fe   :  { %11132 = vmatprep.subr.bf16.mxu0 %v17251_v24 }
0x23a3   :  { %v10873_v39 = vpop.f32.mrb[176].mxu0 }
0x23a4   :  { %v10875_v40 = vpop.f32.mrb[177].mxu0 }
0x23a5   :  { %v10877_v41 = vpop.f32.mrb[178].mxu0 }
0x23a6   :  { %v10878_v42 = vpop.f32.mrb[179].mxu0 }
0x23ab   :  { %v10918_v43 = vpop.f32.mrb[180].mxu0 }
0x23ac   :  { %v10925_v45 = vmax.f32 %v10873_v39, %v10918_v43  ;;  %v10920_v46 = vpop.f32.mrb[181].mxu0  ;;  %v11175_v39 = vld [vmem:[#allocation2 + $0x18] sm:$0x7] }
0x23ad   :  { %v10926_v47 = vmax.f32 %v10875_v40, %v10920_v46  ;;  %v10922_v48 = vpop.f32.mrb[182].mxu0 }
0x23ae   :  { %v10923_v31 = vpop.f32.mrb[183].mxu0  ;;  %v10927_v51 = vpack.c.bf16 %v10925_v45, %v10925_v45  ;;  %v11203_v45 = vld [vmem:[%s21456_s2] sm:$0x3] }
0x23af   :  { %v10928_v49 = vpack.c.bf16 %v10926_v47, %v10926_v47  ;;  %v11208_v46 = vrot.slane %v11203_v45, %v17433_v33  ;;  %v11212_v47 = vrot.slane %v11203_v45, %v17435_v34 }
0x23b1   :  { %15220 = vmatprep.mubr.msk.bf16.mxu0 %vm205_vm0, %v10928_v49 }
0x23b2   :  { %11045 = vmatmul.mubr.bf16.vlgmr.msra.gmra.mrb[184].mxu0 %v10927_v51 }
0x23b3   :  { %11133 = vmatpush1.bf16.msra.mxu0 %v17029_v50  ;;  %15251 = vmatprep.mubr.msk.bf16.mxu0 %vm205_vm0, %v10928_v49 }
0x23b4   :  { %11134 = vmatprep.subr.bf16.mxu0 %v17251_v24 }
0x23b7   :  { %11135 = vmatpush1.bf16.msra.mxu0 %v17030_v52 }
0x23b8   :  { %11136 = vmatprep.subr.bf16.mxu0 %v17251_v24 }
0x23bb   :  { %11137 = vmatpush1.bf16.msra.mxu0 %v17031_v53 }
0x23bc   :  { %11138 = vmatprep.subr.bf16.mxu0 %v17251_v24 }
0x23bf   :  { %11139 = vmatpush1.bf16.msra.mxu0 %v17032_v55 }
0x23c0   :  { %11140 = vmatprep.subr.bf16.mxu0 %v17251_v24 }
0x23c3   :  { %11141 = vmatpush1.bf16.msra.mxu0 %v17033_v56 }
0x23c4   :  { %11142 = vmatprep.subr.bf16.mxu0 %v17251_v24 }
0x23c7   :  { %11143 = vmatpush1.bf16.msra.mxu0 %v17034_v57 }
0x23c8   :  { %11144 = vmatprep.subr.bf16.mxu0 %v17251_v24 }
0x23cb   :  { %11145 = vmatpush1.bf16.msra.mxu0 %v17035_v58 }
0x23cc   :  { %11146 = vmatprep.subr.bf16.mxu0 %v17251_v24 }
0x23cf   :  { %11147 = vmatpush1.bf16.msra.mxu0 %v17036_v44 }
0x23d0   :  { %11148 = vmatprep.subr.bf16.mxu0 %v17251_v24 }
0x23d3   :  { %11149 = vmatpush1.bf16.msra.mxu0 %v17037_v59 }
0x23d4   :  { %11150 = vmatprep.subr.bf16.mxu0 %v17251_v24 }
0x23d7   :  { %11151 = vmatpush1.bf16.msra.mxu0 %v17038_v60 }
0x23d8   :  { %11339 = vmatprep.subr.bf16.mxu0 %v17041_v61 }
0x23da   :  { %11165 = vmatmul.mubr.bf16.vlgmr.msra.gmra.mrb[188].mxu0 %v10927_v51 }
0x23db   :  { %11340 = vmatpush1.bf16.msra.mxu0 %v17039_v62  ;;  %15280 = vmatprep.mubr.msk.bf16.mxu0 %vm205_vm0, %v17069_v63 }
0x23dc   :  { %11341 = vmatprep.subr.bf16.mxu0 %v17044_v2 }
0x23df   :  { %11342 = vmatpush1.bf16.msra.mxu0 %v17042_v3 }
0x23e0   :  { %11343 = vmatprep.subr.bf16.mxu0 %v17047_v4 }
0x23e3   :  { %11344 = vmatpush1.bf16.msra.mxu0 %v17045_v5 }
0x23e4   :  { %11345 = vmatprep.subr.bf16.mxu0 %v17050_v54 }
0x23e7   :  { %11346 = vmatpush1.bf16.msra.mxu0 %v17048_v6 }
0x23e8   :  { %11347 = vmatprep.subr.bf16.mxu0 %v17053_v7 }
0x23eb   :  { %11348 = vmatpush1.bf16.msra.mxu0 %v17051_v8 }
0x23ec   :  { %11349 = vmatprep.subr.bf16.mxu0 %v17056_v9 }
0x23ef   :  { %11350 = vmatpush1.bf16.msra.mxu0 %v17054_v11 }
0x23f0   :  { %11351 = vmatprep.subr.bf16.mxu0 %v17059_v12 }
0x23f3   :  { %11352 = vmatpush1.bf16.msra.mxu0 %v17057_v13 }
0x23f4   :  { %11353 = vmatprep.subr.bf16.mxu0 %v17062_v14  ;;  %v17075_v14 = vld [vmem:[%s21454_s3] sm:$0x7f]  }
0x23f7   :  { %11354 = vmatpush1.bf16.msra.mxu0 %v17060_v15  ;;  %v17076_v15 = vld [vmem:[%s21454_s3 + $0x8] sm:$0x7f]  }
0x23f8   :  { %11355 = vmatprep.subr.bf16.mxu0 %v17065_v1  ;;  %v17077_v1 = vld [vmem:[%s21455_s4] sm:$0xff]  }
0x23fb   :  { %11356 = vmatpush1.bf16.msra.mxu0 %v17063_v0  ;;  %v17079_v0 = vld [vmem:[%s21455_s4 + $0x8] sm:$0xff]  }
0x23fc   :  { %11357 = vmatprep.subr.bf16.mxu0 %v17068_v16  ;;  %v17081_v16 = vld [vmem:[%s21455_s4 + $0x10] sm:$0xff]  }
0x23ff   :  { %11358 = vmatpush1.bf16.msra.mxu0 %v17066_v17  ;;  %v17083_v17 = vld [vmem:[%s21455_s4 + $0x18] sm:$0xff]  }
0x2400   :  { %11740 = vmatprep.subr.bf16.mxu0 %v17251_v24 }
0x2402   :  { %11372 = vmatmul.mubr.bf16.vlgmr.msra.gmra.mrb[192].mxu0 %v17071_v18  ;;  %v17085_v18 = vld [vmem:[%s21455_s4 + $0x20] sm:$0xff]  }
0x2403   :  { %15281 = vmatprep.mubr.msk.bf16.mxu0 %vm205_vm0, %v17072_v19  ;;  %11741 = vmatpush1.bf16.msra.mxu0 %v17078_v22  ;;  %v17087_v19 = vld [vmem:[%s21455_s4 + $0x28] sm:$0xff]   ;;  %v17091_v22 = vld [vmem:[%s21455_s4 + $0x38] sm:$0xff]  }
0x2404   :  { %11742 = vmatprep.subr.bf16.mxu0 %v17251_v24 }
0x2407   :  { %11743 = vmatpush1.bf16.msra.mxu0 %v17080_v23  ;;  %v17092_v23 = vld [vmem:[%s21455_s4 + $0x8c] sm:$0xff]  }
0x2408   :  { %11744 = vmatprep.subr.bf16.mxu0 %v17251_v24 }
0x240a   :  { %11382 = vmatmul.mubr.bf16.gmra.mrb[196].mxu0 %v17074_v21  ;;  %v17089_v21 = vld [vmem:[%s21455_s4 + $0x30] sm:$0xff]  }
0x240b   :  { %11745 = vmatpush1.bf16.msra.mxu0 %v17082_v25  ;;  %v17093_v25 = vld [vmem:[%s21455_s4 + $0x40] sm:$0xff]  }
0x240c   :  { %11746 = vmatprep.subr.bf16.mxu0 %v17251_v24 }
0x240f   :  { %11747 = vmatpush1.bf16.msra.mxu0 %v17084_v10  ;;  %v17094_v10 = vld [vmem:[%s21455_s4 + $0x94] sm:$0xff]  }
0x2410   :  { %11748 = vmatprep.subr.bf16.mxu0 %v17251_v24 }
0x2413   :  { %11749 = vmatpush1.bf16.msra.mxu0 %v17086_v26  ;;  %v17095_v26 = vld [vmem:[%s21455_s4 + $0x48] sm:$0xff]  }
0x2414   :  { %11750 = vmatprep.subr.bf16.mxu0 %v17251_v24 }
0x2417   :  { %11751 = vmatpush1.bf16.msra.mxu0 %v17088_v32 }
0x2418   :  { %11752 = vmatprep.subr.bf16.mxu0 %v17251_v24 }
0x241b   :  { %11753 = vmatpush1.bf16.msra.mxu0 %v17090_v35  ;;  %v17101_v35 = vld [vmem:[%s21457_s5 + $0x5c] ss:$8 sps:$4 sm:$0xff]  }
0x241c   :  { %11754 = vmatprep.subr.bf16.mxu0 %v17251_v24 }
0x241f   :  { %11755 = vmatpush1.bf16.msra.mxu0 %v17092_v23  ;;  %v17130_v23 = vld [vmem:[%s21457_s5 + $0x14c] ss:$8 sps:$4 sm:$0xff]  }
0x2420   :  { %11756 = vmatprep.subr.bf16.mxu0 %v17251_v24 }
0x2423   :  { %11757 = vmatpush1.bf16.msra.mxu0 %v17094_v10  ;;  %v17128_v10 = vld [vmem:[%s21457_s5 + $0x148] ss:$8 sps:$4 sm:$0xff]  }
0x2424   :  { %11758 = vmatprep.subr.bf16.mxu0 %v17251_v24 }
0x2485   :  { %v11046_v27 = vpop.f32.mrb[184].mxu0 }
0x2486   :  { %v11048_v28 = vpop.f32.mrb[185].mxu0 }
0x2487   :  { %v11049_v29 = vpop.f32.mrb[186].mxu0  ;;  %v17097_v28 = vld [vmem:[%s21455_s4 + $0x50] ss:$0 sps:$4 sm:$0xff]  }
0x2488   :  { %v11050_v30 = vpop.f32.mrb[187].mxu0  ;;  %v17098_v29 = vld [vmem:[%s21455_s4 + $0xa4] ss:$0 sps:$4 sm:$0xff]  }
0x2489   :  { %v11610_v30 = vsel %vm486_vm3, %v17097_v28, 0  ;;  %v11738_v32 = vsel %vm486_vm3, %v17098_v29, 0  ;;  %vm12845_vm3 = vcmask 1047559  }
0x24ad   :  { %v11166_v36 = vpop.f32.mrb[188].mxu0 }
0x24ae   :  { %v11172_v38 = vmax.f32 %v11046_v27, %v11166_v36  ;;  %v11168_v20 = vpop.f32.mrb[189].mxu0  ;;  %v17096_v27 = vld [vmem:[%s21455_s4 + $0x9c] sm:$0xff]  }
0x24af   :  { %v11169_v40 = vpop.f32.mrb[190].mxu0  ;;  %11759 = vmatpush1.bf16.msra.mxu0 %v17096_v27 }
0x24b0   :  { %v11173_v41 = vpack.c.bf16 %v11172_v38, %v11172_v38  ;;  %v11170_v42 = vpop.f32.mrb[191].mxu0  ;;  %11760 = vmatprep.subr.bf16.mxu0 %v17251_v24 }
0x24b2   :  { %v11176_v43 = vsel %vm17918_vm11, %v11173_v41, %v11175_v39 }
0x24b3   :  { %11177 = vst [vmem:[#allocation2 + $0x18] sm:$0x7] %v11176_v43  ;;  %11761 = vmatpush1.bf16.msra.mxu0 %v11738_v32  ;;  %v17135_v32 = vld [vmem:[%s21457_s5 + $0x164] ss:$8 sps:$4 sm:$0xff]  }
0x24d5   :  { %v11373_v48 = vpop.f32.mrb[192].mxu0 }
0x24d6   :  { %v11374_v31 = vadd.f32 %v11373_v48, %v11208_v46  ;;  %v11375_v49 = vpop.f32.mrb[193].mxu0 }
0x24d7   :  { %v11376_v50 = vadd.f32 %v11375_v49, %v11212_v47  ;;  %v11377_v51 = vpop.f32.mrb[194].mxu0 }
0x24d8   :  { %v11378_v52 = vadd.f32 %v11377_v51, %v11208_v46  ;;  %v11379_v53 = vpop.f32.mrb[195].mxu0  ;;  %v11392_v56 = vmax.f32 %v11374_v31, 0.0  ;;  %v17104_v51 = vld [vmem:[%s21457_s5 + $0x6c] ss:$8 sps:$4 sm:$0xff]  }
0x24d9   :  { %v11380_v55 = vadd.f32 %v11379_v53, %v11212_v47  ;;  %v11393_v58 = vmax.f32 %v11376_v50, 0.0  ;;  %v17099_v50 = vld [vmem:[%s21457_s5 + $0x58] ss:$8 sps:$4 sm:$0xff]   ;;  %v17107_v53 = vld [vmem:[%s21457_s5 + $0x7c] ss:$8 sps:$4 sm:$0xff]  }
0x24da   :  { %v11394_v57 = vmax.f32 %v11378_v52, 0.0  ;;  %v17102_v52 = vld [vmem:[%s21457_s5 + $0x68] ss:$8 sps:$4 sm:$0xff]  }
0x24db   :  { %v11395_v44 = vmax.f32 %v11380_v55, 0.0  ;;  %v17105_v55 = vld [vmem:[%s21457_s5 + $0x78] ss:$8 sps:$4 sm:$0xff]  }
0x24dc   :  { %v11400_v59 = vpack.c.bf16 %v11394_v57, %v11392_v56  ;;  %v17110_v56 = vld [vmem:[%s21457_s5 + $0x8c] ss:$8 sps:$4 sm:$0xff]   ;;  %v17108_v57 = vld [vmem:[%s21457_s5 + $0x88] ss:$8 sps:$4 sm:$0xff]  }
0x24dd   :  { %v11401_v60 = vpack.c.bf16 %v11395_v44, %v11393_v58  ;;  %v11383_v61 = vpop.f32.mrb[196].mxu0  ;;  %v17113_v58 = vld [vmem:[%s21457_s5 + $0x9c] ss:$8 sps:$4 sm:$0xff]   ;;  %v17111_v44 = vld [vmem:[%s21457_s5 + $0x98] ss:$8 sps:$4 sm:$0xff]  }
0x24de   :  { %v11384_v62 = vadd.f32 %v11383_v61, %v11208_v46  ;;  %v11385_v63 = vpop.f32.mrb[197].mxu0 }
0x24df   :  { %v11386_v2 = vadd.f32 %v11385_v63, %v11212_v47  ;;  %v11387_v3 = vpop.f32.mrb[198].mxu0  ;;  %11420 = vmatprep.subr.bf16.mxu1 %v11401_v60 }
0x24e0   :  { %v11388_v4 = vadd.f32 %v11387_v3, %v11208_v46  ;;  %v11389_v5 = vpop.f32.mrb[199].mxu0  ;;  %11421 = vmatpush1.bf16.msra.mxu1 %v11400_v59  ;;  %v11396_v6 = vmax.f32 %v11384_v62, 0.0  ;;  %v17118_v62 = vld [vmem:[%s21457_s5 + $0x10c] ss:$8 sps:$4 sm:$0xff]  }
0x24e1   :  { %v11390_v54 = vadd.f32 %v11389_v5, %v11212_v47  ;;  %v11397_v8 = vmax.f32 %v11386_v2, 0.0 }
0x24e2   :  { %v11398_v7 = vmax.f32 %v11388_v4, 0.0 }
0x24e3   :  { %v11399_v9 = vmax.f32 %v11390_v54, 0.0 }
0x24e4   :  { %v11402_v11 = vpack.c.bf16 %v11398_v7, %v11396_v6 }
0x24e5   :  { %v11403_v12 = vpack.c.bf16 %v11399_v9, %v11397_v8 }
0x24e6   :  { %v11415_v13 = vsel %vm288_vm1, %v11402_v11, 0 }
0x24e7   :  { %15283 = vmatprep.subr.msk.bf16.mxu1 %vm288_vm1, %v11403_v12 }
0x24e8   :  { %11423 = vmatpush1.bf16.msra.mxu1 %v11415_v13 }
0x24e9   :  { %11473 = vmatprep.subr.bf16.mxu1 %v11401_v60 }
0x24eb   :  { %15284 = vmatmul.mubr.msk.bf16.vlgmr.msra.gmra.mrb[116].mxu1 %vm284_vm2, %v17075_v14 }
0x24ec   :  { %11474 = vmatpush1.bf16.msra.mxu1 %v11400_v59  ;;  %11505 = vmatprep.mubr.bf16.mxu1 %v17251_v24  ;;  %v15345_v59 = vld [vmem:[%s21457_s5 + $0xa8] sm:$0x33] }
0x24ed   :  { %15288 = vmatprep.subr.msk.bf16.mxu1 %vm288_vm1, %v11403_v12  ;;  %v15357_v60 = vcombine.high %v15345_v59, %v15345_v59  ;;  %v15356_v61 = vcombine.low %v15345_v59, %v15345_v59  ;;  %v11794_v59 = vld [vmem:[%s21457_s5 + $0x50] sm:$0x33]  ;;  %vm12836_vm1 = vcmask 1044484  }
0x24ef   :  { %v11872_v63 = vsel %vm752_vm5, %v15356_v61, 0  ;;  %v15432_v61 = vcombine.high %v11794_v59, %v11794_v59 }
0x24f0   :  { %11476 = vmatpush1.bf16.msra.mxu1 %v11415_v13 }
0x24f1   :  { %11612 = vmatprep.subr.bf16.mxu1 %v17251_v24 }
0x24f3   :  { %15289 = vmatmul.mubr.msk.bf16.vlgmr.msra.gmra.mrb[120].mxu1 %vm284_vm2, %v17076_v15  ;;  %vm12842_vm2 = vcmask 1046534  }
0x24f4   :  { %11613 = vmatpush1.bf16.msra.mxu1 %v17077_v1  ;;  %v17116_v1 = vld [vmem:[%s21457_s5 + $0x108] ss:$8 sps:$4 sm:$0xff]  }
0x24f5   :  { %11614 = vmatprep.subr.bf16.mxu1 %v17251_v24 }
0x24f8   :  { %11615 = vmatpush1.bf16.msra.mxu1 %v17079_v0 }
0x24f9   :  { %11616 = vmatprep.subr.bf16.mxu1 %v17251_v24 }
0x24fc   :  { %11617 = vmatpush1.bf16.msra.mxu1 %v17081_v16  ;;  %v17121_v16 = vld [vmem:[%s21457_s5 + $0x11c] ss:$8 sps:$4 sm:$0xff]  }
0x24fd   :  { %11618 = vmatprep.subr.bf16.mxu1 %v17251_v24 }
0x2500   :  { %11619 = vmatpush1.bf16.msra.mxu1 %v17083_v17  ;;  %v17119_v17 = vld [vmem:[%s21457_s5 + $0x118] ss:$8 sps:$4 sm:$0xff]  }
0x2501   :  { %11620 = vmatprep.subr.bf16.mxu1 %v17251_v24 }
0x2504   :  { %11621 = vmatpush1.bf16.msra.mxu1 %v17085_v18  ;;  %v17124_v18 = vld [vmem:[%s21457_s5 + $0x12c] ss:$8 sps:$4 sm:$0xff]  }
0x2505   :  { %11622 = vmatprep.subr.bf16.mxu1 %v17251_v24 }
0x2508   :  { %11623 = vmatpush1.bf16.msra.mxu1 %v17087_v19  ;;  %v17122_v19 = vld [vmem:[%s21457_s5 + $0x128] ss:$8 sps:$4 sm:$0xff]  }
0x2509   :  { %11624 = vmatprep.subr.bf16.mxu1 %v17251_v24 }
0x250c   :  { %11625 = vmatpush1.bf16.msra.mxu1 %v17089_v21  ;;  %v17127_v21 = vld [vmem:[%s21457_s5 + $0x13c] ss:$8 sps:$4 sm:$0xff]  }
0x250d   :  { %11626 = vmatprep.subr.bf16.mxu1 %v17251_v24 }
0x2510   :  { %11627 = vmatpush1.bf16.msra.mxu1 %v17091_v22  ;;  %v17125_v22 = vld [vmem:[%s21457_s5 + $0x138] ss:$8 sps:$4 sm:$0xff]  }
0x2511   :  { %11628 = vmatprep.subr.bf16.mxu1 %v17251_v24 }
0x2514   :  { %11629 = vmatpush1.bf16.msra.mxu1 %v17093_v25  ;;  %v15381_v25 = vld [vmem:[%s21457_s5 + $0x158] sm:$0x33] }
0x2515   :  { %11630 = vmatprep.subr.bf16.mxu1 %v17251_v24  ;;  %v15392_v27 = vcombine.low %v15381_v25, %v15381_v25 }
0x2517   :  { %v12004_v28 = vsel %vm752_vm5, %v15392_v27, 0 }
0x2518   :  { %11631 = vmatpush1.bf16.msra.mxu1 %v17095_v26  ;;  %v15393_v26 = vcombine.high %v15381_v25, %v15381_v25 }
0x2519   :  { %11632 = vmatprep.subr.bf16.mxu1 %v17251_v24 }
0x251c   :  { %11633 = vmatpush1.bf16.msra.mxu1 %v11610_v30 }
0x251d   :  { %11877 = vmatprep.subr.bf16.mxu1 %v17101_v35  ;;  %v17133_v35 = vld [vmem:[%s21457_s5 + $0x160] ss:$8 sps:$4 sm:$0xff]  }
0x25be   :  { %v11454_v36 = vpop.f32.mrb[116].mxu1 }
0x25bf   :  { %v11456_v38 = vpop.f32.mrb[117].mxu1 }
0x25c0   :  { %v11458_v20 = vpop.f32.mrb[118].mxu1 }
0x25c1   :  { %v11460_v39 = vpop.f32.mrb[119].mxu1 }
0x25c6   :  { %v11507_v40 = vpop.f32.mrb[120].mxu1 }
0x25c7   :  { %v11516_v41 = vmax.f32 %v11454_v36, %v11507_v40  ;;  %v11509_v42 = vpop.f32.mrb[121].mxu1  ;;  %v17139_v40 = vld [vmem:[%s21457_s5 + $0x180] ss:$8 sps:$4 sm:$0xff]  }
0x25c8   :  { %v11517_v43 = vmax.f32 %v11456_v38, %v11509_v42  ;;  %v11511_v45 = vpop.f32.mrb[122].mxu1  ;;  %v17138_v38 = vld [vmem:[%s21457_s5 + $0x174] ss:$8 sps:$4 sm:$0xff]   ;;  %v17142_v42 = vld [vmem:[%s21457_s5 + $0x190] ss:$8 sps:$4 sm:$0xff]  }
0x25c9   :  { %v11518_v46 = vmax.f32 %v11458_v20, %v11511_v45  ;;  %v11513_v47 = vpop.f32.mrb[123].mxu1  ;;  %v17136_v20 = vld [vmem:[%s21457_s5 + $0x170] ss:$8 sps:$4 sm:$0xff]  }
0x25ca   :  { %v11519_v48 = vmax.f32 %v11460_v39, %v11513_v47  ;;  %v17141_v39 = vld [vmem:[%s21457_s5 + $0x184] ss:$8 sps:$4 sm:$0xff]   ;;  %v15406_v45 = vld [vmem:[%s21457_s5 + $0x1b0] sm:$0x33] }
0x25cb   :  { %v11520_v31 = vpack.c.bf16 %v11518_v46, %v11516_v41  ;;  %v17144_v41 = vld [vmem:[%s21457_s5 + $0x194] ss:$8 sps:$4 sm:$0xff]   ;;  %v17145_v46 = vld [vmem:[%s21457_s5 + $0x1a0] ss:$8 sps:$4 sm:$0xff]   ;;  %v15418_v47 = vcombine.high %v15406_v45, %v15406_v45 }
0x25cc   :  { %v11521_v49 = vpack.c.bf16 %v11519_v48, %v11517_v43  ;;  %v17147_v43 = vld [vmem:[%s21457_s5 + $0x1a4] ss:$8 sps:$4 sm:$0xff]   ;;  %v15417_v48 = vcombine.low %v15406_v45, %v15406_v45  ;;  %v17191_v45 = vld [vmem:[%s21458_s8 + $0x38] sm:$0xff]  }
0x25ce   :  { %15301 = vmatprep.mubr.msk.bf16.mxu1 %vm482_vm4, %v11521_v49  ;;  %15334 = vmatprep.mubr.msk.bf16.mxu0 %vm482_vm4, %v11521_v49  ;;  %v17152_v49 = vld [vmem:[%s21457_s5 + $0x4] ss:$8 sps:$4 sm:$0xff]   ;;  %vm12878_vm4 = vcmask 654336  }
0x25cf   :  { %11645 = vmatmul.mubr.bf16.vlgmr.msra.gmra.mrb[124].mxu1 %v11520_v31  ;;  %11773 = vmatmul.mubr.bf16.vlgmr.msra.gmra.mrb[200].mxu0 %v11520_v31  ;;  %v12124_v31 = vsel %vm752_vm5, %v15417_v48, 0 }
0x25d0   :  { %11878 = vmatpush1.bf16.msra.mxu1 %v17099_v50  ;;  %11909 = vmatprep.mubr.bf16.mxu1 %v17251_v24  ;;  %v17150_v50 = vld [vmem:[%s21457_s5] ss:$8 sps:$4 sm:$0xff]  }
0x25d1   :  { %11879 = vmatprep.subr.bf16.mxu1 %v17104_v51  ;;  %12458 = vmatprep.mubr.bf16.mxu0 %v17251_v24 }
0x25d4   :  { %11880 = vmatpush1.bf16.msra.mxu1 %v17102_v52  ;;  %v17155_v52 = vld [vmem:[%s21457_s5 + $0x14] ss:$8 sps:$4 sm:$0xff]  }
0x25d5   :  { %11881 = vmatprep.subr.bf16.mxu1 %v17107_v53  ;;  %v17153_v53 = vld [vmem:[%s21457_s5 + $0x10] ss:$8 sps:$4 sm:$0xff]  }
0x25d8   :  { %11882 = vmatpush1.bf16.msra.mxu1 %v17105_v55  ;;  %v17158_v55 = vld [vmem:[%s21457_s5 + $0x24] ss:$8 sps:$4 sm:$0xff]  }
0x25d9   :  { %11883 = vmatprep.subr.bf16.mxu1 %v17110_v56  ;;  %v17156_v56 = vld [vmem:[%s21457_s5 + $0x20] ss:$8 sps:$4 sm:$0xff]  }
0x25dc   :  { %11884 = vmatpush1.bf16.msra.mxu1 %v17108_v57  ;;  %v17161_v57 = vld [vmem:[%s21457_s5 + $0x34] ss:$8 sps:$4 sm:$0xff]  }
0x25dd   :  { %11885 = vmatprep.subr.bf16.mxu1 %v17113_v58  ;;  %v17159_v58 = vld [vmem:[%s21457_s5 + $0x30] ss:$8 sps:$4 sm:$0xff]  }
0x25e0   :  { %11886 = vmatpush1.bf16.msra.mxu1 %v17111_v44  ;;  %v17164_v44 = vld [vmem:[%s21457_s5 + $0x44] ss:$8 sps:$4 sm:$0xff]  }
0x25e1   :  { %15358 = vmatprep.subr.msk.bf16.mxu1 %vm752_vm5, %v15357_v60  ;;  %v17162_v60 = vld [vmem:[%s21457_s5 + $0x40] ss:$8 sps:$4 sm:$0xff]  }
0x25e4   :  { %11888 = vmatpush1.bf16.msra.mxu1 %v11872_v63 }
0x25e5   :  { %12009 = vmatprep.subr.bf16.mxu1 %v17118_v62  ;;  %v15431_v62 = vcombine.low %v11794_v59, %v11794_v59 }
0x25e7   :  { %v12230_v63 = vsel %vm752_vm5, %v15431_v62, 0  ;;  %v17197_v62 = vld [vmem:[%s21458_s8 + $0x68] sm:$0xff]  }
0x26a2   :  { %v11646_v2 = vpop.f32.mrb[124].mxu1  ;;  %v11774_v3 = vpop.f32.mrb[200].mxu0 }
0x26a3   :  { %v11781_v4 = vmax.f32 %v11646_v2, %v11774_v3  ;;  %v11648_v5 = vpop.f32.mrb[125].mxu1  ;;  %v11776_v54 = vpop.f32.mrb[201].mxu0  ;;  %v17169_v2 = vld [vmem:[%s21457_s5 + $0xb4] ss:$8 sps:$4 sm:$0xff]   ;;  %v17167_v3 = vld [vmem:[%s21457_s5 + $0xb0] ss:$8 sps:$4 sm:$0xff]  }
0x26a4   :  { %v11649_v6 = vpop.f32.mrb[126].mxu1  ;;  %v11777_v7 = vpop.f32.mrb[202].mxu0  ;;  %v17170_v5 = vld [vmem:[%s21457_s5 + $0xc0] ss:$8 sps:$4 sm:$0xff]   ;;  %v17175_v54 = vld [vmem:[%s21457_s5 + $0xd4] ss:$8 sps:$4 sm:$0xff]  }
0x26a5   :  { %v11782_v8 = vmax.f32 %v11649_v6, %v11777_v7  ;;  %v11651_v9 = vpop.f32.mrb[127].mxu1  ;;  %v11779_v11 = vpop.f32.mrb[203].mxu0  ;;  %v17173_v6 = vld [vmem:[%s21457_s5 + $0xd0] ss:$8 sps:$4 sm:$0xff]   ;;  %v17178_v7 = vld [vmem:[%s21457_s5 + $0xe4] ss:$8 sps:$4 sm:$0xff]  }
0x26a6   :  { %v17181_v9 = vld [vmem:[%s21457_s5 + $0xf4] ss:$8 sps:$4 sm:$0xff]   ;;  %v15370_v11 = vld [vmem:[%s21457_s5 + $0x100] sm:$0x33] }
0x26a7   :  { %v20912_v12 = vpack.c.bf16 %v11782_v8, %v11781_v4  ;;  %v17172_v4 = vld [vmem:[%s21457_s5 + $0xc4] ss:$8 sps:$4 sm:$0xff]   ;;  %v17176_v8 = vld [vmem:[%s21457_s5 + $0xe0] ss:$8 sps:$4 sm:$0xff]  }
0x26a9   :  { %v11809_v13 = vshll.u32 %v20912_v12, 16  ;;  %v11807_v14 = vshrl.u32 %v20912_v12, 16  ;;  %v12064_v51 = vrot.slane %v20912_v12, 2 }
0x26ab   :  { %v11811_v15 = vrot.slane %v11809_v13, 1  ;;  %v11942_v29 = vrot.slane %v11807_v14, 1  ;;  %v11943_v30 = vrot.slane %v11809_v13, 2  ;;  %v17179_v13 = vld [vmem:[%s21457_s5 + $0xf0] ss:$8 sps:$4 sm:$0xff]  }
0x26ad   :  { %v11812_v0 = vor.u32 %v11811_v15, %v11807_v14  ;;  %v11944_v36 = vor.u32 %v11943_v30, %v11942_v29  ;;  %v15446_v14 = vcombine.high %v15370_v11, %v15370_v11  ;;  %v15445_v15 = vcombine.low %v15370_v11, %v15370_v11  ;;  %v17208_v11 = vld [vmem:[%s21461_s9 + $0x38] sm:$0xff]  }
0x26af   :  { %15359 = vmatmul.mubr.msk.bf16.vlgmr.msra.gmra.mrb[128].mxu1 %vm748_vm6, %v11812_v0  ;;  %v12278_v0 = vrot.slane %v20912_v12, 1 }
0x26b0   :  { %12010 = vmatpush1.bf16.msra.mxu1 %v17116_v1  ;;  %12041 = vmatprep.mubr.bf16.mxu1 %v17251_v24  ;;  %v12338_v1 = vsel %vm752_vm5, %v15445_v15, 0  ;;  %v17211_v15 = vld [vmem:[%s21461_s9 + $0x90] sm:$0xff]  }
0x26b1   :  { %12011 = vmatprep.subr.bf16.mxu1 %v17121_v16  ;;  %v12394_v16 = vld [vmem:[%s21459_s6] sm:$0x3] }
0x26b4   :  { %12012 = vmatpush1.bf16.msra.mxu1 %v17119_v17  ;;  %v12399_v17 = vrot.slane %v12394_v16, %v17433_v33  ;;  %v12416_v33 = vld [vmem:[%s21460_s7] sm:$0x7] }
0x26b5   :  { %12013 = vmatprep.subr.bf16.mxu1 %v17124_v18  ;;  %v12403_v18 = vrot.slane %v12394_v16, %v17435_v34  ;;  %v15451_v34 = vld [vmem:[%s21460_s7 + $0x4] sm:$0x7] }
0x26b8   :  { %12014 = vmatpush1.bf16.msra.mxu1 %v17122_v19 }
0x26b9   :  { %12015 = vmatprep.subr.bf16.mxu1 %v17127_v21 }
0x26bc   :  { %12016 = vmatpush1.bf16.msra.mxu1 %v17125_v22 }
0x26bd   :  { %12017 = vmatprep.subr.bf16.mxu1 %v17130_v23 }
0x26c0   :  { %12018 = vmatpush1.bf16.msra.mxu1 %v17128_v10 }
0x26c1   :  { %15394 = vmatprep.subr.msk.bf16.mxu1 %vm752_vm5, %v15393_v26 }
0x26c4   :  { %12020 = vmatpush1.bf16.msra.mxu1 %v12004_v28 }
0x26c5   :  { %12129 = vmatprep.subr.bf16.mxu1 %v17135_v32 }
0x26c7   :  { %15395 = vmatmul.mubr.msk.bf16.vlgmr.msra.gmra.mrb[128].mxu1 %vm748_vm6, %v11944_v36 }
0x26c8   :  { %12130 = vmatpush1.bf16.msra.mxu1 %v17133_v35  ;;  %12161 = vmatprep.mubr.bf16.mxu1 %v17251_v24 }
0x26c9   :  { %12131 = vmatprep.subr.bf16.mxu1 %v17138_v38  ;;  %v17184_v38 = vld [vmem:[%s21458_s8] sm:$0xff]  }
0x26cc   :  { %12132 = vmatpush1.bf16.msra.mxu1 %v17136_v20  ;;  %v17185_v20 = vld [vmem:[%s21458_s8 + $0x8] sm:$0xff]  }
0x26cd   :  { %12133 = vmatprep.subr.bf16.mxu1 %v17141_v39  ;;  %v17186_v39 = vld [vmem:[%s21458_s8 + $0x10] sm:$0xff]  }
0x26d0   :  { %12134 = vmatpush1.bf16.msra.mxu1 %v17139_v40  ;;  %v17187_v40 = vld [vmem:[%s21458_s8 + $0x18] sm:$0xff]  }
0x26d1   :  { %12135 = vmatprep.subr.bf16.mxu1 %v17144_v41  ;;  %v17188_v41 = vld [vmem:[%s21458_s8 + $0x20] sm:$0xff]  }
0x26d4   :  { %12136 = vmatpush1.bf16.msra.mxu1 %v17142_v42  ;;  %v17189_v42 = vld [vmem:[%s21458_s8 + $0x28] sm:$0xff]  }
0x26d5   :  { %12137 = vmatprep.subr.bf16.mxu1 %v17147_v43  ;;  %v17190_v43 = vld [vmem:[%s21458_s8 + $0x30] sm:$0xff]  }
0x26d8   :  { %12138 = vmatpush1.bf16.msra.mxu1 %v17145_v46  ;;  %v17192_v46 = vld [vmem:[%s21458_s8 + $0x40] sm:$0xff]  }
0x26d9   :  { %15419 = vmatprep.subr.msk.bf16.mxu1 %vm752_vm5, %v15418_v47  ;;  %v17193_v47 = vld [vmem:[%s21458_s8 + $0x48] sm:$0xff]  }
0x26dc   :  { %12140 = vmatpush1.bf16.msra.mxu1 %v12124_v31 }
0x26dd   :  { %12235 = vmatprep.subr.bf16.mxu1 %v17152_v49 }
0x26df   :  { %15420 = vmatmul.mubr.msk.bf16.vlgmr.msra.gmra.mrb[128].mxu1 %vm748_vm6, %v12064_v51 }
0x26e0   :  { %12236 = vmatpush1.bf16.msra.mxu1 %v17150_v50  ;;  %12267 = vmatprep.mubr.bf16.mxu1 %v17251_v24 }
0x26e1   :  { %12237 = vmatprep.subr.bf16.mxu1 %v17155_v52 }
0x26e4   :  { %12238 = vmatpush1.bf16.msra.mxu1 %v17153_v53 }
0x26e5   :  { %12239 = vmatprep.subr.bf16.mxu1 %v17158_v55 }
0x26e8   :  { %12240 = vmatpush1.bf16.msra.mxu1 %v17156_v56 }
0x26e9   :  { %12241 = vmatprep.subr.bf16.mxu1 %v17161_v57 }
0x26ec   :  { %12242 = vmatpush1.bf16.msra.mxu1 %v17159_v58 }
0x26ed   :  { %12243 = vmatprep.subr.bf16.mxu1 %v17164_v44  ;;  %v17194_v44 = vld [vmem:[%s21458_s8 + $0x50] sm:$0xff]  }
0x26f0   :  { %12244 = vmatpush1.bf16.msra.mxu1 %v17162_v60  ;;  %v17195_v60 = vld [vmem:[%s21458_s8 + $0x58] sm:$0xff]  }
0x26f1   :  { %15433 = vmatprep.subr.msk.bf16.mxu1 %vm752_vm5, %v15432_v61  ;;  %v17196_v61 = vld [vmem:[%s21458_s8 + $0x60] sm:$0xff]  }
0x26f4   :  { %12246 = vmatpush1.bf16.msra.mxu1 %v12230_v63  ;;  %v17198_v63 = vld [vmem:[%s21458_s8 + $0x70] sm:$0xff]  }
0x26f5   :  { %12343 = vmatprep.subr.bf16.mxu1 %v17169_v2  ;;  %v17199_v2 = vld [vmem:[%s21458_s8 + $0x78] sm:$0xff]  }
0x26f7   :  { %15434 = vmatmul.mubr.msk.bf16.vlgmr.msra.gmra.mrb[128].mxu1 %vm748_vm6, %v20912_v12 }
0x26f8   :  { %12344 = vmatpush1.bf16.msra.mxu1 %v17167_v3  ;;  %12375 = vmatprep.mubr.bf16.mxu1 %v17251_v24  ;;  %v17200_v3 = vld [vmem:[%s21458_s8 + $0x80] sm:$0xff]  }
0x26f9   :  { %12345 = vmatprep.subr.bf16.mxu1 %v17172_v4  ;;  %v17201_v4 = vld [vmem:[%s21458_s8 + $0x88] sm:$0xff]  }
0x26fc   :  { %12346 = vmatpush1.bf16.msra.mxu1 %v17170_v5  ;;  %v17202_v5 = vld [vmem:[%s21458_s8 + $0x90] sm:$0xff]  }
0x26fd   :  { %12347 = vmatprep.subr.bf16.mxu1 %v17175_v54  ;;  %v17203_v54 = vld [vmem:[%s21458_s8 + $0x98] sm:$0xff]  }
0x2700   :  { %12348 = vmatpush1.bf16.msra.mxu1 %v17173_v6  ;;  %v17204_v6 = vld [vmem:[%s21461_s9 + $0x28] sm:$0xff]  }
0x2701   :  { %12349 = vmatprep.subr.bf16.mxu1 %v17178_v7  ;;  %v17252_v7 = vmov 0.0  }
0x2704   :  { %12350 = vmatpush1.bf16.msra.mxu1 %v17176_v8  ;;  %v17205_v8 = vld [vmem:[%s21461_s9 + $0x78] sm:$0xff]  }
0x2705   :  { %12351 = vmatprep.subr.bf16.mxu1 %v17181_v9  ;;  %v17207_v9 = vld [vmem:[%s21461_s9 + $0x80] sm:$0xff]  }
0x2708   :  { %12352 = vmatpush1.bf16.msra.mxu1 %v17179_v13  ;;  %v17209_v13 = vld [vmem:[%s21461_s9 + $0x88] sm:$0xff]  }
0x2709   :  { %15447 = vmatprep.subr.msk.bf16.mxu1 %vm752_vm5, %v15446_v14  ;;  %v17210_v14 = vld [vmem:[%s21461_s9 + $0x40] sm:$0xff]  }
0x270c   :  { %12354 = vmatpush1.bf16.msra.mxu1 %v12338_v1  ;;  %v17212_v1 = vld [vmem:[%s21461_s9 + $0x48] sm:$0xff]  }
0x270d   :  { %15655 = vmatprep.subr.bf16.mxu1 %v17252_v7 }
0x270f   :  { %15448 = vmatmul.mubr.msk.bf16.vlgmr.msra.gmra.mrb[128].mxu1 %vm748_vm6, %v12278_v0  ;;  %v17213_v0 = vld [vmem:[%s21461_s9 + $0x98] sm:$0xff]  }
0x2710   :  { %15656 = vmatpush3.bf16.msra.mxu1 %v17205_v8  ;;  %15665 = vmatprep.mubr.msk.bf16.mxu1 %vm17253_vm12, %v17252_v7 }
0x2711   :  { %15657 = vmatprep.subr.bf16.mxu1 %v17252_v7 }
0x2714   :  { %15658 = vmatpush3.bf16.msra.mxu1 %v17207_v9  ;;  %v17220_v9 = vld [vmem:[%s21461_s9 + $0xa0] sm:$0xff]  }
0x2715   :  { %15659 = vmatprep.subr.bf16.mxu1 %v17252_v7 }
0x2718   :  { %15660 = vmatpush3.bf16.msra.mxu1 %v17209_v13 }
0x2719   :  { %15661 = vmatprep.subr.bf16.mxu1 %v17252_v7 }
0x271c   :  { %15662 = vmatpush3.bf16.msra.mxu1 %v17211_v15  ;;  %v17222_v15 = vld [vmem:[%s21461_s9 + $0xa8] sm:$0xff]  }
0x271d   :  { %15663 = vmatprep.subr.bf16.mxu1 %v17252_v7 }
0x2720   :  { %15664 = vmatpush3.bf16.msra.mxu1 %v17213_v0  ;;  %v17224_v0 = vld [vmem:[%s21461_s9 + $0xb0] sm:$0xff]  }
0x2721   :  { %15683 = vmatprep.subr.bf16.mxu1 %v17252_v7 }
0x27e2   :  { %v12377_v19 = vpop.f32.mrb[128].mxu1 }
0x27e3   :  { %v12406_v21 = vadd.f32 %v12399_v17, %v12377_v19  ;;  %v12379_v22 = vpop.f32.mrb[129].mxu1 }
0x27e4   :  { %v12407_v23 = vadd.f32 %v12403_v18, %v12379_v22  ;;  %v12381_v25 = vpop.f32.mrb[130].mxu1  ;;  %v16083_v22 = vld [vmem:[#allocation2] ss:$0 sps:$4 sm:$0x77]  }
0x27e5   :  { %v12408_v10 = vadd.f32 %v12399_v17, %v12381_v25  ;;  %v12383_v26 = vpop.f32.mrb[131].mxu1  ;;  %v12410_v28 = vmax.f32 %v12406_v21, 0.0  ;;  %v17214_v21 = vld [vmem:[#allocation2 + $0x4] ss:$0 sps:$4 sm:$0x77]  }
0x27e6   :  { %v12409_v27 = vadd.f32 %v12403_v18, %v12383_v26  ;;  %v12411_v29 = vmax.f32 %v12407_v23, 0.0  ;;  %v16414_v25 = vld [vmem:[#allocation2 + $0x8] ss:$0 sps:$4 sm:$0x77]  }
0x27e7   :  { %v12412_v12 = vmax.f32 %v12408_v10, 0.0 }
0x27e8   :  { %v12413_v30 = vmax.f32 %v12409_v27, 0.0  ;;  %v12762_v27 = vld [vmem:[#allocation2 + $0x1c] sm:$0x7] }
0x27e9   :  { %v12414_v32 = vpack.c.bf16 %v12412_v12, %v12410_v28 }
0x27ea   :  { %v12415_v35 = vpack.c.bf16 %v12413_v30, %v12411_v29  ;;  %v17215_v30 = vld [vmem:[#allocation2 + $0xc] ss:$0 sps:$4 sm:$0x77]  }
0x27eb   :  { %v12421_v36 = vsel %vm1306_vm7, %v12414_v32, 0  ;;  %v21210_v32 = vunpack.c.l.b16 %v17214_v21 }
0x27ec   :  { %15449 = vmatprep.subr.msk.bf16.mxu0 %vm1306_vm7, %v12415_v35 }
0x27ed   :  { %12427 = vmatpush1.bf16.msra.mxu0 %v12421_v36 }
0x27ee   :  { %15452 = vmatprep.subr.msk.bf16.mxu0 %vm1306_vm7, %v12415_v35  ;;  %v17216_v35 = vld [vmem:[#allocation2 + $0x10] ss:$0 sps:$4 sm:$0x77]  }
0x27f0   :  { %15450 = vmatmul.mubr.msk.bf16.vlgmr.msra.gmra.mrb[204].mxu0 %vm1302_vm8, %v12416_v33  ;;  %v21212_v33 = vunpack.c.l.b16 %v16083_v22 }
0x27f1   :  { %12472 = vmatpush1.bf16.msra.mxu0 %v12421_v36  ;;  %12503 = vmatprep.mubr.bf16.mxu0 %v17251_v24  ;;  %v17217_v36 = vld [vmem:[#allocation2 + $0x14] ss:$0 sps:$4 sm:$0x77]  }
0x27f2   :  { %12599 = vmatprep.subr.bf16.mxu0 %v17251_v24  ;;  %v13043_v22 = vrot.slane %v21212_v33, 4 }
0x27f8   :  { %15453 = vmatmul.mubr.msk.bf16.vlgmr.msra.gmra.mrb[208].mxu0 %vm1302_vm8, %v15451_v34  ;;  %v21214_v34 = vunpack.c.l.b16 %v16414_v25 }
0x27f9   :  { %12600 = vmatpush1.bf16.msra.mxu0 %v17184_v38 }
0x27fa   :  { %12601 = vmatprep.subr.bf16.mxu0 %v17251_v24  ;;  %v12947_v37 = vrot.slane %v21214_v34, 1  ;;  %v13133_v21 = vrot.slane %v21214_v34, 6 }
0x27fd   :  { %12602 = vmatpush1.bf16.msra.mxu0 %v17185_v20  ;;  %v17218_v20 = vld [vmem:[#allocation2 + $0x18] ss:$0 sps:$4 sm:$0x77]  }
0x27fe   :  { %12603 = vmatprep.subr.bf16.mxu0 %v17251_v24 }
0x2801   :  { %12604 = vmatpush1.bf16.msra.mxu0 %v17186_v39  ;;  %v21218_v39 = vunpack.c.l.b16 %v17215_v30 }
0x2802   :  { %12605 = vmatprep.subr.bf16.mxu0 %v17251_v24 }
0x2803   :  { %v13135_v25 = vrot.slane %v21218_v39, 5 }
0x2805   :  { %12606 = vmatpush1.bf16.msra.mxu0 %v17187_v40  ;;  %v12945_v40 = vrot.slane %v21210_v32, 2 }
0x2806   :  { %12607 = vmatprep.subr.bf16.mxu0 %v17251_v24 }
0x2809   :  { %12608 = vmatpush1.bf16.msra.mxu0 %v17188_v41  ;;  %v21221_v41 = vunpack.c.l.b16 %v17216_v35 }
0x280a   :  { %12609 = vmatprep.subr.bf16.mxu0 %v17251_v24 }
0x280d   :  { %12610 = vmatpush1.bf16.msra.mxu0 %v17189_v42  ;;  %v21223_v42 = vunpack.c.l.b16 %v17217_v36 }
0x280e   :  { %12611 = vmatprep.subr.bf16.mxu0 %v17251_v24 }
0x280f   :  { %v13139_v30 = vrot.slane %v21223_v42, 3 }
0x2811   :  { %12612 = vmatpush1.bf16.msra.mxu0 %v17190_v43  ;;  %v12826_v43 = vrot.slane %v21212_v33, 1 }
0x2812   :  { %12613 = vmatprep.subr.bf16.mxu0 %v17251_v24 }
0x2815   :  { %12614 = vmatpush1.bf16.msra.mxu0 %v17191_v45  ;;  %v12829_v45 = vrot.slane %v21214_v34, 7 }
0x2816   :  { %12615 = vmatprep.subr.bf16.mxu0 %v17251_v24 }
0x2819   :  { %12616 = vmatpush1.bf16.msra.mxu0 %v17192_v46  ;;  %v12944_v46 = vrot.slane %v21212_v33, 3 }
0x281a   :  { %12617 = vmatprep.subr.bf16.mxu0 %v17251_v24 }
0x281d   :  { %12618 = vmatpush1.bf16.msra.mxu0 %v17193_v47  ;;  %v21229_v47 = vunpack.c.l.b16 %v17218_v20 }
0x281e   :  { %12719 = vmatprep.subr.bf16.mxu0 %v17251_v24 }
0x281f   :  { %v13053_v36 = vrot.slane %v21229_v47, 6  ;;  %v13141_v20 = vrot.slane %v21229_v47, 2 }
0x28c3   :  { %v12460_v48 = vpop.f32.mrb[204].mxu0 }
0x28c4   :  { %v12462_v31 = vpop.f32.mrb[205].mxu0 }
0x28c5   :  { %v12464_v49 = vpop.f32.mrb[206].mxu0 }
0x28c6   :  { %v12465_v50 = vpop.f32.mrb[207].mxu0  ;;  %v12946_v49 = vsel %vm12827_vm13, %v12945_v40, %v12944_v46 }
0x28c7   :  { %v12835_v50 = vrot.slane %v21221_v41, 5 }
0x28cb   :  { %v12505_v51 = vpop.f32.mrb[208].mxu0 }
0x28cc   :  { %v12512_v52 = vmax.f32 %v12460_v48, %v12505_v51  ;;  %v12507_v53 = vpop.f32.mrb[209].mxu0  ;;  %v12828_v48 = vsel %vm12827_vm13, %v21210_v32, %v12826_v43  ;;  %v12838_v51 = vrot.slane %v21223_v42, 4 }
0x28cd   :  { %v12513_v55 = vmax.f32 %v12462_v31, %v12507_v53  ;;  %v12509_v56 = vpop.f32.mrb[210].mxu0  ;;  %v12832_v31 = vrot.slane %v21218_v39, 6 }
0x28ce   :  { %v12510_v57 = vpop.f32.mrb[211].mxu0  ;;  %v12514_v59 = vpack.c.bf16 %v12512_v52, %v12512_v52  ;;  %v12950_v52 = vrot.slane %v21221_v41, 7  ;;  %v12948_v56 = vsel %vm12830_vm15, %v12947_v37, %v12946_v49  ;;  %v17229_v49 = vld [vmem:[%s21461_s9 + $0x20] sm:$0xff]  }
0x28cf   :  { %v12515_v58 = vpack.c.bf16 %v12513_v55, %v12513_v55  ;;  %v12831_v55 = vsel %vm12830_vm15, %v12829_v45, %v12828_v48  ;;  %v12952_v57 = vrot.slane %v21223_v42, 6 }
0x28d1   :  { %15464 = vmatprep.mubr.msk.bf16.mxu0 %vm205_vm0, %v12515_v58 }
0x28d2   :  { %12632 = vmatmul.mubr.bf16.vlgmr.msra.gmra.mrb[212].mxu0 %v12514_v59 }
0x28d3   :  { %12720 = vmatpush1.bf16.msra.mxu0 %v17194_v44  ;;  %15495 = vmatprep.mubr.msk.bf16.mxu0 %vm205_vm0, %v12515_v58  ;;  %vm12839_vm0 = vcmask 1045509   ;;  %v12841_v58 = vrot.slane %v21229_v47, 3  ;;  %v12949_v44 = vsel %vm12833_vm14, %v21218_v39, %v12948_v56 }
0x28d4   :  { %12721 = vmatprep.subr.bf16.mxu0 %v17251_v24 }
0x28d7   :  { %12722 = vmatpush1.bf16.msra.mxu0 %v17195_v60 }
0x28d8   :  { %12723 = vmatprep.subr.bf16.mxu0 %v17251_v24 }
0x28db   :  { %12724 = vmatpush1.bf16.msra.mxu0 %v17196_v61  ;;  %v12834_v61 = vsel %vm12833_vm14, %v12832_v31, %v12831_v55  ;;  %v17228_v31 = vld [vmem:[%s21461_s9 + $0xc0] sm:$0xff]  }
0x28dc   :  { %12725 = vmatprep.subr.bf16.mxu0 %v17251_v24 }
0x28df   :  { %12726 = vmatpush1.bf16.msra.mxu0 %v17197_v62  ;;  %v12837_v62 = vsel %vm12836_vm1, %v12835_v50, %v12834_v61  ;;  %v17232_v61 = vld [vmem:[%s21461_s9 + $0x60] sm:$0xff]  }
0x28e0   :  { %12727 = vmatprep.subr.bf16.mxu0 %v17251_v24 }
0x28e3   :  { %12728 = vmatpush1.bf16.msra.mxu0 %v17198_v63  ;;  %v12951_v63 = vsel %vm12836_vm1, %v12950_v52, %v12949_v44 }
0x28e4   :  { %12729 = vmatprep.subr.bf16.mxu0 %v17251_v24 }
0x28e7   :  { %12730 = vmatpush1.bf16.msra.mxu0 %v17199_v2  ;;  %v12840_v2 = vsel %vm12839_vm0, %v12838_v51, %v12837_v62  ;;  %v13220_v62 = vrot.slane %v21210_v32, 1 }
0x28e8   :  { %12731 = vmatprep.subr.bf16.mxu0 %v17251_v24 }
0x28eb   :  { %12732 = vmatpush1.bf16.msra.mxu0 %v17200_v3 }
0x28ec   :  { %12733 = vmatprep.subr.bf16.mxu0 %v17251_v24 }
0x28ef   :  { %12734 = vmatpush1.bf16.msra.mxu0 %v17201_v4  ;;  %v12953_v4 = vsel %vm12839_vm0, %v12952_v57, %v12951_v63  ;;  %v17230_v57 = vld [vmem:[%s21461_s9 + $0x50] sm:$0xff]   ;;  %v13219_v63 = vrot.slane %v21212_v33, 2 }
0x28f0   :  { %12735 = vmatprep.subr.bf16.mxu0 %v17251_v24 }
0x28f3   :  { %12736 = vmatpush1.bf16.msra.mxu0 %v17202_v5 }
0x28f4   :  { %12737 = vmatprep.subr.bf16.mxu0 %v17251_v24  ;;  %v17206_v24 = vld [vmem:[%s21461_s9 + $0x30] sm:$0xff]  }
0x28f7   :  { %12738 = vmatpush1.bf16.msra.mxu0 %v17203_v54  ;;  %v12843_v54 = vsel %vm12842_vm2, %v12841_v58, %v12840_v2  ;;  %v13223_v2 = vrot.slane %v21218_v39, 7 }
0x28f8   :  { %15641 = vmatprep.subr.bf16.mxu0 %v17252_v7 }
0x28fa   :  { %12752 = vmatmul.mubr.bf16.vlgmr.msra.gmra.mrb[216].mxu0 %v12514_v59  ;;  %v12954_v59 = vrot.slane %v21229_v47, 5 }
0x28fb   :  { %15642 = vmatpush3.bf16.msra.mxu0 %v17204_v6  ;;  %15651 = vmatprep.mubr.msk.bf16.mxu0 %vm17253_vm12, %v17252_v7 }
0x28fc   :  { %15643 = vmatprep.subr.bf16.mxu0 %v17252_v7  ;;  %v12955_v6 = vsel %vm12842_vm2, %v12954_v59, %v12953_v4  ;;  %v17231_v59 = vld [vmem:[%s21461_s9 + $0x58] sm:$0xff]   ;;  %v17233_v4 = vld [vmem:[%s21461_s9 + $0x68] sm:$0xff]  }
0x28ff   :  { %15644 = vmatpush3.bf16.msra.mxu0 %v17206_v24 }
0x2900   :  { %15645 = vmatprep.subr.bf16.mxu0 %v17252_v7 }
0x2903   :  { %15646 = vmatpush3.bf16.msra.mxu0 %v17208_v11  ;;  %v17221_v11 = vld [vmem:[%s21461_s9] sm:$0xff]  }
0x2904   :  { %15647 = vmatprep.subr.bf16.mxu0 %v17252_v7 }
0x2907   :  { %15648 = vmatpush3.bf16.msra.mxu0 %v17210_v14 }
0x2908   :  { %15649 = vmatprep.subr.bf16.mxu0 %v17252_v7 }
0x290b   :  { %15650 = vmatpush3.bf16.msra.mxu0 %v17212_v1  ;;  %v17223_v1 = vld [vmem:[%s21461_s9 + $0x8] sm:$0xff]  }
0x290c   :  { %15669 = vmatprep.subr.bf16.mxu0 %v17252_v7 }
0x29a5   :  { %v12633_v16 = vpop.f32.mrb[212].mxu0 }
0x29a6   :  { %v12635_v17 = vpop.f32.mrb[213].mxu0 }
0x29a7   :  { %v12636_v18 = vpop.f32.mrb[214].mxu0  ;;  %v13044_v17 = vrot.slane %v21210_v32, 3 }
0x29a8   :  { %v12637_v19 = vpop.f32.mrb[215].mxu0  ;;  %v13131_v18 = vrot.slane %v21210_v32, 7 }
0x29a9   :  { %v13046_v19 = vrot.slane %v21214_v34, 2 }
0x29cd   :  { %v12753_v23 = vpop.f32.mrb[216].mxu0 }
0x29ce   :  { %v12759_v10 = vmax.f32 %v12633_v16, %v12753_v23  ;;  %v12755_v26 = vpop.f32.mrb[217].mxu0  ;;  %v17225_v16 = vld [vmem:[%s21461_s9 + $0x10] sm:$0xff]   ;;  %v13048_v23 = vrot.slane %v21218_v39, 1 }
0x29cf   :  { %v12756_v28 = vpop.f32.mrb[218].mxu0  ;;  %v17226_v26 = vld [vmem:[%s21461_s9 + $0xb8] sm:$0xff]  }
0x29d0   :  { %v12760_v12 = vpack.c.bf16 %v12759_v10, %v12759_v10  ;;  %v12757_v29 = vpop.f32.mrb[219].mxu0  ;;  %v13137_v10 = vrot.slane %v21221_v41, 4  ;;  %v13045_v28 = vsel %vm12827_vm13, %v13044_v17, %v13043_v22  ;;  %v17244_v17 = vld [vmem:[%s21463_s13 + $0x8] sm:$0xff]  }
0x29d1   :  { %v13132_v29 = vsel %vm12827_vm13, %v13131_v18, %v21212_v33  ;;  %v13047_v35 = vsel %vm12830_vm15, %v13046_v19, %v13045_v28  ;;  %v13229_v33 = vrot.slane %v21229_v47, 4  ;;  %v17245_v18 = vld [vmem:[%s21463_s13 + $0x10] sm:$0xff]   ;;  %v17246_v19 = vld [vmem:[%s21463_s13 + $0x18] sm:$0xff]   ;;  %v17248_v22 = vld [vmem:[%s21463_s13 + $0x28] sm:$0xff]  }
0x29d2   :  { %v12763_v38 = vsel %vm17918_vm11, %v12760_v12, %v12762_v27  ;;  %v17227_v27 = vld [vmem:[%s21461_s9 + $0x18] sm:$0xff]   ;;  %v13051_v12 = vrot.slane %v21223_v42, 7  ;;  %v13049_v40 = vsel %vm12833_vm14, %v13048_v23, %v13047_v35 }
0x29d3   :  { %12764 = vst [vmem:[#allocation2 + $0x1c] sm:$0x7] %v12763_v38  ;;  %v13134_v38 = vsel %vm12830_vm15, %v13133_v21, %v13132_v29  ;;  %v13050_v37 = vsel %vm12836_vm1, %v21221_v41, %v13049_v40  ;;  %v17247_v21 = vld [vmem:[%s21463_s13 + $0x20] sm:$0xff]  }
0x29d4   :  { %v13136_v45 = vsel %vm12833_vm14, %v13135_v25, %v13134_v38  ;;  %v13052_v50 = vsel %vm12839_vm0, %v13051_v12, %v13050_v37 }
0x29d5   :  { %v13138_v48 = vsel %vm12836_vm1, %v13137_v10, %v13136_v45  ;;  %v13054_v52 = vsel %vm12842_vm2, %v13053_v36, %v13052_v50 }
0x29d6   :  { %v13140_v51 = vsel %vm12839_vm0, %v13139_v30, %v13138_v48 }
0x29da   :  { %v17219_v53 = vld [vmem:[#allocation2 + $0x1c] ss:$0 sps:$4 sm:$0x77]  }
0x29db   :  { %v21245_v60 = vunpack.c.l.b16 %v17219_v53  ;;  %v13142_v53 = vsel %vm12842_vm2, %v13141_v20, %v13140_v51 }
0x29dd   :  { %v12844_v3 = vrot.slane %v21245_v60, 2  ;;  %v12956_v5 = vrot.slane %v21245_v60, 4  ;;  %v13055_v43 = vrot.slane %v21245_v60, 5  ;;  %v13143_v46 = vrot.slane %v21245_v60, 1 }
0x29df   :  { %v12846_v8 = vsel %vm12845_vm3, %v12844_v3, %v12843_v54  ;;  %v12957_v24 = vsel %vm12845_vm3, %v12956_v5, %v12955_v6  ;;  %v13056_v55 = vsel %vm12845_vm3, %v13055_v43, %v13054_v52  ;;  %v13144_v56 = vsel %vm12845_vm3, %v13143_v46, %v13142_v53  ;;  %v15574_v52 = vld [vmem:[%s21464_s10] ss:$0 sm:$0xff] }
0x29e0   :  { %v12847_v13 = vpack.c.b16 %v12846_v8, %v12846_v8  ;;  %v12958_v14 = vpack.c.b16 %v12957_v24, %v12957_v24  ;;  %v13057_v58 = vpack.c.b16 %v13056_v55, %v13056_v55  ;;  %v13145_v44 = vpack.c.b16 %v13144_v56, %v13144_v56  ;;  %v17234_v8 = vld [vmem:[%s21461_s9 + $0x70] sm:$0xff]  }
0x29e1   :  { %v13225_v3 = vrot.slane %v21221_v41, 6  ;;  %v13221_v5 = vsel %vm12827_vm13, %v13220_v62, %v13219_v63  ;;  %v13227_v54 = vrot.slane %v21223_v42, 5  ;;  %v13231_v41 = vrot.slane %v21245_v60, 3  ;;  %v17235_v60 = vld [vmem:[%s21462_s11] sm:$0xff]  }
0x29e2   :  { %15652 = vmatmul.mubr.msk.bf16.vlgmr.msra.gmra.mrb[220].mxu0 %vm12878_vm4, %v12847_v13  ;;  %15666 = vmatmul.mubr.msk.bf16.vlgmr.msra.gmra.mrb[132].mxu1 %vm12878_vm4, %v12958_v14  ;;  %v13222_v32 = vsel %vm12830_vm15, %v21214_v34, %v13221_v5  ;;  %v17238_v13 = vld [vmem:[%s21462_s11 + $0x18] sm:$0xff]   ;;  %v17239_v14 = vld [vmem:[%s21462_s11 + $0x20] sm:$0xff]  }
0x29e3   :  { %15670 = vmatpush3.bf16.msra.mxu0 %v17220_v9  ;;  %15684 = vmatpush3.bf16.msra.mxu1 %v17221_v11  ;;  %v13224_v39 = vsel %vm12833_vm14, %v13223_v2, %v13222_v32  ;;  %v17236_v9 = vld [vmem:[%s21462_s11 + $0x8] sm:$0xff]   ;;  %v17237_v11 = vld [vmem:[%s21462_s11 + $0x10] sm:$0xff]  }
0x29e4   :  { %15671 = vmatprep.subr.bf16.mxu0 %v17252_v7  ;;  %15685 = vmatprep.subr.bf16.mxu1 %v17252_v7  ;;  %v13226_v6 = vsel %vm12836_vm1, %v13225_v3, %v13224_v39 }
0x29e5   :  { %15679 = vmatprep.mubr.msk.bf16.mxu0 %vm17253_vm12, %v17252_v7  ;;  %15693 = vmatprep.mubr.msk.bf16.mxu1 %vm17253_vm12, %v17252_v7  ;;  %v13228_v42 = vsel %vm12839_vm0, %v13227_v54, %v13226_v6 }
0x29e6   :  { %v13230_v24 = vsel %vm12842_vm2, %v13229_v33, %v13228_v42 }
0x29e7   :  { %15672 = vmatpush3.bf16.msra.mxu0 %v17222_v15  ;;  %15686 = vmatpush3.bf16.msra.mxu1 %v17223_v1  ;;  %v13232_v34 = vsel %vm12845_vm3, %v13231_v41, %v13230_v24  ;;  %v17240_v15 = vld [vmem:[%s21462_s11 + $0x28] sm:$0xff]   ;;  %v17241_v1 = vld [vmem:[%s21462_s11 + $0x30] sm:$0xff]  }
0x29e8   :  { %15673 = vmatprep.subr.bf16.mxu0 %v17252_v7  ;;  %15687 = vmatprep.subr.bf16.mxu1 %v17252_v7  ;;  %v13233_v47 = vpack.c.b16 %v13232_v34, %v13232_v34 }
0x29eb   :  { %15674 = vmatpush3.bf16.msra.mxu0 %v17224_v0  ;;  %15688 = vmatpush3.bf16.msra.mxu1 %v17225_v16  ;;  %v17242_v0 = vld [vmem:[%s21462_s11 + $0x38] sm:$0xff]   ;;  %v17243_v16 = vld [vmem:[%s21463_s13] sm:$0xff]  }
0x29ec   :  { %15675 = vmatprep.subr.bf16.mxu0 %v17252_v7  ;;  %15689 = vmatprep.subr.bf16.mxu1 %v17252_v7 }
0x29ef   :  { %15676 = vmatpush3.bf16.msra.mxu0 %v17226_v26  ;;  %15690 = vmatpush3.bf16.msra.mxu1 %v17227_v27 }
0x29f0   :  { %15677 = vmatprep.subr.bf16.mxu0 %v17252_v7  ;;  %15691 = vmatprep.subr.bf16.mxu1 %v17252_v7 }
0x29f3   :  { %15678 = vmatpush3.bf16.msra.mxu0 %v17228_v31  ;;  %15692 = vmatpush3.bf16.msra.mxu1 %v17229_v49 }
0x29f4   :  { %15697 = vmatprep.subr.bf16.mxu0 %v17252_v7  ;;  %15711 = vmatprep.subr.bf16.mxu1 %v17252_v7 }
0x29f6   :  { %15680 = vmatmul.mubr.msk.bf16.vlgmr.msra.gmra.mrb[224].mxu0 %vm12878_vm4, %v13057_v58  ;;  %15694 = vmatmul.mubr.msk.bf16.vlgmr.msra.gmra.mrb[136].mxu1 %vm12878_vm4, %v13145_v44  ;;  %v17249_v58 = vld [vmem:[%s21463_s13 + $0x30] sm:$0xff]   ;;  %v17250_v44 = vld [vmem:[%s21463_s13 + $0x38] sm:$0xff]  }
0x29f7   :  { %15698 = vmatpush3.bf16.msra.mxu0 %v17230_v57  ;;  %15707 = vmatprep.mubr.msk.bf16.mxu0 %vm17253_vm12, %v17252_v7 }
0x29f8   :  { %15699 = vmatprep.subr.bf16.mxu0 %v17252_v7  ;;  %15727 = vmatprep.mubr.msk.bf16.mxu1 %vm17253_vm12, %v17252_v7 }
0x29f9   :  { %15712 = vmatpush3.bf16.msra.mxu1 %v17235_v60 }
0x29fa   :  { %15713 = vmatprep.subr.bf16.mxu1 %v17252_v7 }
0x29fb   :  { %15700 = vmatpush3.bf16.msra.mxu0 %v17231_v59  ;;  %v15575_v59 = vld [vmem:[%s21465_s12] ss:$0 sm:$0xff] }
0x29fc   :  { %15701 = vmatprep.subr.bf16.mxu0 %v17252_v7 }
0x29fd   :  { %15714 = vmatpush3.bf16.msra.mxu1 %v17236_v9 }
0x29fe   :  { %15715 = vmatprep.subr.bf16.mxu1 %v17252_v7 }
0x29ff   :  { %15702 = vmatpush3.bf16.msra.mxu0 %v17232_v61 }
0x2a00   :  { %15703 = vmatprep.subr.bf16.mxu0 %v17252_v7 }
0x2a01   :  { %15716 = vmatpush3.bf16.msra.mxu1 %v17237_v11 }
0x2a02   :  { %15717 = vmatprep.subr.bf16.mxu1 %v17252_v7 }
0x2a03   :  { %15704 = vmatpush3.bf16.msra.mxu0 %v17233_v4 }
0x2a04   :  { %15705 = vmatprep.subr.bf16.mxu0 %v17252_v7 }
0x2a05   :  { %15718 = vmatpush3.bf16.msra.mxu1 %v17238_v13 }
0x2a06   :  { %15719 = vmatprep.subr.bf16.mxu1 %v17252_v7 }
0x2a07   :  { %15706 = vmatpush3.bf16.msra.mxu0 %v17234_v8 }
0x2a08   :  { %15731 = vmatprep.subr.bf16.mxu0 %v17252_v7 }
0x2a09   :  { %15720 = vmatpush3.bf16.msra.mxu1 %v17239_v14 }
0x2a0a   :  { %15708 = vmatmul.mubr.msk.bf16.vlgmr.msra.gmra.mrb[228].mxu0 %vm12878_vm4, %v13233_v47  ;;  %15721 = vmatprep.subr.bf16.mxu1 %v17252_v7 }
0x2a0b   :  { %15747 = vmatprep.mubr.msk.bf16.mxu0 %vm17253_vm12, %v17252_v7  ;;  %15732 = vmatpush3.bf16.msra.mxu0 %v17243_v16 }
0x2a0c   :  { %15733 = vmatprep.subr.bf16.mxu0 %v17252_v7 }
0x2a0d   :  { %15722 = vmatpush3.bf16.msra.mxu1 %v17240_v15 }
0x2a0e   :  { %15723 = vmatprep.subr.bf16.mxu1 %v17252_v7 }
0x2a0f   :  { %15734 = vmatpush3.bf16.msra.mxu0 %v17244_v17 }
0x2a10   :  { %15735 = vmatprep.subr.bf16.mxu0 %v17252_v7 }
0x2a11   :  { %15724 = vmatpush3.bf16.msra.mxu1 %v17241_v1 }
0x2a12   :  { %15725 = vmatprep.subr.bf16.mxu1 %v17252_v7 }
0x2a13   :  { %15736 = vmatpush3.bf16.msra.mxu0 %v17245_v18 }
0x2a14   :  { %15737 = vmatprep.subr.bf16.mxu0 %v17252_v7 }
0x2a15   :  { %15726 = vmatpush3.bf16.msra.mxu1 %v17242_v0 }
0x2a17   :  { %15738 = vmatpush3.bf16.msra.mxu0 %v17246_v19 }
0x2a18   :  { %15739 = vmatprep.subr.bf16.mxu0 %v17252_v7 }
0x2a1b   :  { %15740 = vmatpush3.bf16.msra.mxu0 %v17247_v21 }
0x2a1c   :  { %15741 = vmatprep.subr.bf16.mxu0 %v17252_v7 }
0x2a1f   :  { %15742 = vmatpush3.bf16.msra.mxu0 %v17248_v22 }
0x2a20   :  { %15743 = vmatprep.subr.bf16.mxu0 %v17252_v7 }
0x2a23   :  { %15744 = vmatpush3.bf16.msra.mxu0 %v17249_v58 }
0x2a24   :  { %15745 = vmatprep.subr.bf16.mxu0 %v17252_v7  ;;  %v15584_v7 = vld [vmem:[%s21466_s14] ss:$0 sm:$0xff] }
0x2a27   :  { %15746 = vmatpush3.bf16.msra.mxu0 %v17250_v44 }
0x2ab5   :  { %v12916_v23 = vpop.f32.mrb[220].mxu0  ;;  %v13026_v25 = vpop.f32.mrb[132].mxu1 }
0x2ab6   :  { %v15653_v10 = vpop.f32.mrb[221].mxu0  ;;  %v15667_v26 = vpop.f32.mrb[133].mxu1 }
0x2ab7   :  { %v12919_v27 = vpop.f32.mrb[222].mxu0  ;;  %v13029_v28 = vpop.f32.mrb[134].mxu1 }
0x2ab8   :  { %v15654_v12 = vpop.f32.mrb[223].mxu0  ;;  %v15668_v29 = vpop.f32.mrb[135].mxu1 }
0x2ac9   :  { %v13125_v30 = vpop.f32.mrb[224].mxu0  ;;  %v13213_v35 = vpop.f32.mrb[136].mxu1 }
0x2aca   :  { %v13214_v36 = vadd.f32 %v13213_v35, %v12916_v23  ;;  %v15681_v38 = vpop.f32.mrb[225].mxu0  ;;  %v15695_v20 = vpop.f32.mrb[137].mxu1 }
0x2acb   :  { %v13128_v40 = vpop.f32.mrb[226].mxu0  ;;  %v13216_v43 = vpop.f32.mrb[138].mxu1 }
0x2acc   :  { %v15682_v45 = vpop.f32.mrb[227].mxu0  ;;  %v15696_v46 = vpop.f32.mrb[139].mxu1 }
0x2add   :  { %v13301_v37 = vpop.f32.mrb[228].mxu0 }
0x2ade   :  { %v13302_v48 = vadd.f32 %v13301_v37, %v13026_v25  ;;  %v15709_v31 = vpop.f32.mrb[229].mxu0 }
0x2adf   :  { %v13304_v49 = vpop.f32.mrb[230].mxu0 }
0x2ae0   :  { %v13307_v50 = vadd.f32 %v13302_v48, %v13214_v36  ;;  %v15710_v51 = vpop.f32.mrb[231].mxu0 }
0x2ae2   :  { %v13308_v53 = vadd.f32 %v13307_v50, %v13125_v30 }
0x2ae4   :  { %v13316_v55 = vadd.f32 %v15574_v52, %v13308_v53 }
0x2ae6   :  { %v13317_v56 = vmax.f32 %v13316_v55, 0.0 }
0x2ae8   :  { %v13318_v57 = vpack.c.bf16 %v13317_v56, %v13317_v56 }
0x2aea   :  { %15728 = vmatmul.mubr.bf16.vlgmr.msra.gmra.mrb[140].mxu1 %v13318_v57 }
0x2bbd   :  { %v13424_v61 = vpop.f32.mrb[140].mxu1 }
0x2bbe   :  { %v13425_v62 = vadd.f32 %v15575_v59, %v13424_v61  ;;  %v15729_v63 = vpop.f32.mrb[141].mxu1 }
0x2bbf   :  { %v13427_v2 = vpop.f32.mrb[142].mxu1 }
0x2bc0   :  { %v13430_v3 = vmax.f32 %v13425_v62, 0.0  ;;  %v15730_v4 = vpop.f32.mrb[143].mxu1 }
0x2bc2   :  { %v13431_v5 = vpack.c.bf16 %v13430_v3, %v13430_v3 }
0x2bc4   :  { %15748 = vmatmul.mubr.bf16.vlgmr.msra.gmra.mrb[232].mxu0 %v13431_v5 }
0x2c97   :  { %v13537_v54 = vpop.f32.mrb[232].mxu0 }
0x2c98   :  { %v13538_v32 = vadd.f32 %v15584_v7, %v13537_v54  ;;  %v15749_v33 = vpop.f32.mrb[233].mxu0 }
0x2c99   :  { %v13540_v39 = vpop.f32.mrb[234].mxu0 }
0x2c9a   :  { %13543 = vst [vmem:[%s21467_s15] sm:$0xff] %v13538_v32  ;;  %v15750_v41 = vpop.f32.mrb[235].mxu0 }

</bundles_post_ra>
